<compile_context>
chip_gen: v5e
topology: v5e:2x2
jax: 0.10.0
libtpu: 0.0.40
codegen_flags: <defaults>
</compile_context>

<pallas_src>
import functools

import jax
import jax.numpy as jnp
from jax.experimental import pallas as pl
from jax.experimental.pallas import tpu as pltpu

_EPS = 1e-5                        # nn.BatchNorm3d default eps
_VMEM_LIMIT = 32 * 1024 * 1024     # safe on v5e/v6e (128 MiB) and v7x (64 MiB)


# --------------------------- in-kernel 3x3x3 conv ----------------------------

def _conv27(x_refs, w_ref, H, W):
    """Stride-1 3x3x3 conv for one (n, d) output depth slab.

    x_refs: three refs holding padded depth slices d, d+1, d+2, each
            (H+2, W+2, Cin).
    w_ref : (27, Cin, Cout) tap-major weight (kd, kh, kw order).
    Returns the (H*W, Cout) float32 conv output for this slab.
    """
    # Full precision for the f32 path; native MXU bf16 otherwise.
    prec = (jax.lax.Precision.HIGHEST
            if w_ref.dtype == jnp.float32 else None)
    acc = None
    t = 0
    for kd in range(3):
        # Load once per depth tap; slice/reshape in f32 (clean, tile-aligned
        # relayout), cast back to the compute dtype right before the MXU dot.
        x = x_refs[kd][...].astype(jnp.float32)            # (H+2, W+2, Cin)
        cin = x.shape[-1]
        for kh in range(3):
            for kw in range(3):
                a = x[kh:kh + H, kw:kw + W, :].reshape(H * W, cin)
                a = a.astype(w_ref.dtype)
                p = jnp.dot(a, w_ref[t],
                            preferred_element_type=jnp.float32,
                            precision=prec)
                acc = p if acc is None else acc + p
                t += 1
    return acc


# -------------------------------- kernels ------------------------------------

def _conv_stats_kernel(x0, x1, x2, w_ref, y_ref, stats_ref, *, H, W):
    """Kernel A: y = conv(x); store y; accumulate per-channel [sum; sum_sq]."""
    y = _conv27((x0, x1, x2), w_ref, H, W)                 # (H*W, Cout) f32

    @pl.when(jnp.logical_and(pl.program_id(0) == 0, pl.program_id(1) == 0))
    def _init():
        stats_ref[...] = jnp.zeros_like(stats_ref)

    stats_ref[...] += jnp.concatenate(
        [jnp.sum(y, axis=0, keepdims=True),
         jnp.sum(y * y, axis=0, keepdims=True)], axis=0)
    y_ref[...] = y


def _bn_relu_kernel(y_ref, scale_ref, shift_ref, o_ref):
    """Kernel B (conv1): relu(y * scale + shift).  Blocks are (H, W*C)."""
    o_ref[...] = jnp.maximum(
        y_ref[...] * scale_ref[...] + shift_ref[...], 0.0).astype(o_ref.dtype)


def _bn_relu_res_kernel(y_ref, scale_ref, shift_ref, res_ref, o_ref):
    """Kernel B (conv2): relu(residual + relu(y * scale + shift))."""
    act = jnp.maximum(y_ref[...] * scale_ref[...] + shift_ref[...], 0.0)
    o_ref[...] = jnp.maximum(res_ref[...].astype(jnp.float32) + act, 0.0
                             ).astype(o_ref.dtype)


# --------------------------- pallas_call wrappers -----------------------------

def _halo_specs(Hp, Wp, Cin, Cout):
    """Three depth-shifted views of the padded input + the tap-major weight.

    The depth halo for output slab d is the padded slices d, d+1, d+2; each
    delivered by its own BlockSpec so Pallas' automatic pipeline handles the
    HBM->VMEM streaming (no im2col, no manual DMA)."""
    x_specs = [
        pl.BlockSpec((None, None, Hp, Wp, Cin),
                     lambda n, d, kd=kd: (n, d + kd, 0, 0, 0))
        for kd in range(3)
    ]
    w_spec = pl.BlockSpec((27, Cin, Cout), lambda n, d: (0, 0, 0))  # resident
    return x_specs + [w_spec]


def _conv_stats_store(xp, wtaps, N, D, H, W):
    """Kernel A wrapper: returns (pre-BN activation y, global (2, C) stats)."""
    _, _, Hp, Wp, Cin = xp.shape
    Cout = wtaps.shape[-1]
    HW = H * W
    kernel = functools.partial(_conv_stats_kernel, H=H, W=W)
    return pl.pallas_call(
        kernel,
        out_shape=(jax.ShapeDtypeStruct((N, D, HW, Cout), jnp.float32),
                   jax.ShapeDtypeStruct((2, Cout), jnp.float32)),
        grid=(N, D),
        in_specs=_halo_specs(Hp, Wp, Cin, Cout),
        out_specs=(
            pl.BlockSpec((None, None, HW, Cout), lambda n, d: (n, d, 0, 0)),
            pl.BlockSpec((2, Cout), lambda n, d: (0, 0)),   # accumulator
        ),
        compiler_params=pltpu.CompilerParams(
            dimension_semantics=("arbitrary", "arbitrary"),
            vmem_limit_bytes=_VMEM_LIMIT),
    )(xp, xp, xp, wtaps)


def _bn_relu(y4, scale_t, shift_t, out_dtype):
    """Kernel B wrapper (conv1).  y4: (N, D, H, W*C); scale/shift: (1, W*C)."""
    N, D, H, WC = y4.shape
    return pl.pallas_call(
        _bn_relu_kernel,
        out_shape=jax.ShapeDtypeStruct((N, D, H, WC), out_dtype),
        grid=(N, D),
        in_specs=[
            pl.BlockSpec((None, None, H, WC), lambda n, d: (n, d, 0, 0)),
            pl.BlockSpec((1, WC), lambda n, d: (0, 0)),
            pl.BlockSpec((1, WC), lambda n, d: (0, 0)),
        ],
        out_specs=pl.BlockSpec((None, None, H, WC), lambda n, d: (n, d, 0, 0)),
        compiler_params=pltpu.CompilerParams(
            dimension_semantics=("parallel", "parallel"),
            vmem_limit_bytes=_VMEM_LIMIT),
    )(y4, scale_t, shift_t)


def _bn_relu_res(y4, scale_t, shift_t, res4, out_dtype):
    """Kernel B wrapper (conv2 + residual).  All 4-D operands: (N, D, H, W*C)."""
    N, D, H, WC = y4.shape
    return pl.pallas_call(
        _bn_relu_res_kernel,
        out_shape=jax.ShapeDtypeStruct((N, D, H, WC), out_dtype),
        grid=(N, D),
        in_specs=[
            pl.BlockSpec((None, None, H, WC), lambda n, d: (n, d, 0, 0)),
            pl.BlockSpec((1, WC), lambda n, d: (0, 0)),
            pl.BlockSpec((1, WC), lambda n, d: (0, 0)),
            pl.BlockSpec((None, None, H, WC), lambda n, d: (n, d, 0, 0)),
        ],
        out_specs=pl.BlockSpec((None, None, H, WC), lambda n, d: (n, d, 0, 0)),
        compiler_params=pltpu.CompilerParams(
            dimension_semantics=("parallel", "parallel"),
            vmem_limit_bytes=_VMEM_LIMIT),
    )(y4, scale_t, shift_t, res4)


# -------------------------------- JAX glue ------------------------------------

def _pad_dhw(x_ndhwc):
    return jnp.pad(x_ndhwc, ((0, 0), (1, 1), (1, 1), (1, 1), (0, 0)))


def _weight_taps(w_oidhw):
    """PyTorch Conv3d weight (Cout, Cin, 3, 3, 3) -> (27, Cin, Cout), tap-major."""
    Cout, Cin = w_oidhw.shape[0], w_oidhw.shape[1]
    return jnp.transpose(w_oidhw, (2, 3, 4, 1, 0)).reshape(27, Cin, Cout)


def _bn_fold(stats, gamma, beta, count):
    """Fold training-mode batch stats + affine params into (1, C) scale/shift."""
    mean = stats[0] / count
    var = jnp.maximum(stats[1] / count - mean * mean, 0.0)   # biased variance
    scale = gamma * jax.lax.rsqrt(var + _EPS)
    shift = beta - mean * scale
    return (scale.reshape(1, -1).astype(jnp.float32),
            shift.reshape(1, -1).astype(jnp.float32))


def residual_block_forward(x_ncdhw, w1, w2, gamma1, beta1, gamma2, beta2,
                           compute_dtype=jnp.bfloat16):
    """same_shape=True residual_block forward.  x: (N, C, D, H, W)."""
    N, Cin, D, H, W = x_ncdhw.shape
    Cout = w1.shape[0]
    assert Cin == Cout, "same_shape=True requires in_channel == out_channel"
    HW = H * W
    WC = W * Cout
    M = N * D * HW

    x_ndhwc = jnp.transpose(x_ncdhw, (0, 2, 3, 4, 1)).astype(jnp.float32)

    # ---- conv1 -> bn1 -> relu -------------------------------------------------
    xp1 = _pad_dhw(x_ndhwc).astype(compute_dtype)      # (N, D+2, H+2, W+2, C)
    w1t = _weight_taps(w1).astype(compute_dtype)       # (27, Cin, Cout)
    y1, stats1 = _conv_stats_store(xp1, w1t, N, D, H, W)
    scale1, shift1 = _bn_fold(stats1, gamma1, beta1, M)
    out1 = _bn_relu(y1.reshape(N, D, H, WC),           # lane-dense (W*C) pass
                    jnp.tile(scale1, (1, W)), jnp.tile(shift1, (1, W)),
                    compute_dtype)                      # (N, D, H, W*C)

    # ---- conv2 -> bn2 -> relu ; residual add -> relu --------------------------
    xp2 = _pad_dhw(out1.reshape(N, D, H, W, Cout))      # stays compute_dtype
    w2t = _weight_taps(w2).astype(compute_dtype)
    y2, stats2 = _conv_stats_store(xp2, w2t, N, D, H, W)
    scale2, shift2 = _bn_fold(stats2, gamma2, beta2, M)
    res = x_ndhwc.reshape(N, D, H, WC)                  # f32 residual
    y = _bn_relu_res(y2.reshape(N, D, H, WC),
                     jnp.tile(scale2, (1, W)), jnp.tile(shift2, (1, W)),
                     res, jnp.float32)                  # (N, D, H, W*C) f32

    return jnp.transpose(y.reshape(N, D, H, W, Cout), (0, 4, 1, 2, 3))


# ----------------------------- pure-JAX reference -----------------------------

def _reference_forward(x, w1, w2, g1, b1, g2, b2, conv_dtype=jnp.float32):
    """conv_dtype=f32: exact module semantics.  conv_dtype=bf16: rounds conv
    inputs exactly like the kernel's mixed-precision path (f32 accumulation)."""
    def conv(x_, w_):
        return jax.lax.conv_general_dilated(
            x_.astype(conv_dtype), w_.astype(conv_dtype),
            window_strides=(1, 1, 1),
            padding=((1, 1), (1, 1), (1, 1)),
            dimension_numbers=('NCDHW', 'OIDHW', 'NCDHW'),
            preferred_element_type=jnp.float32,
            precision=jax.lax.Precision.HIGHEST)

    def bn(y, g, b):
        mean = jnp.mean(y, axis=(0, 2, 3, 4), keepdims=True)
        var = jnp.mean((y - mean) ** 2, axis=(0, 2, 3, 4), keepdims=True)
        yn = (y - mean) * jax.lax.rsqrt(var + _EPS)
        return yn * g.reshape(1, -1, 1, 1, 1) + b.reshape(1, -1, 1, 1, 1)

    out = jax.nn.relu(bn(conv(x, w1), g1, b1))
    out = jax.nn.relu(bn(conv(out, w2), g2, b2))
    return jax.nn.relu(x + out)


# ----------------------------------- main -------------------------------------

if __name__ == "__main__":
    key = jax.random.PRNGKey(0)
    kx, kw1, kw2, kg1, kb1, kg2, kb2 = jax.random.split(key, 7)

    # Small but representative shapes: batch=2, channels=32, spatial=8^3
    # (Conv3d => 5-D input).  C=32 keeps the lane dimension reasonably dense
    # and W*C = 256 makes the elementwise passes fully lane-dense.
    N, C, D, H, W = 2, 32, 8, 8, 8
    x = jax.random.normal(kx, (N, C, D, H, W), jnp.float32)
    w1 = 0.1 * jax.random.normal(kw1, (C, C, 3, 3, 3), jnp.float32)
    w2 = 0.1 * jax.random.normal(kw2, (C, C, 3, 3, 3), jnp.float32)
    gamma1 = 1.0 + 0.05 * jax.random.normal(kg1, (C,), jnp.float32)
    beta1 = 0.05 * jax.random.normal(kb1, (C,), jnp.float32)
    gamma2 = 1.0 + 0.05 * jax.random.normal(kg2, (C,), jnp.float32)
    beta2 = 0.05 * jax.random.normal(kb2, (C,), jnp.float32)

    fwd_f32 = jax.jit(functools.partial(residual_block_forward,
                                        compute_dtype=jnp.float32))
    fwd_bf16 = jax.jit(functools.partial(residual_block_forward,
                                         compute_dtype=jnp.bfloat16))

    # 1) module semantics: f32 matmul inputs (HIGHEST precision) vs f32 reference.
    y32 = jax.block_until_ready(fwd_f32(x, w1, w2, gamma1, beta1, gamma2, beta2))
    ref32 = _reference_forward(x, w1, w2, gamma1, beta1, gamma2, beta2,
                               conv_dtype=jnp.float32)
    err_f32 = float(jnp.max(jnp.abs(y32 - ref32)))

    # 2) mixed-precision perf path: bf16 matmul inputs (f32 accumulation / BN),
    #    checked against a reference that rounds conv inputs identically.
    ybf = jax.block_until_ready(fwd_bf16(x, w1, w2, gamma1, beta1, gamma2, beta2))
    refbf = _reference_forward(x, w1, w2, gamma1, beta1, gamma2, beta2,
                               conv_dtype=jnp.bfloat16)
    err_bf16 = float(jnp.max(jnp.abs(ybf - refbf)))

    if err_f32 < 5e-3 and err_bf16 < 5e-2:
        print("KERNEL_OK")
    else:
        print(f"MISMATCH f32_max_abs_err={err_f32} bf16_max_abs_err={err_bf16}")
</pallas_src>

<mosaic_0001>
module attributes {stable_mosaic.version = 11 : i64} {
  func.func @_conv_stats_kernel(%arg0: i32, %arg1: i32, %arg2: memref<1x1x10x10x32xf32, #tpu.memory_space<vmem>>, %arg3: memref<1x1x10x10x32xf32, #tpu.memory_space<vmem>>, %arg4: memref<1x1x10x10x32xf32, #tpu.memory_space<vmem>>, %arg5: memref<27x32x32xf32, #tpu.memory_space<vmem>>, %arg6: memref<1x1x64x32xf32, #tpu.memory_space<vmem>>, %arg7: memref<2x32xf32, #tpu.memory_space<vmem>>) attributes {dimension_semantics = [#tpu.dimension_semantics<arbitrary>, #tpu.dimension_semantics<arbitrary>], iteration_bounds = array<i64: 2, 8>, scalar_prefetch = 0 : i64, scratch_operands = 0 : i64, tpu.core_type = #tpu.core_type<tc>, window_params = [{transform_indices = @transform_0, window_bounds = array<i64: 1, 1, 10, 10, 32>}, {transform_indices = @transform_1, window_bounds = array<i64: 1, 1, 10, 10, 32>}, {transform_indices = @transform_2, window_bounds = array<i64: 1, 1, 10, 10, 32>}, {pipeline_mode = #tpu.pipeline_mode<synchronous>, transform_indices = @transform_3, window_bounds = array<i64: 27, 32, 32>}, {transform_indices = @transform_4, window_bounds = array<i64: 1, 1, 64, 32>}, {pipeline_mode = #tpu.pipeline_mode<synchronous>, transform_indices = @transform_5, window_bounds = array<i64: 2, 32>}]} {
    %c0 = arith.constant 0 : index
    %c0_0 = arith.constant 0 : index
    %c0_1 = arith.constant 0 : index
    %c0_2 = arith.constant 0 : index
    %c0_3 = arith.constant 0 : index
    %0 = vector.load %arg2[%c0, %c0_0, %c0_1, %c0_2, %c0_3] : memref<1x1x10x10x32xf32, #tpu.memory_space<vmem>>, vector<1x1x10x10x32xf32>
    %1 = vector.shape_cast %0 : vector<1x1x10x10x32xf32> to vector<10x10x32xf32>
    %2 = vector.extract_strided_slice %1 {offsets = [0, 0, 0], sizes = [8, 8, 32], strides = [1, 1, 1]} : vector<10x10x32xf32> to vector<8x8x32xf32>
    %3 = vector.shape_cast %2 : vector<8x8x32xf32> to vector<64x32xf32>
    %c0_4 = arith.constant 0 : index
    %c0_5 = arith.constant 0 : index
    %c0_6 = arith.constant 0 : index
    %4 = vector.load %arg5[%c0_4, %c0_5, %c0_6] : memref<27x32x32xf32, #tpu.memory_space<vmem>>, vector<1x32x32xf32>
    %5 = vector.shape_cast %4 : vector<1x32x32xf32> to vector<32x32xf32>
    %cst = arith.constant dense<0.000000e+00> : vector<64x32xf32>
    %6 = tpu.matmul %3, %5, %cst {dimension_numbers = #tpu.dot_dimension_numbers<[1], [0], [0], [1], [0, 0, 1, 1], [], []>, precision = #tpu.contract_precision<fp32>} : vector<64x32xf32>, vector<32x32xf32>, vector<64x32xf32> -> vector<64x32xf32>
    %7 = vector.extract_strided_slice %1 {offsets = [0, 1, 0], sizes = [8, 8, 32], strides = [1, 1, 1]} : vector<10x10x32xf32> to vector<8x8x32xf32>
    %8 = vector.shape_cast %7 : vector<8x8x32xf32> to vector<64x32xf32>
    %c1 = arith.constant 1 : index
    %c0_7 = arith.constant 0 : index
    %c0_8 = arith.constant 0 : index
    %9 = vector.load %arg5[%c1, %c0_7, %c0_8] : memref<27x32x32xf32, #tpu.memory_space<vmem>>, vector<1x32x32xf32>
    %10 = vector.shape_cast %9 : vector<1x32x32xf32> to vector<32x32xf32>
    %cst_9 = arith.constant dense<0.000000e+00> : vector<64x32xf32>
    %11 = tpu.matmul %8, %10, %cst_9 {dimension_numbers = #tpu.dot_dimension_numbers<[1], [0], [0], [1], [0, 0, 1, 1], [], []>, precision = #tpu.contract_precision<fp32>} : vector<64x32xf32>, vector<32x32xf32>, vector<64x32xf32> -> vector<64x32xf32>
    %12 = arith.addf %6, %11 : vector<64x32xf32>
    %13 = vector.extract_strided_slice %1 {offsets = [0, 2, 0], sizes = [8, 8, 32], strides = [1, 1, 1]} : vector<10x10x32xf32> to vector<8x8x32xf32>
    %14 = vector.shape_cast %13 : vector<8x8x32xf32> to vector<64x32xf32>
    %c2 = arith.constant 2 : index
    %c0_10 = arith.constant 0 : index
    %c0_11 = arith.constant 0 : index
    %15 = vector.load %arg5[%c2, %c0_10, %c0_11] : memref<27x32x32xf32, #tpu.memory_space<vmem>>, vector<1x32x32xf32>
    %16 = vector.shape_cast %15 : vector<1x32x32xf32> to vector<32x32xf32>
    %cst_12 = arith.constant dense<0.000000e+00> : vector<64x32xf32>
    %17 = tpu.matmul %14, %16, %cst_12 {dimension_numbers = #tpu.dot_dimension_numbers<[1], [0], [0], [1], [0, 0, 1, 1], [], []>, precision = #tpu.contract_precision<fp32>} : vector<64x32xf32>, vector<32x32xf32>, vector<64x32xf32> -> vector<64x32xf32>
    %18 = arith.addf %12, %17 : vector<64x32xf32>
    %19 = vector.extract_strided_slice %1 {offsets = [1, 0, 0], sizes = [8, 8, 32], strides = [1, 1, 1]} : vector<10x10x32xf32> to vector<8x8x32xf32>
    %20 = vector.shape_cast %19 : vector<8x8x32xf32> to vector<64x32xf32>
    %c3 = arith.constant 3 : index
    %c0_13 = arith.constant 0 : index
    %c0_14 = arith.constant 0 : index
    %21 = vector.load %arg5[%c3, %c0_13, %c0_14] : memref<27x32x32xf32, #tpu.memory_space<vmem>>, vector<1x32x32xf32>
    %22 = vector.shape_cast %21 : vector<1x32x32xf32> to vector<32x32xf32>
    %cst_15 = arith.constant dense<0.000000e+00> : vector<64x32xf32>
    %23 = tpu.matmul %20, %22, %cst_15 {dimension_numbers = #tpu.dot_dimension_numbers<[1], [0], [0], [1], [0, 0, 1, 1], [], []>, precision = #tpu.contract_precision<fp32>} : vector<64x32xf32>, vector<32x32xf32>, vector<64x32xf32> -> vector<64x32xf32>
    %24 = arith.addf %18, %23 : vector<64x32xf32>
    %25 = vector.extract_strided_slice %1 {offsets = [1, 1, 0], sizes = [8, 8, 32], strides = [1, 1, 1]} : vector<10x10x32xf32> to vector<8x8x32xf32>
    %26 = vector.shape_cast %25 : vector<8x8x32xf32> to vector<64x32xf32>
    %c4 = arith.constant 4 : index
    %c0_16 = arith.constant 0 : index
    %c0_17 = arith.constant 0 : index
    %27 = vector.load %arg5[%c4, %c0_16, %c0_17] : memref<27x32x32xf32, #tpu.memory_space<vmem>>, vector<1x32x32xf32>
    %28 = vector.shape_cast %27 : vector<1x32x32xf32> to vector<32x32xf32>
    %cst_18 = arith.constant dense<0.000000e+00> : vector<64x32xf32>
    %29 = tpu.matmul %26, %28, %cst_18 {dimension_numbers = #tpu.dot_dimension_numbers<[1], [0], [0], [1], [0, 0, 1, 1], [], []>, precision = #tpu.contract_precision<fp32>} : vector<64x32xf32>, vector<32x32xf32>, vector<64x32xf32> -> vector<64x32xf32>
    %30 = arith.addf %24, %29 : vector<64x32xf32>
    %31 = vector.extract_strided_slice %1 {offsets = [1, 2, 0], sizes = [8, 8, 32], strides = [1, 1, 1]} : vector<10x10x32xf32> to vector<8x8x32xf32>
    %32 = vector.shape_cast %31 : vector<8x8x32xf32> to vector<64x32xf32>
    %c5 = arith.constant 5 : index
    %c0_19 = arith.constant 0 : index
    %c0_20 = arith.constant 0 : index
    %33 = vector.load %arg5[%c5, %c0_19, %c0_20] : memref<27x32x32xf32, #tpu.memory_space<vmem>>, vector<1x32x32xf32>
    %34 = vector.shape_cast %33 : vector<1x32x32xf32> to vector<32x32xf32>
    %cst_21 = arith.constant dense<0.000000e+00> : vector<64x32xf32>
    %35 = tpu.matmul %32, %34, %cst_21 {dimension_numbers = #tpu.dot_dimension_numbers<[1], [0], [0], [1], [0, 0, 1, 1], [], []>, precision = #tpu.contract_precision<fp32>} : vector<64x32xf32>, vector<32x32xf32>, vector<64x32xf32> -> vector<64x32xf32>
    %36 = arith.addf %30, %35 : vector<64x32xf32>
    %37 = vector.extract_strided_slice %1 {offsets = [2, 0, 0], sizes = [8, 8, 32], strides = [1, 1, 1]} : vector<10x10x32xf32> to vector<8x8x32xf32>
    %38 = vector.shape_cast %37 : vector<8x8x32xf32> to vector<64x32xf32>
    %c6 = arith.constant 6 : index
    %c0_22 = arith.constant 0 : index
    %c0_23 = arith.constant 0 : index
    %39 = vector.load %arg5[%c6, %c0_22, %c0_23] : memref<27x32x32xf32, #tpu.memory_space<vmem>>, vector<1x32x32xf32>
    %40 = vector.shape_cast %39 : vector<1x32x32xf32> to vector<32x32xf32>
    %cst_24 = arith.constant dense<0.000000e+00> : vector<64x32xf32>
    %41 = tpu.matmul %38, %40, %cst_24 {dimension_numbers = #tpu.dot_dimension_numbers<[1], [0], [0], [1], [0, 0, 1, 1], [], []>, precision = #tpu.contract_precision<fp32>} : vector<64x32xf32>, vector<32x32xf32>, vector<64x32xf32> -> vector<64x32xf32>
    %42 = arith.addf %36, %41 : vector<64x32xf32>
    %43 = vector.extract_strided_slice %1 {offsets = [2, 1, 0], sizes = [8, 8, 32], strides = [1, 1, 1]} : vector<10x10x32xf32> to vector<8x8x32xf32>
    %44 = vector.shape_cast %43 : vector<8x8x32xf32> to vector<64x32xf32>
    %c7 = arith.constant 7 : index
    %c0_25 = arith.constant 0 : index
    %c0_26 = arith.constant 0 : index
    %45 = vector.load %arg5[%c7, %c0_25, %c0_26] : memref<27x32x32xf32, #tpu.memory_space<vmem>>, vector<1x32x32xf32>
    %46 = vector.shape_cast %45 : vector<1x32x32xf32> to vector<32x32xf32>
    %cst_27 = arith.constant dense<0.000000e+00> : vector<64x32xf32>
    %47 = tpu.matmul %44, %46, %cst_27 {dimension_numbers = #tpu.dot_dimension_numbers<[1], [0], [0], [1], [0, 0, 1, 1], [], []>, precision = #tpu.contract_precision<fp32>} : vector<64x32xf32>, vector<32x32xf32>, vector<64x32xf32> -> vector<64x32xf32>
    %48 = arith.addf %42, %47 : vector<64x32xf32>
    %49 = vector.extract_strided_slice %1 {offsets = [2, 2, 0], sizes = [8, 8, 32], strides = [1, 1, 1]} : vector<10x10x32xf32> to vector<8x8x32xf32>
    %50 = vector.shape_cast %49 : vector<8x8x32xf32> to vector<64x32xf32>
    %c8 = arith.constant 8 : index
    %c0_28 = arith.constant 0 : index
    %c0_29 = arith.constant 0 : index
    %51 = vector.load %arg5[%c8, %c0_28, %c0_29] : memref<27x32x32xf32, #tpu.memory_space<vmem>>, vector<1x32x32xf32>
    %52 = vector.shape_cast %51 : vector<1x32x32xf32> to vector<32x32xf32>
    %cst_30 = arith.constant dense<0.000000e+00> : vector<64x32xf32>
    %53 = tpu.matmul %50, %52, %cst_30 {dimension_numbers = #tpu.dot_dimension_numbers<[1], [0], [0], [1], [0, 0, 1, 1], [], []>, precision = #tpu.contract_precision<fp32>} : vector<64x32xf32>, vector<32x32xf32>, vector<64x32xf32> -> vector<64x32xf32>
    %54 = arith.addf %48, %53 : vector<64x32xf32>
    %c0_31 = arith.constant 0 : index
    %c0_32 = arith.constant 0 : index
    %c0_33 = arith.constant 0 : index
    %c0_34 = arith.constant 0 : index
    %c0_35 = arith.constant 0 : index
    %55 = vector.load %arg3[%c0_31, %c0_32, %c0_33, %c0_34, %c0_35] : memref<1x1x10x10x32xf32, #tpu.memory_space<vmem>>, vector<1x1x10x10x32xf32>
    %56 = vector.shape_cast %55 : vector<1x1x10x10x32xf32> to vector<10x10x32xf32>
    %57 = vector.extract_strided_slice %56 {offsets = [0, 0, 0], sizes = [8, 8, 32], strides = [1, 1, 1]} : vector<10x10x32xf32> to vector<8x8x32xf32>
    %58 = vector.shape_cast %57 : vector<8x8x32xf32> to vector<64x32xf32>
    %c9 = arith.constant 9 : index
    %c0_36 = arith.constant 0 : index
    %c0_37 = arith.constant 0 : index
    %59 = vector.load %arg5[%c9, %c0_36, %c0_37] : memref<27x32x32xf32, #tpu.memory_space<vmem>>, vector<1x32x32xf32>
    %60 = vector.shape_cast %59 : vector<1x32x32xf32> to vector<32x32xf32>
    %cst_38 = arith.constant dense<0.000000e+00> : vector<64x32xf32>
    %61 = tpu.matmul %58, %60, %cst_38 {dimension_numbers = #tpu.dot_dimension_numbers<[1], [0], [0], [1], [0, 0, 1, 1], [], []>, precision = #tpu.contract_precision<fp32>} : vector<64x32xf32>, vector<32x32xf32>, vector<64x32xf32> -> vector<64x32xf32>
    %62 = arith.addf %54, %61 : vector<64x32xf32>
    %63 = vector.extract_strided_slice %56 {offsets = [0, 1, 0], sizes = [8, 8, 32], strides = [1, 1, 1]} : vector<10x10x32xf32> to vector<8x8x32xf32>
    %64 = vector.shape_cast %63 : vector<8x8x32xf32> to vector<64x32xf32>
    %c10 = arith.constant 10 : index
    %c0_39 = arith.constant 0 : index
    %c0_40 = arith.constant 0 : index
    %65 = vector.load %arg5[%c10, %c0_39, %c0_40] : memref<27x32x32xf32, #tpu.memory_space<vmem>>, vector<1x32x32xf32>
    %66 = vector.shape_cast %65 : vector<1x32x32xf32> to vector<32x32xf32>
    %cst_41 = arith.constant dense<0.000000e+00> : vector<64x32xf32>
    %67 = tpu.matmul %64, %66, %cst_41 {dimension_numbers = #tpu.dot_dimension_numbers<[1], [0], [0], [1], [0, 0, 1, 1], [], []>, precision = #tpu.contract_precision<fp32>} : vector<64x32xf32>, vector<32x32xf32>, vector<64x32xf32> -> vector<64x32xf32>
    %68 = arith.addf %62, %67 : vector<64x32xf32>
    %69 = vector.extract_strided_slice %56 {offsets = [0, 2, 0], sizes = [8, 8, 32], strides = [1, 1, 1]} : vector<10x10x32xf32> to vector<8x8x32xf32>
    %70 = vector.shape_cast %69 : vector<8x8x32xf32> to vector<64x32xf32>
    %c11 = arith.constant 11 : index
    %c0_42 = arith.constant 0 : index
    %c0_43 = arith.constant 0 : index
    %71 = vector.load %arg5[%c11, %c0_42, %c0_43] : memref<27x32x32xf32, #tpu.memory_space<vmem>>, vector<1x32x32xf32>
    %72 = vector.shape_cast %71 : vector<1x32x32xf32> to vector<32x32xf32>
    %cst_44 = arith.constant dense<0.000000e+00> : vector<64x32xf32>
    %73 = tpu.matmul %70, %72, %cst_44 {dimension_numbers = #tpu.dot_dimension_numbers<[1], [0], [0], [1], [0, 0, 1, 1], [], []>, precision = #tpu.contract_precision<fp32>} : vector<64x32xf32>, vector<32x32xf32>, vector<64x32xf32> -> vector<64x32xf32>
    %74 = arith.addf %68, %73 : vector<64x32xf32>
    %75 = vector.extract_strided_slice %56 {offsets = [1, 0, 0], sizes = [8, 8, 32], strides = [1, 1, 1]} : vector<10x10x32xf32> to vector<8x8x32xf32>
    %76 = vector.shape_cast %75 : vector<8x8x32xf32> to vector<64x32xf32>
    %c12 = arith.constant 12 : index
    %c0_45 = arith.constant 0 : index
    %c0_46 = arith.constant 0 : index
    %77 = vector.load %arg5[%c12, %c0_45, %c0_46] : memref<27x32x32xf32, #tpu.memory_space<vmem>>, vector<1x32x32xf32>
    %78 = vector.shape_cast %77 : vector<1x32x32xf32> to vector<32x32xf32>
    %cst_47 = arith.constant dense<0.000000e+00> : vector<64x32xf32>
    %79 = tpu.matmul %76, %78, %cst_47 {dimension_numbers = #tpu.dot_dimension_numbers<[1], [0], [0], [1], [0, 0, 1, 1], [], []>, precision = #tpu.contract_precision<fp32>} : vector<64x32xf32>, vector<32x32xf32>, vector<64x32xf32> -> vector<64x32xf32>
    %80 = arith.addf %74, %79 : vector<64x32xf32>
    %81 = vector.extract_strided_slice %56 {offsets = [1, 1, 0], sizes = [8, 8, 32], strides = [1, 1, 1]} : vector<10x10x32xf32> to vector<8x8x32xf32>
    %82 = vector.shape_cast %81 : vector<8x8x32xf32> to vector<64x32xf32>
    %c13 = arith.constant 13 : index
    %c0_48 = arith.constant 0 : index
    %c0_49 = arith.constant 0 : index
    %83 = vector.load %arg5[%c13, %c0_48, %c0_49] : memref<27x32x32xf32, #tpu.memory_space<vmem>>, vector<1x32x32xf32>
    %84 = vector.shape_cast %83 : vector<1x32x32xf32> to vector<32x32xf32>
    %cst_50 = arith.constant dense<0.000000e+00> : vector<64x32xf32>
    %85 = tpu.matmul %82, %84, %cst_50 {dimension_numbers = #tpu.dot_dimension_numbers<[1], [0], [0], [1], [0, 0, 1, 1], [], []>, precision = #tpu.contract_precision<fp32>} : vector<64x32xf32>, vector<32x32xf32>, vector<64x32xf32> -> vector<64x32xf32>
    %86 = arith.addf %80, %85 : vector<64x32xf32>
    %87 = vector.extract_strided_slice %56 {offsets = [1, 2, 0], sizes = [8, 8, 32], strides = [1, 1, 1]} : vector<10x10x32xf32> to vector<8x8x32xf32>
    %88 = vector.shape_cast %87 : vector<8x8x32xf32> to vector<64x32xf32>
    %c14 = arith.constant 14 : index
    %c0_51 = arith.constant 0 : index
    %c0_52 = arith.constant 0 : index
    %89 = vector.load %arg5[%c14, %c0_51, %c0_52] : memref<27x32x32xf32, #tpu.memory_space<vmem>>, vector<1x32x32xf32>
    %90 = vector.shape_cast %89 : vector<1x32x32xf32> to vector<32x32xf32>
    %cst_53 = arith.constant dense<0.000000e+00> : vector<64x32xf32>
    %91 = tpu.matmul %88, %90, %cst_53 {dimension_numbers = #tpu.dot_dimension_numbers<[1], [0], [0], [1], [0, 0, 1, 1], [], []>, precision = #tpu.contract_precision<fp32>} : vector<64x32xf32>, vector<32x32xf32>, vector<64x32xf32> -> vector<64x32xf32>
    %92 = arith.addf %86, %91 : vector<64x32xf32>
    %93 = vector.extract_strided_slice %56 {offsets = [2, 0, 0], sizes = [8, 8, 32], strides = [1, 1, 1]} : vector<10x10x32xf32> to vector<8x8x32xf32>
    %94 = vector.shape_cast %93 : vector<8x8x32xf32> to vector<64x32xf32>
    %c15 = arith.constant 15 : index
    %c0_54 = arith.constant 0 : index
    %c0_55 = arith.constant 0 : index
    %95 = vector.load %arg5[%c15, %c0_54, %c0_55] : memref<27x32x32xf32, #tpu.memory_space<vmem>>, vector<1x32x32xf32>
    %96 = vector.shape_cast %95 : vector<1x32x32xf32> to vector<32x32xf32>
    %cst_56 = arith.constant dense<0.000000e+00> : vector<64x32xf32>
    %97 = tpu.matmul %94, %96, %cst_56 {dimension_numbers = #tpu.dot_dimension_numbers<[1], [0], [0], [1], [0, 0, 1, 1], [], []>, precision = #tpu.contract_precision<fp32>} : vector<64x32xf32>, vector<32x32xf32>, vector<64x32xf32> -> vector<64x32xf32>
    %98 = arith.addf %92, %97 : vector<64x32xf32>
    %99 = vector.extract_strided_slice %56 {offsets = [2, 1, 0], sizes = [8, 8, 32], strides = [1, 1, 1]} : vector<10x10x32xf32> to vector<8x8x32xf32>
    %100 = vector.shape_cast %99 : vector<8x8x32xf32> to vector<64x32xf32>
    %c16 = arith.constant 16 : index
    %c0_57 = arith.constant 0 : index
    %c0_58 = arith.constant 0 : index
    %101 = vector.load %arg5[%c16, %c0_57, %c0_58] : memref<27x32x32xf32, #tpu.memory_space<vmem>>, vector<1x32x32xf32>
    %102 = vector.shape_cast %101 : vector<1x32x32xf32> to vector<32x32xf32>
    %cst_59 = arith.constant dense<0.000000e+00> : vector<64x32xf32>
    %103 = tpu.matmul %100, %102, %cst_59 {dimension_numbers = #tpu.dot_dimension_numbers<[1], [0], [0], [1], [0, 0, 1, 1], [], []>, precision = #tpu.contract_precision<fp32>} : vector<64x32xf32>, vector<32x32xf32>, vector<64x32xf32> -> vector<64x32xf32>
    %104 = arith.addf %98, %103 : vector<64x32xf32>
    %105 = vector.extract_strided_slice %56 {offsets = [2, 2, 0], sizes = [8, 8, 32], strides = [1, 1, 1]} : vector<10x10x32xf32> to vector<8x8x32xf32>
    %106 = vector.shape_cast %105 : vector<8x8x32xf32> to vector<64x32xf32>
    %c17 = arith.constant 17 : index
    %c0_60 = arith.constant 0 : index
    %c0_61 = arith.constant 0 : index
    %107 = vector.load %arg5[%c17, %c0_60, %c0_61] : memref<27x32x32xf32, #tpu.memory_space<vmem>>, vector<1x32x32xf32>
    %108 = vector.shape_cast %107 : vector<1x32x32xf32> to vector<32x32xf32>
    %cst_62 = arith.constant dense<0.000000e+00> : vector<64x32xf32>
    %109 = tpu.matmul %106, %108, %cst_62 {dimension_numbers = #tpu.dot_dimension_numbers<[1], [0], [0], [1], [0, 0, 1, 1], [], []>, precision = #tpu.contract_precision<fp32>} : vector<64x32xf32>, vector<32x32xf32>, vector<64x32xf32> -> vector<64x32xf32>
    %110 = arith.addf %104, %109 : vector<64x32xf32>
    %c0_63 = arith.constant 0 : index
    %c0_64 = arith.constant 0 : index
    %c0_65 = arith.constant 0 : index
    %c0_66 = arith.constant 0 : index
    %c0_67 = arith.constant 0 : index
    %111 = vector.load %arg4[%c0_63, %c0_64, %c0_65, %c0_66, %c0_67] : memref<1x1x10x10x32xf32, #tpu.memory_space<vmem>>, vector<1x1x10x10x32xf32>
    %112 = vector.shape_cast %111 : vector<1x1x10x10x32xf32> to vector<10x10x32xf32>
    %113 = vector.extract_strided_slice %112 {offsets = [0, 0, 0], sizes = [8, 8, 32], strides = [1, 1, 1]} : vector<10x10x32xf32> to vector<8x8x32xf32>
    %114 = vector.shape_cast %113 : vector<8x8x32xf32> to vector<64x32xf32>
    %c18 = arith.constant 18 : index
    %c0_68 = arith.constant 0 : index
    %c0_69 = arith.constant 0 : index
    %115 = vector.load %arg5[%c18, %c0_68, %c0_69] : memref<27x32x32xf32, #tpu.memory_space<vmem>>, vector<1x32x32xf32>
    %116 = vector.shape_cast %115 : vector<1x32x32xf32> to vector<32x32xf32>
    %cst_70 = arith.constant dense<0.000000e+00> : vector<64x32xf32>
    %117 = tpu.matmul %114, %116, %cst_70 {dimension_numbers = #tpu.dot_dimension_numbers<[1], [0], [0], [1], [0, 0, 1, 1], [], []>, precision = #tpu.contract_precision<fp32>} : vector<64x32xf32>, vector<32x32xf32>, vector<64x32xf32> -> vector<64x32xf32>
    %118 = arith.addf %110, %117 : vector<64x32xf32>
    %119 = vector.extract_strided_slice %112 {offsets = [0, 1, 0], sizes = [8, 8, 32], strides = [1, 1, 1]} : vector<10x10x32xf32> to vector<8x8x32xf32>
    %120 = vector.shape_cast %119 : vector<8x8x32xf32> to vector<64x32xf32>
    %c19 = arith.constant 19 : index
    %c0_71 = arith.constant 0 : index
    %c0_72 = arith.constant 0 : index
    %121 = vector.load %arg5[%c19, %c0_71, %c0_72] : memref<27x32x32xf32, #tpu.memory_space<vmem>>, vector<1x32x32xf32>
    %122 = vector.shape_cast %121 : vector<1x32x32xf32> to vector<32x32xf32>
    %cst_73 = arith.constant dense<0.000000e+00> : vector<64x32xf32>
    %123 = tpu.matmul %120, %122, %cst_73 {dimension_numbers = #tpu.dot_dimension_numbers<[1], [0], [0], [1], [0, 0, 1, 1], [], []>, precision = #tpu.contract_precision<fp32>} : vector<64x32xf32>, vector<32x32xf32>, vector<64x32xf32> -> vector<64x32xf32>
    %124 = arith.addf %118, %123 : vector<64x32xf32>
    %125 = vector.extract_strided_slice %112 {offsets = [0, 2, 0], sizes = [8, 8, 32], strides = [1, 1, 1]} : vector<10x10x32xf32> to vector<8x8x32xf32>
    %126 = vector.shape_cast %125 : vector<8x8x32xf32> to vector<64x32xf32>
    %c20 = arith.constant 20 : index
    %c0_74 = arith.constant 0 : index
    %c0_75 = arith.constant 0 : index
    %127 = vector.load %arg5[%c20, %c0_74, %c0_75] : memref<27x32x32xf32, #tpu.memory_space<vmem>>, vector<1x32x32xf32>
    %128 = vector.shape_cast %127 : vector<1x32x32xf32> to vector<32x32xf32>
    %cst_76 = arith.constant dense<0.000000e+00> : vector<64x32xf32>
    %129 = tpu.matmul %126, %128, %cst_76 {dimension_numbers = #tpu.dot_dimension_numbers<[1], [0], [0], [1], [0, 0, 1, 1], [], []>, precision = #tpu.contract_precision<fp32>} : vector<64x32xf32>, vector<32x32xf32>, vector<64x32xf32> -> vector<64x32xf32>
    %130 = arith.addf %124, %129 : vector<64x32xf32>
    %131 = vector.extract_strided_slice %112 {offsets = [1, 0, 0], sizes = [8, 8, 32], strides = [1, 1, 1]} : vector<10x10x32xf32> to vector<8x8x32xf32>
    %132 = vector.shape_cast %131 : vector<8x8x32xf32> to vector<64x32xf32>
    %c21 = arith.constant 21 : index
    %c0_77 = arith.constant 0 : index
    %c0_78 = arith.constant 0 : index
    %133 = vector.load %arg5[%c21, %c0_77, %c0_78] : memref<27x32x32xf32, #tpu.memory_space<vmem>>, vector<1x32x32xf32>
    %134 = vector.shape_cast %133 : vector<1x32x32xf32> to vector<32x32xf32>
    %cst_79 = arith.constant dense<0.000000e+00> : vector<64x32xf32>
    %135 = tpu.matmul %132, %134, %cst_79 {dimension_numbers = #tpu.dot_dimension_numbers<[1], [0], [0], [1], [0, 0, 1, 1], [], []>, precision = #tpu.contract_precision<fp32>} : vector<64x32xf32>, vector<32x32xf32>, vector<64x32xf32> -> vector<64x32xf32>
    %136 = arith.addf %130, %135 : vector<64x32xf32>
    %137 = vector.extract_strided_slice %112 {offsets = [1, 1, 0], sizes = [8, 8, 32], strides = [1, 1, 1]} : vector<10x10x32xf32> to vector<8x8x32xf32>
    %138 = vector.shape_cast %137 : vector<8x8x32xf32> to vector<64x32xf32>
    %c22 = arith.constant 22 : index
    %c0_80 = arith.constant 0 : index
    %c0_81 = arith.constant 0 : index
    %139 = vector.load %arg5[%c22, %c0_80, %c0_81] : memref<27x32x32xf32, #tpu.memory_space<vmem>>, vector<1x32x32xf32>
    %140 = vector.shape_cast %139 : vector<1x32x32xf32> to vector<32x32xf32>
    %cst_82 = arith.constant dense<0.000000e+00> : vector<64x32xf32>
    %141 = tpu.matmul %138, %140, %cst_82 {dimension_numbers = #tpu.dot_dimension_numbers<[1], [0], [0], [1], [0, 0, 1, 1], [], []>, precision = #tpu.contract_precision<fp32>} : vector<64x32xf32>, vector<32x32xf32>, vector<64x32xf32> -> vector<64x32xf32>
    %142 = arith.addf %136, %141 : vector<64x32xf32>
    %143 = vector.extract_strided_slice %112 {offsets = [1, 2, 0], sizes = [8, 8, 32], strides = [1, 1, 1]} : vector<10x10x32xf32> to vector<8x8x32xf32>
    %144 = vector.shape_cast %143 : vector<8x8x32xf32> to vector<64x32xf32>
    %c23 = arith.constant 23 : index
    %c0_83 = arith.constant 0 : index
    %c0_84 = arith.constant 0 : index
    %145 = vector.load %arg5[%c23, %c0_83, %c0_84] : memref<27x32x32xf32, #tpu.memory_space<vmem>>, vector<1x32x32xf32>
    %146 = vector.shape_cast %145 : vector<1x32x32xf32> to vector<32x32xf32>
    %cst_85 = arith.constant dense<0.000000e+00> : vector<64x32xf32>
    %147 = tpu.matmul %144, %146, %cst_85 {dimension_numbers = #tpu.dot_dimension_numbers<[1], [0], [0], [1], [0, 0, 1, 1], [], []>, precision = #tpu.contract_precision<fp32>} : vector<64x32xf32>, vector<32x32xf32>, vector<64x32xf32> -> vector<64x32xf32>
    %148 = arith.addf %142, %147 : vector<64x32xf32>
    %149 = vector.extract_strided_slice %112 {offsets = [2, 0, 0], sizes = [8, 8, 32], strides = [1, 1, 1]} : vector<10x10x32xf32> to vector<8x8x32xf32>
    %150 = vector.shape_cast %149 : vector<8x8x32xf32> to vector<64x32xf32>
    %c24 = arith.constant 24 : index
    %c0_86 = arith.constant 0 : index
    %c0_87 = arith.constant 0 : index
    %151 = vector.load %arg5[%c24, %c0_86, %c0_87] : memref<27x32x32xf32, #tpu.memory_space<vmem>>, vector<1x32x32xf32>
    %152 = vector.shape_cast %151 : vector<1x32x32xf32> to vector<32x32xf32>
    %cst_88 = arith.constant dense<0.000000e+00> : vector<64x32xf32>
    %153 = tpu.matmul %150, %152, %cst_88 {dimension_numbers = #tpu.dot_dimension_numbers<[1], [0], [0], [1], [0, 0, 1, 1], [], []>, precision = #tpu.contract_precision<fp32>} : vector<64x32xf32>, vector<32x32xf32>, vector<64x32xf32> -> vector<64x32xf32>
    %154 = arith.addf %148, %153 : vector<64x32xf32>
    %155 = vector.extract_strided_slice %112 {offsets = [2, 1, 0], sizes = [8, 8, 32], strides = [1, 1, 1]} : vector<10x10x32xf32> to vector<8x8x32xf32>
    %156 = vector.shape_cast %155 : vector<8x8x32xf32> to vector<64x32xf32>
    %c25 = arith.constant 25 : index
    %c0_89 = arith.constant 0 : index
    %c0_90 = arith.constant 0 : index
    %157 = vector.load %arg5[%c25, %c0_89, %c0_90] : memref<27x32x32xf32, #tpu.memory_space<vmem>>, vector<1x32x32xf32>
    %158 = vector.shape_cast %157 : vector<1x32x32xf32> to vector<32x32xf32>
    %cst_91 = arith.constant dense<0.000000e+00> : vector<64x32xf32>
    %159 = tpu.matmul %156, %158, %cst_91 {dimension_numbers = #tpu.dot_dimension_numbers<[1], [0], [0], [1], [0, 0, 1, 1], [], []>, precision = #tpu.contract_precision<fp32>} : vector<64x32xf32>, vector<32x32xf32>, vector<64x32xf32> -> vector<64x32xf32>
    %160 = arith.addf %154, %159 : vector<64x32xf32>
    %161 = vector.extract_strided_slice %112 {offsets = [2, 2, 0], sizes = [8, 8, 32], strides = [1, 1, 1]} : vector<10x10x32xf32> to vector<8x8x32xf32>
    %162 = vector.shape_cast %161 : vector<8x8x32xf32> to vector<64x32xf32>
    %c26 = arith.constant 26 : index
    %c0_92 = arith.constant 0 : index
    %c0_93 = arith.constant 0 : index
    %163 = vector.load %arg5[%c26, %c0_92, %c0_93] : memref<27x32x32xf32, #tpu.memory_space<vmem>>, vector<1x32x32xf32>
    %164 = vector.shape_cast %163 : vector<1x32x32xf32> to vector<32x32xf32>
    %cst_94 = arith.constant dense<0.000000e+00> : vector<64x32xf32>
    %165 = tpu.matmul %162, %164, %cst_94 {dimension_numbers = #tpu.dot_dimension_numbers<[1], [0], [0], [1], [0, 0, 1, 1], [], []>, precision = #tpu.contract_precision<fp32>} : vector<64x32xf32>, vector<32x32xf32>, vector<64x32xf32> -> vector<64x32xf32>
    %166 = arith.addf %160, %165 : vector<64x32xf32>
    %c0_i32 = arith.constant 0 : i32
    %167 = arith.cmpi eq, %arg0, %c0_i32 : i32
    %c0_i32_95 = arith.constant 0 : i32
    %168 = arith.cmpi eq, %arg1, %c0_i32_95 : i32
    %169 = arith.andi %167, %168 : i1
    %170 = arith.extui %169 : i1 to i32
    %c0_i32_96 = arith.constant 0 : i32
    %171 = arith.cmpi ne, %170, %c0_i32_96 : i32
    scf.if %171 {
      %cst_107 = arith.constant 0.000000e+00 : f32
      %184 = vector.broadcast %cst_107 : f32 to vector<2x32xf32>
      %c0_108 = arith.constant 0 : index
      %c0_109 = arith.constant 0 : index
      %185 = vector.load %arg7[%c0_108, %c0_109] : memref<2x32xf32, #tpu.memory_space<vmem>>, vector<2x32xf32>
      tpu.vector_store %arg7[%c0_108, %c0_109], %184 {strides = array<i32>} : memref<2x32xf32, #tpu.memory_space<vmem>>, vector<2x32xf32>,
    } else {
    }
    %c0_97 = arith.constant 0 : index
    %c0_98 = arith.constant 0 : index
    %172 = vector.load %arg7[%c0_97, %c0_98] : memref<2x32xf32, #tpu.memory_space<vmem>>, vector<2x32xf32>
    %cst_99 = arith.constant dense<0.000000e+00> : vector<32xf32>
    %173 = vector.multi_reduction <add>, %166, %cst_99 [0] : vector<64x32xf32> to vector<32xf32>
    %174 = vector.shape_cast %173 : vector<32xf32> to vector<1x32xf32>
    %175 = arith.mulf %166, %166 : vector<64x32xf32>
    %cst_100 = arith.constant dense<0.000000e+00> : vector<32xf32>
    %176 = vector.multi_reduction <add>, %175, %cst_100 [0] : vector<64x32xf32> to vector<32xf32>
    %177 = vector.shape_cast %176 : vector<32xf32> to vector<1x32xf32>
    %178 = tpu.concatenate %174, %177 in 0 : vector<1x32xf32>, vector<1x32xf32> -> vector<2x32xf32>
    %179 = arith.addf %172, %178 : vector<2x32xf32>
    %c0_101 = arith.constant 0 : index
    %c0_102 = arith.constant 0 : index
    %180 = vector.load %arg7[%c0_101, %c0_102] : memref<2x32xf32, #tpu.memory_space<vmem>>, vector<2x32xf32>
    tpu.vector_store %arg7[%c0_101, %c0_102], %179 {strides = array<i32>} : memref<2x32xf32, #tpu.memory_space<vmem>>, vector<2x32xf32>,
    %c0_103 = arith.constant 0 : index
    %c0_104 = arith.constant 0 : index
    %c0_105 = arith.constant 0 : index
    %c0_106 = arith.constant 0 : index
    %181 = vector.load %arg6[%c0_103, %c0_104, %c0_105, %c0_106] : memref<1x1x64x32xf32, #tpu.memory_space<vmem>>, vector<1x1x64x32xf32>
    %182 = vector.shape_cast %181 : vector<1x1x64x32xf32> to vector<64x32xf32>
    %183 = vector.shape_cast %166 : vector<64x32xf32> to vector<1x1x64x32xf32>
    tpu.vector_store %arg6[%c0_103, %c0_104, %c0_105, %c0_106], %183 {strides = array<i32>} : memref<1x1x64x32xf32, #tpu.memory_space<vmem>>, vector<1x1x64x32xf32>,
    return
  }
  func.func @transform_0(%arg0: i32, %arg1: i32) -> (i32, i32, i32, i32, i32) {
    %c0_i32 = arith.constant 0 : i32
    %0 = arith.addi %arg1, %c0_i32 : i32
    %c0_i32_0 = arith.constant 0 : i32
    %c0_i32_1 = arith.constant 0 : i32
    %c0_i32_2 = arith.constant 0 : i32
    %c0_i32_3 = arith.constant 0 : i32
    return %arg0, %0, %c0_i32_0, %c0_i32_1, %c0_i32_2 : i32, i32, i32, i32, i32
  }
  func.func @transform_1(%arg0: i32, %arg1: i32) -> (i32, i32, i32, i32, i32) {
    %c1_i32 = arith.constant 1 : i32
    %0 = arith.addi %arg1, %c1_i32 : i32
    %c0_i32 = arith.constant 0 : i32
    %c0_i32_0 = arith.constant 0 : i32
    %c0_i32_1 = arith.constant 0 : i32
    %c0_i32_2 = arith.constant 0 : i32
    return %arg0, %0, %c0_i32, %c0_i32_0, %c0_i32_1 : i32, i32, i32, i32, i32
  }
  func.func @transform_2(%arg0: i32, %arg1: i32) -> (i32, i32, i32, i32, i32) {
    %c2_i32 = arith.constant 2 : i32
    %0 = arith.addi %arg1, %c2_i32 : i32
    %c0_i32 = arith.constant 0 : i32
    %c0_i32_0 = arith.constant 0 : i32
    %c0_i32_1 = arith.constant 0 : i32
    %c0_i32_2 = arith.constant 0 : i32
    return %arg0, %0, %c0_i32, %c0_i32_0, %c0_i32_1 : i32, i32, i32, i32, i32
  }
  func.func @transform_3(%arg0: i32, %arg1: i32) -> (i32, i32, i32) {
    %c0_i32 = arith.constant 0 : i32
    %c0_i32_0 = arith.constant 0 : i32
    %c0_i32_1 = arith.constant 0 : i32
    %c0_i32_2 = arith.constant 0 : i32
    return %c0_i32, %c0_i32_0, %c0_i32_1 : i32, i32, i32
  }
  func.func @transform_4(%arg0: i32, %arg1: i32) -> (i32, i32, i32, i32) {
    %c0_i32 = arith.constant 0 : i32
    %c0_i32_0 = arith.constant 0 : i32
    %c0_i32_1 = arith.constant 0 : i32
    return %arg0, %arg1, %c0_i32, %c0_i32_0 : i32, i32, i32, i32
  }
  func.func @transform_5(%arg0: i32, %arg1: i32) -> (i32, i32) {
    %c0_i32 = arith.constant 0 : i32
    %c0_i32_0 = arith.constant 0 : i32
    %c0_i32_1 = arith.constant 0 : i32
    return %c0_i32, %c0_i32_0 : i32, i32
  }
}

module attributes {stable_mosaic.version = 11 : i64} {
  func.func @_bn_relu_kernel(%arg0: i32, %arg1: i32, %arg2: memref<1x1x8x256xf32, #tpu.memory_space<vmem>>, %arg3: memref<1x256xf32, #tpu.memory_space<vmem>>, %arg4: memref<1x256xf32, #tpu.memory_space<vmem>>, %arg5: memref<1x1x8x256xf32, #tpu.memory_space<vmem>>) attributes {dimension_semantics = [#tpu.dimension_semantics<parallel>, #tpu.dimension_semantics<parallel>], iteration_bounds = array<i64: 2, 8>, scalar_prefetch = 0 : i64, scratch_operands = 0 : i64, tpu.core_type = #tpu.core_type<tc>, window_params = [{transform_indices = @transform_0, window_bounds = array<i64: 1, 1, 8, 256>}, {pipeline_mode = #tpu.pipeline_mode<synchronous>, transform_indices = @transform_1, window_bounds = array<i64: 1, 256>}, {pipeline_mode = #tpu.pipeline_mode<synchronous>, transform_indices = @transform_2, window_bounds = array<i64: 1, 256>}, {transform_indices = @transform_3, window_bounds = array<i64: 1, 1, 8, 256>}]} {
    %c0 = arith.constant 0 : index
    %c0_0 = arith.constant 0 : index
    %c0_1 = arith.constant 0 : index
    %c0_2 = arith.constant 0 : index
    %0 = vector.load %arg2[%c0, %c0_0, %c0_1, %c0_2] : memref<1x1x8x256xf32, #tpu.memory_space<vmem>>, vector<1x1x8x256xf32>
    %1 = vector.shape_cast %0 : vector<1x1x8x256xf32> to vector<8x256xf32>
    %c0_3 = arith.constant 0 : index
    %c0_4 = arith.constant 0 : index
    %2 = vector.load %arg3[%c0_3, %c0_4] : memref<1x256xf32, #tpu.memory_space<vmem>>, vector<1x256xf32>
    %3 = vector.broadcast %2 : vector<1x256xf32> to vector<8x256xf32>
    %4 = arith.mulf %1, %3 : vector<8x256xf32>
    %c0_5 = arith.constant 0 : index
    %c0_6 = arith.constant 0 : index
    %5 = vector.load %arg4[%c0_5, %c0_6] : memref<1x256xf32, #tpu.memory_space<vmem>>, vector<1x256xf32>
    %6 = vector.broadcast %5 : vector<1x256xf32> to vector<8x256xf32>
    %7 = arith.addf %4, %6 : vector<8x256xf32>
    %cst = arith.constant 0.000000e+00 : f32
    %8 = vector.broadcast %cst : f32 to vector<8x256xf32>
    %9 = arith.maximumf %7, %8 : vector<8x256xf32>
    %c0_7 = arith.constant 0 : index
    %c0_8 = arith.constant 0 : index
    %c0_9 = arith.constant 0 : index
    %c0_10 = arith.constant 0 : index
    %10 = vector.load %arg5[%c0_7, %c0_8, %c0_9, %c0_10] : memref<1x1x8x256xf32, #tpu.memory_space<vmem>>, vector<1x1x8x256xf32>
    %11 = vector.shape_cast %10 : vector<1x1x8x256xf32> to vector<8x256xf32>
    %12 = vector.shape_cast %9 : vector<8x256xf32> to vector<1x1x8x256xf32>
    tpu.vector_store %arg5[%c0_7, %c0_8, %c0_9, %c0_10], %12 {strides = array<i32>} : memref<1x1x8x256xf32, #tpu.memory_space<vmem>>, vector<1x1x8x256xf32>,
    return
  }
  func.func @transform_0(%arg0: i32, %arg1: i32) -> (i32, i32, i32, i32) {
    %c0_i32 = arith.constant 0 : i32
    %c0_i32_0 = arith.constant 0 : i32
    %c0_i32_1 = arith.constant 0 : i32
    return %arg0, %arg1, %c0_i32, %c0_i32_0 : i32, i32, i32, i32
  }
  func.func @transform_1(%arg0: i32, %arg1: i32) -> (i32, i32) {
    %c0_i32 = arith.constant 0 : i32
    %c0_i32_0 = arith.constant 0 : i32
    %c0_i32_1 = arith.constant 0 : i32
    return %c0_i32, %c0_i32_0 : i32, i32
  }
  func.func @transform_2(%arg0: i32, %arg1: i32) -> (i32, i32) {
    %c0_i32 = arith.constant 0 : i32
    %c0_i32_0 = arith.constant 0 : i32
    %c0_i32_1 = arith.constant 0 : i32
    return %c0_i32, %c0_i32_0 : i32, i32
  }
  func.func @transform_3(%arg0: i32, %arg1: i32) -> (i32, i32, i32, i32) {
    %c0_i32 = arith.constant 0 : i32
    %c0_i32_0 = arith.constant 0 : i32
    %c0_i32_1 = arith.constant 0 : i32
    return %arg0, %arg1, %c0_i32, %c0_i32_0 : i32, i32, i32, i32
  }
}

module attributes {stable_mosaic.version = 11 : i64} {
  func.func @_bn_relu_res_kernel(%arg0: i32, %arg1: i32, %arg2: memref<1x1x8x256xf32, #tpu.memory_space<vmem>>, %arg3: memref<1x256xf32, #tpu.memory_space<vmem>>, %arg4: memref<1x256xf32, #tpu.memory_space<vmem>>, %arg5: memref<1x1x8x256xf32, #tpu.memory_space<vmem>>, %arg6: memref<1x1x8x256xf32, #tpu.memory_space<vmem>>) attributes {dimension_semantics = [#tpu.dimension_semantics<parallel>, #tpu.dimension_semantics<parallel>], iteration_bounds = array<i64: 2, 8>, scalar_prefetch = 0 : i64, scratch_operands = 0 : i64, tpu.core_type = #tpu.core_type<tc>, window_params = [{transform_indices = @transform_0, window_bounds = array<i64: 1, 1, 8, 256>}, {pipeline_mode = #tpu.pipeline_mode<synchronous>, transform_indices = @transform_1, window_bounds = array<i64: 1, 256>}, {pipeline_mode = #tpu.pipeline_mode<synchronous>, transform_indices = @transform_2, window_bounds = array<i64: 1, 256>}, {transform_indices = @transform_3, window_bounds = array<i64: 1, 1, 8, 256>}, {transform_indices = @transform_4, window_bounds = array<i64: 1, 1, 8, 256>}]} {
    %c0 = arith.constant 0 : index
    %c0_0 = arith.constant 0 : index
    %c0_1 = arith.constant 0 : index
    %c0_2 = arith.constant 0 : index
    %0 = vector.load %arg2[%c0, %c0_0, %c0_1, %c0_2] : memref<1x1x8x256xf32, #tpu.memory_space<vmem>>, vector<1x1x8x256xf32>
    %1 = vector.shape_cast %0 : vector<1x1x8x256xf32> to vector<8x256xf32>
    %c0_3 = arith.constant 0 : index
    %c0_4 = arith.constant 0 : index
    %2 = vector.load %arg3[%c0_3, %c0_4] : memref<1x256xf32, #tpu.memory_space<vmem>>, vector<1x256xf32>
    %3 = vector.broadcast %2 : vector<1x256xf32> to vector<8x256xf32>
    %4 = arith.mulf %1, %3 : vector<8x256xf32>
    %c0_5 = arith.constant 0 : index
    %c0_6 = arith.constant 0 : index
    %5 = vector.load %arg4[%c0_5, %c0_6] : memref<1x256xf32, #tpu.memory_space<vmem>>, vector<1x256xf32>
    %6 = vector.broadcast %5 : vector<1x256xf32> to vector<8x256xf32>
    %7 = arith.addf %4, %6 : vector<8x256xf32>
    %cst = arith.constant 0.000000e+00 : f32
    %8 = vector.broadcast %cst : f32 to vector<8x256xf32>
    %9 = arith.maximumf %7, %8 : vector<8x256xf32>
    %c0_7 = arith.constant 0 : index
    %c0_8 = arith.constant 0 : index
    %c0_9 = arith.constant 0 : index
    %c0_10 = arith.constant 0 : index
    %10 = vector.load %arg5[%c0_7, %c0_8, %c0_9, %c0_10] : memref<1x1x8x256xf32, #tpu.memory_space<vmem>>, vector<1x1x8x256xf32>
    %11 = vector.shape_cast %10 : vector<1x1x8x256xf32> to vector<8x256xf32>
    %12 = arith.addf %11, %9 : vector<8x256xf32>
    %cst_11 = arith.constant 0.000000e+00 : f32
    %13 = vector.broadcast %cst_11 : f32 to vector<8x256xf32>
    %14 = arith.maximumf %12, %13 : vector<8x256xf32>
    %c0_12 = arith.constant 0 : index
    %c0_13 = arith.constant 0 : index
    %c0_14 = arith.constant 0 : index
    %c0_15 = arith.constant 0 : index
    %15 = vector.load %arg6[%c0_12, %c0_13, %c0_14, %c0_15] : memref<1x1x8x256xf32, #tpu.memory_space<vmem>>, vector<1x1x8x256xf32>
    %16 = vector.shape_cast %15 : vector<1x1x8x256xf32> to vector<8x256xf32>
    %17 = vector.shape_cast %14 : vector<8x256xf32> to vector<1x1x8x256xf32>
    tpu.vector_store %arg6[%c0_12, %c0_13, %c0_14, %c0_15], %17 {strides = array<i32>} : memref<1x1x8x256xf32, #tpu.memory_space<vmem>>, vector<1x1x8x256xf32>,
    return
  }
  func.func @transform_0(%arg0: i32, %arg1: i32) -> (i32, i32, i32, i32) {
    %c0_i32 = arith.constant 0 : i32
    %c0_i32_0 = arith.constant 0 : i32
    %c0_i32_1 = arith.constant 0 : i32
    return %arg0, %arg1, %c0_i32, %c0_i32_0 : i32, i32, i32, i32
  }
  func.func @transform_1(%arg0: i32, %arg1: i32) -> (i32, i32) {
    %c0_i32 = arith.constant 0 : i32
    %c0_i32_0 = arith.constant 0 : i32
    %c0_i32_1 = arith.constant 0 : i32
    return %c0_i32, %c0_i32_0 : i32, i32
  }
  func.func @transform_2(%arg0: i32, %arg1: i32) -> (i32, i32) {
    %c0_i32 = arith.constant 0 : i32
    %c0_i32_0 = arith.constant 0 : i32
    %c0_i32_1 = arith.constant 0 : i32
    return %c0_i32, %c0_i32_0 : i32, i32
  }
  func.func @transform_3(%arg0: i32, %arg1: i32) -> (i32, i32, i32, i32) {
    %c0_i32 = arith.constant 0 : i32
    %c0_i32_0 = arith.constant 0 : i32
    %c0_i32_1 = arith.constant 0 : i32
    return %arg0, %arg1, %c0_i32, %c0_i32_0 : i32, i32, i32, i32
  }
  func.func @transform_4(%arg0: i32, %arg1: i32) -> (i32, i32, i32, i32) {
    %c0_i32 = arith.constant 0 : i32
    %c0_i32_0 = arith.constant 0 : i32
    %c0_i32_1 = arith.constant 0 : i32
    return %arg0, %arg1, %c0_i32, %c0_i32_0 : i32, i32, i32, i32
  }
}

</mosaic_0001>

<bundles_post_ra>
// kernel: residual_block_forward.5
= control target key start
LH: loop header
LB: loop body
LE: loop exit
PB: predicated region body
PF: predicated region fallthrough
CT: control target
= control target key end

     0   :  { %s437_s12 = smov 0   ;;  %s439_s13 = smov 0   ;;  %s494_s0 = inlined_call_operand.vmem [shape: f32[2,8,8,256], index: 0, kind: input, shape index: {}]   ;;  %s495_s1 = inlined_call_operand.vmem [shape: f32[1,256], index: 1, kind: input, shape index: {}]   ;;  %s496_s2 = inlined_call_operand.vmem [shape: f32[1,256], index: 2, kind: input, shape index: {}]   ;;  %s497_s3 = inlined_call_operand.vmem [shape: f32[2,8,8,256], index: 3, kind: output, shape index: {}]  }
   0x1   :  { %s441_s14 = smov 0   ;;  %s443_s15 = smov 0  }
   0x2   :  { %s445_s16 = smov 0  }
   0x3 LB: > { %s22_s17 = sadd.s32 1, %s407_s14  ;;  %s25_s18 = sadd.s32 1, %s411_s15  ;;  %s415_s16 = sphi %s445_s16, %s13_s16   ;;  %s411_s15 = sphi %s443_s15, %s501_s15   ;;  %s407_s14 = sphi %s441_s14, %s500_s14   ;;  %s403_s13 = sphi %s439_s13, %s499_s13   ;;  %s399_s12 = sphi %s437_s12, %s498_s12  }
   0x4   : > { %p23_p0 = scmp.ge.s32.totalorder %s22_s17, 8  ;;  %p328_p1 = scmp.ge.s32.totalorder %s415_s16, 1 }
   0x5   : > { %p157_p2 = scmp.lt.s32.totalorder %s415_s16, 17 }
   0x6   : > { %s503_s17 = smov (%p23_p0, %s22_s17), 0  ;;  %s505_s18 = smov (!%p23_p0, %s25_s18), %s411_s15 }
   0x7   : > { %p158_p3 = pnand %p328_p1, %p157_p2  ;;  %p27_p4 = scmp.ge.s32.totalorder %s505_s18, 2 }
   0x8   : > { %p189_p5 = scmp.lt.s32.totalorder (!%p158_p3), %s403_s13, 1  ;;  %p191_p6 = scmp.lt.s32.totalorder (!%p158_p3), %s399_s12, 7 }
   0x9   : > { %s507_s18 = smov (%p27_p4, %s505_s18), 0  ;;  %161 = sbr.rel (%p158_p3) target bundleno = 28 (0x1c), region = 32 }
   0xe   : > { %s509_s13 = smov (!%p189_p5, %s403_s13), 1  ;;  %s511_s12 = smov (!%p191_p6, %s399_s12), 7  ;;  %v209_v0 = vld [vmem:[%s495_s1] sm:$0x3] }
   0xf   : > { %s330_s21 = sshll.u32 %s509_s13, 4  ;;  %s329_s22 = sshll.u32 %s511_s12, 1  ;;  %v217_v1 = vld [vmem:[%s496_s2] sm:$0x3]  ;;  %v211_v2 = vperm.slane %v209_v0, 0  ;;  %v212_v3 = vperm.slane %v209_v0, 1 }
  0x10   : > { %s195_s25 = sadd.s32 %s330_s21, %s329_s22  ;;  %v219_v4 = vperm.slane %v217_v1, 0  ;;  %v220_v5 = vperm.slane %v217_v1, 1 }
  0x11   : > { %s331_s26 = sshll.u32 %s195_s25, 3 }
  0x12   : > { %s197_s29 = scalar_lea.vmem %s494_s0, %s331_s26  ;;  %s206_s5 = scalar_lea.vmem %s497_s3, %s331_s26 }
  0x13   : > { %v207_v6 = vld [vmem:[%s197_s29] sm:$0xff]  ;;  %v208_v7 = vld [vmem:[%s197_s29 + $0x8] sm:$0xff] }
  0x14   : > { %v215_v8 = vmul.f32 %v211_v2, %v207_v6  ;;  %v216_v9 = vmul.f32 %v212_v3, %v208_v7 }
  0x16   : > { %v223_v10 = vadd.f32 %v219_v4, %v215_v8  ;;  %v224_v11 = vadd.f32 %v220_v5, %v216_v9 }
  0x18   : > { %v225_v12 = vmax.f32 %v223_v10, 0.0  ;;  %v226_v13 = vmax.f32 %v224_v11, 0.0 }
  0x1a   : > { %227 = vst [vmem:[%s206_s5] sm:$0xff] %v225_v12 }
  0x1b   : > { %228 = vst [vmem:[%s206_s5 + $0x8] sm:$0xff] %v226_v13 }
  0x1c PF: > { %s13_s16 = sadd.s32 1, %s415_s16   ;;  %s498_s12 = smov %s407_s14 }
  0x1d   : > { %p10_p7 = scmp.ge.s32.totalorder %s13_s16, 18   ;;  %s499_s13 = smov %s411_s15 }
  0x1e   : > { %s500_s14 = smov %s503_s17  ;;  %s501_s15 = smov %s507_s18 }
  0x1f   :  { %12 = sbr.rel (!%p10_p7) target bundleno = 3 (0x3), region = 62 }

// kernel: residual_block_forward.7
= control target key start
LH: loop header
LB: loop body
LE: loop exit
PB: predicated region body
PF: predicated region fallthrough
CT: control target
= control target key end

     0   :  { %s533_s15 = smov 0   ;;  %s535_s16 = smov 0   ;;  %s593_s0 = inlined_call_operand.vmem [shape: f32[2,8,8,256], index: 0, kind: input, shape index: {}]   ;;  %s594_s1 = inlined_call_operand.vmem [shape: f32[1,256], index: 1, kind: input, shape index: {}]   ;;  %s595_s2 = inlined_call_operand.vmem [shape: f32[1,256], index: 2, kind: input, shape index: {}]   ;;  %s596_s3 = inlined_call_operand.vmem [shape: f32[2,8,8,256], index: 3, kind: input, shape index: {}]   ;;  %s597_s4 = inlined_call_operand.vmem [shape: f32[2,8,8,256], index: 4, kind: output, shape index: {}]  }
   0x1   :  { %s537_s17 = smov 0   ;;  %s539_s18 = smov 0  }
   0x2   :  { %s541_s19 = smov 0  }
   0x3 LB: > { %s23_s20 = sadd.s32 1, %s498_s17  ;;  %s26_s21 = sadd.s32 1, %s502_s18  ;;  %s506_s19 = sphi %s541_s19, %s14_s19   ;;  %s502_s18 = sphi %s539_s18, %s601_s18   ;;  %s498_s17 = sphi %s537_s17, %s600_s17   ;;  %s494_s16 = sphi %s535_s16, %s599_s16   ;;  %s490_s15 = sphi %s533_s15, %s598_s15  }
   0x4   : > { %p24_p0 = scmp.ge.s32.totalorder %s23_s20, 8  ;;  %p416_p1 = scmp.ge.s32.totalorder %s506_s19, 1 }
   0x5   : > { %p198_p2 = scmp.lt.s32.totalorder %s506_s19, 17 }
   0x6   : > { %s603_s20 = smov (%p24_p0, %s23_s20), 0  ;;  %s605_s21 = smov (!%p24_p0, %s26_s21), %s502_s18 }
   0x7   : > { %p199_p3 = pnand %p416_p1, %p198_p2  ;;  %p28_p4 = scmp.ge.s32.totalorder %s605_s21, 2 }
   0x8   : > { %p241_p5 = scmp.lt.s32.totalorder (!%p199_p3), %s494_s16, 1  ;;  %p243_p6 = scmp.lt.s32.totalorder (!%p199_p3), %s490_s15, 7 }
   0x9   : > { %s607_s21 = smov (%p28_p4, %s605_s21), 0  ;;  %202 = sbr.rel (%p199_p3) target bundleno = 32 (0x20), region = 36 }
   0xe   : > { %s609_s16 = smov (!%p241_p5, %s494_s16), 1  ;;  %s611_s15 = smov (!%p243_p6, %s490_s15), 7  ;;  %v270_v0 = vld [vmem:[%s594_s1] sm:$0x3] }
   0xf   : > { %s418_s24 = sshll.u32 %s609_s16, 4  ;;  %s417_s25 = sshll.u32 %s611_s15, 1  ;;  %v278_v1 = vld [vmem:[%s595_s2] sm:$0x3]  ;;  %v272_v2 = vperm.slane %v270_v0, 0  ;;  %v273_v3 = vperm.slane %v270_v0, 1 }
  0x10   : > { %s247_s28 = sadd.s32 %s418_s24, %s417_s25  ;;  %v280_v4 = vperm.slane %v278_v1, 0  ;;  %v281_v5 = vperm.slane %v278_v1, 1 }
  0x11   : > { %s419_s29 = sshll.u32 %s247_s28, 3 }
  0x12   : > { %s249_s6 = scalar_lea.vmem %s593_s0, %s419_s29  ;;  %s258_s9 = scalar_lea.vmem %s596_s3, %s419_s29 }
  0x13   : > { %v268_v6 = vld [vmem:[%s249_s6] sm:$0xff]  ;;  %v269_v7 = vld [vmem:[%s249_s6 + $0x8] sm:$0xff]  ;;  %s267_s12 = scalar_lea.vmem %s597_s4, %s419_s29 }
  0x14   : > { %v276_v8 = vmul.f32 %v272_v2, %v268_v6  ;;  %v277_v9 = vmul.f32 %v273_v3, %v269_v7  ;;  %v288_v12 = vld [vmem:[%s258_s9] sm:$0xff]  ;;  %v289_v13 = vld [vmem:[%s258_s9 + $0x8] sm:$0xff] }
  0x16   : > { %v284_v10 = vadd.f32 %v280_v4, %v276_v8  ;;  %v285_v11 = vadd.f32 %v281_v5, %v277_v9 }
  0x18   : > { %v286_v14 = vmax.f32 %v284_v10, 0.0  ;;  %v287_v15 = vmax.f32 %v285_v11, 0.0 }
  0x1a   : > { %v290_v16 = vadd.f32 %v288_v12, %v286_v14  ;;  %v291_v17 = vadd.f32 %v289_v13, %v287_v15 }
  0x1c   : > { %v292_v18 = vmax.f32 %v290_v16, 0.0  ;;  %v293_v19 = vmax.f32 %v291_v17, 0.0 }
  0x1e   : > { %294 = vst [vmem:[%s267_s12] sm:$0xff] %v292_v18 }
  0x1f   : > { %295 = vst [vmem:[%s267_s12 + $0x8] sm:$0xff] %v293_v19 }
  0x20 PF: > { %s14_s19 = sadd.s32 1, %s506_s19   ;;  %s598_s15 = smov %s498_s17 }
  0x21   : > { %p11_p7 = scmp.ge.s32.totalorder %s14_s19, 18   ;;  %s599_s16 = smov %s502_s18 }
  0x22   : > { %s600_s17 = smov %s603_s20  ;;  %s601_s18 = smov %s607_s21 }
  0x23   :  { %13 = sbr.rel (!%p11_p7) target bundleno = 3 (0x3), region = 69 }

// kernel: residual_block_forward.4
= control target key start
LH: loop header
LB: loop body
LE: loop exit
PB: predicated region body
PF: predicated region fallthrough
CT: control target
= control target key end

     0   :  { %s12481_s18 = smov 0   ;;  %s12483_s19 = smov 0   ;;  %s18228_s0 = inlined_call_operand.vmem [shape: f32[2,10,10,10,32], index: 0, kind: input, shape index: {}, may-alias: {0,1,2}]   ;;  %s18229_s1 = inlined_call_operand.vmem [shape: f32[2,10,10,10,32], index: 1, kind: input, shape index: {}, may-alias: {0,1,2}]   ;;  %s18230_s2 = inlined_call_operand.vmem [shape: f32[2,10,10,10,32], index: 2, kind: input, shape index: {}, may-alias: {0,1,2}]   ;;  %s18231_s3 = inlined_call_operand.vmem [shape: f32[27,32,32], index: 3, kind: input, shape index: {}]   ;;  %s18232_s4 = inlined_call_operand.vmem [shape: f32[2,8,64,32], index: 4, kind: output, shape index: {0}]   ;;  %s18233_s5 = inlined_call_operand.vmem [shape: f32[2,32], index: 5, kind: output, shape index: {1}]  }
   0x1   :  { %s12485_s20 = smov 0   ;;  %s12487_s21 = smov 0  }
   0x2   :  { %s12489_s22 = smov 0  }
   0x3 LB: > { %s25_s23 = sadd.s32 1, %s12440_s20  ;;  %s28_s24 = sadd.s32 1, %s12444_s21  ;;  %s12448_s22 = sphi %s12489_s22, %s16_s22   ;;  %s12444_s21 = sphi %s12487_s21, %s19408_s21   ;;  %s12440_s20 = sphi %s12485_s20, %s19407_s20   ;;  %s12436_s19 = sphi %s12483_s19, %s19406_s19   ;;  %s12432_s18 = sphi %s12481_s18, %s19405_s18  }
   0x4   : > { %p26_p0 = scmp.ge.s32.totalorder %s25_s23, 8  ;;  %p12231_p1 = scmp.ge.s32.totalorder %s12448_s22, 1 }
   0x5   : > { %p245_p2 = scmp.lt.s32.totalorder %s12448_s22, 17 }
   0x6   : > { %s19410_s23 = smov (%p26_p0, %s25_s23), 0  ;;  %s19412_s24 = smov (!%p26_p0, %s28_s24), %s12444_s21 }
   0x7   : > { %p246_p3 = pnand %p12231_p1, %p245_p2  ;;  %p30_p4 = scmp.ge.s32.totalorder %s19412_s24, 2 }
   0x9   : > { %s19414_s24 = smov (%p30_p4, %s19412_s24), 0  ;;  %249 = sbr.rel (%p246_p3) target bundleno = 2800 (0xaf0), region = 36 }
   0xe   : > { %v12241_v0 = vld [vmem:[%s18231_s3 + $0x38] sm:$0xff]  ;;  %v12240_v1 = vld [vmem:[%s18231_s3 + $0x30] sm:$0xff]  ;;  %v12239_v2 = vld [vmem:[%s18231_s3 + $0x28] sm:$0xff]  ;;  %p301_p5 = scmp.lt.s32.totalorder %s12436_s19, 1  ;;  %p303_p6 = scmp.lt.s32.totalorder %s12432_s18, 9  ;;  %vm381_vm0 = vcmask 1046528  }
   0xf   : > { %v12526_v3 = vand.u32 4294901760, %v12241_v0  ;;  %v12528_v4 = vand.u32 4294901760, %v12240_v1  ;;  %v12530_v5 = vand.u32 4294901760, %v12239_v2  ;;  %v12238_v6 = vld [vmem:[%s18231_s3 + $0x20] sm:$0xff]  ;;  %p334_p7 = scmp.lt.s32.totalorder %s12432_s18, 7  ;;  %vm411_vm1 = vcmask 261120  }
  0x10   : > { %v12536_v7 = vand.u32 4294901760, %v12238_v6  ;;  %s12539_s8 = scalar_select %p301_p5, %s12436_s19, 1  ;;  %vm1248_vm2 = vcmask 1045504  }
  0x11   : > { %12344 = vmatpush.msra.mxu2 %v12526_v3  ;;  %v526_v8 = vsub.f32 %v12241_v0, %v12526_v3  ;;  %v532_v9 = vsub.f32 %v12240_v1, %v12528_v4  ;;  %v12545_v10 = vsub.f32 %v12239_v2, %v12530_v5  ;;  %s304_s9 = scalar_select %p303_p6, %s12432_s18, 9  ;;  %441 = vmatpush.msra.mxu0 %v12526_v3 }
  0x12   : > { %v12550_v11 = vsub.f32 %v12238_v6, %v12536_v7  ;;  %s12553_s10 = smul.u32 200, %s12539_s8  ;;  %s12236_s12 = sshll.u32 %s12539_s8, 6 }
  0x13   : > { %v527_v12 = vand.u32 4294901760, %v526_v8  ;;  %12345 = vmatpush.msra.mxu2 %v12528_v4  ;;  %v533_v13 = vand.u32 4294901760, %v532_v9  ;;  %v539_v14 = vand.u32 4294901760, %v12545_v10  ;;  %s12352_s11 = smul.u32 20, %s304_s9  ;;  %443 = vmatpush.msra.mxu0 %v12528_v4  ;;  %s310_s17 = sadd.s32 1, %s12432_s18 }
  0x14   : > { %v545_v15 = vand.u32 4294901760, %v12550_v11  ;;  %s335_s13 = scalar_select %p334_p7, %s12432_s18, 7 }
  0x15   : > { %v528_v16 = vsub.f32 %v526_v8, %v527_v12  ;;  %v534_v17 = vsub.f32 %v532_v9, %v533_v13  ;;  %12346 = vmatpush.msra.mxu2 %v12530_v5  ;;  %v540_v18 = vsub.f32 %v12545_v10, %v539_v14  ;;  %s307_s14 = sadd.s32 %s12553_s10, %s12352_s11  ;;  %445 = vmatpush.msra.mxu0 %v12530_v5  ;;  %p313_p8 = scmp.lt.s32.totalorder %s310_s17, 9 }
  0x16   : > { %v12570_v19 = vsub.f32 %v12550_v11, %v545_v15  ;;  %s12232_s15 = sshll.u32 %s307_s14, 3  ;;  %s12235_s16 = sshll.u32 %s335_s13, 3 }
  0x17   : > { %v529_v20 = vand.u32 4294901760, %v528_v16  ;;  %v535_v21 = vand.u32 4294901760, %v534_v17  ;;  %12347 = vmatpush.msra.mxu2 %v12536_v7  ;;  %s12576_s26 = scalar_lea.vmem %s18228_s0, %s12232_s15  ;;  %s338_s27 = sadd.s32 %s12236_s12, %s12235_s16  ;;  %447 = vmatpush.msra.mxu0 %v12536_v7  ;;  %v541_v25 = vand.u32 4294901760, %v540_v18 }
  0x18   : > { %s12237_s28 = sshll.u32 %s338_s27, 3  ;;  %v12580_v22 = vld [vmem:[%s12576_s26 + $0x40] sm:$0xff]  ;;  %v12583_v23 = vld [vmem:[%s12576_s26 + $0x48] sm:$0x3]  ;;  %v547_v30 = vand.u32 4294901760, %v12570_v19  ;;  %v12602_v32 = vld [vmem:[%s12576_s26 + $0x50] sm:$0xff] }
  0x19   : > { %596 = vmatpush.msrb.mxu2 %v526_v8  ;;  %v12586_v24 = vld [vmem:[%s12576_s26] sm:$0xff]  ;;  %731 = vmatpush.msrb.mxu0 %v527_v12  ;;  %s12591_s6 = scalar_lea.vmem %s18232_s4, %s12237_s28  ;;  %v394_v26 = vrot.slane %v12580_v22, 1  ;;  %v395_v27 = vrot.slane %v12583_v23, 1  ;;  %v12596_v28 = vld [vmem:[%s12576_s26 + $0x8] sm:$0x3]  ;;  %v12608_v34 = vld [vmem:[%s12576_s26 + $0x10] sm:$0xff] }
  0x1a   : > { %12348 = vmatpush.msra.mxu3 %v529_v20  ;;  %530 = vmatpush.msra.mxu1 %v529_v20  ;;  %v382_v29 = vrot.slane %v12586_v24, 1  ;;  %v383_v31 = vrot.slane %v12596_v28, 1  ;;  %v12605_v33 = vld [vmem:[%s12576_s26 + $0x58] sm:$0x3]  ;;  %v397_v36 = vrot.slane %v12602_v32, 1  ;;  %v385_v39 = vrot.slane %v12608_v34, 1 }
  0x1b   : > { %599 = vmatpush.msrb.mxu2 %v532_v9  ;;  %735 = vmatpush.msrb.mxu0 %v533_v13  ;;  %v396_v35 = vsel %vm381_vm0, %v394_v26, %v395_v27  ;;  %v398_v37 = vrot.slane %v12605_v33, 1  ;;  %v12614_v38 = vld [vmem:[%s12576_s26 + $0x18] sm:$0x3]  ;;  %v12618_v40 = vld [vmem:[%s12576_s26 + $0x60] sm:$0xff]  ;;  %v12624_v44 = vld [vmem:[%s12576_s26 + $0x68] sm:$0x3] }
  0x1c   : > { %12349 = vmatpush.msra.mxu3 %v535_v21  ;;  %536 = vmatpush.msra.mxu1 %v535_v21  ;;  %v420_v41 = vsel %vm411_vm1, %v396_v35, 0  ;;  %v384_v42 = vsel %vm381_vm0, %v382_v29, %v383_v31  ;;  %v386_v43 = vrot.slane %v12614_v38, 1  ;;  %v400_v45 = vrot.slane %v12618_v40, 1  ;;  %v12629_v46 = vld [vmem:[%s12576_s26 + $0x20] sm:$0xff]  ;;  %v12637_v51 = vld [vmem:[%s12576_s26 + $0x28] sm:$0x3] }
  0x1d   : > { %602 = vmatpush.msrb.mxu2 %v12545_v10  ;;  %739 = vmatpush.msrb.mxu0 %v539_v14  ;;  %v12631_v47 = vand.u32 4294901760, %v420_v41  ;;  %v412_v48 = vsel %vm411_vm1, %v384_v42, 0  ;;  %v399_v49 = vsel %vm381_vm0, %v397_v36, %v398_v37  ;;  %v401_v50 = vrot.slane %v12624_v44, 1  ;;  %v12645_v56 = vld [vmem:[%s12576_s26 + $0x70] sm:$0xff]  ;;  %v12658_v61 = vld [vmem:[%s12576_s26 + $0x78] sm:$0x3] }
  0x1e   : > { %12350 = vmatpush.msra.mxu3 %v541_v25  ;;  %542 = vmatpush.msra.mxu1 %v541_v25  ;;  %v12639_v52 = vand.u32 4294901760, %v412_v48  ;;  %v422_v53 = vsel %vm411_vm1, %v399_v49, 0  ;;  %v387_v54 = vsel %vm381_vm0, %v385_v39, %v386_v43  ;;  %v388_v55 = vrot.slane %v12629_v46, 1  ;;  %v12703_v19 = vld [vmem:[%s12576_s26 + $0x30] sm:$0xff]  ;;  %v12706_v20 = vld [vmem:[%s12576_s26 + $0x38] sm:$0x3] }
  0x1f   : > { %18722 = vst [vmem:[#allocation2_spill] sm:$0xff] %v12631_v47  ;;  %605 = vmatpush.msrb.mxu2 %v12550_v11  ;;  %743 = vmatpush.msrb.mxu0 %v545_v15  ;;  %v12651_v57 = vsub.f32 %v420_v41, %v12631_v47  ;;  %v12653_v58 = vand.u32 4294901760, %v422_v53  ;;  %v414_v59 = vsel %vm411_vm1, %v387_v54, 0  ;;  %v402_v60 = vsel %vm381_vm0, %v400_v45, %v401_v50  ;;  %v364_v31 = vld [vmem:[%s18231_s3 + $0x18] sm:$0xff]  ;;  %s19416_s17 = smov (!%p313_p8, %s310_s17), 9  ;;  %s321_s27 = sadd.s32 2, %s12432_s18 }
  0x20   : > { %12351 = vmatpush.msra.mxu3 %v547_v30  ;;  %548 = vmatpush.msra.mxu1 %v547_v30  ;;  %v12662_v62 = vsub.f32 %v412_v48, %v12639_v52  ;;  %v12665_v63 = vand.u32 4294901760, %v414_v59  ;;  %v424_v0 = vsel %vm411_vm1, %v402_v60, 0  ;;  %v389_v1 = vrot.slane %v12637_v51, 1  ;;  %s12354_s28 = smul.u32 20, %s19416_s17  ;;  %p324_p9 = scmp.lt.s32.totalorder %s321_s27, 9 }
  0x21   : > { %18723 = vst [vmem:[#allocation3_spill] sm:$0xff] %v12651_v57  ;;  %566 = vmatmul.f32.vlgmr.msra.gmra.mxu3 %v12631_v47  ;;  %550 = vmatmul.f32.vlgmr.msra.gmra.mxu1 %v12639_v52  ;;  %v12670_v2 = vand.u32 4294901760, %v12651_v57  ;;  %v12674_v6 = vsub.f32 %v422_v53, %v12653_v58  ;;  %v403_v8 = vrot.slane %v12645_v56, 1  ;;  %v404_v12 = vrot.slane %v12658_v61, 1  ;;  %p12012_p10 = scmp.eq.s32.totalorder %s12436_s19, 0  ;;  %p12013_p11 = scmp.eq.s32.totalorder %s12432_s18, 0 }
  0x22   : > { %18724 = vst [vmem:[#allocation4_spill] sm:$0xff] %v12653_v58  ;;  %660 = vmatpush.msrb.mxu3 %v12526_v3  ;;  %790 = vmatpush.msrb.mxu1 %v12526_v3  ;;  %v450_v9 = vand.u32 4294901760, %v12662_v62  ;;  %v12680_v10 = vsub.f32 %v414_v59, %v12665_v63  ;;  %v390_v11 = vsel %vm381_vm0, %v388_v55, %v389_v1  ;;  %v12690_v3 = vand.u32 4294901760, %v424_v0  ;;  %s317_s29 = sadd.s32 %s12354_s28, %s12553_s10  ;;  %s19418_s27 = smov (!%p324_p9, %s321_s27), 9 }
  0x23   : > { %18725 = vst [vmem:[#allocation5_spill] sm:$0xff] %v12665_v63  ;;  %v483_v13 = vsub.f32 %v12651_v57, %v12670_v2  ;;  %v12687_v14 = vand.u32 4294901760, %v12674_v6  ;;  %v416_v15 = vsel %vm411_vm1, %v390_v11, 0  ;;  %v391_v29 = vrot.slane %v12703_v19, 1  ;;  %s12233_s30 = sshll.u32 %s317_s29, 3  ;;  %s12355_s29 = smul.u32 20, %s19418_s27 }
  0x24   : > { %18726 = vst [vmem:[#allocation6_spill] sm:$0xff] %v12670_v2  ;;  %662 = vmatpush.msrb.mxu3 %v12528_v4  ;;  %792 = vmatpush.msrb.mxu1 %v12528_v4  ;;  %v451_v16 = vsub.f32 %v12662_v62, %v450_v9  ;;  %v12698_v17 = vand.u32 4294901760, %v12680_v10  ;;  %v12700_v18 = vand.u32 4294901760, %v416_v15  ;;  %v405_v4 = vsel %vm381_vm0, %v403_v8, %v404_v12  ;;  %s14334_s9 = scalar_lea.vmem %s18229_s1, %s12233_s30  ;;  %p18091_p12 = pnand %p12013_p11, %p12012_p10 }
  0x25   : > { %18727 = vst [vmem:[#allocation7_spill] sm:$0xff] %v12674_v6  ;;  %v12708_v21 = vand.u32 4294901760, %v483_v13  ;;  %v491_v26 = vsub.f32 %v12674_v6, %v12687_v14  ;;  %v12717_v27 = vsub.f32 %v424_v0, %v12690_v3  ;;  %v392_v30 = vrot.slane %v12706_v20, 1  ;;  %s328_s30 = sadd.s32 %s12355_s29, %s12553_s10 }
  0x26   : > { %18728 = vst [vmem:[#allocation8_spill] sm:$0xff] %v12680_v10  ;;  %664 = vmatpush.msrb.mxu3 %v12530_v5  ;;  %794 = vmatpush.msrb.mxu1 %v12530_v5  ;;  %v452_v25 = vand.u32 4294901760, %v451_v16  ;;  %v459_v5 = vsub.f32 %v12680_v10, %v12698_v17  ;;  %v12729_v35 = vsub.f32 %v416_v15, %v12700_v18  ;;  %v426_v36 = vsel %vm411_vm1, %v405_v4, 0  ;;  %v363_v16 = vld [vmem:[%s18231_s3 + $0x10] sm:$0xff]  ;;  %s12234_s10 = sshll.u32 %s328_s30, 3 }
  0x27   : > { %18729 = vst [vmem:[#allocation9_spill] sm:$0xff] %v12687_v14  ;;  %485 = vmatmul.f32.vlgmr.msra.gmra.mxu2 %v12708_v21  ;;  %v12732_v37 = vand.u32 4294901760, %v364_v31  ;;  %v393_v39 = vsel %vm381_vm0, %v391_v29, %v392_v30  ;;  %v12742_v43 = vand.u32 4294901760, %v491_v26  ;;  %v12745_v45 = vand.u32 4294901760, %v12717_v27  ;;  %s16195_s11 = scalar_lea.vmem %s18230_s2, %s12234_s10 }
  0x28   : > { %18730 = vst [vmem:[#allocation10_spill] sm:$0xff] %v12690_v3  ;;  %666 = vmatpush.msrb.mxu3 %v12536_v7  ;;  %453 = vmatmul.f32.vlgmr.msra.gmra.mxu0 %v452_v25  ;;  %v418_v41 = vsel %vm411_vm1, %v393_v39, 0  ;;  %v12747_v48 = vand.u32 4294901760, %v426_v36  ;;  %v12750_v49 = vand.u32 4294901760, %v459_v5  ;;  %v12753_v50 = vand.u32 4294901760, %v12729_v35  ;;  %v362_v39 = vld [vmem:[%s18231_s3 + $0x8] sm:$0xff] }
  0x29   : > { %18731 = vst [vmem:[#allocation11_spill] sm:$0xff] %v12698_v17  ;;  %570 = vmatmul.f32.gmra.mxu3 %v12653_v58  ;;  %554 = vmatmul.f32.gmra.mxu1 %v12665_v63  ;;  %v12739_v42 = vsub.f32 %v364_v31, %v12732_v37  ;;  %v12755_v53 = vand.u32 4294901760, %v418_v41  ;;  %v499_v55 = vsub.f32 %v12717_v27, %v12745_v45  ;;  %v860_v25 = vand.u32 4294901760, %v363_v16 }
  0x2a   : > { %18732 = vst [vmem:[#allocation12_spill] sm:$0xff] %v12700_v18  ;;  %859 = vmatpush.msra.mxu2 %v12732_v37  ;;  %796 = vmatpush.msrb.mxu1 %v12536_v7  ;;  %v12766_v59 = vsub.f32 %v426_v36, %v12747_v48  ;;  %v467_v60 = vsub.f32 %v12729_v35, %v12753_v50 }
  0x2b   : > { %18733 = vst [vmem:[#allocation13_spill] sm:$0xff] %v12708_v21  ;;  %v945_v54 = vand.u32 4294901760, %v12739_v42  ;;  %1014 = vmatpush.msra.mxu0 %v12739_v42  ;;  %v12773_v0 = vsub.f32 %v418_v41, %v12755_v53  ;;  %v12776_v8 = vand.u32 4294901760, %v499_v55  ;;  %v950_v26 = vsub.f32 %v363_v16, %v860_v25 }
  0x2c   : > { %18734 = vst [vmem:[#allocation14_spill] sm:$0xff] %v12717_v27  ;;  %1078 = vmatpush.msra.mxu1 %v12732_v37  ;;  %v12779_v11 = vand.u32 4294901760, %v12766_v59  ;;  %v12781_v12 = vand.u32 4294901760, %v467_v60  ;;  %861 = vmatpush.msra.mxu2 %v860_v25  ;;  %v862_v41 = vand.u32 4294901760, %v362_v39 }
  0x2d   : > { %18735 = vst [vmem:[#allocation15_spill] sm:$0xff] %v12729_v35  ;;  %v946_v7 = vsub.f32 %v12739_v42, %v945_v54  ;;  %v12784_v13 = vand.u32 4294901760, %v12773_v0  ;;  %v951_v31 = vand.u32 4294901760, %v950_v26  ;;  %1017 = vmatpush.msra.mxu0 %v950_v26  ;;  %v12245_v42 = vld [vmem:[%s18231_s3 + $0x58] sm:$0xff] }
  0x2e   : > { %18736 = vst [vmem:[#allocation16_spill] sm:$0xff] %v12742_v43  ;;  %v507_v15 = vsub.f32 %v12766_v59, %v12779_v11  ;;  %1080 = vmatpush.msra.mxu1 %v860_v25  ;;  %863 = vmatpush.msra.mxu2 %v862_v41 }
  0x2f   : > { %18737 = vst [vmem:[#allocation17_spill] sm:$0xff] %v12745_v45  ;;  %493 = vmatmul.f32.gmra.mxu2 %v12742_v43  ;;  %v947_v1 = vand.u32 4294901760, %v946_v7  ;;  %v475_v4 = vsub.f32 %v12773_v0, %v12784_v13  ;;  %v952_v5 = vsub.f32 %v950_v26, %v951_v31  ;;  %v956_v7 = vsub.f32 %v362_v39, %v862_v41 }
  0x30   : > { %18738 = vst [vmem:[#allocation18_spill] sm:$0xff] %v12747_v48  ;;  %461 = vmatmul.f32.gmra.mxu0 %v12750_v49  ;;  %v12797_v29 = vand.u32 4294901760, %v507_v15  ;;  %1082 = vmatpush.msra.mxu1 %v862_v41  ;;  %v832_v39 = vsel %vm411_vm1, %v12608_v34, 0 }
  0x31   : > { %18739 = vst [vmem:[#allocation19_spill] sm:$0xff] %v12750_v49  ;;  %574 = vmatmul.f32.gmra.mxu3 %v12690_v3  ;;  %558 = vmatmul.f32.gmra.mxu1 %v12700_v18  ;;  %v12799_v30 = vand.u32 4294901760, %v475_v4  ;;  %v953_v36 = vand.u32 4294901760, %v952_v5 }
  0x32   : > { %18740 = vst [vmem:[#allocation20_spill] sm:$0xff] %v12753_v50  ;;  %948 = vmatpush.msra.mxu3 %v947_v1  ;;  %1020 = vmatpush.msra.mxu0 %v956_v7 }
  0x33   : > { %18741 = vst [vmem:[#allocation21_spill] sm:$0xff] %v12755_v53 }
  0x34   : > { %18742 = vst [vmem:[#allocation22_spill] sm:$0xff] %v12766_v59  ;;  %954 = vmatpush.msra.mxu3 %v953_v36 }
  0x35   : > { %18743 = vst [vmem:[#allocation23_spill] sm:$0xff] %v12773_v0 }
  0x36   : > { %18744 = vst [vmem:[#allocation24_spill] sm:$0xff] %v12776_v8 }
  0x37   : > { %18745 = vst [vmem:[#allocation25_spill] sm:$0xff] %v12779_v11  ;;  %501 = vmatmul.f32.gmra.mxu2 %v12776_v8 }
  0x38   : > { %18746 = vst [vmem:[#allocation26_spill] sm:$0xff] %v12781_v12  ;;  %469 = vmatmul.f32.gmra.mxu0 %v12781_v12 }
  0x39   : > { %18747 = vst [vmem:[#allocation27_spill] sm:$0xff] %v12784_v13  ;;  %578 = vmatmul.f32.gmra.mxu3 %v12747_v48  ;;  %562 = vmatmul.f32.gmra.mxu1 %v12755_v53 }
  0x3a   : > { %18748 = vst [vmem:[#allocation28_spill] sm:$0xff] %v12797_v29 }
  0x3b   : > { %18749 = vst [vmem:[#allocation29_spill] sm:$0xff] %v12799_v30 }
  0x3f   : > { %509 = vmatmul.f32.gmra.mxu2 %v12797_v29 }
  0x40   : > { %477 = vmatmul.f32.gmra.mxu0 %v12799_v30 }
  0x41   : > { %670 = vmatmul.f32.vlgmr.msrb.gmra.mxu3 %v450_v9  ;;  %798 = vmatmul.f32.vlgmr.msrb.gmra.mxu1 %v12639_v52  ;;  %v957_v9 = vand.u32 4294901760, %v956_v7 }
  0x43   : > { %v958_v55 = vsub.f32 %v956_v7, %v957_v9 }
  0x47   : > { %608 = vmatmul.f32.vlgmr.msrb.gmra.mxu2 %v12662_v62  ;;  %v959_v62 = vand.u32 4294901760, %v958_v55 }
  0x48   : > { %745 = vmatmul.f32.vlgmr.msrb.gmra.mxu0 %v12639_v52  ;;  %v361_v52 = vld [vmem:[%s18231_s3] sm:$0xff] }
  0x49   : > { %676 = vmatmul.f32.gmra.mxu3 %v12698_v17  ;;  %802 = vmatmul.f32.gmra.mxu1 %v12665_v63  ;;  %v864_v60 = vand.u32 4294901760, %v361_v52 }
  0x4a   : > { %960 = vmatpush.msra.mxu3 %v959_v62 }
  0x4b   : > { %865 = vmatpush.msra.mxu2 %v864_v60  ;;  %v962_v1 = vsub.f32 %v361_v52, %v864_v60  ;;  %1084 = vmatpush.msra.mxu1 %v864_v60  ;;  %v12244_v52 = vld [vmem:[%s18231_s3 + $0x50] sm:$0xff] }
  0x4d   : > { %1149 = vmatpush.msrb.mxu2 %v945_v54  ;;  %v963_v15 = vand.u32 4294901760, %v962_v1  ;;  %1023 = vmatpush.msra.mxu0 %v962_v1  ;;  %v12843_v54 = vand.u32 4294901760, %v12245_v42 }
  0x4f   : > { %613 = vmatmul.f32.gmra.mxu2 %v12680_v10  ;;  %v964_v16 = vsub.f32 %v962_v1, %v963_v15  ;;  %1307 = vmatpush.msrb.mxu0 %v12843_v54  ;;  %v12876_v1 = vand.u32 4294901760, %v12244_v52 }
  0x50   : > { %749 = vmatmul.f32.gmra.mxu0 %v12665_v63  ;;  %1153 = vmatpush.msrb.mxu2 %v951_v31 }
  0x51   : > { %682 = vmatmul.f32.gmra.mxu3 %v12753_v50  ;;  %806 = vmatmul.f32.gmra.mxu1 %v12700_v18  ;;  %v965_v4 = vand.u32 4294901760, %v964_v16 }
  0x52   : > { %1157 = vmatpush.msrb.mxu2 %v957_v9  ;;  %v12863_v9 = vand.u32 4294901760, %v832_v39  ;;  %1309 = vmatpush.msrb.mxu0 %v12876_v1 }
  0x53   : > { %966 = vmatpush.msra.mxu3 %v965_v4 }
  0x54   : > { %1161 = vmatpush.msrb.mxu2 %v963_v15  ;;  %v12867_v62 = vsub.f32 %v832_v39, %v12863_v9  ;;  %v12881_v15 = vsub.f32 %v12244_v52, %v12876_v1 }
  0x55   : > { %1208 = vmatpush.msrb.mxu3 %v12732_v37  ;;  %v830_v37 = vsel %vm411_vm1, %v12586_v24, 0 }
  0x56   : > { %v12850_v26 = vand.u32 4294901760, %v830_v37  ;;  %v12884_v4 = vand.u32 4294901760, %v12867_v62 }
  0x57   : > { %618 = vmatmul.f32.gmra.mxu2 %v12729_v35  ;;  %1210 = vmatpush.msrb.mxu3 %v860_v25  ;;  %v12848_v25 = vsub.f32 %v12245_v42, %v12843_v54 }
  0x58   : > { %753 = vmatmul.f32.gmra.mxu0 %v12700_v18  ;;  %v867_v36 = vsub.f32 %v830_v37, %v12850_v26  ;;  %v18234_v37 = vand.u32 4294901760, %v12881_v15  ;;  %v877_v39 = vsub.f32 %v12867_v62, %v12884_v4 }
  0x59   : > { %688 = vmatmul.f32.gmra.mxu3 %v12784_v13  ;;  %810 = vmatmul.f32.gmra.mxu1 %v12755_v53  ;;  %v18235_v31 = vand.u32 4294901760, %v12848_v25  ;;  %v18764_v29 = vand.u32 4294901760, %v12848_v25 }
  0x5a   : > { %1212 = vmatpush.msrb.mxu3 %v862_v41  ;;  %v868_v7 = vand.u32 4294901760, %v867_v36  ;;  %v12903_v52 = vand.u32 4294901760, %v877_v39  ;;  %v838_v39 = vsel %vm411_vm1, %v12580_v22, 0 }
  0x5b   : > { %v1394_v5 = vsub.f32 %v12848_v25, %v18235_v31 }
  0x5c   : > { %1214 = vmatpush.msrb.mxu3 %v864_v60  ;;  %v869_v55 = vsub.f32 %v867_v36, %v868_v7  ;;  %v834_v60 = vsel %vm411_vm1, %v12629_v46, 0 }
  0x5d   : > { %v1395_v41 = vand.u32 4294901760, %v1394_v5  ;;  %v12886_v42 = vand.u32 4294901760, %v834_v60  ;;  %v1400_v5 = vsub.f32 %v12881_v15, %v18234_v37 }
  0x5e   : > { %v870_v16 = vand.u32 4294901760, %v869_v55 }
  0x5f   : > { %623 = vmatmul.f32.gmra.mxu2 %v12773_v0  ;;  %1396 = vmatpush.msrb.mxu1 %v1395_v41  ;;  %18750 = vst [vmem:[#allocation30_spill] sm:$0xff] %v12886_v42  ;;  %v12896_v41 = vsub.f32 %v834_v60, %v12886_v42  ;;  %v1401_v55 = vand.u32 4294901760, %v1400_v5  ;;  %v12243_v5 = vld [vmem:[%s18231_s3 + $0x48] sm:$0xff] }
  0x60   : > { %757 = vmatmul.f32.gmra.mxu0 %v12755_v53 }
  0x61   : > { %694 = vmatmul.f32.gmra.mxu3 %v12670_v2  ;;  %814 = vmatmul.f32.gmra.mxu1 %v12631_v47  ;;  %18751 = vst [vmem:[#allocation31_spill] sm:$0xff] %v12896_v41 }
  0x62   : > { %1402 = vmatpush.msrb.mxu1 %v1401_v55  ;;  %v12924_v55 = vand.u32 4294901760, %v12243_v5 }
  0x64   : > { %1311 = vmatpush.msrb.mxu0 %v12924_v55 }
  0x67   : > { %628 = vmatmul.f32.gmra.mxu2 %v12651_v57 }
  0x68   : > { %761 = vmatmul.f32.gmra.mxu0 %v12631_v47 }
  0x69   : > { %700 = vmatmul.f32.gmra.mxu3 %v12687_v14  ;;  %818 = vmatmul.f32.gmra.mxu1 %v12653_v58 }
  0x6f   : > { %633 = vmatmul.f32.gmra.mxu2 %v12674_v6 }
  0x70   : > { %765 = vmatmul.f32.gmra.mxu0 %v12653_v58 }
  0x71   : > { %706 = vmatmul.f32.gmra.mxu3 %v12745_v45  ;;  %822 = vmatmul.f32.gmra.mxu1 %v12690_v3 }
  0x77   : > { %638 = vmatmul.f32.gmra.mxu2 %v12717_v27 }
  0x78   : > { %769 = vmatmul.f32.gmra.mxu0 %v12690_v3  ;;  %v18765_v3 = vand.u32 4294901760, %v12881_v15 }
  0x79   : > { %712 = vmatmul.f32.gmra.mxu3 %v12779_v11  ;;  %826 = vmatmul.f32.gmra.mxu1 %v12747_v48  ;;  %v1404_v11 = vsub.f32 %v12243_v5, %v12924_v55 }
  0x7b   : > { %v1405_v27 = vand.u32 4294901760, %v1404_v11 }
  0x7d   : > { %v1406_v14 = vsub.f32 %v1404_v11, %v1405_v27 }
  0x7f   : > { %643 = vmatmul.f32.gmra.mxu2 %v12766_v59  ;;  %v12934_v59 = vand.u32 4294901760, %v838_v39  ;;  %v1407_v5 = vand.u32 4294901760, %v1406_v14  ;;  %v12242_v14 = vld [vmem:[%s18231_s3 + $0x40] sm:$0xff] }
  0x80   : > { %773 = vmatmul.f32.gmra.mxu0 %v12747_v48 }
  0x81   : > { %968 = vmatmul.f32.vlgmr.msra.gmra.mxu3 %v12850_v26  ;;  %1088 = vmatmul.f32.vlgmr.msra.gmra.mxu1 %v868_v7  ;;  %v836_v7 = vsel %vm411_vm1, %v12703_v19, 0  ;;  %18756 = vst [vmem:[#allocation36_spill] sm:$0xff] %v12934_v59  ;;  %v12941_v6 = vsub.f32 %v838_v39, %v12934_v59 }
  0x82   : > { %1526 = vmatpush.msra.mxu3 %v12843_v54  ;;  %v12908_v37 = vand.u32 4294901760, %v836_v7  ;;  %1408 = vmatpush.msrb.mxu1 %v1407_v5  ;;  %v1312_v5 = vand.u32 4294901760, %v12242_v14 }
  0x83   : > { %18757 = vst [vmem:[#allocation37_spill] sm:$0xff] %v12941_v6  ;;  %v12953_v0 = vand.u32 4294901760, %v12941_v6 }
  0x84   : > { %1528 = vmatpush.msra.mxu3 %v12876_v1  ;;  %v12915_v60 = vsub.f32 %v836_v7, %v12908_v37  ;;  %1313 = vmatpush.msrb.mxu0 %v1312_v5  ;;  %v1410_v17 = vsub.f32 %v12242_v14, %v1312_v5 }
  0x85   : > { %18760 = vst [vmem:[#allocation40_spill] sm:$0xff] %v12953_v0 }
  0x86   : > { %18753 = vst [vmem:[#allocation33_spill] sm:$0xff] %v12915_v60  ;;  %1530 = vmatpush.msra.mxu3 %v12924_v55  ;;  %v12932_v31 = vand.u32 4294901760, %v12915_v60  ;;  %v1411_v8 = vand.u32 4294901760, %v1410_v17 }
  0x87   : > { %871 = vmatmul.f32.vlgmr.msra.gmra.mxu2 %v870_v16  ;;  %v12906_v16 = vand.u32 4294901760, %v12896_v41 }
  0x88   : > { %1026 = vmatmul.f32.vlgmr.msra.gmra.mxu0 %v867_v36  ;;  %1462 = vmatpush.msra.mxu2 %v12848_v25  ;;  %18755 = vst [vmem:[#allocation35_spill] sm:$0xff] %v12932_v31  ;;  %v893_v45 = vsub.f32 %v12915_v60, %v12932_v31  ;;  %v1412_v14 = vsub.f32 %v1410_v17, %v1411_v8  ;;  %v1249_v25 = vrot.slane %v12586_v24, 2 }
  0x89   : > { %972 = vmatmul.f32.gmra.mxu3 %v12863_v9  ;;  %1094 = vmatmul.f32.gmra.mxu1 %v12884_v4  ;;  %18752 = vst [vmem:[#allocation32_spill] sm:$0xff] %v12906_v16  ;;  %v885_v36 = vsub.f32 %v12896_v41, %v12906_v16 }
  0x8a   : > { %1465 = vmatpush.msra.mxu2 %v12881_v15  ;;  %v12950_v2 = vand.u32 4294901760, %v893_v45  ;;  %v842_v45 = vsel %vm411_vm1, %v12618_v40, 0  ;;  %1532 = vmatpush.msra.mxu3 %v1312_v5  ;;  %v1250_v15 = vrot.slane %v12596_v28, 2 }
  0x8b   : > { %v12929_v7 = vand.u32 4294901760, %v885_v36  ;;  %v840_v36 = vsel %vm411_vm1, %v12602_v32, 0  ;;  %v12976_v10 = vand.u32 4294901760, %v842_v45  ;;  %1597 = vmatpush.msra.mxu0 %v18764_v29  ;;  %v1413_v29 = vand.u32 4294901760, %v1412_v14 }
  0x8c   : > { %1468 = vmatpush.msra.mxu2 %v1404_v11  ;;  %v12948_v57 = vand.u32 4294901760, %v840_v36  ;;  %18759 = vst [vmem:[#allocation39_spill] sm:$0xff] %v12950_v2  ;;  %v901_v11 = vsub.f32 %v12941_v6, %v12953_v0  ;;  %v1251_v28 = vsel %vm1248_vm2, %v1249_v25, %v1250_v15  ;;  %v1252_v14 = vrot.slane %v12608_v34, 2 }
  0x8d   : > { %18754 = vst [vmem:[#allocation34_spill] sm:$0xff] %v12929_v7  ;;  %1601 = vmatpush.msra.mxu0 %v18765_v3  ;;  %v844_v3 = vsel %vm411_vm1, %v12645_v56, 0  ;;  %1414 = vmatpush.msrb.mxu1 %v1413_v29 }
  0x8e   : > { %18758 = vst [vmem:[#allocation38_spill] sm:$0xff] %v12948_v57  ;;  %v12958_v13 = vsub.f32 %v840_v36, %v12948_v57  ;;  %v12974_v35 = vand.u32 4294901760, %v901_v11  ;;  %1471 = vmatpush.msra.mxu2 %v1410_v17  ;;  %v12990_v11 = vsub.f32 %v842_v45, %v12976_v10  ;;  %v13006_v30 = vand.u32 4294901760, %v844_v3 }
  0x8f   : > { %879 = vmatmul.f32.gmra.mxu2 %v12903_v52  ;;  %1605 = vmatpush.msra.mxu0 %v1405_v27 }
  0x90   : > { %1031 = vmatmul.f32.gmra.mxu0 %v12867_v62  ;;  %18761 = vst [vmem:[#allocation41_spill] sm:$0xff] %v12958_v13  ;;  %v12972_v36 = vand.u32 4294901760, %v12958_v13  ;;  %v13004_v47 = vand.u32 4294901760, %v12990_v11  ;;  %1656 = vmatpush.msra.mxu1 %v12843_v54 }
  0x91   : > { %976 = vmatmul.f32.gmra.mxu3 %v12886_v42  ;;  %1100 = vmatmul.f32.gmra.mxu1 %v12906_v16  ;;  %18763 = vst [vmem:[#allocation43_spill] sm:$0xff] %v12974_v35 }
  0x92   : > { %18762 = vst [vmem:[#allocation42_spill] sm:$0xff] %v12972_v36  ;;  %v909_v43 = vsub.f32 %v12958_v13, %v12972_v36  ;;  %1609 = vmatpush.msra.mxu0 %v1411_v8  ;;  %1658 = vmatpush.msra.mxu1 %v12876_v1  ;;  %v1253_v1 = vrot.slane %v12614_v38, 2 }
  0x93   : > { %18766 = vst [vmem:[#allocation44_spill] sm:$0xff] %v12990_v11 }
  0x94   : > { %v12999_v45 = vand.u32 4294901760, %v909_v43  ;;  %18768 = vst [vmem:[#allocation46_spill] sm:$0xff] %v13004_v47  ;;  %v13019_v43 = vsub.f32 %v844_v3, %v13006_v30  ;;  %1660 = vmatpush.msra.mxu1 %v12924_v55  ;;  %v1254_v34 = vsel %vm1248_vm2, %v1252_v14, %v1253_v1 }
  0x95   : > { %18769 = vst [vmem:[#allocation47_spill] sm:$0xff] %v13006_v30 }
  0x96   : > { %18767 = vst [vmem:[#allocation45_spill] sm:$0xff] %v12999_v45  ;;  %v13033_v15 = vand.u32 4294901760, %v13019_v43  ;;  %1662 = vmatpush.msra.mxu1 %v1312_v5  ;;  %v1280_v5 = vsel %vm411_vm1, %v1254_v34, 0 }
  0x97   : > { %887 = vmatmul.f32.gmra.mxu2 %v12929_v7  ;;  %18770 = vst [vmem:[#allocation48_spill] sm:$0xff] %v13019_v43  ;;  %v13059_v63 = vand.u32 4294901760, %v1280_v5 }
  0x98   : > { %1036 = vmatmul.f32.gmra.mxu0 %v12896_v41  ;;  %18772 = vst [vmem:[#allocation50_spill] sm:$0xff] %v13033_v15  ;;  %v925_v38 = vsub.f32 %v13019_v43, %v13033_v15 }
  0x99   : > { %980 = vmatmul.f32.gmra.mxu3 %v12908_v37  ;;  %1106 = vmatmul.f32.gmra.mxu1 %v12932_v31 }
  0x9a   : > { %v13056_v1 = vand.u32 4294901760, %v925_v38  ;;  %v1258_v38 = vrot.slane %v12703_v19, 2 }
  0x9c   : > { %18773 = vst [vmem:[#allocation51_spill] sm:$0xff] %v13056_v1 }
  0x9e   : > { %v12955_v39 = vpop.f32.mrf.mxu1 }
  0x9f   : > { %895 = vmatmul.f32.gmra.mxu2 %v12950_v2 }
  0xa0   : > { %1041 = vmatmul.f32.gmra.mxu0 %v12915_v60 }
  0xa1   : > { %984 = vmatmul.f32.gmra.mxu3 %v12934_v59  ;;  %1112 = vmatmul.f32.gmra.mxu1 %v12953_v0 }
  0xa4   : > { %v567_v50 = vpop.f32.mrf.mxu3 }
  0xa5   : > { %v12980_v48 = vpop.f32.mrf.mxu0 }
  0xa6   : > { %v12986_v58 = vpop.f32.mrf.mxu1 }
  0xa7   : > { %903 = vmatmul.f32.gmra.mxu2 %v12974_v35 }
  0xa8   : > { %1046 = vmatmul.f32.gmra.mxu0 %v12941_v6 }
  0xa9   : > { %988 = vmatmul.f32.gmra.mxu3 %v12948_v57  ;;  %1118 = vmatmul.f32.gmra.mxu1 %v12972_v36 }
  0xaa   : > { %v486_v21 = vpop.f32.mrf.mxu2 }
  0xab   : > { %v13001_v17 = vadd.f32 %v567_v50, %v486_v21  ;;  %v917_v21 = vsub.f32 %v12990_v11, %v13004_v47  ;;  %v1278_v50 = vsel %vm411_vm1, %v1251_v28, 0 }
  0xac   : > { %v571_v27 = vpop.f32.mrf.mxu3  ;;  %v13035_v53 = vand.u32 4294901760, %v1278_v50 }
  0xad   : > { %v13009_v8 = vpop.f32.mrf.mxu0  ;;  %v13030_v25 = vand.u32 4294901760, %v917_v21  ;;  %v1255_v21 = vrot.slane %v12629_v46, 2 }
  0xae   : > { %v13011_v24 = vpop.f32.mrf.mxu1  ;;  %v13048_v55 = vsub.f32 %v1278_v50, %v13035_v53 }
  0xaf   : > { %911 = vmatmul.f32.gmra.mxu2 %v12999_v45  ;;  %18771 = vst [vmem:[#allocation49_spill] sm:$0xff] %v13030_v25 }
  0xb0   : > { %1051 = vmatmul.f32.gmra.mxu0 %v12958_v13  ;;  %v18297_v49 = vand.u32 4294901760, %v13048_v55 }
  0xb1   : > { %992 = vmatmul.f32.gmra.mxu3 %v12976_v10  ;;  %1124 = vmatmul.f32.gmra.mxu1 %v13004_v47 }
  0xb2   : > { %v494_v54 = vpop.f32.mrf.mxu2  ;;  %v1317_v46 = vsub.f32 %v13048_v55, %v18297_v49 }
  0xb3   : > { %v13028_v29 = vadd.f32 %v571_v27, %v494_v54  ;;  %v1256_v54 = vrot.slane %v12637_v51, 2  ;;  %v13071_v51 = vsub.f32 %v1280_v5, %v13059_v63 }
  0xb4   : > { %v575_v3 = vpop.f32.mrf.mxu3 }
  0xb5   : > { %v13037_v12 = vpop.f32.mrf.mxu0 }
  0xb6   : > { %v13039_v28 = vpop.f32.mrf.mxu1 }
  0xb7   : > { %919 = vmatmul.f32.gmra.mxu2 %v13030_v25 }
  0xb8   : > { %1056 = vmatmul.f32.gmra.mxu0 %v12990_v11 }
  0xb9   : > { %996 = vmatmul.f32.gmra.mxu3 %v13006_v30  ;;  %1130 = vmatmul.f32.gmra.mxu1 %v13033_v15  ;;  %v1257_v15 = vsel %vm1248_vm2, %v1255_v21, %v1256_v54 }
  0xba   : > { %v502_v27 = vpop.f32.mrf.mxu2 }
  0xbb   : > { %v13054_v14 = vadd.f32 %v575_v3, %v502_v27  ;;  %v1282_v3 = vsel %vm411_vm1, %v1257_v15, 0  ;;  %v1259_v27 = vrot.slane %v12706_v20, 2  ;;  %v552_v20 = vadd.f32 %v12955_v39, %v12980_v48 }
  0xbc   : > { %v579_v18 = vpop.f32.mrf.mxu3  ;;  %v13082_v49 = vand.u32 4294901760, %v1282_v3 }
  0xbd   : > { %v13061_v50 = vpop.f32.mrf.mxu0  ;;  %v1260_v47 = vsel %vm1248_vm2, %v1258_v38, %v1259_v27 }
  0xbe   : > { %v799_v11 = vpop.f32.mrf.mxu1  ;;  %v13090_v19 = vsub.f32 %v1282_v3, %v13082_v49  ;;  %v1284_v15 = vsel %vm411_vm1, %v1260_v47, 0 }
  0xbf   : > { %927 = vmatmul.f32.gmra.mxu2 %v13056_v1  ;;  %v13080_v1 = vand.u32 4294901760, %v13071_v51  ;;  %v13103_v3 = vand.u32 4294901760, %v1284_v15 }
  0xc0   : > { %1061 = vmatmul.f32.gmra.mxu0 %v13019_v43  ;;  %v1318_v43 = vand.u32 4294901760, %v1317_v46  ;;  %18774 = vst [vmem:[#allocation52_spill] sm:$0xff] %v13090_v19  ;;  %v13101_v13 = vand.u32 4294901760, %v13090_v19 }
  0xc1   : > { %1216 = vmatmul.f32.vlgmr.msrb.gmra.mxu3 %v12850_v26  ;;  %1416 = vmatmul.f32.vlgmr.msrb.gmra.mxu1 %v13035_v53 }
  0xc2   : > { %v510_v34 = vpop.f32.mrf.mxu2  ;;  %18776 = vst [vmem:[#allocation54_spill] sm:$0xff] %v13101_v13 }
  0xc3   : > { %v13077_v21 = vadd.f32 %v579_v18, %v510_v34  ;;  %v1325_v18 = vsub.f32 %v13071_v51, %v13080_v1  ;;  %v1261_v34 = vrot.slane %v12580_v22, 2  ;;  %v1333_v22 = vsub.f32 %v13090_v19, %v13101_v13 }
  0xc4   : > { %v671_v54 = vpop.f32.mrf.mxu3 }
  0xc5   : > { %v746_v5 = vpop.f32.mrf.mxu0  ;;  %v13098_v27 = vand.u32 4294901760, %v1325_v18 }
  0xc6   : > { %v803_v25 = vpop.f32.mrf.mxu1 }
  0xc7   : > { %1163 = vmatmul.f32.vlgmr.msrb.gmra.mxu2 %v12850_v26  ;;  %v1262_v26 = vrot.slane %v12583_v23, 2  ;;  %18775 = vst [vmem:[#allocation53_spill] sm:$0xff] %v13098_v27  ;;  %v13112_v23 = vsub.f32 %v1284_v15, %v13103_v3 }
  0xc8   : > { %1319 = vmatmul.f32.vlgmr.msrb.gmra.mxu0 %v1318_v43 }
  0xc9   : > { %1220 = vmatmul.f32.gmra.mxu3 %v12863_v9  ;;  %1420 = vmatmul.f32.gmra.mxu1 %v13059_v63  ;;  %v1263_v36 = vsel %vm1248_vm2, %v1261_v34, %v1262_v26  ;;  %18777 = vst [vmem:[#allocation55_spill] sm:$0xff] %v13112_v23  ;;  %v13125_v15 = vand.u32 4294901760, %v13112_v23 }
  0xca   : > { %v609_v46 = vpop.f32.mrf.mxu2 }
  0xcb   : > { %v610_v38 = vadd.f32 %v609_v46, %v552_v20  ;;  %v1264_v20 = vrot.slane %v12602_v32, 2  ;;  %v1265_v46 = vrot.slane %v12605_v33, 2  ;;  %18779 = vst [vmem:[#allocation57_spill] sm:$0xff] %v13125_v15  ;;  %v1341_v32 = vsub.f32 %v13112_v23, %v13125_v15 }
  0xcc   : > { %v677_v43 = vpop.f32.mrf.mxu3 }
  0xcd   : > { %v672_v45 = vadd.f32 %v671_v54, %v610_v38  ;;  %v750_v48 = vpop.f32.mrf.mxu0  ;;  %v556_v54 = vadd.f32 %v12986_v58, %v13009_v8  ;;  %v13122_v38 = vand.u32 4294901760, %v1333_v22 }
  0xce   : > { %v807_v39 = vpop.f32.mrf.mxu1 }
  0xcf   : > { %v747_v47 = vadd.f32 %v746_v5, %v672_v45  ;;  %1167 = vmatmul.f32.gmra.mxu2 %v12863_v9  ;;  %v1286_v45 = vsel %vm411_vm1, %v1263_v36, 0  ;;  %18778 = vst [vmem:[#allocation56_spill] sm:$0xff] %v13122_v38 }
  0xd0   : > { %1327 = vmatmul.f32.gmra.mxu0 %v13098_v27  ;;  %v13127_v27 = vand.u32 4294901760, %v1286_v45 }
  0xd1   : > { %1224 = vmatmul.f32.gmra.mxu3 %v12886_v42  ;;  %v13116_v18 = vadd.f32 %v799_v11, %v747_v47  ;;  %1424 = vmatmul.f32.gmra.mxu1 %v13082_v49  ;;  %v1266_v47 = vsel %vm1248_vm2, %v1264_v20, %v1265_v46  ;;  %v1268_v20 = vrot.slane %v12624_v44, 2 }
  0xd2   : > { %v614_v5 = vpop.f32.mrf.mxu2  ;;  %v13136_v33 = vsub.f32 %v1286_v45, %v13127_v27 }
  0xd3   : > { %v615_v34 = vadd.f32 %v614_v5, %v556_v54  ;;  %v1267_v5 = vrot.slane %v12618_v40, 2 }
  0xd4   : > { %v683_v26 = vpop.f32.mrf.mxu3  ;;  %18780 = vst [vmem:[#allocation58_spill] sm:$0xff] %v13136_v33  ;;  %v13149_v45 = vand.u32 4294901760, %v13136_v33 }
  0xd5   : > { %v678_v58 = vadd.f32 %v677_v43, %v615_v34  ;;  %v754_v11 = vpop.f32.mrf.mxu0  ;;  %v560_v43 = vadd.f32 %v13011_v24, %v13037_v12 }
  0xd6   : > { %v811_v8 = vpop.f32.mrf.mxu1  ;;  %18782 = vst [vmem:[#allocation60_spill] sm:$0xff] %v13149_v45  ;;  %v1349_v40 = vsub.f32 %v13136_v33, %v13149_v45 }
  0xd7   : > { %v751_v36 = vadd.f32 %v750_v48, %v678_v58  ;;  %1171 = vmatmul.f32.gmra.mxu2 %v12886_v42  ;;  %v1288_v48 = vsel %vm411_vm1, %v1266_v47, 0  ;;  %v13146_v58 = vand.u32 4294901760, %v1341_v32 }
  0xd8   : > { %1335 = vmatmul.f32.gmra.mxu0 %v13122_v38  ;;  %v13151_v38 = vand.u32 4294901760, %v1288_v48 }
  0xd9   : > { %1228 = vmatmul.f32.gmra.mxu3 %v12908_v37  ;;  %v13140_v22 = vadd.f32 %v803_v25, %v751_v36  ;;  %1428 = vmatmul.f32.gmra.mxu1 %v13103_v3  ;;  %18781 = vst [vmem:[#allocation59_spill] sm:$0xff] %v13146_v58  ;;  %v1269_v36 = vsel %vm1248_vm2, %v1267_v5, %v1268_v20  ;;  %v1271_v5 = vrot.slane %v12658_v61, 2 }
  0xda   : > { %v619_v54 = vpop.f32.mrf.mxu2  ;;  %v13160_v44 = vsub.f32 %v1288_v48, %v13151_v38 }
  0xdb   : > { %v620_v46 = vadd.f32 %v619_v54, %v560_v43  ;;  %v1270_v54 = vrot.slane %v12645_v56, 2 }
  0xdc   : > { %v689_v34 = vpop.f32.mrf.mxu3  ;;  %18783 = vst [vmem:[#allocation61_spill] sm:$0xff] %v13160_v44  ;;  %v13173_v48 = vand.u32 4294901760, %v13160_v44 }
  0xdd   : > { %v684_v12 = vadd.f32 %v683_v26, %v620_v46  ;;  %v758_v24 = vpop.f32.mrf.mxu0  ;;  %v564_v26 = vadd.f32 %v13039_v28, %v13061_v50 }
  0xde   : > { %v815_v25 = vpop.f32.mrf.mxu1  ;;  %18785 = vst [vmem:[#allocation63_spill] sm:$0xff] %v13173_v48  ;;  %v1357_v56 = vsub.f32 %v13160_v44, %v13173_v48 }
  0xdf   : > { %v755_v47 = vadd.f32 %v754_v11, %v684_v12  ;;  %1175 = vmatmul.f32.gmra.mxu2 %v12908_v37  ;;  %v1290_v11 = vsel %vm411_vm1, %v1269_v36, 0  ;;  %v13170_v12 = vand.u32 4294901760, %v1349_v40 }
  0xe0   : > { %1343 = vmatmul.f32.gmra.mxu0 %v13146_v58  ;;  %v13175_v58 = vand.u32 4294901760, %v1290_v11 }
  0xe1   : > { %1232 = vmatmul.f32.gmra.mxu3 %v12934_v59  ;;  %v13164_v32 = vadd.f32 %v807_v39, %v755_v47  ;;  %1432 = vmatmul.f32.gmra.mxu1 %v13127_v27  ;;  %18784 = vst [vmem:[#allocation62_spill] sm:$0xff] %v13170_v12  ;;  %v1272_v47 = vsel %vm1248_vm2, %v1270_v54, %v1271_v5 }
  0xe2   : > { %v624_v43 = vpop.f32.mrf.mxu2  ;;  %v13184_v61 = vsub.f32 %v1290_v11, %v13175_v58 }
  0xe3   : > { %v625_v20 = vadd.f32 %v624_v43, %v564_v26 }
  0xe4   : > { %v695_v46 = vpop.f32.mrf.mxu3  ;;  %18786 = vst [vmem:[#allocation64_spill] sm:$0xff] %v13184_v61  ;;  %v13199_v11 = vand.u32 4294901760, %v13184_v61 }
  0xe5   : > { %v690_v28 = vadd.f32 %v689_v34, %v625_v20  ;;  %v762_v50 = vpop.f32.mrf.mxu0  ;;  %v1292_v34 = vsel %vm411_vm1, %v1272_v47, 0  ;;  %v13196_v20 = vand.u32 4294901760, %v1357_v56 }
  0xe6   : > { %v819_v39 = vpop.f32.mrf.mxu1  ;;  %18788 = vst [vmem:[#allocation66_spill] sm:$0xff] %v13199_v11 }
  0xe7   : > { %v759_v36 = vadd.f32 %v758_v24, %v690_v28  ;;  %1179 = vmatmul.f32.gmra.mxu2 %v12934_v59  ;;  %v12249_v24 = vld [vmem:[%s18231_s3 + $0x78] sm:$0xff]  ;;  %18787 = vst [vmem:[#allocation65_spill] sm:$0xff] %v13196_v20 }
  0xe8   : > { %1351 = vmatmul.f32.gmra.mxu0 %v13170_v12  ;;  %v13193_v43 = vand.u32 4294901760, %v12249_v24 }
  0xe9   : > { %1236 = vmatmul.f32.gmra.mxu3 %v12948_v57  ;;  %v13186_v40 = vadd.f32 %v811_v8, %v759_v36  ;;  %1436 = vmatmul.f32.gmra.mxu1 %v13151_v38  ;;  %v13201_v8 = vand.u32 4294901760, %v1292_v34 }
  0xea   : > { %v629_v26 = vpop.f32.mrf.mxu2  ;;  %1725 = vmatpush.msrb.mxu2 %v13193_v43  ;;  %v13205_v28 = vsub.f32 %v12249_v24, %v13193_v43  ;;  %1944 = vmatpush.msrb.mxu1 %v13193_v43  ;;  %v1365_v24 = vsub.f32 %v13184_v61, %v13199_v11 }
  0xeb   : > { %v630_v54 = vadd.f32 %v629_v26, %v13001_v17  ;;  %18789 = vst [vmem:[#allocation67_spill] sm:$0xff] %v13201_v8  ;;  %v13216_v26 = vsub.f32 %v1292_v34, %v13201_v8 }
  0xec   : > { %v701_v5 = vpop.f32.mrf.mxu3  ;;  %v18329_v17 = vand.u32 4294901760, %v13205_v28  ;;  %1880 = vmatpush.msrb.mxu0 %v13205_v28 }
  0xed   : > { %v696_v47 = vadd.f32 %v695_v46, %v630_v54  ;;  %v766_v36 = vpop.f32.mrf.mxu0  ;;  %18790 = vst [vmem:[#allocation68_spill] sm:$0xff] %v13216_v26  ;;  %v13228_v35 = vand.u32 4294901760, %v13216_v26 }
  0xee   : > { %v823_v12 = vpop.f32.mrf.mxu1  ;;  %v1812_v46 = vsub.f32 %v13205_v28, %v18329_v17 }
  0xef   : > { %v763_v56 = vadd.f32 %v762_v50, %v696_v47  ;;  %1183 = vmatmul.f32.gmra.mxu2 %v12948_v57  ;;  %18792 = vst [vmem:[#allocation70_spill] sm:$0xff] %v13228_v35 }
  0xf0   : > { %1359 = vmatmul.f32.gmra.mxu0 %v13196_v20  ;;  %v1813_v47 = vand.u32 4294901760, %v1812_v46  ;;  %v13225_v20 = vand.u32 4294901760, %v1365_v24 }
  0xf1   : > { %1240 = vmatmul.f32.gmra.mxu3 %v12976_v10  ;;  %v13221_v54 = vadd.f32 %v815_v25, %v763_v56  ;;  %1440 = vmatmul.f32.gmra.mxu1 %v13175_v58 }
  0xf2   : > { %v634_v50 = vpop.f32.mrf.mxu2  ;;  %18791 = vst [vmem:[#allocation69_spill] sm:$0xff] %v13225_v20  ;;  %1814 = vmatpush.msrb.mxu3 %v1813_v47 }
  0xf3   : > { %v635_v6 = vadd.f32 %v634_v50, %v13028_v29  ;;  %v1373_v29 = vsub.f32 %v13216_v26, %v13228_v35 }
  0xf4   : > { %v707_v57 = vpop.f32.mrf.mxu3 }
  0xf5   : > { %v702_v34 = vadd.f32 %v701_v5, %v635_v6  ;;  %v770_v0 = vpop.f32.mrf.mxu0  ;;  %v12248_v6 = vld [vmem:[%s18231_s3 + $0x70] sm:$0xff]  ;;  %v13244_v46 = vand.u32 4294901760, %v1373_v29 }
  0xf6   : > { %v827_v60 = vpop.f32.mrf.mxu1  ;;  %v13241_v56 = vand.u32 4294901760, %v12248_v6 }
  0xf7   : > { %v767_v59 = vadd.f32 %v766_v36, %v702_v34  ;;  %1187 = vmatmul.f32.gmra.mxu2 %v12976_v10  ;;  %18793 = vst [vmem:[#allocation71_spill] sm:$0xff] %v13244_v46 }
  0xf8   : > { %1367 = vmatmul.f32.gmra.mxu0 %v13225_v20  ;;  %1727 = vmatpush.msrb.mxu2 %v13241_v56  ;;  %v13248_v50 = vsub.f32 %v12248_v6, %v13241_v56 }
  0xf9   : > { %1244 = vmatmul.f32.gmra.mxu3 %v13006_v30  ;;  %v13235_v25 = vadd.f32 %v819_v39, %v767_v59  ;;  %1444 = vmatmul.f32.gmra.mxu1 %v13201_v8 }
  0xfa   : > { %v639_v5 = vpop.f32.mrf.mxu2  ;;  %1946 = vmatpush.msrb.mxu1 %v13241_v56  ;;  %v1817_v34 = vand.u32 4294901760, %v13248_v50  ;;  %1883 = vmatpush.msrb.mxu0 %v13248_v50 }
  0xfb   : > { %v640_v36 = vadd.f32 %v639_v5, %v13054_v14  ;;  %v18794_v14 = vand.u32 4294901760, %v13048_v55 }
  0xfc   : > { %v713_v24 = vpop.f32.mrf.mxu3  ;;  %v1818_v29 = vsub.f32 %v13248_v50, %v1817_v34 }
  0xfd   : > { %v708_v59 = vadd.f32 %v707_v57, %v640_v36  ;;  %v774_v39 = vpop.f32.mrf.mxu0 }
  0xfe   : > { %v1089_v47 = vpop.f32.mrf.mxu1  ;;  %v1819_v5 = vand.u32 4294901760, %v1818_v29 }
  0xff   : > { %v771_v17 = vadd.f32 %v770_v0, %v708_v59  ;;  %1191 = vmatmul.f32.gmra.mxu2 %v13006_v30 }
 0x100   : > { %1375 = vmatmul.f32.gmra.mxu0 %v13244_v46  ;;  %1820 = vmatpush.msrb.mxu3 %v1819_v5 }
 0x101   : > { %1536 = vmatmul.f32.vlgmr.msra.gmra.mxu3 %v18794_v14  ;;  %v13260_v6 = vadd.f32 %v823_v12, %v771_v17  ;;  %1664 = vmatmul.f32.vlgmr.msra.gmra.mxu1 %v13035_v53 }
 0x102   : > { %v644_v57 = vpop.f32.mrf.mxu2 }
 0x103   : > { %v645_v36 = vadd.f32 %v644_v57, %v13077_v21  ;;  %v12247_v21 = vld [vmem:[%s18231_s3 + $0x68] sm:$0xff] }
 0x104   : > { %v969_v0 = vpop.f32.mrf.mxu3  ;;  %v13273_v14 = vand.u32 4294901760, %v12247_v21 }
 0x105   : > { %v714_v59 = vadd.f32 %v713_v24, %v645_v36  ;;  %v1027_v20 = vpop.f32.mrf.mxu0 }
 0x106   : > { %v1095_v46 = vpop.f32.mrf.mxu1  ;;  %1729 = vmatpush.msrb.mxu2 %v13273_v14  ;;  %1948 = vmatpush.msrb.mxu1 %v13273_v14 }
 0x107   : > { %v775_v30 = vadd.f32 %v774_v39, %v714_v59  ;;  %1474 = vmatmul.f32.vlgmr.msra.gmra.mxu2 %v13048_v55  ;;  %v1822_v55 = vsub.f32 %v12247_v21, %v13273_v14 }
 0x108   : > { %1611 = vmatmul.f32.vlgmr.msra.gmra.mxu0 %v13035_v53 }
 0x109   : > { %1542 = vmatmul.f32.gmra.mxu3 %v13080_v1  ;;  %v13267_v12 = vadd.f32 %v827_v60, %v775_v30  ;;  %1668 = vmatmul.f32.gmra.mxu1 %v13059_v63  ;;  %v1823_v29 = vand.u32 4294901760, %v1822_v55 }
 0x10a   : > { %v872_v17 = vpop.f32.mrf.mxu2  ;;  %1886 = vmatpush.msrb.mxu0 %v1822_v55 }
 0x10b   : > { %v873_v24 = vadd.f32 %v872_v17, %v13116_v18  ;;  %v1824_v18 = vsub.f32 %v1822_v55, %v1823_v29 }
 0x10c   : > { %v973_v39 = vpop.f32.mrf.mxu3 }
 0x10d   : > { %v970_v53 = vadd.f32 %v969_v0, %v873_v24  ;;  %v1032_v30 = vpop.f32.mrf.mxu0  ;;  %v1825_v59 = vand.u32 4294901760, %v1824_v18 }
 0x10e   : > { %v1101_v60 = vpop.f32.mrf.mxu1 }
 0x10f   : > { %v1028_v57 = vadd.f32 %v1027_v20, %v970_v53  ;;  %1479 = vmatmul.f32.gmra.mxu2 %v13071_v51  ;;  %1826 = vmatpush.msrb.mxu3 %v1825_v59 }
 0x110   : > { %1615 = vmatmul.f32.gmra.mxu0 %v13059_v63 }
 0x111   : > { %1548 = vmatmul.f32.gmra.mxu3 %v13101_v13  ;;  %v13282_v5 = vadd.f32 %v1089_v47, %v1028_v57  ;;  %1672 = vmatmul.f32.gmra.mxu1 %v13082_v49 }
 0x112   : > { %v880_v36 = vpop.f32.mrf.mxu2 }
 0x113   : > { %v881_v0 = vadd.f32 %v880_v36, %v13140_v22  ;;  %v12246_v22 = vld [vmem:[%s18231_s3 + $0x60] sm:$0xff] }
 0x114   : > { %v977_v21 = vpop.f32.mrf.mxu3  ;;  %v1730_v57 = vand.u32 4294901760, %v12246_v22 }
 0x115   : > { %v974_v17 = vadd.f32 %v973_v39, %v881_v0  ;;  %v1037_v24 = vpop.f32.mrf.mxu0  ;;  %v18795_v0 = vand.u32 4294901760, %v13205_v28 }
 0x116   : > { %v1107_v20 = vpop.f32.mrf.mxu1  ;;  %1731 = vmatpush.msrb.mxu2 %v1730_v57  ;;  %1950 = vmatpush.msrb.mxu1 %v1730_v57 }
 0x117   : > { %v1033_v53 = vadd.f32 %v1032_v30, %v974_v17  ;;  %1484 = vmatmul.f32.gmra.mxu2 %v13090_v19  ;;  %v1828_v30 = vsub.f32 %v12246_v22, %v1730_v57 }
 0x118   : > { %1619 = vmatmul.f32.gmra.mxu0 %v13082_v49  ;;  %2015 = vmatpush.msra.mxu2 %v18795_v0 }
 0x119   : > { %1554 = vmatmul.f32.gmra.mxu3 %v13125_v15  ;;  %v13289_v47 = vadd.f32 %v1095_v46, %v1033_v53  ;;  %1676 = vmatmul.f32.gmra.mxu1 %v13103_v3  ;;  %v1829_v17 = vand.u32 4294901760, %v1828_v30 }
 0x11a   : > { %v888_v55 = vpop.f32.mrf.mxu2  ;;  %1889 = vmatpush.msrb.mxu0 %v1828_v30  ;;  %2019 = vmatpush.msra.mxu2 %v1817_v34 }
 0x11b   : > { %v889_v39 = vadd.f32 %v888_v55, %v13164_v32  ;;  %v1830_v32 = vsub.f32 %v1828_v30, %v1829_v17 }
 0x11c   : > { %v981_v18 = vpop.f32.mrf.mxu3  ;;  %2023 = vmatpush.msra.mxu2 %v1823_v29 }
 0x11d   : > { %v978_v36 = vadd.f32 %v977_v21, %v889_v39  ;;  %v1042_v59 = vpop.f32.mrf.mxu0  ;;  %v1831_v21 = vand.u32 4294901760, %v1830_v32 }
 0x11e   : > { %v1113_v46 = vpop.f32.mrf.mxu1  ;;  %2027 = vmatpush.msra.mxu2 %v1829_v17 }
 0x11f   : > { %v1038_v53 = vadd.f32 %v1037_v24, %v978_v36  ;;  %1489 = vmatmul.f32.gmra.mxu2 %v13112_v23  ;;  %1832 = vmatpush.msrb.mxu3 %v1831_v21 }
 0x120   : > { %1623 = vmatmul.f32.gmra.mxu0 %v13103_v3 }
 0x121   : > { %1560 = vmatmul.f32.gmra.mxu3 %v13149_v45  ;;  %v13301_v55 = vadd.f32 %v1101_v60, %v1038_v53  ;;  %1680 = vmatmul.f32.gmra.mxu1 %v13127_v27 }
 0x122   : > { %v896_v28 = vpop.f32.mrf.mxu2  ;;  %2074 = vmatpush.msra.mxu3 %v13193_v43 }
 0x123   : > { %v897_v22 = vadd.f32 %v896_v28, %v13186_v40 }
 0x124   : > { %v985_v39 = vpop.f32.mrf.mxu3  ;;  %2076 = vmatpush.msra.mxu3 %v13241_v56  ;;  %v12253_v56 = vld [vmem:[%s18231_s3 + $0x98] sm:$0xff] }
 0x125   : > { %v982_v24 = vadd.f32 %v981_v18, %v897_v22  ;;  %v1047_v36 = vpop.f32.mrf.mxu0 }
 0x126   : > { %v1119_v30 = vpop.f32.mrf.mxu1  ;;  %2078 = vmatpush.msra.mxu3 %v13273_v14  ;;  %v13323_v14 = vand.u32 4294901760, %v12253_v56 }
 0x127   : > { %v1043_v60 = vadd.f32 %v1042_v59, %v982_v24  ;;  %1494 = vmatmul.f32.gmra.mxu2 %v13136_v33 }
 0x128   : > { %1627 = vmatmul.f32.gmra.mxu0 %v13127_v27  ;;  %2080 = vmatpush.msra.mxu3 %v1730_v57  ;;  %v13330_v57 = vsub.f32 %v12253_v56, %v13323_v14 }
 0x129   : > { %1566 = vmatmul.f32.gmra.mxu3 %v13173_v48  ;;  %v13312_v50 = vadd.f32 %v1107_v20, %v1043_v60  ;;  %1684 = vmatmul.f32.gmra.mxu1 %v13151_v38 }
 0x12a   : > { %v904_v40 = vpop.f32.mrf.mxu2  ;;  %2146 = vmatpush.msra.mxu0 %v13323_v14  ;;  %v18336_v21 = vand.u32 4294901760, %v13330_v57 }
 0x12b   : > { %v905_v43 = vadd.f32 %v904_v40, %v13221_v54 }
 0x12c   : > { %v989_v34 = vpop.f32.mrf.mxu3 }
 0x12d   : > { %v986_v29 = vadd.f32 %v985_v39, %v905_v43  ;;  %v1052_v18 = vpop.f32.mrf.mxu0 }
 0x12e   : > { %v1125_v59 = vpop.f32.mrf.mxu1 }
 0x12f   : > { %v1048_v0 = vadd.f32 %v1047_v36, %v986_v29  ;;  %1499 = vmatmul.f32.gmra.mxu2 %v13160_v44 }
 0x130   : > { %1631 = vmatmul.f32.gmra.mxu0 %v13151_v38 }
 0x131   : > { %1572 = vmatmul.f32.gmra.mxu3 %v13199_v11  ;;  %v13325_v20 = vadd.f32 %v1113_v46, %v1048_v0  ;;  %1688 = vmatmul.f32.gmra.mxu1 %v13175_v58  ;;  %v2233_v46 = vsub.f32 %v13330_v57, %v18336_v21 }
 0x132   : > { %v912_v54 = vpop.f32.mrf.mxu2 }
 0x133   : > { %v913_v17 = vadd.f32 %v912_v54, %v13235_v25  ;;  %v2234_v25 = vand.u32 4294901760, %v2233_v46 }
 0x134   : > { %v993_v53 = vpop.f32.mrf.mxu3 }
 0x135   : > { %v990_v32 = vadd.f32 %v989_v34, %v913_v17  ;;  %v1057_v28 = vpop.f32.mrf.mxu0  ;;  %2235 = vmatpush.msra.mxu1 %v2234_v25 }
 0x136   : > { %v1131_v22 = vpop.f32.mrf.mxu1 }
 0x137   : > { %v1053_v39 = vadd.f32 %v1052_v18, %v990_v32  ;;  %1504 = vmatmul.f32.gmra.mxu2 %v13184_v61 }
 0x138   : > { %1635 = vmatmul.f32.gmra.mxu0 %v13175_v58 }
 0x139   : > { %1578 = vmatmul.f32.gmra.mxu3 %v13228_v35  ;;  %v13340_v24 = vadd.f32 %v1119_v30, %v1053_v39  ;;  %1692 = vmatmul.f32.gmra.mxu1 %v13201_v8  ;;  %v12252_v30 = vld [vmem:[%s18231_s3 + $0x90] sm:$0xff] }
 0x13a   : > { %v920_v36 = vpop.f32.mrf.mxu2  ;;  %v13352_v0 = vand.u32 4294901760, %v12252_v30 }
 0x13b   : > { %v921_v60 = vadd.f32 %v920_v36, %v13260_v6 }
 0x13c   : > { %v997_v40 = vpop.f32.mrf.mxu3  ;;  %2148 = vmatpush.msra.mxu0 %v13352_v0 }
 0x13d   : > { %v994_v43 = vadd.f32 %v993_v53, %v921_v60  ;;  %v1062_v34 = vpop.f32.mrf.mxu0 }
 0x13e   : > { %v13344_v29 = vpop.f32.mrf.mxu1 }
 0x13f   : > { %v1058_v18 = vadd.f32 %v1057_v28, %v994_v43  ;;  %1509 = vmatmul.f32.gmra.mxu2 %v13216_v26  ;;  %v13364_v28 = vsub.f32 %v12252_v30, %v13352_v0 }
 0x140   : > { %1639 = vmatmul.f32.gmra.mxu0 %v13201_v8 }
 0x141   : > { %1834 = vmatmul.f32.vlgmr.msrb.gmra.mxu3 %v12863_v9  ;;  %v13354_v6 = vadd.f32 %v1125_v59, %v1058_v18  ;;  %1954 = vmatmul.f32.vlgmr.msrb.gmra.mxu1 %v12884_v4  ;;  %v2238_v4 = vand.u32 4294901760, %v13364_v28 }
 0x142   : > { %2365 = vmatpush.msrb.mxu3 %v13323_v14  ;;  %v928_v56 = vpop.f32.mrf.mxu2 }
 0x143   : > { %v929_v54 = vadd.f32 %v928_v56, %v13267_v12  ;;  %v2239_v46 = vsub.f32 %v13364_v28, %v2238_v4 }
 0x144   : > { %v1217_v17 = vpop.f32.mrf.mxu3  ;;  %2367 = vmatpush.msrb.mxu3 %v13352_v0 }
 0x145   : > { %v998_v53 = vadd.f32 %v997_v40, %v929_v54  ;;  %v13361_v32 = vpop.f32.mrf.mxu0  ;;  %v2240_v40 = vand.u32 4294901760, %v2239_v46  ;;  %v18797_v46 = vld [vmem:[#allocation33_spill] sm:$0xff] }
 0x146   : > { %v13366_v59 = vpop.f32.mrf.mxu1 }
 0x147   : > { %v1063_v39 = vadd.f32 %v1062_v34, %v998_v53  ;;  %1737 = vmatmul.f32.vlgmr.msrb.gmra.mxu2 %v12903_v52  ;;  %2241 = vmatpush.msra.mxu1 %v2240_v40 }
 0x148   : > { %1892 = vmatmul.f32.vlgmr.msrb.gmra.mxu0 %v12867_v62  ;;  %2301 = vmatpush.msrb.mxu2 %v13330_v57 }
 0x149   : > { %1838 = vmatmul.f32.gmra.mxu3 %v12886_v42  ;;  %v13372_v12 = vadd.f32 %v1131_v22, %v1063_v39  ;;  %1960 = vmatmul.f32.gmra.mxu1 %v12906_v16  ;;  %v12251_v22 = vld [vmem:[%s18231_s3 + $0x88] sm:$0xff]  ;;  %v18796_v39 = vld [vmem:[#allocation36_spill] sm:$0xff] }
 0x14a   : > { %v1164_v25 = vpop.f32.mrf.mxu2  ;;  %2304 = vmatpush.msrb.mxu2 %v13364_v28 }
 0x14b   : > { %v1165_v36 = vadd.f32 %v1164_v25, %v13282_v5  ;;  %v13391_v5 = vand.u32 4294901760, %v12251_v22  ;;  %v18798_v25 = vld [vmem:[#allocation40_spill] sm:$0xff] }
 0x14c   : > { %v1221_v60 = vpop.f32.mrf.mxu3 }
 0x14d   : > { %v13379_v52 = vadd.f32 %v1217_v17, %v1165_v36  ;;  %v13381_v43 = vpop.f32.mrf.mxu0  ;;  %2150 = vmatpush.msra.mxu0 %v13391_v5  ;;  %2369 = vmatpush.msrb.mxu3 %v13391_v5  ;;  %v2243_v17 = vsub.f32 %v12251_v22, %v13391_v5 }
 0x14e   : > { %v13383_v62 = vpop.f32.mrf.mxu1 }
 0x14f   : > { %1745 = vmatmul.f32.gmra.mxu2 %v12929_v7  ;;  %v2244_v28 = vand.u32 4294901760, %v2243_v17 }
 0x150   : > { %1897 = vmatmul.f32.gmra.mxu0 %v12896_v41  ;;  %2307 = vmatpush.msrb.mxu2 %v2243_v17 }
 0x151   : > { %1842 = vmatmul.f32.gmra.mxu3 %v12908_v37  ;;  %1966 = vmatmul.f32.gmra.mxu1 %v12932_v31  ;;  %v2245_v36 = vsub.f32 %v2243_v17, %v2244_v28  ;;  %v18799_v31 = vld [vmem:[#allocation43_spill] sm:$0xff]  ;;  %v18800_v17 = vld [vmem:[#allocation38_spill] sm:$0xff] }
 0x152   : > { %v1168_v34 = vpop.f32.mrf.mxu2 }
 0x153   : > { %v1169_v18 = vadd.f32 %v1168_v34, %v13289_v47  ;;  %v2246_v34 = vand.u32 4294901760, %v2245_v36  ;;  %v18802_v36 = vld [vmem:[#allocation42_spill] sm:$0xff] }
 0x154   : > { %v1225_v30 = vpop.f32.mrf.mxu3 }
 0x155   : > { %v13397_v56 = vadd.f32 %v1221_v60, %v1169_v18  ;;  %v13399_v54 = vpop.f32.mrf.mxu0  ;;  %2247 = vmatpush.msra.mxu1 %v2246_v34  ;;  %v18803_v34 = vand.u32 4294901760, %v13330_v57 }
 0x156   : > { %v13402_v53 = vpop.f32.mrf.mxu1 }
 0x157   : > { %1753 = vmatmul.f32.gmra.mxu2 %v12950_v2 }
 0x158   : > { %1902 = vmatmul.f32.gmra.mxu0 %v18797_v46  ;;  %v18801_v46 = vld [vmem:[#allocation37_spill] sm:$0xff] }
 0x159   : > { %1846 = vmatmul.f32.gmra.mxu3 %v18796_v39  ;;  %1972 = vmatmul.f32.gmra.mxu1 %v18798_v25  ;;  %v12250_v25 = vld [vmem:[%s18231_s3 + $0x80] sm:$0xff] }
 0x15a   : > { %v1172_v47 = vpop.f32.mrf.mxu2 }
 0x15b   : > { %v1173_v60 = vadd.f32 %v1172_v47, %v13301_v55  ;;  %v2151_v55 = vand.u32 4294901760, %v12250_v25 }
 0x15c   : > { %v1229_v40 = vpop.f32.mrf.mxu3 }
 0x15d   : > { %v13409_v18 = vadd.f32 %v1225_v30, %v1173_v60  ;;  %v13411_v22 = vpop.f32.mrf.mxu0  ;;  %2152 = vmatpush.msra.mxu0 %v2151_v55  ;;  %2371 = vmatpush.msrb.mxu3 %v2151_v55  ;;  %v2249_v2 = vsub.f32 %v12250_v25, %v2151_v55 }
 0x15e   : > { %v13413_v21 = vpop.f32.mrf.mxu1 }
 0x15f   : > { %1761 = vmatmul.f32.gmra.mxu2 %v18799_v31  ;;  %2436 = vmatpush.msrb.mxu0 %v18803_v34  ;;  %v13430_v31 = vld [vmem:[%s12576_s26 + $0x80] sm:$0xff]  ;;  %v2250_v7 = vand.u32 4294901760, %v2249_v2 }
 0x160   : > { %1907 = vmatmul.f32.gmra.mxu0 %v18801_v46  ;;  %v1710_v57 = vsel %vm411_vm1, %v13430_v31, 0  ;;  %2310 = vmatpush.msrb.mxu2 %v2249_v2 }
 0x161   : > { %1850 = vmatmul.f32.gmra.mxu3 %v18800_v17  ;;  %1978 = vmatmul.f32.gmra.mxu1 %v18802_v36  ;;  %v18804_v36 = vld [vmem:[#allocation45_spill] sm:$0xff]  ;;  %v13441_v34 = vand.u32 4294901760, %v1710_v57 }
 0x162   : > { %v1176_v30 = vpop.f32.mrf.mxu2  ;;  %2440 = vmatpush.msrb.mxu0 %v2238_v4 }
 0x163   : > { %v1177_v47 = vadd.f32 %v1176_v30, %v13312_v50  ;;  %v18805_v50 = vld [vmem:[#allocation41_spill] sm:$0xff]  ;;  %v2251_v30 = vsub.f32 %v2249_v2, %v2250_v7  ;;  %18807 = vst [vmem:[#allocation38_spill] sm:$0xff] %v13441_v34  ;;  %v13452_v2 = vsub.f32 %v1710_v57, %v13441_v34 }
 0x164   : > { %v1233_v60 = vpop.f32.mrf.mxu3  ;;  %2444 = vmatpush.msrb.mxu0 %v2244_v28 }
 0x165   : > { %v13425_v41 = vadd.f32 %v1229_v40, %v1177_v47  ;;  %v13427_v16 = vpop.f32.mrf.mxu0  ;;  %v18806_v40 = vld [vmem:[#allocation46_spill] sm:$0xff]  ;;  %18809 = vst [vmem:[#allocation72_spill] sm:$0xff] %v13452_v2 }
 0x166   : > { %v13432_v46 = vpop.f32.mrf.mxu1  ;;  %2448 = vmatpush.msrb.mxu0 %v2250_v7  ;;  %v18810_v7 = vld [vmem:[#allocation47_spill] sm:$0xff] }
 0x167   : > { %1769 = vmatmul.f32.gmra.mxu2 %v18804_v36  ;;  %v2252_v36 = vand.u32 4294901760, %v2251_v30 }
 0x168   : > { %1912 = vmatmul.f32.gmra.mxu0 %v18805_v50 }
 0x169   : > { %1854 = vmatmul.f32.gmra.mxu3 %v12976_v10  ;;  %1984 = vmatmul.f32.gmra.mxu1 %v18806_v40  ;;  %v18808_v40 = vld [vmem:[#allocation49_spill] sm:$0xff] }
 0x16a   : > { %v1180_v47 = vpop.f32.mrf.mxu2  ;;  %2253 = vmatpush.msra.mxu1 %v2252_v36 }
 0x16b   : > { %v1181_v4 = vadd.f32 %v1180_v47, %v13325_v20  ;;  %v18811_v20 = vld [vmem:[#allocation44_spill] sm:$0xff]  ;;  %v18812_v47 = vld [vmem:[#allocation50_spill] sm:$0xff] }
 0x16c   : > { %v1237_v25 = vpop.f32.mrf.mxu3  ;;  %2495 = vmatpush.msrb.mxu1 %v13323_v14 }
 0x16d   : > { %v13443_v28 = vadd.f32 %v1233_v60, %v1181_v4  ;;  %v13445_v26 = vpop.f32.mrf.mxu0  ;;  %v13460_v4 = vand.u32 4294901760, %v13452_v2 }
 0x16e   : > { %v13447_v50 = vpop.f32.mrf.mxu1  ;;  %2497 = vmatpush.msrb.mxu1 %v13352_v0 }
 0x16f   : > { %1777 = vmatmul.f32.gmra.mxu2 %v18808_v40  ;;  %18813 = vst [vmem:[#allocation73_spill] sm:$0xff] %v13460_v4  ;;  %v1791_v0 = vsub.f32 %v13452_v2, %v13460_v4 }
 0x170   : > { %1917 = vmatmul.f32.gmra.mxu0 %v18811_v20  ;;  %2499 = vmatpush.msrb.mxu1 %v13391_v5  ;;  %v18814_v20 = vld [vmem:[#allocation51_spill] sm:$0xff] }
 0x171   : > { %1858 = vmatmul.f32.gmra.mxu3 %v18810_v7  ;;  %1990 = vmatmul.f32.gmra.mxu1 %v18812_v47 }
 0x172   : > { %v1184_v60 = vpop.f32.mrf.mxu2  ;;  %2501 = vmatpush.msrb.mxu1 %v2151_v55 }
 0x173   : > { %v1185_v36 = vadd.f32 %v1184_v60, %v13340_v24  ;;  %v18815_v24 = vld [vmem:[#allocation48_spill] sm:$0xff] }
 0x174   : > { %v1241_v30 = vpop.f32.mrf.mxu3 }
 0x175   : > { %v13463_v14 = vadd.f32 %v1237_v25, %v1185_v36  ;;  %v13465_v57 = vpop.f32.mrf.mxu0  ;;  %v13476_v25 = vand.u32 4294901760, %v1791_v0 }
 0x176   : > { %v13467_v40 = vpop.f32.mrf.mxu1 }
 0x177   : > { %1785 = vmatmul.f32.gmra.mxu2 %v18814_v20  ;;  %18816 = vst [vmem:[#allocation74_spill] sm:$0xff] %v13476_v25 }
 0x178   : > { %1922 = vmatmul.f32.gmra.mxu0 %v18815_v24  ;;  %v18817_v24 = vld [vmem:[#allocation5_spill] sm:$0xff] }
 0x179   : > { %1862 = vmatmul.f32.gmra.mxu3 %v13441_v34  ;;  %1996 = vmatmul.f32.gmra.mxu1 %v13460_v4 }
 0x17a   : > { %v1188_v60 = vpop.f32.mrf.mxu2 }
 0x17b   : > { %v1189_v5 = vadd.f32 %v1188_v60, %v13354_v6 }
 0x17c   : > { %v1245_v36 = vpop.f32.mrf.mxu3 }
 0x17d   : > { %v13478_v47 = vadd.f32 %v1241_v30, %v1189_v5  ;;  %v13480_v55 = vpop.f32.mrf.mxu0  ;;  %v18818_v5 = vld [vmem:[#allocation19_spill] sm:$0xff] }
 0x17e   : > { %v1665_v20 = vpop.f32.mrf.mxu1 }
 0x17f   : > { %1793 = vmatmul.f32.gmra.mxu2 %v13476_v25  ;;  %v18819_v25 = vld [vmem:[#allocation12_spill] sm:$0xff] }
 0x180   : > { %1927 = vmatmul.f32.gmra.mxu0 %v13452_v2  ;;  %v1418_v2 = vadd.f32 %v13344_v29, %v13361_v32  ;;  %v18821_v29 = vld [vmem:[#allocation21_spill] sm:$0xff] }
 0x181   : > { %2082 = vmatmul.f32.vlgmr.msra.gmra.mxu3 %v12863_v9  ;;  %2255 = vmatmul.f32.vlgmr.msra.gmra.mxu1 %v18817_v24 }
 0x182   : > { %v1192_v4 = vpop.f32.mrf.mxu2 }
 0x183   : > { %v1193_v35 = vadd.f32 %v1192_v4, %v13372_v12 }
 0x184   : > { %v1537_v6 = vpop.f32.mrf.mxu3 }
 0x185   : > { %v13487_v0 = vadd.f32 %v1245_v36, %v1193_v35  ;;  %v1612_v60 = vpop.f32.mrf.mxu0 }
 0x186   : > { %v1669_v30 = vpop.f32.mrf.mxu1 }
 0x187   : > { %2029 = vmatmul.f32.vlgmr.msra.gmra.mxu2 %v12863_v9  ;;  %v18820_v9 = vld [vmem:[#allocation26_spill] sm:$0xff] }
 0x188   : > { %2158 = vmatmul.f32.vlgmr.msra.gmra.mxu0 %v18818_v5  ;;  %v1422_v5 = vadd.f32 %v13366_v59, %v13381_v43  ;;  %v1426_v59 = vadd.f32 %v13383_v62, %v13399_v54  ;;  %v18824_v62 = vld [vmem:[#allocation13_spill] sm:$0xff] }
 0x189   : > { %2086 = vmatmul.f32.gmra.mxu3 %v12886_v42  ;;  %2259 = vmatmul.f32.gmra.mxu1 %v18819_v25 }
 0x18a   : > { %v1475_v61 = vpop.f32.mrf.mxu2 }
 0x18b   : > { %v1476_v8 = vadd.f32 %v1475_v61, %v1418_v2 }
 0x18c   : > { %v1543_v11 = vpop.f32.mrf.mxu3 }
 0x18d   : > { %v1538_v12 = vadd.f32 %v1537_v6, %v1476_v8  ;;  %v1616_v4 = vpop.f32.mrf.mxu0 }
 0x18e   : > { %v1673_v35 = vpop.f32.mrf.mxu1 }
 0x18f   : > { %v1613_v36 = vadd.f32 %v1612_v60, %v1538_v12  ;;  %2033 = vmatmul.f32.gmra.mxu2 %v12886_v42 }
 0x190   : > { %2166 = vmatmul.f32.gmra.mxu0 %v18820_v9  ;;  %v18822_v9 = vld [vmem:[#allocation29_spill] sm:$0xff] }
 0x191   : > { %2090 = vmatmul.f32.gmra.mxu3 %v12908_v37  ;;  %v1666_v44 = vadd.f32 %v1665_v20, %v1613_v36  ;;  %2263 = vmatmul.f32.gmra.mxu1 %v18821_v29  ;;  %v18823_v20 = vld [vmem:[#allocation2_spill] sm:$0xff] }
 0x192   : > { %v1480_v32 = vpop.f32.mrf.mxu2 }
 0x193   : > { %v13502_v61 = vadd.f32 %v1666_v44, %v13379_v52  ;;  %v1481_v8 = vadd.f32 %v1480_v32, %v1422_v5 }
 0x194   : > { %v1549_v2 = vpop.f32.mrf.mxu3 }
 0x195   : > { %v1544_v6 = vadd.f32 %v1543_v11, %v1481_v8  ;;  %v1620_v60 = vpop.f32.mrf.mxu0 }
 0x196   : > { %v1677_v12 = vpop.f32.mrf.mxu1 }
 0x197   : > { %v1617_v42 = vadd.f32 %v1616_v4, %v1544_v6  ;;  %2037 = vmatmul.f32.gmra.mxu2 %v12908_v37  ;;  %v13515_v6 = vld [vmem:[%s12576_s26 + $0x88] sm:$0x3] }
 0x198   : > { %2174 = vmatmul.f32.gmra.mxu0 %v18822_v9 }
 0x199   : > { %2094 = vmatmul.f32.gmra.mxu3 %v18796_v39  ;;  %v1670_v43 = vadd.f32 %v1669_v30, %v1617_v42  ;;  %2267 = vmatmul.f32.gmra.mxu1 %v18823_v20  ;;  %v1430_v42 = vadd.f32 %v13402_v53, %v13411_v22  ;;  %v2123_v30 = vrot.slane %v13430_v31, 1  ;;  %v18826_v53 = vld [vmem:[#allocation16_spill] sm:$0xff]  ;;  %v1434_v22 = vadd.f32 %v13413_v21, %v13427_v16 }
 0x19a   : > { %v1485_v44 = vpop.f32.mrf.mxu2 }
 0x19b   : > { %v13511_v52 = vadd.f32 %v1670_v43, %v13397_v56  ;;  %v1486_v11 = vadd.f32 %v1485_v44, %v1426_v59  ;;  %v18825_v56 = vld [vmem:[#allocation4_spill] sm:$0xff]  ;;  %v2124_v59 = vrot.slane %v13515_v6, 1 }
 0x19c   : > { %v1555_v36 = vpop.f32.mrf.mxu3 }
 0x19d   : > { %v1550_v4 = vadd.f32 %v1549_v2, %v1486_v11  ;;  %v1624_v5 = vpop.f32.mrf.mxu0 }
 0x19e   : > { %v1681_v32 = vpop.f32.mrf.mxu1 }
 0x19f   : > { %v1621_v8 = vadd.f32 %v1620_v60, %v1550_v4  ;;  %2041 = vmatmul.f32.gmra.mxu2 %v18796_v39 }
 0x1a0   : > { %2182 = vmatmul.f32.gmra.mxu0 %v18824_v62  ;;  %v2125_v62 = vsel %vm381_vm0, %v2123_v30, %v2124_v59  ;;  %v12257_v30 = vld [vmem:[%s18231_s3 + $0xb8] sm:$0xff] }
 0x1a1   : > { %2098 = vmatmul.f32.gmra.mxu3 %v18800_v17  ;;  %v1674_v54 = vadd.f32 %v1673_v35, %v1621_v8  ;;  %2271 = vmatmul.f32.gmra.mxu1 %v18825_v56  ;;  %v2131_v8 = vsel %vm411_vm1, %v2125_v62, 0  ;;  %v13543_v59 = vand.u32 4294901760, %v12257_v30  ;;  %v18829_v62 = vld [vmem:[#allocation24_spill] sm:$0xff] }
 0x1a2   : > { %v1490_v2 = vpop.f32.mrf.mxu2 }
 0x1a3   : > { %v13525_v60 = vadd.f32 %v1674_v54, %v13409_v18  ;;  %v1491_v43 = vadd.f32 %v1490_v2, %v1430_v42  ;;  %v18827_v18 = vld [vmem:[#allocation10_spill] sm:$0xff]  ;;  %v13541_v2 = vand.u32 4294901760, %v2131_v8  ;;  %2566 = vmatpush.msra.mxu2 %v13543_v59  ;;  %2785 = vmatpush.msra.mxu1 %v13543_v59 }
 0x1a4   : > { %v1561_v44 = vpop.f32.mrf.mxu3 }
 0x1a5   : > { %v1556_v11 = vadd.f32 %v1555_v36, %v1491_v43  ;;  %v1628_v4 = vpop.f32.mrf.mxu0  ;;  %18828 = vst [vmem:[#allocation5_spill] sm:$0xff] %v13541_v2  ;;  %v13554_v43 = vsub.f32 %v2131_v8, %v13541_v2 }
 0x1a6   : > { %v1685_v9 = vpop.f32.mrf.mxu1 }
 0x1a7   : > { %v1625_v39 = vadd.f32 %v1624_v5, %v1556_v11  ;;  %2045 = vmatmul.f32.gmra.mxu2 %v18800_v17  ;;  %18830 = vst [vmem:[#allocation19_spill] sm:$0xff] %v13554_v43  ;;  %v1438_v11 = vadd.f32 %v13432_v46, %v13445_v26 }
 0x1a8   : > { %2190 = vmatmul.f32.gmra.mxu0 %v18826_v53 }
 0x1a9   : > { %2102 = vmatmul.f32.gmra.mxu3 %v12976_v10  ;;  %v1678_v35 = vadd.f32 %v1677_v12, %v1625_v39  ;;  %2275 = vmatmul.f32.gmra.mxu1 %v18827_v18  ;;  %v13547_v12 = vsub.f32 %v12257_v30, %v13543_v59 }
 0x1aa   : > { %v1495_v36 = vpop.f32.mrf.mxu2 }
 0x1ab   : > { %v13536_v42 = vadd.f32 %v1678_v35, %v13425_v41  ;;  %v1496_v54 = vadd.f32 %v1495_v36, %v1434_v22  ;;  %v18831_v35 = vld [vmem:[#allocation18_spill] sm:$0xff]  ;;  %2721 = vmatpush.msra.mxu0 %v13547_v12 }
 0x1ac   : > { %v1567_v5 = vpop.f32.mrf.mxu3 }
 0x1ad   : > { %v1562_v16 = vadd.f32 %v1561_v44, %v1496_v54  ;;  %v1632_v21 = vpop.f32.mrf.mxu0  ;;  %v18360_v44 = vand.u32 4294901760, %v13547_v12 }
 0x1ae   : > { %v1689_v39 = vpop.f32.mrf.mxu1 }
 0x1af   : > { %v1629_v41 = vadd.f32 %v1628_v4, %v1562_v16  ;;  %2049 = vmatmul.f32.gmra.mxu2 %v12976_v10  ;;  %v2653_v36 = vsub.f32 %v13547_v12, %v18360_v44  ;;  %v13568_v16 = vand.u32 4294901760, %v13554_v43  ;;  %v12256_v44 = vld [vmem:[%s18231_s3 + $0xb0] sm:$0xff] }
 0x1b0   : > { %2198 = vmatmul.f32.gmra.mxu0 %v18829_v62 }
 0x1b1   : > { %2106 = vmatmul.f32.gmra.mxu3 %v18810_v7  ;;  %v1682_v22 = vadd.f32 %v1681_v32, %v1629_v41  ;;  %2279 = vmatmul.f32.gmra.mxu1 %v18831_v35  ;;  %18832 = vst [vmem:[#allocation12_spill] sm:$0xff] %v13568_v16  ;;  %v2654_v62 = vand.u32 4294901760, %v2653_v36 }
 0x1b2   : > { %v1500_v4 = vpop.f32.mrf.mxu2 }
 0x1b3   : > { %v13565_v54 = vadd.f32 %v1682_v22, %v13443_v28  ;;  %v1501_v8 = vadd.f32 %v1500_v4, %v1438_v11  ;;  %2655 = vmatpush.msra.mxu3 %v2654_v62  ;;  %v18833_v28 = vld [vmem:[#allocation28_spill] sm:$0xff]  ;;  %v2212_v11 = vsub.f32 %v13554_v43, %v13568_v16  ;;  %v13578_v22 = vand.u32 4294901760, %v12256_v44 }
 0x1b4   : > { %v1573_v30 = vpop.f32.mrf.mxu3 }
 0x1b5   : > { %v1568_v26 = vadd.f32 %v1567_v5, %v1501_v8  ;;  %v1636_v46 = vpop.f32.mrf.mxu0  ;;  %v1442_v5 = vadd.f32 %v13447_v50, %v13465_v57  ;;  %2568 = vmatpush.msra.mxu2 %v13578_v22  ;;  %v13585_v4 = vsub.f32 %v12256_v44, %v13578_v22  ;;  %2787 = vmatpush.msra.mxu1 %v13578_v22 }
 0x1b6   : > { %v1693_v32 = vpop.f32.mrf.mxu1 }
 0x1b7   : > { %v1633_v41 = vadd.f32 %v1632_v21, %v1568_v26  ;;  %2053 = vmatmul.f32.gmra.mxu2 %v18810_v7  ;;  %v18361_v50 = vand.u32 4294901760, %v13585_v4  ;;  %2724 = vmatpush.msra.mxu0 %v13585_v4  ;;  %v18836_v7 = vld [vmem:[#allocation8_spill] sm:$0xff] }
 0x1b8   : > { %2206 = vmatmul.f32.gmra.mxu0 %v18833_v28  ;;  %v13591_v28 = vand.u32 4294901760, %v2212_v11 }
 0x1b9   : > { %2110 = vmatmul.f32.gmra.mxu3 %v13441_v34  ;;  %v1686_v62 = vadd.f32 %v1685_v9, %v1633_v41  ;;  %2283 = vmatmul.f32.gmra.mxu1 %v13541_v2  ;;  %v2659_v44 = vsub.f32 %v13585_v4, %v18361_v50 }
 0x1ba   : > { %v1505_v21 = vpop.f32.mrf.mxu2  ;;  %18834 = vst [vmem:[#allocation2_spill] sm:$0xff] %v13591_v28 }
 0x1bb   : > { %v13589_v36 = vadd.f32 %v1686_v62, %v13463_v14  ;;  %v1506_v8 = vadd.f32 %v1505_v21, %v1442_v5  ;;  %v18835_v14 = vld [vmem:[#allocation11_spill] sm:$0xff]  ;;  %v2660_v11 = vand.u32 4294901760, %v2659_v44  ;;  %v1446_v5 = vadd.f32 %v13467_v40, %v13480_v55  ;;  %v18837_v55 = vld [vmem:[#allocation20_spill] sm:$0xff] }
 0x1bc   : > { %v1579_v26 = vpop.f32.mrf.mxu3  ;;  %v12255_v40 = vld [vmem:[%s18231_s3 + $0xa8] sm:$0xff] }
 0x1bd   : > { %v1574_v57 = vadd.f32 %v1573_v30, %v1506_v8  ;;  %v1640_v9 = vpop.f32.mrf.mxu0  ;;  %2661 = vmatpush.msra.mxu3 %v2660_v11 }
 0x1be   : > { %v1955_v41 = vpop.f32.mrf.mxu1 }
 0x1bf   : > { %v1637_v53 = vadd.f32 %v1636_v46, %v1574_v57  ;;  %2057 = vmatmul.f32.gmra.mxu2 %v13441_v34 }
 0x1c0   : > { %2214 = vmatmul.f32.gmra.mxu0 %v13591_v28 }
 0x1c1   : > { %2375 = vmatmul.f32.vlgmr.msrb.gmra.mxu3 %v18835_v14  ;;  %v1690_v62 = vadd.f32 %v1689_v39, %v1637_v53  ;;  %2503 = vmatmul.f32.vlgmr.msrb.gmra.mxu1 %v18817_v24  ;;  %v13613_v53 = vand.u32 4294901760, %v12255_v40 }
 0x1c2   : > { %v1510_v30 = vpop.f32.mrf.mxu2 }
 0x1c3   : > { %v13605_v21 = vadd.f32 %v1690_v62, %v13478_v47  ;;  %v1511_v8 = vadd.f32 %v1510_v30, %v1446_v5  ;;  %2570 = vmatpush.msra.mxu2 %v13613_v53  ;;  %2789 = vmatpush.msra.mxu1 %v13613_v53  ;;  %v18838_v62 = vld [vmem:[#allocation15_spill] sm:$0xff] }
 0x1c4   : > { %v1835_v46 = vpop.f32.mrf.mxu3  ;;  %v18839_v30 = vld [vmem:[#allocation27_spill] sm:$0xff] }
 0x1c5   : > { %v1580_v57 = vadd.f32 %v1579_v26, %v1511_v8  ;;  %v1893_v50 = vpop.f32.mrf.mxu0  ;;  %v2663_v26 = vsub.f32 %v12255_v40, %v13613_v53 }
 0x1c6   : > { %v1961_v34 = vpop.f32.mrf.mxu1 }
 0x1c7   : > { %v1641_v28 = vadd.f32 %v1640_v9, %v1580_v57  ;;  %2313 = vmatmul.f32.vlgmr.msrb.gmra.mxu2 %v18836_v7  ;;  %v2664_v14 = vand.u32 4294901760, %v2663_v26  ;;  %2727 = vmatpush.msra.mxu0 %v2663_v26 }
 0x1c8   : > { %2450 = vmatmul.f32.vlgmr.msrb.gmra.mxu0 %v18817_v24 }
 0x1c9   : > { %2381 = vmatmul.f32.gmra.mxu3 %v18837_v55  ;;  %v1694_v47 = vadd.f32 %v1693_v32, %v1641_v28  ;;  %2507 = vmatmul.f32.gmra.mxu1 %v18819_v25  ;;  %v2665_v32 = vsub.f32 %v2663_v26, %v2664_v14  ;;  %v12254_v26 = vld [vmem:[%s18231_s3 + $0xa0] sm:$0xff] }
 0x1ca   : > { %v1738_v39 = vpop.f32.mrf.mxu2 }
 0x1cb   : > { %v13620_v7 = vadd.f32 %v1694_v47, %v13487_v0  ;;  %v1836_v9 = vadd.f32 %v1835_v46, %v1738_v39  ;;  %v2666_v8 = vand.u32 4294901760, %v2665_v32 }
 0x1cc   : > { %v1839_v44 = vpop.f32.mrf.mxu3 }
 0x1cd   : > { %v1894_v24 = vadd.f32 %v1893_v50, %v1836_v9  ;;  %v1898_v11 = vpop.f32.mrf.mxu0  ;;  %2667 = vmatpush.msra.mxu3 %v2666_v8  ;;  %v18841_v9 = vld [vmem:[#allocation6_spill] sm:$0xff]  ;;  %v18842_v8 = vand.u32 4294901760, %v13547_v12 }
 0x1ce   : > { %v1967_v5 = vpop.f32.mrf.mxu1 }
 0x1cf   : > { %v13622_v28 = vadd.f32 %v1955_v41, %v1894_v24  ;;  %2318 = vmatmul.f32.gmra.mxu2 %v18838_v62  ;;  %v18840_v41 = vld [vmem:[#allocation23_spill] sm:$0xff]  ;;  %v2571_v24 = vand.u32 4294901760, %v12254_v26 }
 0x1d0   : > { %2454 = vmatmul.f32.gmra.mxu0 %v18819_v25 }
 0x1d1   : > { %2387 = vmatmul.f32.gmra.mxu3 %v18839_v30  ;;  %2511 = vmatmul.f32.gmra.mxu1 %v18821_v29 }
 0x1d2   : > { %v1746_v0 = vpop.f32.mrf.mxu2  ;;  %2572 = vmatpush.msra.mxu2 %v2571_v24  ;;  %2791 = vmatpush.msra.mxu1 %v2571_v24 }
 0x1d3   : > { %v1840_v46 = vadd.f32 %v1839_v44, %v1746_v0 }
 0x1d4   : > { %v1843_v57 = vpop.f32.mrf.mxu3  ;;  %2856 = vmatpush.msrb.mxu2 %v18842_v8 }
 0x1d5   : > { %v1899_v40 = vadd.f32 %v1898_v11, %v1840_v46  ;;  %v1903_v50 = vpop.f32.mrf.mxu0  ;;  %v2669_v11 = vsub.f32 %v12254_v26, %v2571_v24  ;;  %v18845_v26 = vld [vmem:[#allocation9_spill] sm:$0xff] }
 0x1d6   : > { %v1973_v47 = vpop.f32.mrf.mxu1 }
 0x1d7   : > { %v13628_v39 = vadd.f32 %v1961_v34, %v1899_v40  ;;  %2323 = vmatmul.f32.gmra.mxu2 %v18840_v41  ;;  %v2670_v0 = vand.u32 4294901760, %v2669_v11  ;;  %2730 = vmatpush.msra.mxu0 %v2669_v11 }
 0x1d8   : > { %2458 = vmatmul.f32.gmra.mxu0 %v18821_v29  ;;  %v18844_v29 = vld [vmem:[#allocation3_spill] sm:$0xff] }
 0x1d9   : > { %2393 = vmatmul.f32.gmra.mxu3 %v18841_v9  ;;  %2515 = vmatmul.f32.gmra.mxu1 %v18823_v20  ;;  %v18843_v9 = vand.u32 4294901760, %v13585_v4  ;;  %v2671_v30 = vsub.f32 %v2669_v11, %v2670_v0 }
 0x1da   : > { %v1754_v44 = vpop.f32.mrf.mxu2 }
 0x1db   : > { %v1844_v32 = vadd.f32 %v1843_v57, %v1754_v44  ;;  %2860 = vmatpush.msrb.mxu2 %v18843_v9  ;;  %v2672_v57 = vand.u32 4294901760, %v2671_v30  ;;  %v18847_v30 = vld [vmem:[#allocation17_spill] sm:$0xff] }
 0x1dc   : > { %v1847_v34 = vpop.f32.mrf.mxu3 }
 0x1dd   : > { %v1904_v46 = vadd.f32 %v1903_v50, %v1844_v32  ;;  %v1908_v40 = vpop.f32.mrf.mxu0  ;;  %2864 = vmatpush.msrb.mxu2 %v2664_v14  ;;  %2673 = vmatpush.msra.mxu3 %v2672_v57  ;;  %v18846_v32 = vld [vmem:[#allocation7_spill] sm:$0xff] }
 0x1de   : > { %v1979_v41 = vpop.f32.mrf.mxu1 }
 0x1df   : > { %v13641_v62 = vadd.f32 %v1967_v5, %v1904_v46  ;;  %2328 = vmatmul.f32.gmra.mxu2 %v18844_v29  ;;  %2915 = vmatpush.msrb.mxu3 %v13543_v59 }
 0x1e0   : > { %2462 = vmatmul.f32.gmra.mxu0 %v18823_v20  ;;  %2868 = vmatpush.msrb.mxu2 %v2670_v0 }
 0x1e1   : > { %2399 = vmatmul.f32.gmra.mxu3 %v18845_v26  ;;  %2519 = vmatmul.f32.gmra.mxu1 %v18825_v56 }
 0x1e2   : > { %v1762_v12 = vpop.f32.mrf.mxu2  ;;  %2917 = vmatpush.msrb.mxu3 %v13578_v22 }
 0x1e3   : > { %v1848_v50 = vadd.f32 %v1847_v34, %v1762_v12 }
 0x1e4   : > { %v1851_v44 = vpop.f32.mrf.mxu3  ;;  %2919 = vmatpush.msrb.mxu3 %v13613_v53  ;;  %v12261_v53 = vld [vmem:[%s18231_s3 + $0xd8] sm:$0xff] }
 0x1e5   : > { %v1909_v4 = vadd.f32 %v1908_v40, %v1848_v50  ;;  %v1913_v5 = vpop.f32.mrf.mxu0  ;;  %v18849_v40 = vld [vmem:[#allocation25_spill] sm:$0xff]  ;;  %v13664_v57 = vand.u32 4294901760, %v12261_v53 }
 0x1e6   : > { %v1985_v9 = vpop.f32.mrf.mxu1  ;;  %2921 = vmatpush.msrb.mxu3 %v2571_v24 }
 0x1e7   : > { %v13649_v11 = vadd.f32 %v1973_v47, %v1909_v4  ;;  %2333 = vmatmul.f32.gmra.mxu2 %v18846_v32  ;;  %v18848_v47 = vld [vmem:[#allocation14_spill] sm:$0xff]  ;;  %2984 = vmatpush.msrb.mxu0 %v13664_v57  ;;  %v13669_v50 = vsub.f32 %v12261_v53, %v13664_v57 }
 0x1e8   : > { %2466 = vmatmul.f32.gmra.mxu0 %v18825_v56 }
 0x1e9   : > { %2405 = vmatmul.f32.gmra.mxu3 %v18847_v30  ;;  %2523 = vmatmul.f32.gmra.mxu1 %v18827_v18 }
 0x1ea   : > { %v1770_v59 = vpop.f32.mrf.mxu2 }
 0x1eb   : > { %v1852_v14 = vadd.f32 %v1851_v44, %v1770_v59 }
 0x1ec   : > { %v1855_v34 = vpop.f32.mrf.mxu3 }
 0x1ed   : > { %v1914_v8 = vadd.f32 %v1913_v5, %v1852_v14  ;;  %v1918_v0 = vpop.f32.mrf.mxu0  ;;  %v18850_v14 = vld [vmem:[#allocation22_spill] sm:$0xff] }
 0x1ee   : > { %v1991_v22 = vpop.f32.mrf.mxu1 }
 0x1ef   : > { %v13656_v46 = vadd.f32 %v1979_v41, %v1914_v8  ;;  %2338 = vmatmul.f32.gmra.mxu2 %v18848_v47  ;;  %v18368_v8 = vand.u32 4294901760, %v13669_v50  ;;  %v18854_v47 = vld [vmem:[#allocation62_spill] sm:$0xff] }
 0x1f0   : > { %2470 = vmatmul.f32.gmra.mxu0 %v18827_v18 }
 0x1f1   : > { %2411 = vmatmul.f32.gmra.mxu3 %v18849_v40  ;;  %2527 = vmatmul.f32.gmra.mxu1 %v18831_v35 }
 0x1f2   : > { %v1778_v24 = vpop.f32.mrf.mxu2 }
 0x1f3   : > { %v1856_v12 = vadd.f32 %v1855_v34, %v1778_v24  ;;  %v3071_v34 = vsub.f32 %v13669_v50, %v18368_v8  ;;  %v18851_v8 = vld [vmem:[#allocation53_spill] sm:$0xff] }
 0x1f4   : > { %v1859_v41 = vpop.f32.mrf.mxu3 }
 0x1f5   : > { %v1919_v44 = vadd.f32 %v1918_v0, %v1856_v12  ;;  %v1923_v4 = vpop.f32.mrf.mxu0  ;;  %v3072_v12 = vand.u32 4294901760, %v3071_v34 }
 0x1f6   : > { %v1997_v5 = vpop.f32.mrf.mxu1 }
 0x1f7   : > { %v13671_v59 = vadd.f32 %v1985_v9, %v1919_v44  ;;  %2343 = vmatmul.f32.gmra.mxu2 %v18850_v14  ;;  %3073 = vmatpush.msrb.mxu1 %v3072_v12 }
 0x1f8   : > { %2474 = vmatmul.f32.gmra.mxu0 %v18831_v35 }
 0x1f9   : > { %2417 = vmatmul.f32.gmra.mxu3 %v13568_v16  ;;  %2531 = vmatmul.f32.gmra.mxu1 %v13541_v2  ;;  %v12260_v16 = vld [vmem:[%s18231_s3 + $0xd0] sm:$0xff] }
 0x1fa   : > { %v1786_v53 = vpop.f32.mrf.mxu2 }
 0x1fb   : > { %v1860_v0 = vadd.f32 %v1859_v41, %v1786_v53  ;;  %v13691_v41 = vand.u32 4294901760, %v12260_v16 }
 0x1fc   : > { %v1863_v24 = vpop.f32.mrf.mxu3 }
 0x1fd   : > { %v1924_v9 = vadd.f32 %v1923_v4, %v1860_v0  ;;  %v1928_v44 = vpop.f32.mrf.mxu0  ;;  %2986 = vmatpush.msrb.mxu0 %v13691_v41 }
 0x1fe   : > { %v13681_v14 = vpop.f32.mrf.mxu1 }
 0x1ff   : > { %v13683_v40 = vadd.f32 %v1991_v22, %v1924_v9  ;;  %2348 = vmatmul.f32.gmra.mxu2 %v13554_v43  ;;  %v18852_v43 = vld [vmem:[#allocation56_spill] sm:$0xff] }
 0x200   : > { %2478 = vmatmul.f32.gmra.mxu0 %v13541_v2 }
 0x201   : > { %2675 = vmatmul.f32.vlgmr.msra.gmra.mxu3 %v13059_v63  ;;  %2795 = vmatmul.f32.vlgmr.msra.gmra.mxu1 %v13080_v1  ;;  %v13705_v1 = vsub.f32 %v12260_v16, %v13691_v41 }
 0x202   : > { %3203 = vmatpush.msra.mxu3 %v13664_v57  ;;  %v1794_v4 = vpop.f32.mrf.mxu2 }
 0x203   : > { %v1864_v22 = vadd.f32 %v1863_v24, %v1794_v4  ;;  %v18371_v24 = vand.u32 4294901760, %v13705_v1 }
 0x204   : > { %v2083_v34 = vpop.f32.mrf.mxu3  ;;  %3205 = vmatpush.msra.mxu3 %v13691_v41 }
 0x205   : > { %v1929_v53 = vadd.f32 %v1928_v44, %v1864_v22  ;;  %v13697_v0 = vpop.f32.mrf.mxu0 }
 0x206   : > { %v13699_v12 = vpop.f32.mrf.mxu1 }
 0x207   : > { %v13701_v9 = vadd.f32 %v1997_v5, %v1929_v53  ;;  %2578 = vmatmul.f32.vlgmr.msra.gmra.mxu2 %v18851_v8  ;;  %v3077_v8 = vsub.f32 %v13705_v1, %v18371_v24 }
 0x208   : > { %2733 = vmatmul.f32.vlgmr.msra.gmra.mxu0 %v13071_v51  ;;  %3139 = vmatpush.msra.mxu2 %v13669_v50 }
 0x209   : > { %2679 = vmatmul.f32.gmra.mxu3 %v13082_v49  ;;  %2801 = vmatmul.f32.gmra.mxu1 %v13101_v13  ;;  %v3078_v51 = vand.u32 4294901760, %v3077_v8 }
 0x20a   : > { %v2030_v44 = vpop.f32.mrf.mxu2  ;;  %3142 = vmatpush.msra.mxu2 %v13705_v1 }
 0x20b   : > { %v2031_v4 = vadd.f32 %v2030_v44, %v13622_v28  ;;  %3079 = vmatpush.msrb.mxu1 %v3078_v51  ;;  %v12259_v28 = vld [vmem:[%s18231_s3 + $0xc8] sm:$0xff] }
 0x20c   : > { %v2087_v5 = vpop.f32.mrf.mxu3 }
 0x20d   : > { %v2084_v16 = vadd.f32 %v2083_v34, %v2031_v4  ;;  %v13717_v22 = vpop.f32.mrf.mxu0  ;;  %v13730_v34 = vand.u32 4294901760, %v12259_v28 }
 0x20e   : > { %v13719_v53 = vpop.f32.mrf.mxu1 }
 0x20f   : > { %v13722_v13 = vadd.f32 %v2084_v16, %v13502_v61  ;;  %2586 = vmatmul.f32.gmra.mxu2 %v18852_v43  ;;  %2988 = vmatpush.msrb.mxu0 %v13730_v34 }
 0x210   : > { %2738 = vmatmul.f32.gmra.mxu0 %v13090_v19  ;;  %3207 = vmatpush.msra.mxu3 %v13730_v34  ;;  %v18853_v19 = vld [vmem:[#allocation59_spill] sm:$0xff] }
 0x211   : > { %2683 = vmatmul.f32.gmra.mxu3 %v13103_v3  ;;  %2807 = vmatmul.f32.gmra.mxu1 %v13125_v15  ;;  %v3081_v15 = vsub.f32 %v12259_v28, %v13730_v34 }
 0x212   : > { %v2034_v44 = vpop.f32.mrf.mxu2 }
 0x213   : > { %v2035_v61 = vadd.f32 %v2034_v44, %v13628_v39  ;;  %v3082_v39 = vand.u32 4294901760, %v3081_v15  ;;  %3145 = vmatpush.msra.mxu2 %v3081_v15 }
 0x214   : > { %v2091_v4 = vpop.f32.mrf.mxu3 }
 0x215   : > { %v2088_v8 = vadd.f32 %v2087_v5, %v2035_v61  ;;  %v13736_v16 = vpop.f32.mrf.mxu0  ;;  %v3083_v43 = vsub.f32 %v3081_v15, %v3082_v39 }
 0x216   : > { %v13738_v51 = vpop.f32.mrf.mxu1 }
 0x217   : > { %v13741_v24 = vadd.f32 %v2088_v8, %v13511_v52  ;;  %2594 = vmatmul.f32.gmra.mxu2 %v18853_v19  ;;  %v3084_v8 = vand.u32 4294901760, %v3083_v43  ;;  %v2544_v43 = vrot.slane %v13515_v6, 2 }
 0x218   : > { %2743 = vmatmul.f32.gmra.mxu0 %v13112_v23  ;;  %v18857_v23 = vld [vmem:[#allocation65_spill] sm:$0xff] }
 0x219   : > { %2687 = vmatmul.f32.gmra.mxu3 %v13127_v27  ;;  %2813 = vmatmul.f32.gmra.mxu1 %v13149_v45  ;;  %v12258_v45 = vld [vmem:[%s18231_s3 + $0xc0] sm:$0xff] }
 0x21a   : > { %v2038_v5 = vpop.f32.mrf.mxu2  ;;  %3085 = vmatpush.msrb.mxu1 %v3084_v8  ;;  %v2989_v15 = vand.u32 4294901760, %v12258_v45 }
 0x21b   : > { %v2039_v44 = vadd.f32 %v2038_v5, %v13641_v62  ;;  %v2543_v62 = vrot.slane %v13430_v31, 2  ;;  %v18855_v5 = vand.u32 4294901760, %v13669_v50  ;;  %v18856_v31 = vand.u32 4294901760, %v13705_v1  ;;  %v18858_v50 = vld [vmem:[#allocation61_spill] sm:$0xff] }
 0x21c   : > { %v2095_v61 = vpop.f32.mrf.mxu3  ;;  %2990 = vmatpush.msrb.mxu0 %v2989_v15  ;;  %3209 = vmatpush.msra.mxu3 %v2989_v15 }
 0x21d   : > { %v2092_v2 = vadd.f32 %v2091_v4, %v2039_v44  ;;  %v13749_v52 = vpop.f32.mrf.mxu0 }
 0x21e   : > { %v13751_v19 = vpop.f32.mrf.mxu1  ;;  %3274 = vmatpush.msra.mxu0 %v18855_v5 }
 0x21f   : > { %v13754_v28 = vadd.f32 %v2092_v2, %v13525_v60  ;;  %2602 = vmatmul.f32.gmra.mxu2 %v18854_v47 }
 0x220   : > { %2748 = vmatmul.f32.gmra.mxu0 %v13136_v33  ;;  %v2545_v33 = vsel %vm1248_vm2, %v2543_v62, %v2544_v43 }
 0x221   : > { %2691 = vmatmul.f32.gmra.mxu3 %v13151_v38  ;;  %2819 = vmatmul.f32.gmra.mxu1 %v13173_v48 }
 0x222   : > { %v2042_v60 = vpop.f32.mrf.mxu2  ;;  %3278 = vmatpush.msra.mxu0 %v18856_v31 }
 0x223   : > { %v2043_v2 = vadd.f32 %v2042_v60, %v13649_v11  ;;  %v3087_v11 = vsub.f32 %v12258_v45, %v2989_v15  ;;  %v18859_v60 = vld [vmem:[#allocation66_spill] sm:$0xff] }
 0x224   : > { %v2099_v4 = vpop.f32.mrf.mxu3  ;;  %3282 = vmatpush.msra.mxu0 %v3082_v39 }
 0x225   : > { %v2096_v44 = vadd.f32 %v2095_v61, %v2043_v2  ;;  %v13768_v8 = vpop.f32.mrf.mxu0  ;;  %v2551_v61 = vsel %vm411_vm1, %v2545_v33, 0  ;;  %v3088_v62 = vand.u32 4294901760, %v3087_v11  ;;  %3148 = vmatpush.msra.mxu2 %v3087_v11 }
 0x226   : > { %v13773_v48 = vpop.f32.mrf.mxu1 }
 0x227   : > { %v13776_v6 = vadd.f32 %v2096_v44, %v13536_v42  ;;  %2610 = vmatmul.f32.gmra.mxu2 %v18857_v23  ;;  %v13784_v42 = vand.u32 4294901760, %v2551_v61  ;;  %v3089_v5 = vsub.f32 %v3087_v11, %v3088_v62  ;;  %3286 = vmatpush.msra.mxu0 %v3088_v62  ;;  %v18864_v11 = vld [vmem:[#allocation70_spill] sm:$0xff] }
 0x228   : > { %2753 = vmatmul.f32.gmra.mxu0 %v18858_v50 }
 0x229   : > { %2695 = vmatmul.f32.gmra.mxu3 %v13175_v58  ;;  %2825 = vmatmul.f32.gmra.mxu1 %v18859_v60  ;;  %v3090_v44 = vand.u32 4294901760, %v3089_v5  ;;  %v18860_v60 = vld [vmem:[#allocation69_spill] sm:$0xff]  ;;  %v13795_v50 = vsub.f32 %v2551_v61, %v13784_v42 }
 0x22a   : > { %v2046_v1 = vpop.f32.mrf.mxu2 }
 0x22b   : > { %v2047_v43 = vadd.f32 %v2046_v1, %v13656_v46  ;;  %18861 = vst [vmem:[#allocation4_spill] sm:$0xff] %v13795_v50  ;;  %3091 = vmatpush.msrb.mxu1 %v3090_v44  ;;  %v18862_v46 = vld [vmem:[#allocation67_spill] sm:$0xff]  ;;  %v18863_v1 = vld [vmem:[#allocation64_spill] sm:$0xff] }
 0x22c   : > { %v2103_v2 = vpop.f32.mrf.mxu3 }
 0x22d   : > { %v2100_v45 = vadd.f32 %v2099_v4, %v2047_v43  ;;  %v13786_v39 = vpop.f32.mrf.mxu0  ;;  %3333 = vmatpush.msra.mxu1 %v13664_v57 }
 0x22e   : > { %v13788_v31 = vpop.f32.mrf.mxu1 }
 0x22f   : > { %v13791_v33 = vadd.f32 %v2100_v45, %v13565_v54  ;;  %2618 = vmatmul.f32.gmra.mxu2 %v18860_v60  ;;  %v13803_v54 = vand.u32 4294901760, %v13795_v50  ;;  %3335 = vmatpush.msra.mxu1 %v13691_v41 }
 0x230   : > { %2758 = vmatmul.f32.gmra.mxu0 %v18863_v1 }
 0x231   : > { %2699 = vmatmul.f32.gmra.mxu3 %v18862_v46  ;;  %2831 = vmatmul.f32.gmra.mxu1 %v18864_v11  ;;  %18865 = vst [vmem:[#allocation10_spill] sm:$0xff] %v13803_v54  ;;  %v18866_v11 = vld [vmem:[#allocation71_spill] sm:$0xff]  ;;  %v2632_v57 = vsub.f32 %v13795_v50, %v13803_v54 }
 0x232   : > { %v2050_v4 = vpop.f32.mrf.mxu2  ;;  %3337 = vmatpush.msra.mxu1 %v13730_v34 }
 0x233   : > { %v2051_v62 = vadd.f32 %v2050_v4, %v13671_v59  ;;  %v18867_v59 = vld [vmem:[#allocation68_spill] sm:$0xff]  ;;  %v13821_v4 = vand.u32 4294901760, %v2632_v57 }
 0x234   : > { %v2107_v43 = vpop.f32.mrf.mxu3  ;;  %3339 = vmatpush.msra.mxu1 %v2989_v15 }
 0x235   : > { %v2104_v61 = vadd.f32 %v2103_v2, %v2051_v62  ;;  %v13806_v5 = vpop.f32.mrf.mxu0  ;;  %18868 = vst [vmem:[#allocation18_spill] sm:$0xff] %v13821_v4 }
 0x236   : > { %v13808_v45 = vpop.f32.mrf.mxu1 }
 0x237   : > { %v13812_v44 = vadd.f32 %v2104_v61, %v13589_v36  ;;  %2626 = vmatmul.f32.gmra.mxu2 %v18866_v11 }
 0x238   : > { %2763 = vmatmul.f32.gmra.mxu0 %v18867_v59 }
 0x239   : > { %2703 = vmatmul.f32.gmra.mxu3 %v13784_v42  ;;  %2837 = vmatmul.f32.gmra.mxu1 %v13803_v54  ;;  %v18869_v54 = vld [vmem:[#allocation30_spill] sm:$0xff] }
 0x23a   : > { %v2054_v41 = vpop.f32.mrf.mxu2 }
 0x23b   : > { %v2055_v2 = vadd.f32 %v2054_v41, %v13683_v40 }
 0x23c   : > { %v2111_v34 = vpop.f32.mrf.mxu3 }
 0x23d   : > { %v2108_v36 = vadd.f32 %v2107_v43, %v2055_v2  ;;  %v13823_v62 = vpop.f32.mrf.mxu0 }
 0x23e   : > { %v2504_v61 = vpop.f32.mrf.mxu1 }
 0x23f   : > { %v13826_v1 = vadd.f32 %v2108_v36, %v13605_v21  ;;  %2634 = vmatmul.f32.gmra.mxu2 %v13821_v4  ;;  %v18870_v21 = vld [vmem:[#allocation34_spill] sm:$0xff]  ;;  %v2257_v36 = vadd.f32 %v13681_v14, %v13697_v0  ;;  %v18872_v14 = vld [vmem:[#allocation36_spill] sm:$0xff] }
 0x240   : > { %2768 = vmatmul.f32.gmra.mxu0 %v13795_v50 }
 0x241   : > { %2923 = vmatmul.f32.vlgmr.msrb.gmra.mxu3 %v13059_v63  ;;  %3093 = vmatmul.f32.vlgmr.msrb.gmra.mxu1 %v18869_v54 }
 0x242   : > { %v2058_v15 = vpop.f32.mrf.mxu2 }
 0x243   : > { %v2059_v40 = vadd.f32 %v2058_v15, %v13701_v9 }
 0x244   : > { %v2376_v57 = vpop.f32.mrf.mxu3 }
 0x245   : > { %v2112_v41 = vadd.f32 %v2111_v34, %v2059_v40  ;;  %v2451_v43 = vpop.f32.mrf.mxu0 }
 0x246   : > { %v2508_v2 = vpop.f32.mrf.mxu1 }
 0x247   : > { %v13834_v59 = vadd.f32 %v2112_v41, %v13620_v7  ;;  %2870 = vmatmul.f32.vlgmr.msrb.gmra.mxu2 %v13059_v63  ;;  %v18871_v63 = vld [vmem:[#allocation39_spill] sm:$0xff]  ;;  %v2261_v7 = vadd.f32 %v13699_v12, %v13717_v22  ;;  %v2265_v12 = vadd.f32 %v13719_v53, %v13736_v16  ;;  %v2269_v53 = vadd.f32 %v13738_v51, %v13749_v52  ;;  %v18875_v51 = vld [vmem:[#allocation49_spill] sm:$0xff] }
 0x248   : > { %2996 = vmatmul.f32.vlgmr.msrb.gmra.mxu0 %v18870_v21  ;;  %v2273_v52 = vadd.f32 %v13751_v19, %v13768_v8 }
 0x249   : > { %2927 = vmatmul.f32.gmra.mxu3 %v13082_v49  ;;  %3097 = vmatmul.f32.gmra.mxu1 %v12908_v37 }
 0x24a   : > { %v2314_v50 = vpop.f32.mrf.mxu2 }
 0x24b   : > { %v2315_v9 = vadd.f32 %v2314_v50, %v2257_v36 }
 0x24c   : > { %v2382_v15 = vpop.f32.mrf.mxu3 }
 0x24d   : > { %v2377_v34 = vadd.f32 %v2376_v57, %v2315_v9  ;;  %v2455_v40 = vpop.f32.mrf.mxu0 }
 0x24e   : > { %v2512_v4 = vpop.f32.mrf.mxu1 }
 0x24f   : > { %v2452_v11 = vadd.f32 %v2451_v43, %v2377_v34  ;;  %2874 = vmatmul.f32.gmra.mxu2 %v13082_v49 }
 0x250   : > { %3004 = vmatmul.f32.gmra.mxu0 %v18871_v63  ;;  %v18873_v63 = vld [vmem:[#allocation43_spill] sm:$0xff] }
 0x251   : > { %2931 = vmatmul.f32.gmra.mxu3 %v13103_v3  ;;  %v2505_v41 = vadd.f32 %v2504_v61, %v2452_v11  ;;  %3101 = vmatmul.f32.gmra.mxu1 %v18872_v14 }
 0x252   : > { %v2319_v0 = vpop.f32.mrf.mxu2 }
 0x253   : > { %v13849_v50 = vadd.f32 %v2505_v41, %v13722_v13  ;;  %v2320_v57 = vadd.f32 %v2319_v0, %v2261_v7 }
 0x254   : > { %v2388_v21 = vpop.f32.mrf.mxu3 }
 0x255   : > { %v2383_v36 = vadd.f32 %v2382_v15, %v2320_v57  ;;  %v2459_v43 = vpop.f32.mrf.mxu0  ;;  %v18874_v57 = vld [vmem:[#allocation45_spill] sm:$0xff] }
 0x256   : > { %v2516_v9 = vpop.f32.mrf.mxu1 }
 0x257   : > { %v2456_v34 = vadd.f32 %v2455_v40, %v2383_v36  ;;  %2878 = vmatmul.f32.gmra.mxu2 %v13103_v3 }
 0x258   : > { %3012 = vmatmul.f32.gmra.mxu0 %v18873_v63 }
 0x259   : > { %2935 = vmatmul.f32.gmra.mxu3 %v13127_v27  ;;  %v2509_v22 = vadd.f32 %v2508_v2, %v2456_v34  ;;  %3105 = vmatmul.f32.gmra.mxu1 %v18800_v17 }
 0x25a   : > { %v2324_v13 = vpop.f32.mrf.mxu2 }
 0x25b   : > { %v13858_v11 = vadd.f32 %v2509_v22, %v13741_v24  ;;  %v2325_v61 = vadd.f32 %v2324_v13, %v2265_v12  ;;  %v13870_v12 = vld [vmem:[%s12576_s26 + $0x90] sm:$0xff] }
 0x25c   : > { %v2394_v15 = vpop.f32.mrf.mxu3  ;;  %v2969_v13 = vsel %vm411_vm1, %v13870_v12, 0 }
 0x25d   : > { %v2389_v7 = vadd.f32 %v2388_v21, %v2325_v61  ;;  %v2463_v40 = vpop.f32.mrf.mxu0 }
 0x25e   : > { %v2520_v41 = vpop.f32.mrf.mxu1 }
 0x25f   : > { %v2460_v0 = vadd.f32 %v2459_v43, %v2389_v7  ;;  %2882 = vmatmul.f32.gmra.mxu2 %v13127_v27 }
 0x260   : > { %3020 = vmatmul.f32.gmra.mxu0 %v18874_v57  ;;  %v13886_v57 = vand.u32 4294901760, %v2969_v13 }
 0x261   : > { %2939 = vmatmul.f32.gmra.mxu3 %v13151_v38  ;;  %v2513_v16 = vadd.f32 %v2512_v4, %v2460_v0  ;;  %3109 = vmatmul.f32.gmra.mxu1 %v12976_v10  ;;  %v12265_v0 = vld [vmem:[%s18231_s3 + $0xf8] sm:$0xff] }
 0x262   : > { %v2329_v24 = vpop.f32.mrf.mxu2 }
 0x263   : > { %v13867_v2 = vadd.f32 %v2513_v16, %v13754_v28  ;;  %v2330_v21 = vadd.f32 %v2329_v24, %v2269_v53  ;;  %v18876_v28 = vld [vmem:[#allocation47_spill] sm:$0xff]  ;;  %v13888_v53 = vand.u32 4294901760, %v12265_v0 }
 0x264   : > { %v2400_v36 = vpop.f32.mrf.mxu3  ;;  %v18877_v24 = vld [vmem:[#allocation51_spill] sm:$0xff] }
 0x265   : > { %v2395_v34 = vadd.f32 %v2394_v15, %v2330_v21  ;;  %v2467_v43 = vpop.f32.mrf.mxu0  ;;  %3405 = vmatpush.msrb.mxu2 %v13888_v53  ;;  %v13892_v16 = vsub.f32 %v12265_v0, %v13888_v53  ;;  %3624 = vmatpush.msrb.mxu1 %v13888_v53  ;;  %v13899_v21 = vsub.f32 %v2969_v13, %v13886_v57 }
 0x266   : > { %v2524_v63 = vpop.f32.mrf.mxu1 }
 0x267   : > { %v2464_v22 = vadd.f32 %v2463_v40, %v2395_v34  ;;  %2886 = vmatmul.f32.gmra.mxu2 %v13151_v38  ;;  %v2277_v34 = vadd.f32 %v13773_v48, %v13786_v39  ;;  %3560 = vmatpush.msrb.mxu0 %v13892_v16 }
 0x268   : > { %3028 = vmatmul.f32.gmra.mxu0 %v18875_v51  ;;  %v18878_v51 = vld [vmem:[#allocation38_spill] sm:$0xff] }
 0x269   : > { %2943 = vmatmul.f32.gmra.mxu3 %v13175_v58  ;;  %v2517_v4 = vadd.f32 %v2516_v9, %v2464_v22  ;;  %3113 = vmatmul.f32.gmra.mxu1 %v18876_v28 }
 0x26a   : > { %v2334_v61 = vpop.f32.mrf.mxu2 }
 0x26b   : > { %v13881_v15 = vadd.f32 %v2517_v4, %v13776_v6  ;;  %v2335_v7 = vadd.f32 %v2334_v61, %v2273_v52 }
 0x26c   : > { %v2406_v40 = vpop.f32.mrf.mxu3 }
 0x26d   : > { %v2401_v19 = vadd.f32 %v2400_v36, %v2335_v7  ;;  %v2471_v8 = vpop.f32.mrf.mxu0  ;;  %v18385_v36 = vand.u32 4294901760, %v13892_v16  ;;  %v18383_v7 = vand.u32 4294901760, %v13899_v21 }
 0x26e   : > { %v2528_v9 = vpop.f32.mrf.mxu1 }
 0x26f   : > { %v2468_v6 = vadd.f32 %v2467_v43, %v2401_v19  ;;  %2890 = vmatmul.f32.gmra.mxu2 %v13175_v58  ;;  %v3492_v52 = vsub.f32 %v13892_v16, %v18385_v36  ;;  %v18881_v36 = vld [vmem:[#allocation31_spill] sm:$0xff] }
 0x270   : > { %3036 = vmatmul.f32.gmra.mxu0 %v18877_v24  ;;  %v3050_v24 = vsub.f32 %v13899_v21, %v18383_v7 }
 0x271   : > { %2947 = vmatmul.f32.gmra.mxu3 %v18862_v46  ;;  %v2521_v22 = vadd.f32 %v2520_v41, %v2468_v6  ;;  %3117 = vmatmul.f32.gmra.mxu1 %v18878_v51  ;;  %v3493_v0 = vand.u32 4294901760, %v3492_v52  ;;  %v12264_v6 = vld [vmem:[%s18231_s3 + $0xf0] sm:$0xff] }
 0x272   : > { %v2339_v43 = vpop.f32.mrf.mxu2 }
 0x273   : > { %v13910_v4 = vadd.f32 %v2521_v22, %v13791_v33  ;;  %v2340_v13 = vadd.f32 %v2339_v43, %v2277_v34  ;;  %3494 = vmatpush.msrb.mxu3 %v3493_v0  ;;  %v18879_v33 = vld [vmem:[#allocation74_spill] sm:$0xff]  ;;  %v13922_v34 = vand.u32 4294901760, %v12264_v6 }
 0x274   : > { %v2412_v61 = vpop.f32.mrf.mxu3 }
 0x275   : > { %v2407_v19 = vadd.f32 %v2406_v40, %v2340_v13  ;;  %v2475_v48 = vpop.f32.mrf.mxu0  ;;  %v2281_v40 = vadd.f32 %v13788_v31, %v13806_v5  ;;  %3407 = vmatpush.msrb.mxu2 %v13922_v34  ;;  %v13929_v43 = vsub.f32 %v12264_v6, %v13922_v34  ;;  %3626 = vmatpush.msrb.mxu1 %v13922_v34 }
 0x276   : > { %v2532_v39 = vpop.f32.mrf.mxu1 }
 0x277   : > { %v2472_v41 = vadd.f32 %v2471_v8, %v2407_v19  ;;  %2894 = vmatmul.f32.gmra.mxu2 %v18862_v46  ;;  %v3051_v19 = vand.u32 4294901760, %v3050_v24  ;;  %3563 = vmatpush.msrb.mxu0 %v13929_v43  ;;  %v2285_v24 = vadd.f32 %v13808_v45, %v13823_v62  ;;  %v12263_v45 = vld [vmem:[%s18231_s3 + $0xe8] sm:$0xff] }
 0x278   : > { %3044 = vmatmul.f32.gmra.mxu0 %v18879_v33  ;;  %v18384_v33 = vand.u32 4294901760, %v13929_v43  ;;  %v18882_v62 = vld [vmem:[#allocation35_spill] sm:$0xff] }
 0x279   : > { %2951 = vmatmul.f32.gmra.mxu3 %v13784_v42  ;;  %v2525_v8 = vadd.f32 %v2524_v63, %v2472_v41  ;;  %3121 = vmatmul.f32.gmra.mxu1 %v13886_v57 }
 0x27a   : > { %v2344_v22 = vpop.f32.mrf.mxu2  ;;  %v3498_v41 = vsub.f32 %v13929_v43, %v18384_v33 }
 0x27b   : > { %v13933_v52 = vadd.f32 %v2525_v8, %v13812_v44  ;;  %v2345_v13 = vadd.f32 %v2344_v22, %v2281_v40  ;;  %v18880_v44 = vld [vmem:[#allocation32_spill] sm:$0xff] }
 0x27c   : > { %v2418_v0 = vpop.f32.mrf.mxu3  ;;  %v3499_v40 = vand.u32 4294901760, %v3498_v41 }
 0x27d   : > { %v2413_v31 = vadd.f32 %v2412_v61, %v2345_v13  ;;  %v2479_v5 = vpop.f32.mrf.mxu0 }
 0x27e   : > { %v2796_v63 = vpop.f32.mrf.mxu1  ;;  %3500 = vmatpush.msrb.mxu3 %v3499_v40 }
 0x27f   : > { %v2476_v6 = vadd.f32 %v2475_v48, %v2413_v31  ;;  %2898 = vmatmul.f32.gmra.mxu2 %v13784_v42 }
 0x280   : > { %3052 = vmatmul.f32.gmra.mxu0 %v3051_v19 }
 0x281   : > { %3213 = vmatmul.f32.vlgmr.msra.gmra.mxu3 %v18880_v44  ;;  %v2529_v8 = vadd.f32 %v2528_v9, %v2476_v6  ;;  %3341 = vmatmul.f32.vlgmr.msra.gmra.mxu1 %v18869_v54  ;;  %v13954_v9 = vand.u32 4294901760, %v12263_v45 }
 0x282   : > { %v2349_v61 = vpop.f32.mrf.mxu2 }
 0x283   : > { %v13946_v22 = vadd.f32 %v2529_v8, %v13826_v1  ;;  %v2350_v13 = vadd.f32 %v2349_v61, %v2285_v24  ;;  %3409 = vmatpush.msrb.mxu2 %v13954_v9  ;;  %3628 = vmatpush.msrb.mxu1 %v13954_v9  ;;  %v18883_v61 = vld [vmem:[#allocation33_spill] sm:$0xff] }
 0x284   : > { %v2676_v7 = vpop.f32.mrf.mxu3 }
 0x285   : > { %v2419_v48 = vadd.f32 %v2418_v0, %v2350_v13  ;;  %v2734_v31 = vpop.f32.mrf.mxu0  ;;  %v3502_v0 = vsub.f32 %v12263_v45, %v13954_v9  ;;  %v18884_v13 = vld [vmem:[#allocation40_spill] sm:$0xff] }
 0x286   : > { %v2802_v33 = vpop.f32.mrf.mxu1 }
 0x287   : > { %v2480_v19 = vadd.f32 %v2479_v5, %v2419_v48  ;;  %3151 = vmatmul.f32.vlgmr.msra.gmra.mxu2 %v18881_v36  ;;  %v3503_v44 = vand.u32 4294901760, %v3502_v0  ;;  %3566 = vmatpush.msrb.mxu0 %v3502_v0 }
 0x288   : > { %3288 = vmatmul.f32.vlgmr.msra.gmra.mxu0 %v18869_v54 }
 0x289   : > { %3219 = vmatmul.f32.gmra.mxu3 %v18882_v62  ;;  %v2533_v1 = vadd.f32 %v2532_v39, %v2480_v19  ;;  %3345 = vmatmul.f32.gmra.mxu1 %v12908_v37  ;;  %v3504_v39 = vsub.f32 %v3502_v0, %v3503_v44  ;;  %v18886_v0 = vld [vmem:[#allocation42_spill] sm:$0xff] }
 0x28a   : > { %v2579_v41 = vpop.f32.mrf.mxu2 }
 0x28b   : > { %v13961_v36 = vadd.f32 %v2533_v1, %v13834_v59  ;;  %v2677_v5 = vadd.f32 %v2676_v7, %v2579_v41  ;;  %v3505_v48 = vand.u32 4294901760, %v3504_v39  ;;  %v12262_v41 = vld [vmem:[%s18231_s3 + $0xe0] sm:$0xff] }
 0x28c   : > { %v2680_v6 = vpop.f32.mrf.mxu3 }
 0x28d   : > { %v2735_v54 = vadd.f32 %v2734_v31, %v2677_v5  ;;  %v2739_v40 = vpop.f32.mrf.mxu0  ;;  %3506 = vmatpush.msrb.mxu3 %v3505_v48  ;;  %v18888_v48 = vand.u32 4294901760, %v13929_v43 }
 0x28e   : > { %v2808_v24 = vpop.f32.mrf.mxu1 }
 0x28f   : > { %v13963_v8 = vadd.f32 %v2796_v63, %v2735_v54  ;;  %3156 = vmatmul.f32.gmra.mxu2 %v18883_v61  ;;  %v18885_v63 = vld [vmem:[#allocation37_spill] sm:$0xff] }
 0x290   : > { %3292 = vmatmul.f32.gmra.mxu0 %v12908_v37  ;;  %v3410_v37 = vand.u32 4294901760, %v12262_v41 }
 0x291   : > { %3225 = vmatmul.f32.gmra.mxu3 %v18884_v13  ;;  %3349 = vmatmul.f32.gmra.mxu1 %v18872_v14 }
 0x292   : > { %v2587_v59 = vpop.f32.mrf.mxu2  ;;  %3411 = vmatpush.msrb.mxu2 %v3410_v37  ;;  %3630 = vmatpush.msrb.mxu1 %v3410_v37 }
 0x293   : > { %v2681_v7 = vadd.f32 %v2680_v6, %v2587_v59  ;;  %v3508_v6 = vsub.f32 %v12262_v41, %v3410_v37 }
 0x294   : > { %v2684_v19 = vpop.f32.mrf.mxu3 }
 0x295   : > { %v2740_v45 = vadd.f32 %v2739_v40, %v2681_v7  ;;  %v2744_v31 = vpop.f32.mrf.mxu0  ;;  %v18887_v40 = vand.u32 4294901760, %v13892_v16  ;;  %v3509_v39 = vand.u32 4294901760, %v3508_v6  ;;  %3569 = vmatpush.msrb.mxu0 %v3508_v6 }
 0x296   : > { %v2814_v62 = vpop.f32.mrf.mxu1 }
 0x297   : > { %v13969_v1 = vadd.f32 %v2802_v33, %v2740_v45  ;;  %3161 = vmatmul.f32.gmra.mxu2 %v18885_v63  ;;  %v3510_v59 = vsub.f32 %v3508_v6, %v3509_v39  ;;  %v18889_v45 = vld [vmem:[#allocation41_spill] sm:$0xff]  ;;  %v18890_v63 = vld [vmem:[#allocation46_spill] sm:$0xff]  ;;  %v18891_v6 = vld [vmem:[#allocation44_spill] sm:$0xff] }
 0x298   : > { %3296 = vmatmul.f32.gmra.mxu0 %v18872_v14  ;;  %3695 = vmatpush.msra.mxu2 %v18887_v40 }
 0x299   : > { %3231 = vmatmul.f32.gmra.mxu3 %v18886_v0  ;;  %3353 = vmatmul.f32.gmra.mxu1 %v18800_v17 }
 0x29a   : > { %v2595_v5 = vpop.f32.mrf.mxu2  ;;  %3699 = vmatpush.msra.mxu2 %v18888_v48 }
 0x29b   : > { %v2685_v54 = vadd.f32 %v2684_v19, %v2595_v5  ;;  %v3511_v19 = vand.u32 4294901760, %v3510_v59 }
 0x29c   : > { %v2688_v33 = vpop.f32.mrf.mxu3  ;;  %3703 = vmatpush.msra.mxu2 %v3503_v44 }
 0x29d   : > { %v2745_v61 = vadd.f32 %v2744_v31, %v2685_v54  ;;  %v2749_v13 = vpop.f32.mrf.mxu0  ;;  %3512 = vmatpush.msrb.mxu3 %v3511_v19 }
 0x29e   : > { %v2820_v14 = vpop.f32.mrf.mxu1  ;;  %3707 = vmatpush.msra.mxu2 %v3509_v39 }
 0x29f   : > { %v13982_v7 = vadd.f32 %v2808_v24, %v2745_v61  ;;  %3166 = vmatmul.f32.gmra.mxu2 %v18889_v45  ;;  %3754 = vmatpush.msra.mxu3 %v13888_v53  ;;  %v18894_v61 = vld [vmem:[#allocation73_spill] sm:$0xff] }
 0x2a0   : > { %3300 = vmatmul.f32.gmra.mxu0 %v18800_v17  ;;  %v18892_v17 = vld [vmem:[#allocation50_spill] sm:$0xff] }
 0x2a1   : > { %3237 = vmatmul.f32.gmra.mxu3 %v18890_v63  ;;  %3357 = vmatmul.f32.gmra.mxu1 %v12976_v10 }
 0x2a2   : > { %v2603_v16 = vpop.f32.mrf.mxu2  ;;  %3756 = vmatpush.msra.mxu3 %v13922_v34 }
 0x2a3   : > { %v2689_v31 = vadd.f32 %v2688_v33, %v2603_v16  ;;  %v18895_v16 = vld [vmem:[#allocation72_spill] sm:$0xff] }
 0x2a4   : > { %v2692_v41 = vpop.f32.mrf.mxu3  ;;  %3758 = vmatpush.msra.mxu3 %v13954_v9  ;;  %v12269_v9 = vld [vmem:[%s18231_s3 + $0x118] sm:$0xff] }
 0x2a5   : > { %v2750_v43 = vadd.f32 %v2749_v13, %v2689_v31  ;;  %v2754_v24 = vpop.f32.mrf.mxu0  ;;  %v18896_v31 = vand.u32 4294901760, %v13899_v21 }
 0x2a6   : > { %v2826_v0 = vpop.f32.mrf.mxu1  ;;  %3760 = vmatpush.msra.mxu3 %v3410_v37 }
 0x2a7   : > { %v13990_v5 = vadd.f32 %v2814_v62, %v2750_v43  ;;  %3171 = vmatmul.f32.gmra.mxu2 %v18891_v6  ;;  %v18893_v62 = vld [vmem:[#allocation48_spill] sm:$0xff] }
 0x2a8   : > { %3304 = vmatmul.f32.gmra.mxu0 %v12976_v10  ;;  %v14005_v10 = vand.u32 4294901760, %v12269_v9 }
 0x2a9   : > { %3243 = vmatmul.f32.gmra.mxu3 %v18892_v17  ;;  %3361 = vmatmul.f32.gmra.mxu1 %v18876_v28 }
 0x2aa   : > { %v2611_v53 = vpop.f32.mrf.mxu2  ;;  %3825 = vmatpush.msra.mxu0 %v14005_v10 }
 0x2ab   : > { %v2693_v44 = vadd.f32 %v2692_v41, %v2611_v53 }
 0x2ac   : > { %v2696_v54 = vpop.f32.mrf.mxu3 }
 0x2ad   : > { %v2755_v33 = vadd.f32 %v2754_v24, %v2693_v44  ;;  %v2759_v40 = vpop.f32.mrf.mxu0 }
 0x2ae   : > { %v2832_v34 = vpop.f32.mrf.mxu1 }
 0x2af   : > { %v13997_v39 = vadd.f32 %v2820_v14, %v2755_v33  ;;  %3176 = vmatmul.f32.gmra.mxu2 %v18893_v62  ;;  %v14010_v14 = vsub.f32 %v12269_v9, %v14005_v10 }
 0x2b0   : > { %3308 = vmatmul.f32.gmra.mxu0 %v18876_v28 }
 0x2b1   : > { %3249 = vmatmul.f32.gmra.mxu3 %v18894_v61  ;;  %3365 = vmatmul.f32.gmra.mxu1 %v18878_v51  ;;  %v3911_v28 = vand.u32 4294901760, %v14010_v14 }
 0x2b2   : > { %v2619_v37 = vpop.f32.mrf.mxu2 }
 0x2b3   : > { %v2697_v13 = vadd.f32 %v2696_v54, %v2619_v37  ;;  %v3912_v41 = vsub.f32 %v14010_v14, %v3911_v28  ;;  %v18897_v37 = vld [vmem:[#allocation26_spill] sm:$0xff] }
 0x2b4   : > { %v2700_v48 = vpop.f32.mrf.mxu3 }
 0x2b5   : > { %v2760_v59 = vadd.f32 %v2759_v40, %v2697_v13  ;;  %v2764_v45 = vpop.f32.mrf.mxu0  ;;  %v18898_v13 = vld [vmem:[#allocation21_spill] sm:$0xff] }
 0x2b6   : > { %v2838_v63 = vpop.f32.mrf.mxu1 }
 0x2b7   : > { %v14012_v19 = vadd.f32 %v2826_v0, %v2760_v59  ;;  %3181 = vmatmul.f32.gmra.mxu2 %v18895_v16  ;;  %v3913_v0 = vand.u32 4294901760, %v3912_v41  ;;  %v18900_v59 = vld [vmem:[#allocation27_spill] sm:$0xff] }
 0x2b8   : > { %3312 = vmatmul.f32.gmra.mxu0 %v18878_v51  ;;  %v12268_v51 = vld [vmem:[%s18231_s3 + $0x110] sm:$0xff] }
 0x2b9   : > { %3255 = vmatmul.f32.gmra.mxu3 %v18896_v31  ;;  %3369 = vmatmul.f32.gmra.mxu1 %v13886_v57  ;;  %v14033_v33 = vand.u32 4294901760, %v12268_v51 }
 0x2ba   : > { %v2627_v43 = vpop.f32.mrf.mxu2  ;;  %3914 = vmatpush.msra.mxu1 %v3913_v0 }
 0x2bb   : > { %v2701_v24 = vadd.f32 %v2700_v48, %v2627_v43  ;;  %3827 = vmatpush.msra.mxu0 %v14033_v33  ;;  %v18899_v48 = vld [vmem:[#allocation15_spill] sm:$0xff] }
 0x2bc   : > { %v2704_v6 = vpop.f32.mrf.mxu3 }
 0x2bd   : > { %v2765_v17 = vadd.f32 %v2764_v45, %v2701_v24  ;;  %v2769_v53 = vpop.f32.mrf.mxu0 }
 0x2be   : > { %v14023_v44 = vpop.f32.mrf.mxu1 }
 0x2bf   : > { %v14025_v54 = vadd.f32 %v2832_v34, %v2765_v17  ;;  %3186 = vmatmul.f32.gmra.mxu2 %v13899_v21 }
 0x2c0   : > { %3316 = vmatmul.f32.gmra.mxu0 %v13886_v57 }
 0x2c1   : > { %3514 = vmatmul.f32.vlgmr.msrb.gmra.mxu3 %v18819_v25  ;;  %3634 = vmatmul.f32.vlgmr.msrb.gmra.mxu1 %v18837_v55  ;;  %v14047_v55 = vsub.f32 %v12268_v51, %v14033_v33  ;;  %v18902_v51 = vld [vmem:[#allocation23_spill] sm:$0xff] }
 0x2c2   : > { %4044 = vmatpush.msrb.mxu3 %v14005_v10  ;;  %v2635_v40 = vpop.f32.mrf.mxu2 }
 0x2c3   : > { %v2705_v34 = vadd.f32 %v2704_v6, %v2635_v40  ;;  %v3917_v45 = vand.u32 4294901760, %v14047_v55 }
 0x2c4   : > { %v2924_v62 = vpop.f32.mrf.mxu3  ;;  %4046 = vmatpush.msrb.mxu3 %v14033_v33 }
 0x2c5   : > { %v2770_v21 = vadd.f32 %v2769_v53, %v2705_v34  ;;  %v14039_v9 = vpop.f32.mrf.mxu0  ;;  %v3918_v41 = vsub.f32 %v14047_v55, %v3917_v45  ;;  %v18901_v53 = vld [vmem:[#allocation29_spill] sm:$0xff]  ;;  %v18903_v34 = vld [vmem:[#allocation6_spill] sm:$0xff] }
 0x2c6   : > { %v14041_v61 = vpop.f32.mrf.mxu1 }
 0x2c7   : > { %v14043_v57 = vadd.f32 %v2838_v63, %v2770_v21  ;;  %3417 = vmatmul.f32.vlgmr.msrb.gmra.mxu2 %v18897_v37  ;;  %v3919_v6 = vand.u32 4294901760, %v3918_v41 }
 0x2c8   : > { %3572 = vmatmul.f32.vlgmr.msrb.gmra.mxu0 %v18899_v48  ;;  %3980 = vmatpush.msrb.mxu2 %v14010_v14  ;;  %v18907_v14 = vld [vmem:[#allocation14_spill] sm:$0xff] }
 0x2c9   : > { %3518 = vmatmul.f32.gmra.mxu3 %v18898_v13  ;;  %3640 = vmatmul.f32.gmra.mxu1 %v18900_v59 }
 0x2ca   : > { %v2871_v16 = vpop.f32.mrf.mxu2  ;;  %3983 = vmatpush.msrb.mxu2 %v14047_v55  ;;  %3920 = vmatpush.msra.mxu1 %v3919_v6 }
 0x2cb   : > { %v2872_v31 = vadd.f32 %v2871_v16, %v13963_v8  ;;  %v12267_v8 = vld [vmem:[%s18231_s3 + $0x108] sm:$0xff] }
 0x2cc   : > { %v2928_v63 = vpop.f32.mrf.mxu3  ;;  %v14072_v40 = vand.u32 4294901760, %v12267_v8 }
 0x2cd   : > { %v2925_v43 = vadd.f32 %v2924_v62, %v2872_v31  ;;  %v14059_v24 = vpop.f32.mrf.mxu0  ;;  %v18904_v31 = vld [vmem:[#allocation13_spill] sm:$0xff] }
 0x2ce   : > { %v14061_v0 = vpop.f32.mrf.mxu1  ;;  %3829 = vmatpush.msra.mxu0 %v14072_v40  ;;  %4048 = vmatpush.msrb.mxu3 %v14072_v40  ;;  %v3922_v41 = vsub.f32 %v12267_v8, %v14072_v40  ;;  %v14096_v8 = vld [vmem:[%s12576_s26 + $0x98] sm:$0x3] }
 0x2cf   : > { %v14064_v17 = vadd.f32 %v2925_v43, %v13849_v50  ;;  %3425 = vmatmul.f32.gmra.mxu2 %v18901_v53 }
 0x2d0   : > { %3577 = vmatmul.f32.gmra.mxu0 %v18902_v51  ;;  %3986 = vmatpush.msrb.mxu2 %v3922_v41 }
 0x2d1   : > { %3522 = vmatmul.f32.gmra.mxu3 %v18823_v20  ;;  %3646 = vmatmul.f32.gmra.mxu1 %v18903_v34 }
 0x2d2   : > { %v2875_v62 = vpop.f32.mrf.mxu2 }
 0x2d3   : > { %v2876_v50 = vadd.f32 %v2875_v62, %v13969_v1  ;;  %v3923_v1 = vand.u32 4294901760, %v3922_v41 }
 0x2d4   : > { %v2932_v21 = vpop.f32.mrf.mxu3 }
 0x2d5   : > { %v2929_v37 = vadd.f32 %v2928_v63, %v2876_v50  ;;  %v14078_v48 = vpop.f32.mrf.mxu0  ;;  %v3924_v53 = vsub.f32 %v3922_v41, %v3923_v1 }
 0x2d6   : > { %v14080_v59 = vpop.f32.mrf.mxu1 }
 0x2d7   : > { %v14083_v16 = vadd.f32 %v2929_v37, %v13858_v11  ;;  %3433 = vmatmul.f32.gmra.mxu2 %v18904_v31  ;;  %v3925_v34 = vand.u32 4294901760, %v3924_v53  ;;  %v3383_v37 = vrot.slane %v14096_v8, 1 }
 0x2d8   : > { %3582 = vmatmul.f32.gmra.mxu0 %v18844_v29  ;;  %v18905_v29 = vld [vmem:[#allocation16_spill] sm:$0xff] }
 0x2d9   : > { %3526 = vmatmul.f32.gmra.mxu3 %v18825_v56  ;;  %3652 = vmatmul.f32.gmra.mxu1 %v18845_v26  ;;  %v12266_v26 = vld [vmem:[%s18231_s3 + $0x100] sm:$0xff] }
 0x2da   : > { %v2879_v63 = vpop.f32.mrf.mxu2  ;;  %3926 = vmatpush.msra.mxu1 %v3925_v34 }
 0x2db   : > { %v2880_v43 = vadd.f32 %v2879_v63, %v13982_v7  ;;  %v3830_v7 = vand.u32 4294901760, %v12266_v26 }
 0x2dc   : > { %v2936_v6 = vpop.f32.mrf.mxu3 }
 0x2dd   : > { %v2933_v11 = vadd.f32 %v2932_v21, %v2880_v43  ;;  %v14091_v51 = vpop.f32.mrf.mxu0  ;;  %v3382_v21 = vrot.slane %v13870_v12, 1  ;;  %3831 = vmatpush.msra.mxu0 %v3830_v7  ;;  %4050 = vmatpush.msrb.mxu3 %v3830_v7 }
 0x2de   : > { %v14093_v62 = vpop.f32.mrf.mxu1 }
 0x2df   : > { %v14099_v50 = vadd.f32 %v2933_v11, %v13867_v2  ;;  %3441 = vmatmul.f32.gmra.mxu2 %v18905_v29  ;;  %4115 = vmatpush.msrb.mxu0 %v3911_v28  ;;  %v18906_v11 = vld [vmem:[#allocation24_spill] sm:$0xff] }
 0x2e0   : > { %3587 = vmatmul.f32.gmra.mxu0 %v18846_v32  ;;  %v3384_v32 = vsel %vm381_vm0, %v3382_v21, %v3383_v37 }
 0x2e1   : > { %3530 = vmatmul.f32.gmra.mxu3 %v18827_v18  ;;  %3658 = vmatmul.f32.gmra.mxu1 %v18847_v30  ;;  %v3390_v28 = vsel %vm411_vm1, %v3384_v32, 0 }
 0x2e2   : > { %v2883_v2 = vpop.f32.mrf.mxu2  ;;  %4119 = vmatpush.msrb.mxu0 %v3917_v45 }
 0x2e3   : > { %v2884_v31 = vadd.f32 %v2883_v2, %v13990_v5  ;;  %v3928_v5 = vsub.f32 %v12266_v26, %v3830_v7 }
 0x2e4   : > { %v2940_v41 = vpop.f32.mrf.mxu3  ;;  %4123 = vmatpush.msrb.mxu0 %v3923_v1 }
 0x2e5   : > { %v2937_v63 = vadd.f32 %v2936_v6, %v2884_v31  ;;  %v14113_v43 = vpop.f32.mrf.mxu0  ;;  %v18908_v6 = vld [vmem:[#allocation25_spill] sm:$0xff]  ;;  %v3929_v34 = vand.u32 4294901760, %v3928_v5  ;;  %3989 = vmatpush.msrb.mxu2 %v3928_v5 }
 0x2e6   : > { %v14118_v30 = vpop.f32.mrf.mxu1 }
 0x2e7   : > { %v14121_v53 = vadd.f32 %v2937_v63, %v13881_v15  ;;  %3449 = vmatmul.f32.gmra.mxu2 %v18906_v11  ;;  %v14129_v15 = vand.u32 4294901760, %v3390_v28  ;;  %v3930_v21 = vsub.f32 %v3928_v5, %v3929_v34  ;;  %4127 = vmatpush.msrb.mxu0 %v3929_v34  ;;  %v18909_v63 = vld [vmem:[#allocation28_spill] sm:$0xff]  ;;  %v18911_v11 = vld [vmem:[#allocation22_spill] sm:$0xff] }
 0x2e8   : > { %3592 = vmatmul.f32.gmra.mxu0 %v18907_v14  ;;  %v18912_v5 = vld [vmem:[#allocation12_spill] sm:$0xff] }
 0x2e9   : > { %3534 = vmatmul.f32.gmra.mxu3 %v18831_v35  ;;  %3664 = vmatmul.f32.gmra.mxu1 %v18908_v6  ;;  %v3931_v37 = vand.u32 4294901760, %v3930_v21  ;;  %v3469_v32 = vsub.f32 %v3390_v28, %v14129_v15  ;;  %v18913_v21 = vld [vmem:[#allocation2_spill] sm:$0xff] }
 0x2ea   : > { %v2887_v55 = vpop.f32.mrf.mxu2 }
 0x2eb   : > { %v2888_v45 = vadd.f32 %v2887_v55, %v13997_v39  ;;  %3932 = vmatpush.msra.mxu1 %v3931_v37  ;;  %v18910_v39 = vld [vmem:[#allocation5_spill] sm:$0xff]  ;;  %v3470_v34 = vand.u32 4294901760, %v3469_v32 }
 0x2ec   : > { %v2944_v29 = vpop.f32.mrf.mxu3 }
 0x2ed   : > { %v2941_v26 = vadd.f32 %v2940_v41, %v2888_v45  ;;  %v14131_v1 = vpop.f32.mrf.mxu0  ;;  %4174 = vmatpush.msrb.mxu1 %v14005_v10  ;;  %v18914_v10 = vld [vmem:[#allocation19_spill] sm:$0xff] }
 0x2ee   : > { %v14133_v2 = vpop.f32.mrf.mxu1 }
 0x2ef   : > { %v14136_v31 = vadd.f32 %v2941_v26, %v13910_v4  ;;  %3457 = vmatmul.f32.gmra.mxu2 %v18909_v63  ;;  %4176 = vmatpush.msrb.mxu1 %v14033_v33  ;;  %v3471_v26 = vsub.f32 %v3469_v32, %v3470_v34 }
 0x2f0   : > { %3597 = vmatmul.f32.gmra.mxu0 %v18911_v11 }
 0x2f1   : > { %3538 = vmatmul.f32.gmra.mxu3 %v18910_v39  ;;  %3670 = vmatmul.f32.gmra.mxu1 %v18912_v5 }
 0x2f2   : > { %v2891_v41 = vpop.f32.mrf.mxu2  ;;  %4178 = vmatpush.msrb.mxu1 %v14072_v40 }
 0x2f3   : > { %v2892_v14 = vadd.f32 %v2891_v41, %v14012_v19 }
 0x2f4   : > { %v2948_v6 = vpop.f32.mrf.mxu3  ;;  %4180 = vmatpush.msrb.mxu1 %v3830_v7 }
 0x2f5   : > { %v2945_v4 = vadd.f32 %v2944_v29, %v2892_v14  ;;  %v14146_v55 = vpop.f32.mrf.mxu0  ;;  %v3472_v29 = vand.u32 4294901760, %v3471_v26 }
 0x2f6   : > { %v14148_v28 = vpop.f32.mrf.mxu1 }
 0x2f7   : > { %v14152_v45 = vadd.f32 %v2945_v4, %v13933_v52  ;;  %3465 = vmatmul.f32.gmra.mxu2 %v18913_v21 }
 0x2f8   : > { %3602 = vmatmul.f32.gmra.mxu0 %v18914_v10 }
 0x2f9   : > { %3542 = vmatmul.f32.gmra.mxu3 %v14129_v15  ;;  %3676 = vmatmul.f32.gmra.mxu1 %v3470_v34 }
 0x2fa   : > { %v2895_v19 = vpop.f32.mrf.mxu2 }
 0x2fb   : > { %v2896_v33 = vadd.f32 %v2895_v19, %v14025_v54 }
 0x2fc   : > { %v2952_v37 = vpop.f32.mrf.mxu3 }
 0x2fd   : > { %v2949_v63 = vadd.f32 %v2948_v6, %v2896_v33  ;;  %v14158_v11 = vpop.f32.mrf.mxu0 }
 0x2fe   : > { %v3342_v40 = vpop.f32.mrf.mxu1 }
 0x2ff   : > { %v14161_v52 = vadd.f32 %v2949_v63, %v13946_v22  ;;  %3473 = vmatmul.f32.gmra.mxu2 %v3472_v29  ;;  %v18915_v22 = vld [vmem:[#allocation56_spill] sm:$0xff] }
 0x300   : > { %3607 = vmatmul.f32.gmra.mxu0 %v3469_v32  ;;  %v3095_v32 = vadd.f32 %v14023_v44, %v14039_v9 }
 0x301   : > { %3762 = vmatmul.f32.vlgmr.msra.gmra.mxu3 %v18819_v25  ;;  %3934 = vmatmul.f32.vlgmr.msra.gmra.mxu1 %v13082_v49 }
 0x302   : > { %v2899_v5 = vpop.f32.mrf.mxu2 }
 0x303   : > { %v2900_v7 = vadd.f32 %v2899_v5, %v14043_v57 }
 0x304   : > { %v3214_v41 = vpop.f32.mrf.mxu3 }
 0x305   : > { %v2953_v54 = vadd.f32 %v2952_v37, %v2900_v7  ;;  %v3289_v14 = vpop.f32.mrf.mxu0 }
 0x306   : > { %v3346_v34 = vpop.f32.mrf.mxu1 }
 0x307   : > { %v14167_v6 = vadd.f32 %v2953_v54, %v13961_v36  ;;  %3709 = vmatmul.f32.vlgmr.msra.gmra.mxu2 %v18819_v25  ;;  %v18916_v25 = vld [vmem:[#allocation59_spill] sm:$0xff]  ;;  %v3099_v36 = vadd.f32 %v14041_v61, %v14059_v24  ;;  %v3103_v61 = vadd.f32 %v14061_v0, %v14078_v48  ;;  %v3802_v48 = vrot.slane %v13870_v12, 2 }
 0x308   : > { %3837 = vmatmul.f32.vlgmr.msra.gmra.mxu0 %v18915_v22  ;;  %v3111_v12 = vadd.f32 %v14093_v62, %v14113_v43 }
 0x309   : > { %3766 = vmatmul.f32.gmra.mxu3 %v18898_v13  ;;  %3938 = vmatmul.f32.gmra.mxu1 %v13103_v3 }
 0x30a   : > { %v3152_v4 = vpop.f32.mrf.mxu2 }
 0x30b   : > { %v3153_v57 = vadd.f32 %v3152_v4, %v3095_v32 }
 0x30c   : > { %v3220_v21 = vpop.f32.mrf.mxu3 }
 0x30d   : > { %v3215_v26 = vadd.f32 %v3214_v41, %v3153_v57  ;;  %v3293_v10 = vpop.f32.mrf.mxu0 }
 0x30e   : > { %v3350_v19 = vpop.f32.mrf.mxu1 }
 0x30f   : > { %v3290_v33 = vadd.f32 %v3289_v14, %v3215_v26  ;;  %3713 = vmatmul.f32.gmra.mxu2 %v18898_v13 }
 0x310   : > { %3845 = vmatmul.f32.gmra.mxu0 %v18916_v25 }
 0x311   : > { %3770 = vmatmul.f32.gmra.mxu3 %v18823_v20  ;;  %v3343_v29 = vadd.f32 %v3342_v40, %v3290_v33  ;;  %3942 = vmatmul.f32.gmra.mxu1 %v13127_v27 }
 0x312   : > { %v3157_v44 = vpop.f32.mrf.mxu2 }
 0x313   : > { %v14182_v9 = vadd.f32 %v3343_v29, %v14064_v17  ;;  %v3158_v37 = vadd.f32 %v3157_v44, %v3099_v36 }
 0x314   : > { %v3226_v63 = vpop.f32.mrf.mxu3 }
 0x315   : > { %v3221_v5 = vadd.f32 %v3220_v21, %v3158_v37  ;;  %v3297_v7 = vpop.f32.mrf.mxu0 }
 0x316   : > { %v3354_v41 = vpop.f32.mrf.mxu1 }
 0x317   : > { %v3294_v13 = vadd.f32 %v3293_v10, %v3221_v5  ;;  %3717 = vmatmul.f32.gmra.mxu2 %v18823_v20 }
 0x318   : > { %3853 = vmatmul.f32.gmra.mxu0 %v18854_v47  ;;  %v3107_v47 = vadd.f32 %v14080_v59, %v14091_v51 }
 0x319   : > { %3774 = vmatmul.f32.gmra.mxu3 %v18825_v56  ;;  %v3347_v24 = vadd.f32 %v3346_v34, %v3294_v13  ;;  %3946 = vmatmul.f32.gmra.mxu1 %v13151_v38  ;;  %v3803_v34 = vrot.slane %v14096_v8, 2 }
 0x31a   : > { %v3162_v17 = vpop.f32.mrf.mxu2 }
 0x31b   : > { %v14191_v40 = vadd.f32 %v3347_v24, %v14083_v16  ;;  %v3163_v54 = vadd.f32 %v3162_v17, %v3103_v61 }
 0x31c   : > { %v3232_v14 = vpop.f32.mrf.mxu3 }
 0x31d   : > { %v3227_v22 = vadd.f32 %v3226_v63, %v3163_v54  ;;  %v3301_v32 = vpop.f32.mrf.mxu0  ;;  %v18917_v63 = vld [vmem:[#allocation71_spill] sm:$0xff] }
 0x31e   : > { %v3358_v4 = vpop.f32.mrf.mxu1 }
 0x31f   : > { %v3298_v20 = vadd.f32 %v3297_v7, %v3227_v22  ;;  %3721 = vmatmul.f32.gmra.mxu2 %v18825_v56 }
 0x320   : > { %3861 = vmatmul.f32.gmra.mxu0 %v18857_v23  ;;  %v3804_v23 = vsel %vm1248_vm2, %v3802_v48, %v3803_v34  ;;  %v3119_v48 = vadd.f32 %v14133_v2, %v14146_v55 }
 0x321   : > { %3778 = vmatmul.f32.gmra.mxu3 %v18827_v18  ;;  %v3351_v0 = vadd.f32 %v3350_v19, %v3298_v20  ;;  %3950 = vmatmul.f32.gmra.mxu1 %v13175_v58  ;;  %v3810_v51 = vsel %vm411_vm1, %v3804_v23, 0  ;;  %v12272_v20 = vld [vmem:[%s18231_s3 + $0x130] sm:$0xff] }
 0x322   : > { %v3167_v16 = vpop.f32.mrf.mxu2  ;;  %v14218_v29 = vand.u32 4294901760, %v3810_v51 }
 0x323   : > { %v14202_v57 = vadd.f32 %v3351_v0, %v14099_v50  ;;  %v3168_v21 = vadd.f32 %v3167_v16, %v3107_v47  ;;  %v14254_v0 = vand.u32 4294901760, %v12272_v20 }
 0x324   : > { %v3238_v56 = vpop.f32.mrf.mxu3  ;;  %v14231_v5 = vsub.f32 %v3810_v51, %v14218_v29  ;;  %v3123_v51 = vadd.f32 %v14148_v28, %v14158_v11  ;;  %v12271_v28 = vld [vmem:[%s18231_s3 + $0x128] sm:$0xff]  ;;  %v18921_v11 = vld [vmem:[#allocation57_spill] sm:$0xff] }
 0x325   : > { %v3233_v26 = vadd.f32 %v3232_v14, %v3168_v21  ;;  %v3305_v10 = vpop.f32.mrf.mxu0  ;;  %v14261_v34 = vsub.f32 %v12272_v20, %v14254_v0  ;;  %v18922_v20 = vld [vmem:[#allocation55_spill] sm:$0xff] }
 0x326   : > { %v3362_v33 = vpop.f32.mrf.mxu1  ;;  %v3890_v14 = vand.u32 4294901760, %v14231_v5 }
 0x327   : > { %v3302_v25 = vadd.f32 %v3301_v32, %v3233_v26  ;;  %3725 = vmatmul.f32.gmra.mxu2 %v18827_v18  ;;  %v12273_v18 = vld [vmem:[%s18231_s3 + $0x138] sm:$0xff]  ;;  %v4376_v23 = vand.u32 4294901760, %v14261_v34 }
 0x328   : > { %3869 = vmatmul.f32.gmra.mxu0 %v18860_v60  ;;  %v14220_v60 = vand.u32 4294901760, %v12273_v18  ;;  %v3891_v47 = vsub.f32 %v14231_v5, %v3890_v14 }
 0x329   : > { %3782 = vmatmul.f32.gmra.mxu3 %v18831_v35  ;;  %v3355_v59 = vadd.f32 %v3354_v41, %v3302_v25  ;;  %3954 = vmatmul.f32.gmra.mxu1 %v18862_v46  ;;  %v3115_v41 = vadd.f32 %v14118_v30, %v14131_v1  ;;  %v4377_v25 = vsub.f32 %v14261_v34, %v4376_v23 }
 0x32a   : > { %v3172_v8 = vpop.f32.mrf.mxu2  ;;  %4284 = vmatpush.msra.mxu2 %v14220_v60  ;;  %v14224_v37 = vsub.f32 %v12273_v18, %v14220_v60  ;;  %4503 = vmatpush.msra.mxu1 %v14220_v60 }
 0x32b   : > { %v14213_v50 = vadd.f32 %v3355_v59, %v14121_v53  ;;  %v3173_v19 = vadd.f32 %v3172_v8, %v3111_v12  ;;  %v4378_v59 = vand.u32 4294901760, %v4377_v25 }
 0x32c   : > { %v3244_v36 = vpop.f32.mrf.mxu3  ;;  %v4370_v7 = vand.u32 4294901760, %v14224_v37  ;;  %4439 = vmatpush.msra.mxu0 %v14224_v37  ;;  %4286 = vmatpush.msra.mxu2 %v14254_v0 }
 0x32d   : > { %v3239_v62 = vadd.f32 %v3238_v56, %v3173_v19  ;;  %v3309_v43 = vpop.f32.mrf.mxu0  ;;  %4505 = vmatpush.msra.mxu1 %v14254_v0 }
 0x32e   : > { %v3366_v44 = vpop.f32.mrf.mxu1  ;;  %4442 = vmatpush.msra.mxu0 %v14261_v34 }
 0x32f   : > { %v3306_v53 = vadd.f32 %v3305_v10, %v3239_v62  ;;  %3729 = vmatmul.f32.gmra.mxu2 %v18831_v35  ;;  %v4371_v35 = vsub.f32 %v14224_v37, %v4370_v7  ;;  %v3892_v10 = vand.u32 4294901760, %v3891_v47 }
 0x330   : > { %3877 = vmatmul.f32.gmra.mxu0 %v18917_v63 }
 0x331   : > { %3786 = vmatmul.f32.gmra.mxu3 %v18910_v39  ;;  %v3359_v13 = vadd.f32 %v3358_v4, %v3306_v53  ;;  %3958 = vmatmul.f32.gmra.mxu1 %v13784_v42  ;;  %v4372_v22 = vand.u32 4294901760, %v4371_v35 }
 0x332   : > { %v3177_v61 = vpop.f32.mrf.mxu2 }
 0x333   : > { %v14242_v24 = vadd.f32 %v3359_v13, %v14136_v31  ;;  %v3178_v17 = vadd.f32 %v3177_v61, %v3115_v41  ;;  %4373 = vmatpush.msra.mxu3 %v4372_v22  ;;  %v18918_v31 = vld [vmem:[#allocation18_spill] sm:$0xff]  ;;  %v18920_v41 = vld [vmem:[#allocation52_spill] sm:$0xff] }
 0x334   : > { %v3250_v54 = vpop.f32.mrf.mxu3 }
 0x335   : > { %v3245_v32 = vadd.f32 %v3244_v36, %v3178_v17  ;;  %v3313_v30 = vpop.f32.mrf.mxu0  ;;  %4379 = vmatpush.msra.mxu3 %v4378_v59 }
 0x336   : > { %v3370_v1 = vpop.f32.mrf.mxu1 }
 0x337   : > { %v3310_v4 = vadd.f32 %v3309_v43, %v3245_v32  ;;  %3733 = vmatmul.f32.gmra.mxu2 %v18910_v39 }
 0x338   : > { %3885 = vmatmul.f32.gmra.mxu0 %v18918_v31  ;;  %v18923_v31 = vld [vmem:[#allocation60_spill] sm:$0xff] }
 0x339   : > { %3790 = vmatmul.f32.gmra.mxu3 %v14129_v15  ;;  %v3363_v16 = vadd.f32 %v3362_v33, %v3310_v4  ;;  %3962 = vmatmul.f32.gmra.mxu1 %v14218_v29 }
 0x33a   : > { %v3182_v39 = vpop.f32.mrf.mxu2 }
 0x33b   : > { %v14265_v21 = vadd.f32 %v3363_v16, %v14152_v45  ;;  %v3183_v56 = vadd.f32 %v3182_v39, %v3119_v48  ;;  %v18919_v45 = vld [vmem:[#allocation54_spill] sm:$0xff] }
 0x33c   : > { %v3256_v26 = vpop.f32.mrf.mxu3 }
 0x33d   : > { %v3251_v2 = vadd.f32 %v3250_v54, %v3183_v56  ;;  %v3317_v55 = vpop.f32.mrf.mxu0 }
 0x33e   : > { %v3635_v33 = vpop.f32.mrf.mxu1 }
 0x33f   : > { %v3314_v12 = vadd.f32 %v3313_v30, %v3251_v2  ;;  %3737 = vmatmul.f32.gmra.mxu2 %v14129_v15  ;;  %v18924_v2 = vld [vmem:[#allocation58_spill] sm:$0xff] }
 0x340   : > { %3893 = vmatmul.f32.gmra.mxu0 %v3892_v10 }
 0x341   : > { %4054 = vmatmul.f32.vlgmr.msrb.gmra.mxu3 %v18919_v45  ;;  %v3367_v8 = vadd.f32 %v3366_v44, %v3314_v12  ;;  %4182 = vmatmul.f32.vlgmr.msrb.gmra.mxu1 %v13082_v49  ;;  %v14286_v44 = vand.u32 4294901760, %v12271_v28 }
 0x342   : > { %v3187_v19 = vpop.f32.mrf.mxu2 }
 0x343   : > { %v14278_v36 = vadd.f32 %v3367_v8, %v14161_v52  ;;  %v3188_v18 = vadd.f32 %v3187_v19, %v3123_v51  ;;  %4288 = vmatpush.msra.mxu2 %v14286_v44  ;;  %v4381_v61 = vsub.f32 %v12271_v28, %v14286_v44  ;;  %4507 = vmatpush.msra.mxu1 %v14286_v44 }
 0x344   : > { %v3515_v62 = vpop.f32.mrf.mxu3 }
 0x345   : > { %v3257_v43 = vadd.f32 %v3256_v26, %v3188_v18  ;;  %v3573_v53 = vpop.f32.mrf.mxu0  ;;  %v4382_v22 = vand.u32 4294901760, %v4381_v61  ;;  %4445 = vmatpush.msra.mxu0 %v4381_v61 }
 0x346   : > { %v3641_v15 = vpop.f32.mrf.mxu1 }
 0x347   : > { %v3318_v63 = vadd.f32 %v3317_v55, %v3257_v43  ;;  %3992 = vmatmul.f32.vlgmr.msrb.gmra.mxu2 %v18920_v41  ;;  %v12270_v55 = vld [vmem:[%s18231_s3 + $0x120] sm:$0xff]  ;;  %v18926_v43 = vld [vmem:[#allocation61_spill] sm:$0xff] }
 0x348   : > { %4129 = vmatmul.f32.vlgmr.msrb.gmra.mxu0 %v13082_v49 }
 0x349   : > { %4060 = vmatmul.f32.gmra.mxu3 %v18921_v11  ;;  %v3371_v52 = vadd.f32 %v3370_v1, %v3318_v63  ;;  %4186 = vmatmul.f32.gmra.mxu1 %v13103_v3  ;;  %v4383_v1 = vsub.f32 %v4381_v61, %v4382_v22  ;;  %v18929_v11 = vld [vmem:[#allocation70_spill] sm:$0xff] }
 0x34a   : > { %v3418_v13 = vpop.f32.mrf.mxu2 }
 0x34b   : > { %v14293_v35 = vadd.f32 %v3371_v52, %v14167_v6  ;;  %v3516_v17 = vadd.f32 %v3515_v62, %v3418_v13  ;;  %v4384_v47 = vand.u32 4294901760, %v4383_v1 }
 0x34c   : > { %v3519_v54 = vpop.f32.mrf.mxu3 }
 0x34d   : > { %v3574_v49 = vadd.f32 %v3573_v53, %v3516_v17  ;;  %v3578_v32 = vpop.f32.mrf.mxu0  ;;  %4385 = vmatpush.msra.mxu3 %v4384_v47  ;;  %v18927_v53 = vld [vmem:[#allocation66_spill] sm:$0xff] }
 0x34e   : > { %v3647_v30 = vpop.f32.mrf.mxu1  ;;  %v14337_v17 = vld [vmem:[%s14334_s9] sm:$0xff] }
 0x34f   : > { %v14295_v4 = vadd.f32 %v3635_v33, %v3574_v49  ;;  %3997 = vmatmul.f32.gmra.mxu2 %v18922_v20  ;;  %v4289_v33 = vand.u32 4294901760, %v12270_v55  ;;  %v18931_v49 = vld [vmem:[#allocation10_spill] sm:$0xff] }
 0x350   : > { %4133 = vmatmul.f32.gmra.mxu0 %v13103_v3  ;;  %v18925_v3 = vld [vmem:[#allocation63_spill] sm:$0xff] }
 0x351   : > { %4066 = vmatmul.f32.gmra.mxu3 %v18923_v31  ;;  %4190 = vmatmul.f32.gmra.mxu1 %v13127_v27  ;;  %v4387_v12 = vsub.f32 %v12270_v55, %v4289_v33 }
 0x352   : > { %v3426_v6 = vpop.f32.mrf.mxu2  ;;  %4290 = vmatpush.msra.mxu2 %v4289_v33  ;;  %4509 = vmatpush.msra.mxu1 %v4289_v33 }
 0x353   : > { %v3520_v48 = vadd.f32 %v3519_v54, %v3426_v6  ;;  %v4388_v51 = vand.u32 4294901760, %v4387_v12  ;;  %4448 = vmatpush.msra.mxu0 %v4387_v12 }
 0x354   : > { %v3523_v16 = vpop.f32.mrf.mxu3  ;;  %4574 = vmatpush.msrb.mxu2 %v4370_v7 }
 0x355   : > { %v3579_v39 = vadd.f32 %v3578_v32, %v3520_v48  ;;  %v3583_v56 = vpop.f32.mrf.mxu0  ;;  %v4389_v18 = vsub.f32 %v4387_v12, %v4388_v51  ;;  %v4248_v32 = vsel %vm411_vm1, %v14337_v17, 0  ;;  %v14359_v48 = vld [vmem:[%s14334_s9 + $0x10] sm:$0xff] }
 0x356   : > { %v3653_v26 = vpop.f32.mrf.mxu1  ;;  %4578 = vmatpush.msrb.mxu2 %v4376_v23  ;;  %v14353_v47 = vand.u32 4294901760, %v4248_v32  ;;  %v4251_v55 = vsel %vm411_vm1, %v14359_v48, 0 }
 0x357   : > { %v14302_v10 = vadd.f32 %v3641_v15, %v3579_v39  ;;  %4002 = vmatmul.f32.gmra.mxu2 %v18924_v2  ;;  %v4390_v37 = vand.u32 4294901760, %v4389_v18  ;;  %v14375_v12 = vand.u32 4294901760, %v4251_v55  ;;  %v14378_v18 = vld [vmem:[%s14334_s9 + $0x20] sm:$0xff] }
 0x358   : > { %4137 = vmatmul.f32.gmra.mxu0 %v13127_v27  ;;  %4582 = vmatpush.msrb.mxu2 %v4382_v22  ;;  %v12277_v22 = vld [vmem:[%s18231_s3 + $0x158] sm:$0xff]  ;;  %v4292_v2 = vsub.f32 %v4248_v32, %v14353_v47 }
 0x359   : > { %4072 = vmatmul.f32.gmra.mxu3 %v18925_v3  ;;  %4194 = vmatmul.f32.gmra.mxu1 %v13151_v38  ;;  %18933 = vst [vmem:[#allocation11_spill] sm:$0xff] %v14375_v12 }
 0x35a   : > { %v3434_v25 = vpop.f32.mrf.mxu2  ;;  %4391 = vmatpush.msra.mxu3 %v4390_v37  ;;  %4586 = vmatpush.msrb.mxu2 %v4388_v51  ;;  %v4293_v51 = vand.u32 4294901760, %v4292_v2  ;;  %v12276_v37 = vld [vmem:[%s18231_s3 + $0x150] sm:$0xff] }
 0x35b   : > { %v3524_v45 = vadd.f32 %v3523_v16, %v3434_v25 }
 0x35c   : > { %v3527_v59 = vpop.f32.mrf.mxu3  ;;  %4633 = vmatpush.msrb.mxu3 %v14220_v60 }
 0x35d   : > { %v3584_v8 = vadd.f32 %v3583_v56, %v3524_v45  ;;  %v3588_v19 = vpop.f32.mrf.mxu0 }
 0x35e   : > { %v3659_v27 = vpop.f32.mrf.mxu1  ;;  %4635 = vmatpush.msrb.mxu3 %v14254_v0 }
 0x35f   : > { %v14315_v62 = vadd.f32 %v3647_v30, %v3584_v8  ;;  %4007 = vmatmul.f32.gmra.mxu2 %v18926_v43  ;;  %v14349_v30 = vand.u32 4294901760, %v12277_v22 }
 0x360   : > { %4141 = vmatmul.f32.gmra.mxu0 %v13151_v38  ;;  %v18928_v38 = vld [vmem:[#allocation64_spill] sm:$0xff]  ;;  %4637 = vmatpush.msrb.mxu3 %v14286_v44 }
 0x361   : > { %4078 = vmatmul.f32.gmra.mxu3 %v18927_v53  ;;  %4198 = vmatmul.f32.gmra.mxu1 %v13175_v58  ;;  %v14356_v6 = vsub.f32 %v12277_v22, %v14349_v30  ;;  %v4294_v53 = vsub.f32 %v4292_v2, %v4293_v51 }
 0x362   : > { %v3442_v7 = vpop.f32.mrf.mxu2  ;;  %4639 = vmatpush.msrb.mxu3 %v4289_v33  ;;  %4747 = vmatpush.msrb.mxu0 %v14349_v30 }
 0x363   : > { %v3528_v34 = vadd.f32 %v3527_v59, %v3442_v7  ;;  %v18387_v3 = vand.u32 4294901760, %v14356_v6  ;;  %v4254_v7 = vsel %vm411_vm1, %v14378_v18, 0 }
 0x364   : > { %v3531_v23 = vpop.f32.mrf.mxu3 }
 0x365   : > { %v3589_v15 = vadd.f32 %v3588_v19, %v3528_v34  ;;  %v3593_v63 = vpop.f32.mrf.mxu0  ;;  %v4834_v33 = vsub.f32 %v14356_v6, %v18387_v3  ;;  %v14395_v34 = vand.u32 4294901760, %v12276_v37 }
 0x366   : > { %v3665_v41 = vpop.f32.mrf.mxu1 }
 0x367   : > { %v14324_v28 = vadd.f32 %v3653_v26, %v3589_v15  ;;  %4012 = vmatmul.f32.gmra.mxu2 %v18928_v38  ;;  %v18932_v26 = vld [vmem:[#allocation4_spill] sm:$0xff]  ;;  %v4835_v8 = vand.u32 4294901760, %v4834_v33  ;;  %4749 = vmatpush.msrb.mxu0 %v14395_v34 }
 0x368   : > { %4145 = vmatmul.f32.gmra.mxu0 %v13175_v58  ;;  %v18930_v58 = vld [vmem:[#allocation68_spill] sm:$0xff] }
 0x369   : > { %4084 = vmatmul.f32.gmra.mxu3 %v18929_v11  ;;  %4202 = vmatmul.f32.gmra.mxu1 %v18862_v46  ;;  %v14406_v38 = vld [vmem:[%s14334_s9 + $0x30] sm:$0xff] }
 0x36a   : > { %v3450_v60 = vpop.f32.mrf.mxu2  ;;  %4836 = vmatpush.msrb.mxu1 %v4835_v8 }
 0x36b   : > { %v3532_v0 = vadd.f32 %v3531_v23, %v3450_v60 }
 0x36c   : > { %v3535_v52 = vpop.f32.mrf.mxu3 }
 0x36d   : > { %v3594_v13 = vadd.f32 %v3593_v63, %v3532_v0  ;;  %v3598_v61 = vpop.f32.mrf.mxu0  ;;  %v4295_v63 = vand.u32 4294901760, %v4294_v53 }
 0x36e   : > { %v3671_v44 = vpop.f32.mrf.mxu1 }
 0x36f   : > { %v14339_v54 = vadd.f32 %v3659_v27, %v3594_v13  ;;  %4017 = vmatmul.f32.gmra.mxu2 %v18930_v58  ;;  %v14422_v58 = vsub.f32 %v12276_v37, %v14395_v34 }
 0x370   : > { %4149 = vmatmul.f32.gmra.mxu0 %v18862_v46 }
 0x371   : > { %4090 = vmatmul.f32.gmra.mxu3 %v18931_v49  ;;  %4206 = vmatmul.f32.gmra.mxu1 %v13784_v42  ;;  %v18386_v22 = vand.u32 4294901760, %v14422_v58 }
 0x372   : > { %v3458_v1 = vpop.f32.mrf.mxu2 }
 0x373   : > { %v3536_v20 = vadd.f32 %v3535_v52, %v3458_v1 }
 0x374   : > { %v3539_v31 = vpop.f32.mrf.mxu3 }
 0x375   : > { %v3599_v46 = vadd.f32 %v3598_v61, %v3536_v20  ;;  %v3603_v16 = vpop.f32.mrf.mxu0 }
 0x376   : > { %v3677_v39 = vpop.f32.mrf.mxu1 }
 0x377   : > { %v14361_v56 = vadd.f32 %v3665_v41, %v3599_v46  ;;  %4022 = vmatmul.f32.gmra.mxu2 %v18932_v26 }
 0x378   : > { %4153 = vmatmul.f32.gmra.mxu0 %v13784_v42  ;;  %v14383_v42 = vsub.f32 %v4251_v55, %v14375_v12  ;;  %v14443_v55 = vld [vmem:[%s14334_s9 + $0x40] sm:$0xff] }
 0x379   : > { %4096 = vmatmul.f32.gmra.mxu3 %v3890_v14  ;;  %4210 = vmatmul.f32.gmra.mxu1 %v14218_v29 }
 0x37a   : > { %v3466_v25 = vpop.f32.mrf.mxu2  ;;  %18934 = vst [vmem:[#allocation8_spill] sm:$0xff] %v14383_v42 }
 0x37b   : > { %v3540_v45 = vadd.f32 %v3539_v31, %v3466_v25 }
 0x37c   : > { %v3543_v59 = vpop.f32.mrf.mxu3 }
 0x37d   : > { %v3604_v19 = vadd.f32 %v3603_v16, %v3540_v45  ;;  %v3608_v27 = vpop.f32.mrf.mxu0  ;;  %v4840_v16 = vsub.f32 %v14422_v58, %v18386_v22 }
 0x37e   : > { %v14380_v14 = vpop.f32.mrf.mxu1 }
 0x37f   : > { %v14385_v43 = vadd.f32 %v3671_v44, %v3604_v19  ;;  %4027 = vmatmul.f32.gmra.mxu2 %v14231_v5  ;;  %v14399_v5 = vand.u32 4294901760, %v14383_v42  ;;  %v4257_v44 = vsel %vm411_vm1, %v14406_v38, 0 }
 0x380   : > { %4157 = vmatmul.f32.gmra.mxu0 %v14218_v29  ;;  %v14402_v29 = vand.u32 4294901760, %v4254_v7  ;;  %v14428_v32 = vand.u32 4294901760, %v4257_v44 }
 0x381   : > { %4393 = vmatmul.f32.vlgmr.msra.gmra.mxu3 %v14353_v47  ;;  %4513 = vmatmul.f32.vlgmr.msra.gmra.mxu1 %v4293_v51  ;;  %18935 = vst [vmem:[#allocation20_spill] sm:$0xff] %v14399_v5  ;;  %v4302_v0 = vsub.f32 %v14383_v42, %v14399_v5  ;;  %v4260_v51 = vsel %vm411_vm1, %v14443_v55, 0 }
 0x382   : > { %4966 = vmatpush.msra.mxu3 %v14349_v30  ;;  %v3474_v23 = vpop.f32.mrf.mxu2  ;;  %18936 = vst [vmem:[#allocation3_spill] sm:$0xff] %v14402_v29  ;;  %v14417_v61 = vsub.f32 %v4254_v7, %v14402_v29  ;;  %v14474_v7 = vand.u32 4294901760, %v4260_v51 }
 0x383   : > { %v3544_v15 = vadd.f32 %v3543_v59, %v3474_v23  ;;  %18938 = vst [vmem:[#allocation7_spill] sm:$0xff] %v14428_v32  ;;  %v14431_v20 = vand.u32 4294901760, %v4302_v0  ;;  %v12275_v59 = vld [vmem:[%s18231_s3 + $0x148] sm:$0xff]  ;;  %v14477_v23 = vld [vmem:[%s14334_s9 + $0x50] sm:$0xff] }
 0x384   : > { %v3763_v41 = vpop.f32.mrf.mxu3  ;;  %4968 = vmatpush.msra.mxu3 %v14395_v34  ;;  %18937 = vst [vmem:[#allocation9_spill] sm:$0xff] %v14417_v61  ;;  %v14434_v46 = vand.u32 4294901760, %v14417_v61 }
 0x385   : > { %v3609_v11 = vadd.f32 %v3608_v27, %v3544_v15  ;;  %v14408_v60 = vpop.f32.mrf.mxu0  ;;  %18939 = vst [vmem:[#allocation17_spill] sm:$0xff] %v14431_v20 }
 0x386   : > { %v14412_v52 = vpop.f32.mrf.mxu1  ;;  %18940 = vst [vmem:[#allocation53_spill] sm:$0xff] %v14434_v46  ;;  %v4310_v45 = vsub.f32 %v14417_v61, %v14434_v46 }
 0x387   : > { %v14414_v13 = vadd.f32 %v3677_v39, %v3609_v11  ;;  %4296 = vmatmul.f32.vlgmr.msra.gmra.mxu2 %v4295_v63  ;;  %18944 = vst [vmem:[#allocation67_spill] sm:$0xff] %v14474_v7 }
 0x388   : > { %4451 = vmatmul.f32.vlgmr.msra.gmra.mxu0 %v4292_v2  ;;  %4902 = vmatpush.msra.mxu2 %v14356_v6  ;;  %v4841_v2 = vand.u32 4294901760, %v4840_v16  ;;  %v14472_v53 = vand.u32 4294901760, %v4310_v45 }
 0x389   : > { %4397 = vmatmul.f32.gmra.mxu3 %v14375_v12  ;;  %4519 = vmatmul.f32.gmra.mxu1 %v14399_v5 }
 0x38a   : > { %v3710_v49 = vpop.f32.mrf.mxu2  ;;  %4905 = vmatpush.msra.mxu2 %v14422_v58  ;;  %4842 = vmatpush.msrb.mxu1 %v4841_v2  ;;  %18943 = vst [vmem:[#allocation69_spill] sm:$0xff] %v14472_v53 }
 0x38b   : > { %v3711_v1 = vadd.f32 %v3710_v49, %v14295_v4  ;;  %v14448_v4 = vsub.f32 %v4257_v44, %v14428_v32  ;;  %v4263_v44 = vsel %vm411_vm1, %v14477_v23, 0 }
 0x38c   : > { %v3767_v31 = vpop.f32.mrf.mxu3 }
 0x38d   : > { %v3764_v39 = vadd.f32 %v3763_v41, %v3711_v1  ;;  %v14440_v26 = vpop.f32.mrf.mxu0  ;;  %18941 = vst [vmem:[#allocation62_spill] sm:$0xff] %v14448_v4  ;;  %v14467_v19 = vand.u32 4294901760, %v14448_v4 }
 0x38e   : > { %v14445_v33 = vpop.f32.mrf.mxu1 }
 0x38f   : > { %v14451_v25 = vadd.f32 %v3764_v39, %v14182_v9  ;;  %4304 = vmatmul.f32.gmra.mxu2 %v14431_v20  ;;  %v14463_v9 = vand.u32 4294901760, %v12275_v59  ;;  %18942 = vst [vmem:[#allocation65_spill] sm:$0xff] %v14467_v19  ;;  %v4318_v41 = vsub.f32 %v14448_v4, %v14467_v19 }
 0x390   : > { %4456 = vmatmul.f32.gmra.mxu0 %v14383_v42 }
 0x391   : > { %4401 = vmatmul.f32.gmra.mxu3 %v14402_v29  ;;  %4525 = vmatmul.f32.gmra.mxu1 %v14434_v46  ;;  %v4844_v49 = vsub.f32 %v12275_v59, %v14463_v9  ;;  %v14501_v39 = vand.u32 4294901760, %v4318_v41  ;;  %v18954_v46 = vand.u32 4294901760, %v14422_v58 }
 0x392   : > { %v3714_v8 = vpop.f32.mrf.mxu2  ;;  %4751 = vmatpush.msrb.mxu0 %v14463_v9  ;;  %4970 = vmatpush.msra.mxu3 %v14463_v9 }
 0x393   : > { %v3715_v27 = vadd.f32 %v3714_v8, %v14302_v10  ;;  %v14490_v10 = vsub.f32 %v4260_v51, %v14474_v7  ;;  %v4845_v1 = vand.u32 4294901760, %v4844_v49  ;;  %4908 = vmatpush.msra.mxu2 %v4844_v49  ;;  %18947 = vst [vmem:[#allocation39_spill] sm:$0xff] %v14501_v39 }
 0x394   : > { %v3771_v37 = vpop.f32.mrf.mxu3 }
 0x395   : > { %v3768_v15 = vadd.f32 %v3767_v31, %v3715_v27  ;;  %v14479_v63 = vpop.f32.mrf.mxu0  ;;  %18945 = vst [vmem:[#allocation30_spill] sm:$0xff] %v14490_v10  ;;  %v14498_v31 = vand.u32 4294901760, %v4263_v44  ;;  %v14504_v45 = vand.u32 4294901760, %v14490_v10  ;;  %v4846_v59 = vsub.f32 %v4844_v49, %v4845_v1 }
 0x396   : > { %v14483_v11 = vpop.f32.mrf.mxu1 }
 0x397   : > { %v14486_v0 = vadd.f32 %v3768_v15, %v14191_v40  ;;  %4312 = vmatmul.f32.gmra.mxu2 %v14472_v53  ;;  %18946 = vst [vmem:[#allocation34_spill] sm:$0xff] %v14498_v31  ;;  %v4847_v27 = vand.u32 4294901760, %v4846_v59  ;;  %v14509_v15 = vld [vmem:[%s14334_s9 + $0x60] sm:$0xff]  ;;  %v14514_v3 = vsub.f32 %v4263_v44, %v14498_v31  ;;  %v4326_v41 = vsub.f32 %v14490_v10, %v14504_v45 }
 0x398   : > { %4461 = vmatmul.f32.gmra.mxu0 %v14417_v61  ;;  %18948 = vst [vmem:[#allocation36_spill] sm:$0xff] %v14504_v45  ;;  %v4266_v44 = vsel %vm411_vm1, %v14509_v15, 0  ;;  %v14547_v61 = vld [vmem:[%s14334_s9 + $0x70] sm:$0xff] }
 0x399   : > { %4405 = vmatmul.f32.gmra.mxu3 %v14428_v32  ;;  %4531 = vmatmul.f32.gmra.mxu1 %v14467_v19  ;;  %18949 = vst [vmem:[#allocation43_spill] sm:$0xff] %v14514_v3  ;;  %v14538_v59 = vand.u32 4294901760, %v4326_v41  ;;  %v4269_v58 = vsel %vm411_vm1, %v14547_v61, 0 }
 0x39a   : > { %v3718_v40 = vpop.f32.mrf.mxu2  ;;  %4848 = vmatpush.msrb.mxu1 %v4847_v27  ;;  %v14540_v27 = vand.u32 4294901760, %v4266_v44 }
 0x39b   : > { %v3719_v16 = vadd.f32 %v3718_v40, %v14315_v62  ;;  %v14533_v40 = vand.u32 4294901760, %v14514_v3  ;;  %18951 = vst [vmem:[#allocation49_spill] sm:$0xff] %v14538_v59 }
 0x39c   : > { %v3775_v2 = vpop.f32.mrf.mxu3  ;;  %18952 = vst [vmem:[#allocation47_spill] sm:$0xff] %v14540_v27 }
 0x39d   : > { %v3772_v51 = vadd.f32 %v3771_v37, %v3719_v16  ;;  %v14506_v8 = vpop.f32.mrf.mxu0  ;;  %v12274_v37 = vld [vmem:[%s18231_s3 + $0x140] sm:$0xff]  ;;  %18950 = vst [vmem:[#allocation45_spill] sm:$0xff] %v14533_v40  ;;  %v4334_v42 = vsub.f32 %v14514_v3, %v14533_v40 }
 0x39e   : > { %v14511_v22 = vpop.f32.mrf.mxu1 }
 0x39f   : > { %v14517_v62 = vadd.f32 %v3772_v51, %v14202_v57  ;;  %4320 = vmatmul.f32.gmra.mxu2 %v14501_v39  ;;  %v14529_v57 = vand.u32 4294901760, %v12274_v37 }
 0x3a0   : > { %4466 = vmatmul.f32.gmra.mxu0 %v14448_v4  ;;  %v18953_v4 = vand.u32 4294901760, %v14356_v6  ;;  %v14560_v6 = vsub.f32 %v4266_v44, %v14540_v27  ;;  %v14572_v44 = vand.u32 4294901760, %v4334_v42 }
 0x3a1   : > { %4409 = vmatmul.f32.gmra.mxu3 %v14474_v7  ;;  %4537 = vmatmul.f32.gmra.mxu1 %v14504_v45 }
 0x3a2   : > { %v3722_v49 = vpop.f32.mrf.mxu2  ;;  %4753 = vmatpush.msrb.mxu0 %v14529_v57  ;;  %4972 = vmatpush.msra.mxu3 %v14529_v57  ;;  %18955 = vst [vmem:[#allocation51_spill] sm:$0xff] %v14560_v6 }
 0x3a3   : > { %v3723_v16 = vadd.f32 %v3722_v49, %v14324_v28  ;;  %18956 = vst [vmem:[#allocation38_spill] sm:$0xff] %v14572_v44 }
 0x3a4   : > { %v3779_v51 = vpop.f32.mrf.mxu3  ;;  %5037 = vmatpush.msra.mxu0 %v18953_v4  ;;  %v4850_v4 = vsub.f32 %v12274_v37, %v14529_v57 }
 0x3a5   : > { %v3776_v45 = vadd.f32 %v3775_v2, %v3723_v16  ;;  %v14544_v19 = vpop.f32.mrf.mxu0  ;;  %v14564_v2 = vld [vmem:[%s14334_s9 + $0x8] sm:$0x3]  ;;  %v14577_v16 = vand.u32 4294901760, %v14560_v6 }
 0x3a6   : > { %5041 = vmatpush.msra.mxu0 %v18954_v46  ;;  %v14553_v28 = vpop.f32.mrf.mxu1  ;;  %4911 = vmatpush.msra.mxu2 %v4850_v4  ;;  %v4689_v46 = vrot.slane %v14337_v17, 1  ;;  %v4690_v37 = vrot.slane %v14564_v2, 1 }
 0x3a7   : > { %v14556_v41 = vadd.f32 %v3776_v45, %v14213_v50  ;;  %4328 = vmatmul.f32.gmra.mxu2 %v14538_v59  ;;  %v4851_v50 = vand.u32 4294901760, %v4850_v4  ;;  %18957 = vst [vmem:[#allocation74_spill] sm:$0xff] %v14577_v16 }
 0x3a8   : > { %5045 = vmatpush.msra.mxu0 %v4845_v1  ;;  %v4691_v42 = vsel %vm381_vm0, %v4689_v46, %v4690_v37 }
 0x3a9   : > { %4413 = vmatmul.f32.gmra.mxu3 %v14498_v31  ;;  %4471 = vmatmul.f32.gmra.mxu0 %v14490_v10  ;;  %v14579_v10 = vand.u32 4294901760, %v4269_v58  ;;  %v4852_v5 = vsub.f32 %v4850_v4, %v4851_v50 }
 0x3aa   : > { %4543 = vmatmul.f32.gmra.mxu1 %v14533_v40  ;;  %v3726_v45 = vpop.f32.mrf.mxu2  ;;  %5049 = vmatpush.msra.mxu0 %v4851_v50 }
 0x3ab   : > { %v3727_v1 = vadd.f32 %v3726_v45, %v14339_v54  ;;  %18958 = vst [vmem:[#allocation32_spill] sm:$0xff] %v14579_v10  ;;  %v4853_v17 = vand.u32 4294901760, %v4852_v5  ;;  %v4342_v54 = vsub.f32 %v14560_v6, %v14577_v16  ;;  %v14593_v45 = vsub.f32 %v4269_v58, %v14579_v10 }
 0x3ac   : > { %v3783_v49 = vpop.f32.mrf.mxu3  ;;  %v4692_v5 = vrot.slane %v14359_v48, 1 }
 0x3ad   : > { %v3780_v40 = vadd.f32 %v3779_v51, %v3727_v1  ;;  %v14581_v59 = vpop.f32.mrf.mxu0  ;;  %18959 = vst [vmem:[#allocation31_spill] sm:$0xff] %v14593_v45  ;;  %4854 = vmatpush.msrb.mxu1 %v4853_v17  ;;  %v14596_v51 = vld [vmem:[%s14334_s9 + $0x18] sm:$0x3]  ;;  %v14606_v50 = vand.u32 4294901760, %v4342_v54  ;;  %v14609_v37 = vand.u32 4294901760, %v14593_v45 }
 0x3ae   : > { %v14583_v39 = vpop.f32.mrf.mxu1  ;;  %v4693_v4 = vrot.slane %v14596_v51, 1 }
 0x3af   : > { %v14587_v53 = vadd.f32 %v3780_v40, %v14242_v24  ;;  %4336 = vmatmul.f32.gmra.mxu2 %v14572_v44  ;;  %v4718_v24 = vsel %vm411_vm1, %v4691_v42, 0  ;;  %5096 = vmatpush.msra.mxu1 %v14349_v30  ;;  %18960 = vst [vmem:[#allocation35_spill] sm:$0xff] %v14606_v50  ;;  %v4350_v54 = vsub.f32 %v14593_v45, %v14609_v37 }
 0x3b0   : > { %18961 = vst [vmem:[#allocation33_spill] sm:$0xff] %v14609_v37  ;;  %v14611_v1 = vand.u32 4294901760, %v4718_v24  ;;  %v4694_v30 = vsel %vm381_vm0, %v4692_v5, %v4693_v4 }
 0x3b1   : > { %4417 = vmatmul.f32.gmra.mxu3 %v14540_v27  ;;  %4476 = vmatmul.f32.gmra.mxu0 %v14514_v3 }
 0x3b2   : > { %4549 = vmatmul.f32.gmra.mxu1 %v14577_v16  ;;  %v3730_v40 = vpop.f32.mrf.mxu2 }
 0x3b3   : > { %v3731_v58 = vadd.f32 %v3730_v40, %v14361_v56  ;;  %5098 = vmatpush.msra.mxu1 %v14395_v34  ;;  %v14627_v40 = vld [vmem:[%s14334_s9 + $0x28] sm:$0x3]  ;;  %v14632_v34 = vsub.f32 %v4718_v24, %v14611_v1 }
 0x3b4   : > { %v3787_v46 = vpop.f32.mrf.mxu3  ;;  %18962 = vst [vmem:[#allocation40_spill] sm:$0xff] %v14627_v40  ;;  %v4696_v5 = vrot.slane %v14627_v40, 1 }
 0x3b5   : > { %v3784_v17 = vadd.f32 %v3783_v49, %v3731_v58  ;;  %v14614_v42 = vpop.f32.mrf.mxu0  ;;  %5100 = vmatpush.msra.mxu1 %v14463_v9  ;;  %v4720_v9 = vsel %vm411_vm1, %v4694_v30, 0  ;;  %v14640_v58 = vand.u32 4294901760, %v4350_v54  ;;  %v18422_v24 = vand.u32 4294901760, %v14632_v34 }
 0x3b6   : > { %v14616_v16 = vpop.f32.mrf.mxu1 }
 0x3b7   : > { %v14621_v56 = vadd.f32 %v3784_v17, %v14265_v21  ;;  %4344 = vmatmul.f32.gmra.mxu2 %v14606_v50  ;;  %v4695_v21 = vrot.slane %v14378_v18, 1  ;;  %5102 = vmatpush.msra.mxu1 %v14529_v57  ;;  %18963 = vst [vmem:[#allocation37_spill] sm:$0xff] %v14640_v58  ;;  %v14653_v57 = vld [vmem:[%s14334_s9 + $0x38] sm:$0x3] }
 0x3b8   : > { %18964 = vst [vmem:[#allocation42_spill] sm:$0xff] %v14653_v57 }
 0x3b9   : > { %4421 = vmatmul.f32.gmra.mxu3 %v14579_v10  ;;  %4481 = vmatmul.f32.gmra.mxu0 %v14560_v6  ;;  %v14643_v6 = vand.u32 4294901760, %v4720_v9  ;;  %v4697_v18 = vsel %vm381_vm0, %v4695_v21, %v4696_v5  ;;  %v4699_v21 = vrot.slane %v14653_v57, 1 }
 0x3ba   : > { %4555 = vmatmul.f32.gmra.mxu1 %v14609_v37  ;;  %v3734_v49 = vpop.f32.mrf.mxu2 }
 0x3bb   : > { %v3735_v4 = vadd.f32 %v3734_v49, %v14385_v43  ;;  %v4757_v43 = vsub.f32 %v14632_v34, %v18422_v24 }
 0x3bc   : > { %v3791_v17 = vpop.f32.mrf.mxu3 }
 0x3bd   : > { %v3788_v37 = vadd.f32 %v3787_v46, %v3735_v4  ;;  %v14645_v3 = vpop.f32.mrf.mxu0  ;;  %v14661_v46 = vsub.f32 %v4720_v9, %v14643_v6  ;;  %v4758_v4 = vand.u32 4294901760, %v4757_v43 }
 0x3be   : > { %v4183_v30 = vpop.f32.mrf.mxu1 }
 0x3bf   : > { %v14649_v50 = vadd.f32 %v3788_v37, %v14278_v36  ;;  %4352 = vmatmul.f32.gmra.mxu2 %v14640_v58  ;;  %v4722_v36 = vsel %vm411_vm1, %v4697_v18, 0  ;;  %v4698_v37 = vrot.slane %v14406_v38, 1  ;;  %v14679_v38 = vld [vmem:[%s14334_s9 + $0x48] sm:$0x3] }
 0x3c0   : > { %v14671_v24 = vand.u32 4294901760, %v4722_v36  ;;  %18965 = vst [vmem:[#allocation41_spill] sm:$0xff] %v14679_v38 }
 0x3c1   : > { %4486 = vmatmul.f32.gmra.mxu0 %v14593_v45  ;;  %4641 = vmatmul.f32.vlgmr.msrb.gmra.mxu3 %v14353_v47  ;;  %v14669_v45 = vand.u32 4294901760, %v14661_v46  ;;  %v4700_v20 = vsel %vm381_vm0, %v4698_v37, %v4699_v21 }
 0x3c2   : > { %4856 = vmatmul.f32.vlgmr.msrb.gmra.mxu1 %v14611_v1  ;;  %v3738_v54 = vpop.f32.mrf.mxu2  ;;  %v14685_v43 = vsub.f32 %v4722_v36, %v14671_v24 }
 0x3c3   : > { %v3739_v49 = vadd.f32 %v3738_v54, %v14414_v13  ;;  %v4765_v13 = vsub.f32 %v14661_v46, %v14669_v45  ;;  %v4702_v54 = vrot.slane %v14679_v38, 1 }
 0x3c4   : > { %v4055_v5 = vpop.f32.mrf.mxu3  ;;  %18966 = vst [vmem:[#allocation46_spill] sm:$0xff] %v14685_v43  ;;  %v14696_v36 = vand.u32 4294901760, %v14685_v43 }
 0x3c5   : > { %v3792_v9 = vadd.f32 %v3791_v17, %v3739_v49  ;;  %v4130_v58 = vpop.f32.mrf.mxu0  ;;  %v3936_v17 = vadd.f32 %v14380_v14, %v14408_v60 }
 0x3c6   : > { %v4187_v44 = vpop.f32.mrf.mxu1  ;;  %18968 = vst [vmem:[#allocation50_spill] sm:$0xff] %v14696_v36 }
 0x3c7   : > { %v14675_v18 = vadd.f32 %v3792_v9, %v14293_v35  ;;  %4588 = vmatmul.f32.vlgmr.msrb.gmra.mxu2 %v14353_v47  ;;  %v4724_v35 = vsel %vm411_vm1, %v4700_v20, 0  ;;  %v4701_v47 = vrot.slane %v14443_v55, 1  ;;  %v14703_v55 = vld [vmem:[%s14334_s9 + $0x58] sm:$0x3] }
 0x3c8   : > { %v14698_v9 = vand.u32 4294901760, %v4724_v35  ;;  %18969 = vst [vmem:[#allocation48_spill] sm:$0xff] %v14703_v55 }
 0x3c9   : > { %4645 = vmatmul.f32.gmra.mxu3 %v14375_v12  ;;  %4759 = vmatmul.f32.vlgmr.msrb.gmra.mxu0 %v4758_v4  ;;  %v14693_v4 = vand.u32 4294901760, %v4765_v13  ;;  %v4703_v40 = vsel %vm381_vm0, %v4701_v47, %v4702_v54  ;;  %v4773_v13 = vsub.f32 %v14685_v43, %v14696_v36  ;;  %v4704_v47 = vrot.slane %v14477_v23, 1 }
 0x3ca   : > { %4860 = vmatmul.f32.gmra.mxu1 %v14643_v6  ;;  %v3993_v37 = vpop.f32.mrf.mxu2 }
 0x3cb   : > { %v3994_v21 = vadd.f32 %v3993_v37, %v3936_v17  ;;  %18967 = vst [vmem:[#allocation44_spill] sm:$0xff] %v14693_v4  ;;  %v14710_v17 = vsub.f32 %v4724_v35, %v14698_v9 }
 0x3cc   : > { %v4061_v49 = vpop.f32.mrf.mxu3 }
 0x3cd   : > { %v4056_v14 = vadd.f32 %v4055_v5, %v3994_v21  ;;  %v4134_v60 = vpop.f32.mrf.mxu0  ;;  %18970 = vst [vmem:[#allocation73_spill] sm:$0xff] %v14710_v17  ;;  %v3940_v5 = vadd.f32 %v14412_v52, %v14440_v26  ;;  %v4705_v21 = vrot.slane %v14703_v55, 1  ;;  %v14724_v52 = vand.u32 4294901760, %v14710_v17  ;;  %v14731_v55 = vld [vmem:[%s14334_s9 + $0x68] sm:$0x3] }
 0x3ce   : > { %v4191_v57 = vpop.f32.mrf.mxu1 }
 0x3cf   : > { %v4131_v20 = vadd.f32 %v4130_v58, %v4056_v14  ;;  %4592 = vmatmul.f32.gmra.mxu2 %v14375_v12  ;;  %v4726_v58 = vsel %vm411_vm1, %v4703_v40, 0  ;;  %v14721_v12 = vand.u32 4294901760, %v4773_v13  ;;  %18972 = vst [vmem:[#allocation26_spill] sm:$0xff] %v14724_v52  ;;  %v4706_v23 = vsel %vm381_vm0, %v4704_v47, %v4705_v21 }
 0x3d0   : > { %v14726_v26 = vand.u32 4294901760, %v4726_v58  ;;  %v4708_v47 = vrot.slane %v14731_v55, 1 }
 0x3d1   : > { %4649 = vmatmul.f32.gmra.mxu3 %v14402_v29  ;;  %4767 = vmatmul.f32.gmra.mxu0 %v14693_v4  ;;  %v4184_v37 = vadd.f32 %v4183_v30, %v4131_v20  ;;  %18971 = vst [vmem:[#allocation72_spill] sm:$0xff] %v14721_v12 }
 0x3d2   : > { %4864 = vmatmul.f32.gmra.mxu1 %v14671_v24  ;;  %v3998_v54 = vpop.f32.mrf.mxu2  ;;  %18973 = vst [vmem:[#allocation21_spill] sm:$0xff] %v14726_v26  ;;  %v14738_v13 = vsub.f32 %v4726_v58, %v14726_v26 }
 0x3d3   : > { %v14719_v14 = vadd.f32 %v4184_v37, %v14451_v25  ;;  %v3999_v4 = vadd.f32 %v3998_v54, %v3940_v5  ;;  %v4781_v25 = vsub.f32 %v14710_v17, %v14724_v52  ;;  %v4707_v5 = vrot.slane %v14509_v15, 1 }
 0x3d4   : > { %v4067_v35 = vpop.f32.mrf.mxu3  ;;  %18974 = vst [vmem:[#allocation15_spill] sm:$0xff] %v14738_v13 }
 0x3d5   : > { %v4062_v30 = vadd.f32 %v4061_v49, %v3999_v4  ;;  %v4138_v40 = vpop.f32.mrf.mxu0  ;;  %v3944_v49 = vadd.f32 %v14445_v33, %v14479_v63  ;;  %v14752_v33 = vand.u32 4294901760, %v14738_v13  ;;  %v4709_v15 = vsel %vm381_vm0, %v4707_v5, %v4708_v47 }
 0x3d6   : > { %v4195_v20 = vpop.f32.mrf.mxu1 }
 0x3d7   : > { %v4135_v38 = vadd.f32 %v4134_v60, %v4062_v30  ;;  %4596 = vmatmul.f32.gmra.mxu2 %v14402_v29  ;;  %v4728_v60 = vsel %vm411_vm1, %v4706_v23, 0  ;;  %v14749_v30 = vand.u32 4294901760, %v4781_v25  ;;  %18976 = vst [vmem:[#allocation29_spill] sm:$0xff] %v14752_v33  ;;  %v14759_v29 = vld [vmem:[%s14334_s9 + $0x78] sm:$0x3] }
 0x3d8   : > { %v14754_v63 = vand.u32 4294901760, %v4728_v60 }
 0x3d9   : > { %4653 = vmatmul.f32.gmra.mxu3 %v14428_v32  ;;  %4775 = vmatmul.f32.gmra.mxu0 %v14721_v12  ;;  %v4188_v4 = vadd.f32 %v4187_v44, %v4135_v38  ;;  %18975 = vst [vmem:[#allocation27_spill] sm:$0xff] %v14749_v30 }
 0x3da   : > { %4868 = vmatmul.f32.gmra.mxu1 %v14698_v9  ;;  %v4003_v37 = vpop.f32.mrf.mxu2  ;;  %18977 = vst [vmem:[#allocation23_spill] sm:$0xff] %v14754_v63  ;;  %v14766_v25 = vsub.f32 %v4728_v60, %v14754_v63 }
 0x3db   : > { %v14747_v54 = vadd.f32 %v4188_v4, %v14486_v0  ;;  %v4004_v21 = vadd.f32 %v4003_v37, %v3944_v49  ;;  %v4789_v0 = vsub.f32 %v14738_v13, %v14752_v33  ;;  %v4710_v4 = vrot.slane %v14547_v61, 1 }
 0x3dc   : > { %v4073_v58 = vpop.f32.mrf.mxu3  ;;  %18978 = vst [vmem:[#allocation6_spill] sm:$0xff] %v14766_v25  ;;  %v4711_v37 = vrot.slane %v14759_v29, 1 }
 0x3dd   : > { %v4068_v44 = vadd.f32 %v4067_v35, %v4004_v21  ;;  %v4142_v38 = vpop.f32.mrf.mxu0  ;;  %v3948_v35 = vadd.f32 %v14483_v11, %v14506_v8  ;;  %v14777_v60 = vand.u32 4294901760, %v4789_v0 }
 0x3de   : > { %v4199_v23 = vpop.f32.mrf.mxu1  ;;  %v4712_v61 = vsel %vm381_vm0, %v4710_v4, %v4711_v37 }
 0x3df   : > { %v4139_v12 = vadd.f32 %v4138_v40, %v4068_v44  ;;  %4600 = vmatmul.f32.gmra.mxu2 %v14428_v32  ;;  %v4730_v40 = vsel %vm411_vm1, %v4709_v15, 0  ;;  %18979 = vst [vmem:[#allocation13_spill] sm:$0xff] %v14777_v60 }
 0x3e1   : > { %4657 = vmatmul.f32.gmra.mxu3 %v14474_v7  ;;  %4783 = vmatmul.f32.gmra.mxu0 %v14749_v30  ;;  %v4192_v49 = vadd.f32 %v4191_v57, %v4139_v12  ;;  %v14780_v30 = vand.u32 4294901760, %v14766_v25  ;;  %v14782_v12 = vand.u32 4294901760, %v4730_v40 }
 0x3e2   : > { %4872 = vmatmul.f32.gmra.mxu1 %v14726_v26  ;;  %v4008_v5 = vpop.f32.mrf.mxu2 }
 0x3e3   : > { %v14775_v47 = vadd.f32 %v4192_v49, %v14517_v62  ;;  %v4009_v21 = vadd.f32 %v4008_v5, %v3948_v35  ;;  %18980 = vst [vmem:[#allocation16_spill] sm:$0xff] %v14780_v30  ;;  %v4797_v62 = vsub.f32 %v14766_v25, %v14780_v30  ;;  %v14791_v0 = vsub.f32 %v4730_v40, %v14782_v12 }
 0x3e4   : > { %v4079_v44 = vpop.f32.mrf.mxu3  ;;  %18981 = vst [vmem:[#allocation24_spill] sm:$0xff] %v14782_v12 }
 0x3e5   : > { %v4074_v11 = vadd.f32 %v4073_v58, %v4009_v21  ;;  %v4146_v8 = vpop.f32.mrf.mxu0  ;;  %18982 = vst [vmem:[#allocation14_spill] sm:$0xff] %v14791_v0  ;;  %v3952_v58 = vadd.f32 %v14511_v22, %v14544_v19  ;;  %v12281_v21 = vld [vmem:[%s18231_s3 + $0x178] sm:$0xff]  ;;  %v14803_v40 = vand.u32 4294901760, %v4797_v62 }
 0x3e6   : > { %v4203_v57 = vpop.f32.mrf.mxu1  ;;  %v14810_v19 = vand.u32 4294901760, %v12281_v21 }
 0x3e7   : > { %v4143_v15 = vadd.f32 %v4142_v38, %v4074_v11  ;;  %4604 = vmatmul.f32.gmra.mxu2 %v14474_v7  ;;  %v4732_v38 = vsel %vm411_vm1, %v4712_v61, 0  ;;  %18983 = vst [vmem:[#allocation25_spill] sm:$0xff] %v14803_v40  ;;  %v14806_v11 = vand.u32 4294901760, %v14791_v0 }
 0x3e8   : > { %v14808_v22 = vand.u32 4294901760, %v4732_v38  ;;  %5202 = vmatpush.msrb.mxu2 %v14810_v19  ;;  %5421 = vmatpush.msrb.mxu1 %v14810_v19 }
 0x3e9   : > { %4661 = vmatmul.f32.gmra.mxu3 %v14498_v31  ;;  %4791 = vmatmul.f32.gmra.mxu0 %v14777_v60  ;;  %v4196_v35 = vadd.f32 %v4195_v20, %v4143_v15  ;;  %18984 = vst [vmem:[#allocation28_spill] sm:$0xff] %v14806_v11  ;;  %v4805_v62 = vsub.f32 %v14791_v0, %v14806_v11 }
 0x3ea   : > { %4876 = vmatmul.f32.gmra.mxu1 %v14754_v63  ;;  %v4013_v49 = vpop.f32.mrf.mxu2  ;;  %18985 = vst [vmem:[#allocation5_spill] sm:$0xff] %v14808_v22 }
 0x3eb   : > { %v14798_v4 = vadd.f32 %v4196_v35, %v14556_v41  ;;  %v4014_v5 = vadd.f32 %v4013_v49, %v3952_v58  ;;  %v14814_v41 = vsub.f32 %v12281_v21, %v14810_v19  ;;  %v3956_v49 = vadd.f32 %v14553_v28, %v14581_v59 }
 0x3ec   : > { %v4085_v37 = vpop.f32.mrf.mxu3  ;;  %v14836_v60 = vand.u32 4294901760, %v4805_v62 }
 0x3ed   : > { %v4080_v20 = vadd.f32 %v4079_v44, %v4014_v5  ;;  %v4150_v61 = vpop.f32.mrf.mxu0  ;;  %v14823_v44 = vsub.f32 %v4732_v38, %v14808_v22  ;;  %v18449_v35 = vand.u32 4294901760, %v14814_v41  ;;  %5357 = vmatpush.msrb.mxu0 %v14814_v41 }
 0x3ee   : > { %v4207_v15 = vpop.f32.mrf.mxu1  ;;  %18987 = vst [vmem:[#allocation12_spill] sm:$0xff] %v14836_v60 }
 0x3ef   : > { %v4147_v58 = vadd.f32 %v4146_v8, %v4080_v20  ;;  %4608 = vmatmul.f32.gmra.mxu2 %v14498_v31  ;;  %18986 = vst [vmem:[#allocation22_spill] sm:$0xff] %v14823_v44  ;;  %v5289_v21 = vsub.f32 %v14814_v41, %v18449_v35  ;;  %v14839_v31 = vand.u32 4294901760, %v14823_v44 }
 0x3f1   : > { %4665 = vmatmul.f32.gmra.mxu3 %v14540_v27  ;;  %4799 = vmatmul.f32.gmra.mxu0 %v14803_v40  ;;  %v4200_v5 = vadd.f32 %v4199_v23, %v4147_v58  ;;  %18988 = vst [vmem:[#allocation2_spill] sm:$0xff] %v14839_v31  ;;  %v5290_v59 = vand.u32 4294901760, %v5289_v21  ;;  %v4813_v62 = vsub.f32 %v14823_v44, %v14839_v31 }
 0x3f2   : > { %4880 = vmatmul.f32.gmra.mxu1 %v14782_v12  ;;  %v4018_v8 = vpop.f32.mrf.mxu2 }
 0x3f3   : > { %v14834_v20 = vadd.f32 %v4200_v5, %v14587_v53  ;;  %v4019_v38 = vadd.f32 %v4018_v8, %v3956_v49  ;;  %5291 = vmatpush.msrb.mxu3 %v5290_v59  ;;  %v12280_v53 = vld [vmem:[%s18231_s3 + $0x170] sm:$0xff] }
 0x3f4   : > { %v4091_v40 = vpop.f32.mrf.mxu3  ;;  %v14849_v49 = vand.u32 4294901760, %v12280_v53 }
 0x3f5   : > { %v4086_v28 = vadd.f32 %v4085_v37, %v4019_v38  ;;  %v4154_v23 = vpop.f32.mrf.mxu0  ;;  %v3960_v37 = vadd.f32 %v14583_v39, %v14614_v42 }
 0x3f6   : > { %v4211_v58 = vpop.f32.mrf.mxu1  ;;  %5204 = vmatpush.msrb.mxu2 %v14849_v49  ;;  %v14856_v8 = vsub.f32 %v12280_v53, %v14849_v49  ;;  %5423 = vmatpush.msrb.mxu1 %v14849_v49 }
 0x3f7   : > { %v4151_v7 = vadd.f32 %v4150_v61, %v4086_v28  ;;  %4612 = vmatmul.f32.gmra.mxu2 %v14540_v27  ;;  %v14862_v28 = vand.u32 4294901760, %v4813_v62 }
 0x3f8   : > { %v18450_v39 = vand.u32 4294901760, %v14856_v8  ;;  %5360 = vmatpush.msrb.mxu0 %v14856_v8 }
 0x3f9   : > { %4669 = vmatmul.f32.gmra.mxu3 %v14579_v10  ;;  %4807 = vmatmul.f32.gmra.mxu0 %v14836_v60  ;;  %v4204_v5 = vadd.f32 %v4203_v57, %v4151_v7  ;;  %18989 = vst [vmem:[#allocation19_spill] sm:$0xff] %v14862_v28 }
 0x3fa   : > { %4884 = vmatmul.f32.gmra.mxu1 %v14808_v22  ;;  %v4023_v61 = vpop.f32.mrf.mxu2  ;;  %v5295_v53 = vsub.f32 %v14856_v8, %v18450_v39 }
 0x3fb   : > { %v14860_v21 = vadd.f32 %v4204_v5, %v14621_v56  ;;  %v4024_v38 = vadd.f32 %v4023_v61, %v3960_v37  ;;  %v18990_v56 = vand.u32 4294901760, %v14632_v34  ;;  %v3964_v37 = vadd.f32 %v14616_v16, %v14645_v3  ;;  %v12279_v3 = vld [vmem:[%s18231_s3 + $0x168] sm:$0xff] }
 0x3fc   : > { %v4097_v59 = vpop.f32.mrf.mxu3  ;;  %v5296_v62 = vand.u32 4294901760, %v5295_v53  ;;  %v14885_v16 = vand.u32 4294901760, %v12279_v3 }
 0x3fd   : > { %v4092_v7 = vadd.f32 %v4091_v40, %v4024_v38  ;;  %v4158_v42 = vpop.f32.mrf.mxu0 }
 0x3fe   : > { %v4514_v57 = vpop.f32.mrf.mxu1  ;;  %5297 = vmatpush.msrb.mxu3 %v5296_v62  ;;  %5206 = vmatpush.msrb.mxu2 %v14885_v16 }
 0x3ff   : > { %v4155_v35 = vadd.f32 %v4154_v23, %v4092_v7  ;;  %4616 = vmatmul.f32.gmra.mxu2 %v14579_v10  ;;  %5425 = vmatpush.msrb.mxu1 %v14885_v16 }
 0x401   : > { %4815 = vmatmul.f32.gmra.mxu0 %v14862_v28  ;;  %4976 = vmatmul.f32.vlgmr.msra.gmra.mxu3 %v18990_v56  ;;  %v4208_v5 = vadd.f32 %v4207_v15, %v4155_v35  ;;  %v5299_v35 = vsub.f32 %v12279_v3, %v14885_v16 }
 0x402   : > { %5104 = vmatmul.f32.vlgmr.msra.gmra.mxu1 %v14611_v1  ;;  %v4028_v40 = vpop.f32.mrf.mxu2 }
 0x403   : > { %v14877_v61 = vadd.f32 %v4208_v5, %v14649_v50  ;;  %v4029_v23 = vadd.f32 %v4028_v40, %v3964_v37  ;;  %v5300_v53 = vand.u32 4294901760, %v5299_v35  ;;  %5363 = vmatpush.msrb.mxu0 %v5299_v35 }
 0x404   : > { %v4394_v38 = vpop.f32.mrf.mxu3 }
 0x405   : > { %v4098_v7 = vadd.f32 %v4097_v59, %v4029_v23  ;;  %v4452_v39 = vpop.f32.mrf.mxu0 }
 0x406   : > { %v4520_v28 = vpop.f32.mrf.mxu1 }
 0x407   : > { %v4159_v60 = vadd.f32 %v4158_v42, %v4098_v7  ;;  %4914 = vmatmul.f32.vlgmr.msra.gmra.mxu2 %v14632_v34 }
 0x409   : > { %4982 = vmatmul.f32.gmra.mxu3 %v14669_v45  ;;  %5051 = vmatmul.f32.vlgmr.msra.gmra.mxu0 %v14611_v1  ;;  %v4212_v50 = vadd.f32 %v4211_v58, %v4159_v60  ;;  %v5301_v60 = vsub.f32 %v5299_v35, %v5300_v53 }
 0x40a   : > { %5108 = vmatmul.f32.gmra.mxu1 %v14643_v6  ;;  %v4297_v15 = vpop.f32.mrf.mxu2 }
 0x40b   : > { %v14892_v34 = vadd.f32 %v4212_v50, %v14675_v18  ;;  %v4395_v59 = vadd.f32 %v4394_v38, %v4297_v15  ;;  %v5302_v37 = vand.u32 4294901760, %v5301_v60  ;;  %v18992_v60 = vand.u32 4294901760, %v14856_v8 }
 0x40c   : > { %v4398_v42 = vpop.f32.mrf.mxu3 }
 0x40d   : > { %v4453_v1 = vadd.f32 %v4452_v39, %v4395_v59  ;;  %v4457_v56 = vpop.f32.mrf.mxu0  ;;  %5303 = vmatpush.msrb.mxu3 %v5302_v37  ;;  %v18991_v59 = vand.u32 4294901760, %v14814_v41 }
 0x40e   : > { %v4526_v62 = vpop.f32.mrf.mxu1 }
 0x40f   : > { %v14894_v58 = vadd.f32 %v4514_v57, %v4453_v1  ;;  %4919 = vmatmul.f32.gmra.mxu2 %v14661_v46  ;;  %v12278_v57 = vld [vmem:[%s18231_s3 + $0x160] sm:$0xff] }
 0x410   : > { %v5207_v3 = vand.u32 4294901760, %v12278_v57 }
 0x411   : > { %4988 = vmatmul.f32.gmra.mxu3 %v14696_v36  ;;  %5055 = vmatmul.f32.gmra.mxu0 %v14643_v6 }
 0x412   : > { %5112 = vmatmul.f32.gmra.mxu1 %v14671_v24  ;;  %v4305_v18 = vpop.f32.mrf.mxu2  ;;  %5208 = vmatpush.msrb.mxu2 %v5207_v3  ;;  %v5305_v15 = vsub.f32 %v12278_v57, %v5207_v3 }
 0x413   : > { %v4399_v5 = vadd.f32 %v4398_v42, %v4305_v18  ;;  %5427 = vmatpush.msrb.mxu1 %v5207_v3 }
 0x414   : > { %v4402_v40 = vpop.f32.mrf.mxu3  ;;  %5492 = vmatpush.msra.mxu2 %v18991_v59  ;;  %v5306_v42 = vand.u32 4294901760, %v5305_v15  ;;  %5366 = vmatpush.msrb.mxu0 %v5305_v15 }
 0x415   : > { %v4458_v23 = vadd.f32 %v4457_v56, %v4399_v5  ;;  %v4462_v39 = vpop.f32.mrf.mxu0 }
 0x416   : > { %v4532_v38 = vpop.f32.mrf.mxu1  ;;  %5496 = vmatpush.msra.mxu2 %v18992_v60  ;;  %v5307_v18 = vsub.f32 %v5305_v15, %v5306_v42  ;;  %v5147_v60 = vrot.slane %v14359_v48, 2 }
 0x417   : > { %v14900_v7 = vadd.f32 %v4520_v28, %v4458_v23  ;;  %4924 = vmatmul.f32.gmra.mxu2 %v14685_v43 }
 0x418   : > { %5500 = vmatpush.msra.mxu2 %v5300_v53  ;;  %v12397_v53 = vld [vmem:[%s14334_s9] sm:$0xff] }
 0x419   : > { %4994 = vmatmul.f32.gmra.mxu3 %v14724_v52  ;;  %5059 = vmatmul.f32.gmra.mxu0 %v14671_v24  ;;  %v5144_v15 = vrot.slane %v12397_v53, 2 }
 0x41a   : > { %5116 = vmatmul.f32.gmra.mxu1 %v14698_v9  ;;  %v4313_v50 = vpop.f32.mrf.mxu2  ;;  %5504 = vmatpush.msra.mxu2 %v5306_v42 }
 0x41b   : > { %v4403_v35 = vadd.f32 %v4402_v40, %v4313_v50  ;;  %v5308_v40 = vand.u32 4294901760, %v5307_v18 }
 0x41c   : > { %v4406_v28 = vpop.f32.mrf.mxu3 }
 0x41d   : > { %v4463_v1 = vadd.f32 %v4462_v39, %v4403_v35  ;;  %v4467_v56 = vpop.f32.mrf.mxu0  ;;  %5309 = vmatpush.msrb.mxu3 %v5308_v40 }
 0x41e   : > { %v4538_v37 = vpop.f32.mrf.mxu1 }
 0x41f   : > { %v14913_v5 = vadd.f32 %v4526_v62, %v4463_v1  ;;  %4929 = vmatmul.f32.gmra.mxu2 %v14710_v17  ;;  %5551 = vmatpush.msra.mxu3 %v14810_v19  ;;  %v5145_v19 = vrot.slane %v14564_v2, 2 }
 0x421   : > { %5000 = vmatmul.f32.gmra.mxu3 %v14752_v33  ;;  %5063 = vmatmul.f32.gmra.mxu0 %v14698_v9  ;;  %v5146_v42 = vsel %vm1248_vm2, %v5144_v15, %v5145_v19 }
 0x422   : > { %5120 = vmatmul.f32.gmra.mxu1 %v14726_v26  ;;  %v4321_v41 = vpop.f32.mrf.mxu2  ;;  %5553 = vmatpush.msra.mxu3 %v14849_v49  ;;  %v5173_v2 = vsel %vm411_vm1, %v5146_v42, 0 }
 0x423   : > { %v4407_v23 = vadd.f32 %v4406_v28, %v4321_v41 }
 0x424   : > { %v4410_v8 = vpop.f32.mrf.mxu3  ;;  %5555 = vmatpush.msra.mxu3 %v14885_v16 }
 0x425   : > { %v4468_v62 = vadd.f32 %v4467_v56, %v4407_v23  ;;  %v12285_v56 = vld [vmem:[%s18231_s3 + $0x198] sm:$0xff]  ;;  %v14946_v23 = vand.u32 4294901760, %v5173_v2 }
 0x426   : > { %v4472_v39 = vpop.f32.mrf.mxu0  ;;  %5557 = vmatpush.msra.mxu3 %v5207_v3  ;;  %v5148_v3 = vrot.slane %v14596_v51, 2  ;;  %v14942_v18 = vand.u32 4294901760, %v12285_v56 }
 0x427   : > { %v4544_v57 = vpop.f32.mrf.mxu1  ;;  %v14921_v50 = vadd.f32 %v4532_v38, %v4468_v62  ;;  %4934 = vmatmul.f32.gmra.mxu2 %v14738_v13  ;;  %v5210_v15 = vsub.f32 %v5173_v2, %v14946_v23 }
 0x428   : > { %5620 = vmatpush.msra.mxu0 %v14942_v18  ;;  %v14949_v48 = vsub.f32 %v12285_v56, %v14942_v18 }
 0x429   : > { %5006 = vmatmul.f32.gmra.mxu3 %v14780_v30  ;;  %5067 = vmatmul.f32.gmra.mxu0 %v14726_v26 }
 0x42a   : > { %5124 = vmatmul.f32.gmra.mxu1 %v14754_v63  ;;  %v4329_v35 = vpop.f32.mrf.mxu2 }
 0x42b   : > { %v4411_v49 = vadd.f32 %v4410_v8, %v4329_v35  ;;  %v5149_v8 = vsel %vm1248_vm2, %v5147_v60, %v5148_v3  ;;  %v18457_v35 = vand.u32 4294901760, %v14949_v48  ;;  %v5211_v3 = vand.u32 4294901760, %v5210_v15 }
 0x42c   : > { %v4414_v28 = vpop.f32.mrf.mxu3  ;;  %v5175_v19 = vsel %vm411_vm1, %v5149_v8, 0 }
 0x42d   : > { %v4473_v38 = vadd.f32 %v4472_v39, %v4411_v49  ;;  %v12398_v49 = vld [vmem:[%s14334_s9 + $0x20] sm:$0xff]  ;;  %v14966_v56 = vand.u32 4294901760, %v5175_v19 }
 0x42e   : > { %v4477_v59 = vpop.f32.mrf.mxu0 }
 0x42f   : > { %v4550_v1 = vpop.f32.mrf.mxu1  ;;  %v14931_v16 = vadd.f32 %v4538_v37, %v4473_v38  ;;  %4939 = vmatmul.f32.gmra.mxu2 %v14766_v25  ;;  %v18993_v38 = vld [vmem:[#allocation40_spill] sm:$0xff] }
 0x431   : > { %5012 = vmatmul.f32.gmra.mxu3 %v14806_v11  ;;  %5071 = vmatmul.f32.gmra.mxu0 %v14754_v63 }
 0x432   : > { %5128 = vmatmul.f32.gmra.mxu1 %v14782_v12  ;;  %v4337_v37 = vpop.f32.mrf.mxu2 }
 0x433   : > { %v4415_v40 = vadd.f32 %v4414_v28, %v4337_v37  ;;  %v5150_v28 = vrot.slane %v12398_v49, 2 }
 0x434   : > { %v4418_v41 = vpop.f32.mrf.mxu3 }
 0x435   : > { %v4478_v62 = vadd.f32 %v4477_v59, %v4415_v40  ;;  %v5151_v59 = vrot.slane %v18993_v38, 2  ;;  %v5212_v38 = vsub.f32 %v5210_v15, %v5211_v3 }
 0x436   : > { %v4482_v39 = vpop.f32.mrf.mxu0 }
 0x437   : > { %v4556_v51 = vpop.f32.mrf.mxu1  ;;  %v14952_v53 = vadd.f32 %v4544_v57, %v4478_v62  ;;  %4944 = vmatmul.f32.gmra.mxu2 %v14791_v0  ;;  %v5707_v57 = vsub.f32 %v14949_v48, %v18457_v35  ;;  %v5152_v62 = vsel %vm1248_vm2, %v5150_v28, %v5151_v59  ;;  %v18995_v59 = vld [vmem:[#allocation42_spill] sm:$0xff] }
 0x438   : > { %v5177_v28 = vsel %vm411_vm1, %v5152_v62, 0 }
 0x439   : > { %5018 = vmatmul.f32.gmra.mxu3 %v14839_v31  ;;  %5075 = vmatmul.f32.gmra.mxu0 %v14782_v12  ;;  %v5708_v37 = vand.u32 4294901760, %v5707_v57  ;;  %v14972_v31 = vsub.f32 %v5175_v19, %v14966_v56  ;;  %v12399_v57 = vld [vmem:[%s14334_s9 + $0x30] sm:$0xff]  ;;  %v5154_v19 = vrot.slane %v18995_v59, 2 }
 0x43a   : > { %5132 = vmatmul.f32.gmra.mxu1 %v14808_v22  ;;  %v4345_v42 = vpop.f32.mrf.mxu2 }
 0x43b   : > { %v4419_v60 = vadd.f32 %v4418_v41, %v4345_v42  ;;  %5709 = vmatpush.msra.mxu1 %v5708_v37  ;;  %18994 = vst [vmem:[#allocation56_spill] sm:$0xff] %v14972_v31  ;;  %v12284_v41 = vld [vmem:[%s18231_s3 + $0x190] sm:$0xff] }
 0x43c   : > { %v4422_v2 = vpop.f32.mrf.mxu3  ;;  %v14985_v42 = vand.u32 4294901760, %v12284_v41 }
 0x43d   : > { %v4483_v40 = vadd.f32 %v4482_v39, %v4419_v60  ;;  %v5153_v39 = vrot.slane %v12399_v57, 2  ;;  %v14989_v60 = vand.u32 4294901760, %v14972_v31 }
 0x43e   : > { %v4487_v8 = vpop.f32.mrf.mxu0  ;;  %5622 = vmatpush.msra.mxu0 %v14985_v42 }
 0x43f   : > { %v14969_v49 = vpop.f32.mrf.mxu1  ;;  %v14974_v35 = vadd.f32 %v4550_v1, %v4483_v40  ;;  %4949 = vmatmul.f32.gmra.mxu2 %v14823_v44  ;;  %18996 = vst [vmem:[#allocation59_spill] sm:$0xff] %v14989_v60  ;;  %v5213_v40 = vand.u32 4294901760, %v5212_v38  ;;  %v14992_v44 = vand.u32 4294901760, %v5177_v28  ;;  %v5155_v62 = vsel %vm1248_vm2, %v5153_v39, %v5154_v19 }
 0x440   : > { %v5220_v0 = vsub.f32 %v14972_v31, %v14989_v60  ;;  %v5179_v38 = vsel %vm411_vm1, %v5155_v62, 0 }
 0x441   : > { %5079 = vmatmul.f32.gmra.mxu0 %v14808_v22  ;;  %5311 = vmatmul.f32.vlgmr.msrb.gmra.mxu3 %v14946_v23 }
 0x442   : > { %5431 = vmatmul.f32.vlgmr.msrb.gmra.mxu1 %v5211_v3  ;;  %5839 = vmatpush.msrb.mxu3 %v14942_v18  ;;  %v4353_v1 = vpop.f32.mrf.mxu2 }
 0x443   : > { %v4423_v37 = vadd.f32 %v4422_v2, %v4353_v1  ;;  %v15005_v2 = vsub.f32 %v5177_v28, %v14992_v44  ;;  %v15009_v1 = vsub.f32 %v12284_v41, %v14985_v42  ;;  %v15020_v41 = vand.u32 4294901760, %v5220_v0 }
 0x444   : > { %v4642_v57 = vpop.f32.mrf.mxu3  ;;  %5841 = vmatpush.msrb.mxu3 %v14985_v42 }
 0x445   : > { %v4488_v59 = vadd.f32 %v4487_v8, %v4423_v37  ;;  %18997 = vst [vmem:[#allocation71_spill] sm:$0xff] %v15005_v2  ;;  %v12400_v8 = vld [vmem:[%s14334_s9 + $0x40] sm:$0xff]  ;;  %v18471_v19 = vand.u32 4294901760, %v15009_v1 }
 0x446   : > { %v14996_v3 = vpop.f32.mrf.mxu0  ;;  %v5156_v39 = vrot.slane %v12400_v8, 2  ;;  %18999 = vst [vmem:[#allocation18_spill] sm:$0xff] %v15020_v41 }
 0x447   : > { %v15000_v22 = vpop.f32.mrf.mxu1  ;;  %v15002_v11 = vadd.f32 %v4556_v51, %v4488_v59  ;;  %5214 = vmatmul.f32.vlgmr.msrb.gmra.mxu2 %v5213_v40  ;;  %v18998_v51 = vld [vmem:[#allocation41_spill] sm:$0xff]  ;;  %v15017_v40 = vand.u32 4294901760, %v5179_v38  ;;  %v5713_v8 = vsub.f32 %v15009_v1, %v18471_v19 }
 0x448   : > { %v5157_v37 = vrot.slane %v18998_v51, 2  ;;  %5775 = vmatpush.msrb.mxu2 %v14949_v48 }
 0x449   : > { %5315 = vmatmul.f32.gmra.mxu3 %v14966_v56  ;;  %5369 = vmatmul.f32.vlgmr.msrb.gmra.mxu0 %v5210_v15  ;;  %v15023_v15 = vand.u32 4294901760, %v15005_v2  ;;  %v5714_v25 = vand.u32 4294901760, %v5713_v8  ;;  %v15035_v0 = vsub.f32 %v5179_v38, %v15017_v40 }
 0x44a   : > { %5437 = vmatmul.f32.gmra.mxu1 %v14989_v60  ;;  %v4589_v28 = vpop.f32.mrf.mxu2  ;;  %5778 = vmatpush.msrb.mxu2 %v15009_v1  ;;  %v5158_v12 = vsel %vm1248_vm2, %v5156_v39, %v5157_v37 }
 0x44b   : > { %v4590_v62 = vadd.f32 %v4589_v28, %v14894_v58  ;;  %19000 = vst [vmem:[#allocation54_spill] sm:$0xff] %v15023_v15  ;;  %v5228_v19 = vsub.f32 %v15005_v2, %v15023_v15  ;;  %5715 = vmatpush.msra.mxu1 %v5714_v25  ;;  %v5181_v38 = vsel %vm411_vm1, %v5158_v12, 0  ;;  %v15055_v25 = vand.u32 4294901760, %v15035_v0 }
 0x44c   : > { %v4646_v59 = vpop.f32.mrf.mxu3  ;;  %19001 = vst [vmem:[#allocation52_spill] sm:$0xff] %v15035_v0 }
 0x44d   : > { %v4643_v51 = vadd.f32 %v4642_v57, %v4590_v62  ;;  %v12283_v57 = vld [vmem:[%s18231_s3 + $0x188] sm:$0xff]  ;;  %v12401_v62 = vld [vmem:[%s14334_s9 + $0x50] sm:$0xff]  ;;  %19003 = vst [vmem:[#allocation57_spill] sm:$0xff] %v15055_v25  ;;  %v5236_v13 = vsub.f32 %v15035_v0, %v15055_v25 }
 0x44e   : > { %v15029_v60 = vpop.f32.mrf.mxu0  ;;  %v5159_v39 = vrot.slane %v12401_v62, 2  ;;  %v15051_v8 = vand.u32 4294901760, %v12283_v57 }
 0x44f   : > { %v15032_v58 = vpop.f32.mrf.mxu1  ;;  %v15038_v28 = vadd.f32 %v4643_v51, %v14719_v14  ;;  %5222 = vmatmul.f32.gmra.mxu2 %v15020_v41  ;;  %v19002_v14 = vld [vmem:[#allocation48_spill] sm:$0xff]  ;;  %v15062_v41 = vand.u32 4294901760, %v5181_v38 }
 0x450   : > { %v5160_v37 = vrot.slane %v19002_v14, 2  ;;  %5624 = vmatpush.msra.mxu0 %v15051_v8  ;;  %5843 = vmatpush.msrb.mxu3 %v15051_v8 }
 0x451   : > { %5319 = vmatmul.f32.gmra.mxu3 %v14992_v44  ;;  %5374 = vmatmul.f32.gmra.mxu0 %v14972_v31  ;;  %v15060_v31 = vand.u32 4294901760, %v5228_v19  ;;  %19005 = vst [vmem:[#allocation60_spill] sm:$0xff] %v15062_v41 }
 0x452   : > { %5443 = vmatmul.f32.gmra.mxu1 %v15023_v15  ;;  %v4593_v51 = vpop.f32.mrf.mxu2  ;;  %v5161_v14 = vsel %vm1248_vm2, %v5159_v39, %v5160_v37  ;;  %v5717_v39 = vsub.f32 %v12283_v57, %v15051_v8 }
 0x453   : > { %v4594_v62 = vadd.f32 %v4593_v51, %v14900_v7  ;;  %19004 = vst [vmem:[#allocation55_spill] sm:$0xff] %v15060_v31  ;;  %v15076_v7 = vsub.f32 %v5181_v38, %v15062_v41  ;;  %v5183_v19 = vsel %vm411_vm1, %v5161_v14, 0  ;;  %v15088_v14 = vand.u32 4294901760, %v5236_v13 }
 0x454   : > { %v4650_v12 = vpop.f32.mrf.mxu3  ;;  %v5718_v51 = vand.u32 4294901760, %v5717_v39  ;;  %5781 = vmatpush.msrb.mxu2 %v5717_v39 }
 0x455   : > { %v4647_v30 = vadd.f32 %v4646_v59, %v4594_v62  ;;  %19006 = vst [vmem:[#allocation58_spill] sm:$0xff] %v15076_v7  ;;  %v12402_v59 = vld [vmem:[%s14334_s9 + $0x60] sm:$0xff]  ;;  %v15085_v62 = vand.u32 4294901760, %v5183_v19 }
 0x456   : > { %v15065_v15 = vpop.f32.mrf.mxu0  ;;  %v5162_v37 = vrot.slane %v12402_v59, 2  ;;  %19008 = vst [vmem:[#allocation61_spill] sm:$0xff] %v15088_v14 }
 0x457   : > { %v15069_v63 = vpop.f32.mrf.mxu1  ;;  %v15072_v33 = vadd.f32 %v4647_v30, %v14747_v54  ;;  %5230 = vmatmul.f32.gmra.mxu2 %v15060_v31  ;;  %v5163_v54 = vrot.slane %v14731_v55, 2  ;;  %19007 = vst [vmem:[#allocation63_spill] sm:$0xff] %v15085_v62  ;;  %v15091_v31 = vand.u32 4294901760, %v15076_v7  ;;  %v15099_v52 = vsub.f32 %v5183_v19, %v15085_v62 }
 0x459   : > { %5323 = vmatmul.f32.gmra.mxu3 %v15017_v40  ;;  %5379 = vmatmul.f32.gmra.mxu0 %v15005_v2  ;;  %19009 = vst [vmem:[#allocation66_spill] sm:$0xff] %v15091_v31  ;;  %v5719_v2 = vsub.f32 %v5717_v39, %v5718_v51  ;;  %v5164_v55 = vsel %vm1248_vm2, %v5162_v37, %v5163_v54  ;;  %v5166_v37 = vrot.slane %v14759_v29, 2 }
 0x45a   : > { %5449 = vmatmul.f32.gmra.mxu1 %v15055_v25  ;;  %v4597_v30 = vpop.f32.mrf.mxu2  ;;  %19010 = vst [vmem:[#allocation64_spill] sm:$0xff] %v15099_v52 }
 0x45b   : > { %v4598_v38 = vadd.f32 %v4597_v30, %v14913_v5  ;;  %v5720_v25 = vand.u32 4294901760, %v5719_v2  ;;  %v5244_v5 = vsub.f32 %v15076_v7, %v15091_v31  ;;  %v12282_v2 = vld [vmem:[%s18231_s3 + $0x180] sm:$0xff] }
 0x45c   : > { %v4654_v57 = vpop.f32.mrf.mxu3  ;;  %v15113_v19 = vand.u32 4294901760, %v12282_v2 }
 0x45d   : > { %v4651_v59 = vadd.f32 %v4650_v12, %v4598_v38  ;;  %5721 = vmatpush.msra.mxu1 %v5720_v25  ;;  %v5185_v12 = vsel %vm411_vm1, %v5164_v55, 0  ;;  %v15119_v25 = vand.u32 4294901760, %v15099_v52  ;;  %v15124_v38 = vand.u32 4294901760, %v5244_v5 }
 0x45e   : > { %v15093_v17 = vpop.f32.mrf.mxu0  ;;  %5626 = vmatpush.msra.mxu0 %v15113_v19  ;;  %5845 = vmatpush.msrb.mxu3 %v15113_v19  ;;  %v15126_v55 = vand.u32 4294901760, %v5185_v12 }
 0x45f   : > { %v15096_v26 = vpop.f32.mrf.mxu1  ;;  %v15102_v13 = vadd.f32 %v4651_v59, %v14775_v47  ;;  %5238 = vmatmul.f32.gmra.mxu2 %v15088_v14  ;;  %v12403_v47 = vld [vmem:[%s14334_s9 + $0x70] sm:$0xff]  ;;  %19011 = vst [vmem:[#allocation70_spill] sm:$0xff] %v15119_v25  ;;  %v19015_v14 = vand.u32 4294901760, %v15009_v1  ;;  %v5252_v43 = vsub.f32 %v15099_v52, %v15119_v25 }
 0x460   : > { %v5165_v39 = vrot.slane %v12403_v47, 2  ;;  %19012 = vst [vmem:[#allocation68_spill] sm:$0xff] %v15124_v38  ;;  %v19014_v47 = vand.u32 4294901760, %v14949_v48  ;;  %v15144_v48 = vsub.f32 %v5185_v12, %v15126_v55 }
 0x461   : > { %5327 = vmatmul.f32.gmra.mxu3 %v15062_v41  ;;  %5384 = vmatmul.f32.gmra.mxu0 %v15035_v0  ;;  %19013 = vst [vmem:[#allocation10_spill] sm:$0xff] %v15126_v55 }
 0x462   : > { %5455 = vmatmul.f32.gmra.mxu1 %v15091_v31  ;;  %v4601_v54 = vpop.f32.mrf.mxu2  ;;  %5910 = vmatpush.msrb.mxu0 %v19014_v47  ;;  %v5167_v0 = vsel %vm1248_vm2, %v5165_v39, %v5166_v37  ;;  %19016 = vst [vmem:[#allocation4_spill] sm:$0xff] %v15144_v48  ;;  %v15155_v37 = vand.u32 4294901760, %v15144_v48 }
 0x463   : > { %v4602_v30 = vadd.f32 %v4601_v54, %v14921_v50  ;;  %v5187_v1 = vsel %vm411_vm1, %v5167_v0, 0 }
 0x464   : > { %v4658_v59 = vpop.f32.mrf.mxu3  ;;  %5914 = vmatpush.msrb.mxu0 %v19015_v14  ;;  %19018 = vst [vmem:[#allocation42_spill] sm:$0xff] %v15155_v37 }
 0x465   : > { %v4655_v31 = vadd.f32 %v4654_v57, %v4602_v30  ;;  %v5723_v57 = vsub.f32 %v12282_v2, %v15113_v19 }
 0x466   : > { %v15130_v29 = vpop.f32.mrf.mxu0  ;;  %5918 = vmatpush.msrb.mxu0 %v5718_v51  ;;  %v15157_v51 = vand.u32 4294901760, %v5187_v1 }
 0x467   : > { %v15137_v50 = vpop.f32.mrf.mxu1  ;;  %v15140_v5 = vadd.f32 %v4655_v31, %v14798_v4  ;;  %5246 = vmatmul.f32.gmra.mxu2 %v15124_v38  ;;  %v5724_v14 = vand.u32 4294901760, %v5723_v57  ;;  %v15151_v4 = vand.u32 4294901760, %v5252_v43  ;;  %v5260_v43 = vsub.f32 %v15144_v48, %v15155_v37 }
 0x468   : > { %5784 = vmatpush.msrb.mxu2 %v5723_v57  ;;  %19019 = vst [vmem:[#allocation41_spill] sm:$0xff] %v15157_v51 }
 0x469   : > { %5331 = vmatmul.f32.gmra.mxu3 %v15085_v62  ;;  %5389 = vmatmul.f32.gmra.mxu0 %v15076_v7  ;;  %19017 = vst [vmem:[#allocation40_spill] sm:$0xff] %v15151_v4  ;;  %v5725_v2 = vsub.f32 %v5723_v57, %v5724_v14  ;;  %v15177_v57 = vand.u32 4294901760, %v5260_v43 }
 0x46a   : > { %5461 = vmatmul.f32.gmra.mxu1 %v15119_v25  ;;  %v4605_v31 = vpop.f32.mrf.mxu2  ;;  %5922 = vmatpush.msrb.mxu0 %v5724_v14 }
 0x46b   : > { %v4606_v39 = vadd.f32 %v4605_v31, %v14931_v16  ;;  %v5726_v0 = vand.u32 4294901760, %v5725_v2  ;;  %v15170_v16 = vsub.f32 %v5187_v1, %v15157_v51  ;;  %19021 = vst [vmem:[#allocation75_spill] sm:$0xff] %v15177_v57 }
 0x46c   : > { %v4662_v12 = vpop.f32.mrf.mxu3 }
 0x46d   : > { %v4659_v54 = vadd.f32 %v4658_v59, %v4606_v39  ;;  %19020 = vst [vmem:[#allocation48_spill] sm:$0xff] %v15170_v16  ;;  %5727 = vmatpush.msra.mxu1 %v5726_v0  ;;  %v15180_v31 = vand.u32 4294901760, %v15170_v16 }
 0x46e   : > { %v15159_v30 = vpop.f32.mrf.mxu0 }
 0x46f   : > { %v15161_v47 = vpop.f32.mrf.mxu1  ;;  %v15164_v25 = vadd.f32 %v4659_v54, %v14834_v20  ;;  %5254 = vmatmul.f32.gmra.mxu2 %v15151_v4  ;;  %5969 = vmatpush.msrb.mxu1 %v14942_v18  ;;  %19022 = vst [vmem:[#allocation76_spill] sm:$0xff] %v15180_v31  ;;  %v5268_v18 = vsub.f32 %v15170_v16, %v15180_v31 }
 0x471   : > { %5335 = vmatmul.f32.gmra.mxu3 %v15126_v55  ;;  %5394 = vmatmul.f32.gmra.mxu0 %v15099_v52 }
 0x472   : > { %5467 = vmatmul.f32.gmra.mxu1 %v15155_v37  ;;  %v4609_v59 = vpop.f32.mrf.mxu2 }
 0x473   : > { %v4610_v20 = vadd.f32 %v4609_v59, %v14952_v53  ;;  %5971 = vmatpush.msrb.mxu1 %v14985_v42 }
 0x474   : > { %v4666_v14 = vpop.f32.mrf.mxu3 }
 0x475   : > { %v4663_v1 = vadd.f32 %v4662_v12, %v4610_v20  ;;  %5973 = vmatpush.msrb.mxu1 %v15051_v8  ;;  %v15199_v8 = vand.u32 4294901760, %v5268_v18  ;;  %v19024_v20 = vld [vmem:[#allocation11_spill] sm:$0xff] }
 0x476   : > { %v15183_v39 = vpop.f32.mrf.mxu0 }
 0x477   : > { %v15185_v2 = vpop.f32.mrf.mxu1  ;;  %v15189_v54 = vadd.f32 %v4663_v1, %v14860_v21  ;;  %5262 = vmatmul.f32.gmra.mxu2 %v15177_v57  ;;  %5975 = vmatpush.msrb.mxu1 %v15113_v19  ;;  %19023 = vst [vmem:[#allocation77_spill] sm:$0xff] %v15199_v8 }
 0x479   : > { %5339 = vmatmul.f32.gmra.mxu3 %v15157_v51  ;;  %5399 = vmatmul.f32.gmra.mxu0 %v15144_v48 }
 0x47a   : > { %5473 = vmatmul.f32.gmra.mxu1 %v15180_v31  ;;  %v4613_v53 = vpop.f32.mrf.mxu2 }
 0x47b   : > { %v4614_v42 = vadd.f32 %v4613_v53, %v14974_v35 }
 0x47c   : > { %v4670_v21 = vpop.f32.mrf.mxu3 }
 0x47d   : > { %v4667_v12 = vadd.f32 %v4666_v14, %v4614_v42 }
 0x47e   : > { %v15201_v0 = vpop.f32.mrf.mxu0 }
 0x47f   : > { %v5105_v43 = vpop.f32.mrf.mxu1  ;;  %v15204_v59 = vadd.f32 %v4667_v12, %v14877_v61  ;;  %5270 = vmatmul.f32.gmra.mxu2 %v15199_v8  ;;  %v19025_v61 = vld [vmem:[#allocation17_spill] sm:$0xff]  ;;  %v4858_v12 = vadd.f32 %v14969_v49, %v14996_v3 }
 0x481   : > { %5404 = vmatmul.f32.gmra.mxu0 %v15170_v16  ;;  %5559 = vmatmul.f32.vlgmr.msra.gmra.mxu3 %v14946_v23  ;;  %v19026_v16 = vld [vmem:[#allocation3_spill] sm:$0xff] }
 0x482   : > { %5729 = vmatmul.f32.vlgmr.msra.gmra.mxu1 %v19024_v20  ;;  %v4617_v19 = vpop.f32.mrf.mxu2 }
 0x483   : > { %v4618_v35 = vadd.f32 %v4617_v19, %v15002_v11 }
 0x484   : > { %v4977_v1 = vpop.f32.mrf.mxu3 }
 0x485   : > { %v4671_v18 = vadd.f32 %v4670_v21, %v4618_v35 }
 0x486   : > { %v5052_v14 = vpop.f32.mrf.mxu0 }
 0x487   : > { %v5109_v53 = vpop.f32.mrf.mxu1  ;;  %v15212_v42 = vadd.f32 %v4671_v18, %v14892_v34  ;;  %5506 = vmatmul.f32.vlgmr.msra.gmra.mxu2 %v14946_v23  ;;  %v19027_v34 = vld [vmem:[#allocation69_spill] sm:$0xff]  ;;  %v4862_v23 = vadd.f32 %v15000_v22, %v15029_v60  ;;  %v4866_v22 = vadd.f32 %v15032_v58, %v15065_v15  ;;  %v4870_v15 = vadd.f32 %v15069_v63, %v15093_v17  ;;  %v19032_v17 = vld [vmem:[#allocation38_spill] sm:$0xff] }
 0x488   : > { %v4874_v63 = vadd.f32 %v15096_v26, %v15130_v29 }
 0x489   : > { %5563 = vmatmul.f32.gmra.mxu3 %v14966_v56  ;;  %5632 = vmatmul.f32.vlgmr.msra.gmra.mxu0 %v19025_v61 }
 0x48a   : > { %5733 = vmatmul.f32.gmra.mxu1 %v19026_v16  ;;  %v4915_v31 = vpop.f32.mrf.mxu2 }
 0x48b   : > { %v4916_v11 = vadd.f32 %v4915_v31, %v4858_v12 }
 0x48c   : > { %v4983_v19 = vpop.f32.mrf.mxu3 }
 0x48d   : > { %v4978_v21 = vadd.f32 %v4977_v1, %v4916_v11 }
 0x48e   : > { %v5056_v35 = vpop.f32.mrf.mxu0 }
 0x48f   : > { %v5113_v48 = vpop.f32.mrf.mxu1  ;;  %v5053_v37 = vadd.f32 %v5052_v14, %v4978_v21  ;;  %5510 = vmatmul.f32.gmra.mxu2 %v14966_v56  ;;  %v19028_v21 = vld [vmem:[#allocation39_spill] sm:$0xff] }
 0x491   : > { %5567 = vmatmul.f32.gmra.mxu3 %v14992_v44  ;;  %5640 = vmatmul.f32.gmra.mxu0 %v19027_v34  ;;  %v5106_v18 = vadd.f32 %v5105_v43, %v5053_v37  ;;  %v19029_v37 = vld [vmem:[#allocation67_spill] sm:$0xff]  ;;  %v19040_v34 = vld [vmem:[#allocation8_spill] sm:$0xff] }
 0x492   : > { %5737 = vmatmul.f32.gmra.mxu1 %v14428_v32  ;;  %v4920_v49 = vpop.f32.mrf.mxu2 }
 0x493   : > { %v15227_v3 = vadd.f32 %v5106_v18, %v15038_v28  ;;  %v4921_v31 = vadd.f32 %v4920_v49, %v4862_v23 }
 0x494   : > { %v4989_v1 = vpop.f32.mrf.mxu3 }
 0x495   : > { %v4984_v61 = vadd.f32 %v4983_v19, %v4921_v31 }
 0x496   : > { %v5060_v14 = vpop.f32.mrf.mxu0 }
 0x497   : > { %v5117_v12 = vpop.f32.mrf.mxu1  ;;  %v5057_v11 = vadd.f32 %v5056_v35, %v4984_v61  ;;  %5514 = vmatmul.f32.gmra.mxu2 %v14992_v44  ;;  %v19030_v61 = vld [vmem:[#allocation49_spill] sm:$0xff] }
 0x499   : > { %5571 = vmatmul.f32.gmra.mxu3 %v15017_v40  ;;  %5648 = vmatmul.f32.gmra.mxu0 %v19028_v21  ;;  %v5110_v60 = vadd.f32 %v5109_v53, %v5057_v11  ;;  %v19031_v53 = vld [vmem:[#allocation34_spill] sm:$0xff] }
 0x49a   : > { %5741 = vmatmul.f32.gmra.mxu1 %v19029_v37  ;;  %v4925_v28 = vpop.f32.mrf.mxu2 }
 0x49b   : > { %v15236_v43 = vadd.f32 %v5110_v60, %v15072_v33  ;;  %v4926_v19 = vadd.f32 %v4925_v28, %v4866_v22 }
 0x49c   : > { %v4995_v23 = vpop.f32.mrf.mxu3 }
 0x49d   : > { %v4990_v18 = vadd.f32 %v4989_v1, %v4926_v19  ;;  %v15248_v19 = vld [vmem:[%s14334_s9 + $0x80] sm:$0xff] }
 0x49e   : > { %v5064_v35 = vpop.f32.mrf.mxu0 }
 0x49f   : > { %v5121_v49 = vpop.f32.mrf.mxu1  ;;  %v5061_v31 = vadd.f32 %v5060_v14, %v4990_v18  ;;  %5518 = vmatmul.f32.gmra.mxu2 %v15017_v40 }
 0x4a1   : > { %5575 = vmatmul.f32.gmra.mxu3 %v15062_v41  ;;  %5656 = vmatmul.f32.gmra.mxu0 %v19030_v61  ;;  %v5114_v58 = vadd.f32 %v5113_v48, %v5061_v31 }
 0x4a2   : > { %5745 = vmatmul.f32.gmra.mxu1 %v19031_v53  ;;  %v4930_v33 = vpop.f32.mrf.mxu2 }
 0x4a3   : > { %v15245_v11 = vadd.f32 %v5114_v58, %v15102_v13  ;;  %v4931_v1 = vadd.f32 %v4930_v33, %v4870_v15  ;;  %v5605_v13 = vsel %vm411_vm1, %v15248_v19, 0  ;;  %v12289_v58 = vld [vmem:[%s18231_s3 + $0x1b8] sm:$0xff] }
 0x4a4   : > { %v5001_v22 = vpop.f32.mrf.mxu3  ;;  %v15264_v33 = vand.u32 4294901760, %v5605_v13 }
 0x4a5   : > { %v4996_v60 = vadd.f32 %v4995_v23, %v4931_v1  ;;  %v15266_v1 = vand.u32 4294901760, %v12289_v58 }
 0x4a6   : > { %v5068_v14 = vpop.f32.mrf.mxu0  ;;  %19033 = vst [vmem:[#allocation11_spill] sm:$0xff] %v15264_v33 }
 0x4a7   : > { %v5125_v28 = vpop.f32.mrf.mxu1  ;;  %v5065_v18 = vadd.f32 %v5064_v35, %v4996_v60  ;;  %5522 = vmatmul.f32.gmra.mxu2 %v15062_v41  ;;  %v15270_v60 = vsub.f32 %v12289_v58, %v15266_v1  ;;  %6260 = vmatpush.msra.mxu1 %v15266_v1 }
 0x4a8   : > { %6041 = vmatpush.msra.mxu2 %v15266_v1 }
 0x4a9   : > { %5579 = vmatmul.f32.gmra.mxu3 %v15085_v62  ;;  %5664 = vmatmul.f32.gmra.mxu0 %v19032_v17  ;;  %v5118_v48 = vadd.f32 %v5117_v12, %v5065_v18  ;;  %v19034_v18 = vld [vmem:[#allocation35_spill] sm:$0xff] }
 0x4aa   : > { %5749 = vmatmul.f32.gmra.mxu1 %v14540_v27  ;;  %v4935_v23 = vpop.f32.mrf.mxu2  ;;  %6196 = vmatpush.msra.mxu0 %v15270_v60 }
 0x4ab   : > { %v15259_v31 = vadd.f32 %v5118_v48, %v15140_v5  ;;  %v4936_v35 = vadd.f32 %v4935_v23, %v4874_v63  ;;  %v15277_v63 = vsub.f32 %v5605_v13, %v15264_v33  ;;  %v4878_v48 = vadd.f32 %v15137_v50, %v15159_v30 }
 0x4ac   : > { %v5007_v15 = vpop.f32.mrf.mxu3 }
 0x4ad   : > { %v5002_v26 = vadd.f32 %v5001_v22, %v4936_v35  ;;  %19035 = vst [vmem:[#allocation17_spill] sm:$0xff] %v15277_v63  ;;  %v18514_v22 = vand.u32 4294901760, %v15270_v60 }
 0x4ae   : > { %v5072_v29 = vpop.f32.mrf.mxu0 }
 0x4af   : > { %v5129_v12 = vpop.f32.mrf.mxu1  ;;  %v5069_v5 = vadd.f32 %v5068_v14, %v5002_v26  ;;  %5526 = vmatmul.f32.gmra.mxu2 %v15085_v62  ;;  %v6128_v35 = vsub.f32 %v15270_v60, %v18514_v22  ;;  %v12288_v22 = vld [vmem:[%s18231_s3 + $0x1b0] sm:$0xff] }
 0x4b1   : > { %5583 = vmatmul.f32.gmra.mxu3 %v15126_v55  ;;  %5672 = vmatmul.f32.gmra.mxu0 %v19034_v18  ;;  %v5122_v23 = vadd.f32 %v5121_v49, %v5069_v5  ;;  %v15291_v18 = vand.u32 4294901760, %v15277_v63  ;;  %v6129_v17 = vand.u32 4294901760, %v6128_v35 }
 0x4b2   : > { %5753 = vmatmul.f32.gmra.mxu1 %v14579_v10  ;;  %v4940_v14 = vpop.f32.mrf.mxu2 }
 0x4b3   : > { %v15288_v58 = vadd.f32 %v5122_v23, %v15164_v25  ;;  %v4941_v13 = vadd.f32 %v4940_v14, %v4878_v48  ;;  %19036 = vst [vmem:[#allocation78_spill] sm:$0xff] %v15291_v18  ;;  %6130 = vmatpush.msra.mxu3 %v6129_v17  ;;  %v19037_v25 = vld [vmem:[#allocation37_spill] sm:$0xff]  ;;  %v5686_v48 = vsub.f32 %v15277_v63, %v15291_v18  ;;  %v15301_v23 = vand.u32 4294901760, %v12288_v22 }
 0x4b4   : > { %v5013_v26 = vpop.f32.mrf.mxu3 }
 0x4b5   : > { %v5008_v50 = vadd.f32 %v5007_v15, %v4941_v13  ;;  %v4882_v15 = vadd.f32 %v15161_v47, %v15183_v39  ;;  %6043 = vmatpush.msra.mxu2 %v15301_v23  ;;  %v15308_v14 = vsub.f32 %v12288_v22, %v15301_v23  ;;  %6262 = vmatpush.msra.mxu1 %v15301_v23 }
 0x4b6   : > { %v5076_v30 = vpop.f32.mrf.mxu0 }
 0x4b7   : > { %v5133_v49 = vpop.f32.mrf.mxu1  ;;  %v5073_v5 = vadd.f32 %v5072_v29, %v5008_v50  ;;  %5530 = vmatmul.f32.gmra.mxu2 %v15126_v55  ;;  %v18515_v47 = vand.u32 4294901760, %v15308_v14  ;;  %6199 = vmatpush.msra.mxu0 %v15308_v14 }
 0x4b9   : > { %5587 = vmatmul.f32.gmra.mxu3 %v15157_v51  ;;  %5680 = vmatmul.f32.gmra.mxu0 %v19037_v25  ;;  %v5126_v17 = vadd.f32 %v5125_v28, %v5073_v5  ;;  %v15314_v25 = vand.u32 4294901760, %v5686_v48  ;;  %v6134_v22 = vsub.f32 %v15308_v14, %v18515_v47 }
 0x4ba   : > { %5757 = vmatmul.f32.gmra.mxu1 %v15264_v33  ;;  %v4945_v29 = vpop.f32.mrf.mxu2 }
 0x4bb   : > { %v15312_v35 = vadd.f32 %v5126_v17, %v15189_v54  ;;  %v4946_v13 = vadd.f32 %v4945_v29, %v4882_v15  ;;  %19038 = vst [vmem:[#allocation79_spill] sm:$0xff] %v15314_v25  ;;  %v19039_v54 = vld [vmem:[#allocation20_spill] sm:$0xff]  ;;  %v6135_v48 = vand.u32 4294901760, %v6134_v22  ;;  %v4886_v15 = vadd.f32 %v15185_v2, %v15201_v0  ;;  %v12287_v2 = vld [vmem:[%s18231_s3 + $0x1a8] sm:$0xff]  ;;  %v19041_v0 = vld [vmem:[#allocation53_spill] sm:$0xff] }
 0x4bc   : > { %v5019_v50 = vpop.f32.mrf.mxu3 }
 0x4bd   : > { %v5014_v39 = vadd.f32 %v5013_v26, %v4946_v13  ;;  %6136 = vmatpush.msra.mxu3 %v6135_v48 }
 0x4be   : > { %v5080_v28 = vpop.f32.mrf.mxu0 }
 0x4bf   : > { %v5432_v5 = vpop.f32.mrf.mxu1  ;;  %v5077_v61 = vadd.f32 %v5076_v30, %v5014_v39  ;;  %5534 = vmatmul.f32.gmra.mxu2 %v15157_v51 }
 0x4c1   : > { %5688 = vmatmul.f32.gmra.mxu0 %v15314_v25  ;;  %5849 = vmatmul.f32.vlgmr.msrb.gmra.mxu3 %v19039_v54  ;;  %v5130_v17 = vadd.f32 %v5129_v12, %v5077_v61  ;;  %v15336_v61 = vand.u32 4294901760, %v12287_v2 }
 0x4c2   : > { %5977 = vmatmul.f32.vlgmr.msrb.gmra.mxu1 %v19024_v20  ;;  %v4950_v26 = vpop.f32.mrf.mxu2 }
 0x4c3   : > { %v15328_v29 = vadd.f32 %v5130_v17, %v15204_v59  ;;  %v4951_v13 = vadd.f32 %v4950_v26, %v4886_v15  ;;  %6045 = vmatpush.msra.mxu2 %v15336_v61  ;;  %6264 = vmatpush.msra.mxu1 %v15336_v61  ;;  %v19042_v17 = vld [vmem:[#allocation9_spill] sm:$0xff] }
 0x4c4   : > { %v5312_v30 = vpop.f32.mrf.mxu3  ;;  %v19043_v26 = vld [vmem:[#allocation65_spill] sm:$0xff] }
 0x4c5   : > { %v5020_v39 = vadd.f32 %v5019_v50, %v4951_v13  ;;  %v6138_v50 = vsub.f32 %v12287_v2, %v15336_v61 }
 0x4c6   : > { %v5370_v47 = vpop.f32.mrf.mxu0 }
 0x4c7   : > { %v5438_v21 = vpop.f32.mrf.mxu1  ;;  %v5081_v25 = vadd.f32 %v5080_v28, %v5020_v39  ;;  %5787 = vmatmul.f32.vlgmr.msrb.gmra.mxu2 %v19040_v34  ;;  %v6139_v54 = vand.u32 4294901760, %v6138_v50  ;;  %6202 = vmatpush.msra.mxu0 %v6138_v50 }
 0x4c9   : > { %5855 = vmatmul.f32.gmra.mxu3 %v19041_v0  ;;  %5924 = vmatmul.f32.vlgmr.msrb.gmra.mxu0 %v19024_v20  ;;  %v5134_v59 = vadd.f32 %v5133_v49, %v5081_v25  ;;  %v6140_v49 = vsub.f32 %v6138_v50, %v6139_v54  ;;  %v12286_v50 = vld [vmem:[%s18231_s3 + $0x1a0] sm:$0xff] }
 0x4ca   : > { %5981 = vmatmul.f32.gmra.mxu1 %v19026_v16  ;;  %v5215_v12 = vpop.f32.mrf.mxu2 }
 0x4cb   : > { %v15343_v34 = vadd.f32 %v5134_v59, %v15212_v42  ;;  %v5313_v28 = vadd.f32 %v5312_v30, %v5215_v12  ;;  %v6141_v13 = vand.u32 4294901760, %v6140_v49 }
 0x4cc   : > { %v5316_v22 = vpop.f32.mrf.mxu3 }
 0x4cd   : > { %v5371_v20 = vadd.f32 %v5370_v47, %v5313_v28  ;;  %6142 = vmatpush.msra.mxu3 %v6141_v13  ;;  %v19045_v28 = vld [vmem:[#allocation36_spill] sm:$0xff]  ;;  %v19046_v13 = vand.u32 4294901760, %v15270_v60 }
 0x4ce   : > { %v5375_v48 = vpop.f32.mrf.mxu0 }
 0x4cf   : > { %v5444_v15 = vpop.f32.mrf.mxu1  ;;  %v15345_v25 = vadd.f32 %v5432_v5, %v5371_v20  ;;  %5792 = vmatmul.f32.gmra.mxu2 %v19042_v17  ;;  %v19044_v5 = vld [vmem:[#allocation62_spill] sm:$0xff]  ;;  %v6046_v20 = vand.u32 4294901760, %v12286_v50 }
 0x4d1   : > { %5861 = vmatmul.f32.gmra.mxu3 %v19043_v26  ;;  %5928 = vmatmul.f32.gmra.mxu0 %v19026_v16  ;;  %v19069_v16 = vld [vmem:[#allocation25_spill] sm:$0xff] }
 0x4d2   : > { %5985 = vmatmul.f32.gmra.mxu1 %v14428_v32  ;;  %v5223_v42 = vpop.f32.mrf.mxu2  ;;  %6047 = vmatpush.msra.mxu2 %v6046_v20 }
 0x4d3   : > { %v5317_v30 = vadd.f32 %v5316_v22, %v5223_v42  ;;  %6266 = vmatpush.msra.mxu1 %v6046_v20 }
 0x4d4   : > { %v5320_v39 = vpop.f32.mrf.mxu3  ;;  %6331 = vmatpush.msrb.mxu2 %v19046_v13 }
 0x4d5   : > { %v5376_v2 = vadd.f32 %v5375_v48, %v5317_v30  ;;  %v6144_v48 = vsub.f32 %v12286_v50, %v6046_v20  ;;  %v19049_v50 = vld [vmem:[#allocation45_spill] sm:$0xff] }
 0x4d6   : > { %v5380_v47 = vpop.f32.mrf.mxu0 }
 0x4d7   : > { %v5450_v59 = vpop.f32.mrf.mxu1  ;;  %v15351_v12 = vadd.f32 %v5438_v21, %v5376_v2  ;;  %5797 = vmatmul.f32.gmra.mxu2 %v19044_v5  ;;  %v6145_v42 = vand.u32 4294901760, %v6144_v48  ;;  %6205 = vmatpush.msra.mxu0 %v6144_v48 }
 0x4d9   : > { %5867 = vmatmul.f32.gmra.mxu3 %v19045_v28  ;;  %5932 = vmatmul.f32.gmra.mxu0 %v14428_v32  ;;  %v19047_v28 = vand.u32 4294901760, %v15308_v14  ;;  %v6146_v26 = vsub.f32 %v6144_v48, %v6145_v42  ;;  %v19048_v32 = vld [vmem:[#allocation30_spill] sm:$0xff] }
 0x4da   : > { %5989 = vmatmul.f32.gmra.mxu1 %v19029_v37  ;;  %v5231_v22 = vpop.f32.mrf.mxu2 }
 0x4db   : > { %v5321_v49 = vadd.f32 %v5320_v39, %v5231_v22  ;;  %6335 = vmatpush.msrb.mxu2 %v19047_v28  ;;  %v6147_v39 = vand.u32 4294901760, %v6146_v26  ;;  %v19051_v26 = vld [vmem:[#allocation74_spill] sm:$0xff] }
 0x4dc   : > { %v5324_v21 = vpop.f32.mrf.mxu3 }
 0x4dd   : > { %v5381_v30 = vadd.f32 %v5380_v47, %v5321_v49  ;;  %6339 = vmatpush.msrb.mxu2 %v6139_v54  ;;  %6148 = vmatpush.msra.mxu3 %v6147_v39  ;;  %v19050_v49 = vld [vmem:[#allocation43_spill] sm:$0xff] }
 0x4de   : > { %v5385_v2 = vpop.f32.mrf.mxu0 }
 0x4df   : > { %v5456_v5 = vpop.f32.mrf.mxu1  ;;  %v15364_v17 = vadd.f32 %v5444_v15, %v5381_v30  ;;  %5802 = vmatmul.f32.gmra.mxu2 %v19048_v32  ;;  %6390 = vmatpush.msrb.mxu3 %v15266_v1 }
 0x4e0   : > { %6343 = vmatpush.msrb.mxu2 %v6145_v42 }
 0x4e1   : > { %5873 = vmatmul.f32.gmra.mxu3 %v19049_v50  ;;  %5936 = vmatmul.f32.gmra.mxu0 %v19029_v37 }
 0x4e2   : > { %5993 = vmatmul.f32.gmra.mxu1 %v19031_v53  ;;  %v5239_v60 = vpop.f32.mrf.mxu2  ;;  %6392 = vmatpush.msrb.mxu3 %v15301_v23 }
 0x4e3   : > { %v5325_v47 = vadd.f32 %v5324_v21, %v5239_v60 }
 0x4e4   : > { %v5328_v22 = vpop.f32.mrf.mxu3  ;;  %6394 = vmatpush.msrb.mxu3 %v15336_v61  ;;  %v12293_v61 = vld [vmem:[%s18231_s3 + $0x1d8] sm:$0xff] }
 0x4e5   : > { %v5386_v14 = vadd.f32 %v5385_v2, %v5325_v47  ;;  %v19053_v2 = vld [vmem:[#allocation33_spill] sm:$0xff]  ;;  %v15387_v39 = vand.u32 4294901760, %v12293_v61 }
 0x4e6   : > { %v5390_v15 = vpop.f32.mrf.mxu0  ;;  %6396 = vmatpush.msrb.mxu3 %v6046_v20 }
 0x4e7   : > { %v5462_v28 = vpop.f32.mrf.mxu1  ;;  %v15372_v48 = vadd.f32 %v5450_v59, %v5386_v14  ;;  %5807 = vmatmul.f32.gmra.mxu2 %v19050_v49  ;;  %v19052_v59 = vld [vmem:[#allocation51_spill] sm:$0xff]  ;;  %6461 = vmatpush.msrb.mxu0 %v15387_v39  ;;  %v15392_v47 = vsub.f32 %v12293_v61, %v15387_v39 }
 0x4e9   : > { %5879 = vmatmul.f32.gmra.mxu3 %v19051_v26  ;;  %5940 = vmatmul.f32.gmra.mxu0 %v19031_v53  ;;  %v19062_v26 = vld [vmem:[#allocation29_spill] sm:$0xff] }
 0x4ea   : > { %5997 = vmatmul.f32.gmra.mxu1 %v14540_v27  ;;  %v5247_v1 = vpop.f32.mrf.mxu2 }
 0x4eb   : > { %v5329_v54 = vadd.f32 %v5328_v22, %v5247_v1 }
 0x4ec   : > { %v5332_v21 = vpop.f32.mrf.mxu3 }
 0x4ed   : > { %v5391_v13 = vadd.f32 %v5390_v15, %v5329_v54  ;;  %v19054_v54 = vld [vmem:[#allocation31_spill] sm:$0xff] }
 0x4ee   : > { %v5395_v42 = vpop.f32.mrf.mxu0 }
 0x4ef   : > { %v5468_v23 = vpop.f32.mrf.mxu1  ;;  %v15379_v30 = vadd.f32 %v5456_v5, %v5391_v13  ;;  %5812 = vmatmul.f32.gmra.mxu2 %v19052_v59  ;;  %v18520_v13 = vand.u32 4294901760, %v15392_v47  ;;  %v19060_v59 = vld [vmem:[#allocation21_spill] sm:$0xff] }
 0x4f1   : > { %5885 = vmatmul.f32.gmra.mxu3 %v19053_v2  ;;  %5944 = vmatmul.f32.gmra.mxu0 %v14540_v27 }
 0x4f2   : > { %6001 = vmatmul.f32.gmra.mxu1 %v14579_v10  ;;  %v5255_v20 = vpop.f32.mrf.mxu2 }
 0x4f3   : > { %v5333_v60 = vadd.f32 %v5332_v21, %v5255_v20  ;;  %v6548_v21 = vsub.f32 %v15392_v47, %v18520_v13  ;;  %v19055_v13 = vld [vmem:[#allocation44_spill] sm:$0xff] }
 0x4f4   : > { %v5336_v5 = vpop.f32.mrf.mxu3 }
 0x4f5   : > { %v5396_v22 = vadd.f32 %v5395_v42, %v5333_v60  ;;  %v6549_v60 = vand.u32 4294901760, %v6548_v21 }
 0x4f6   : > { %v5400_v14 = vpop.f32.mrf.mxu0 }
 0x4f7   : > { %v5474_v15 = vpop.f32.mrf.mxu1  ;;  %v15394_v1 = vadd.f32 %v5462_v28, %v5396_v22  ;;  %5817 = vmatmul.f32.gmra.mxu2 %v19054_v54  ;;  %6550 = vmatpush.msrb.mxu1 %v6549_v60 }
 0x4f9   : > { %5891 = vmatmul.f32.gmra.mxu3 %v15291_v18  ;;  %5948 = vmatmul.f32.gmra.mxu0 %v14579_v10  ;;  %v12292_v18 = vld [vmem:[%s18231_s3 + $0x1d0] sm:$0xff]  ;;  %v19061_v10 = vld [vmem:[#allocation73_spill] sm:$0xff] }
 0x4fa   : > { %6005 = vmatmul.f32.gmra.mxu1 %v15264_v33  ;;  %v5263_v61 = vpop.f32.mrf.mxu2 }
 0x4fb   : > { %v5337_v42 = vadd.f32 %v5336_v5, %v5263_v61  ;;  %v15414_v5 = vand.u32 4294901760, %v12292_v18 }
 0x4fc   : > { %v5340_v20 = vpop.f32.mrf.mxu3 }
 0x4fd   : > { %v5401_v28 = vadd.f32 %v5400_v14, %v5337_v42  ;;  %6463 = vmatpush.msrb.mxu0 %v15414_v5 }
 0x4fe   : > { %v5405_v22 = vpop.f32.mrf.mxu0 }
 0x4ff   : > { %v15404_v54 = vpop.f32.mrf.mxu1  ;;  %v15406_v2 = vadd.f32 %v5468_v23, %v5401_v28  ;;  %5822 = vmatmul.f32.gmra.mxu2 %v15277_v63  ;;  %v19056_v63 = vld [vmem:[#allocation72_spill] sm:$0xff] }
 0x501   : > { %5952 = vmatmul.f32.gmra.mxu0 %v15264_v33  ;;  %6150 = vmatmul.f32.vlgmr.msra.gmra.mxu3 %v14643_v6 }
 0x502   : > { %6270 = vmatmul.f32.vlgmr.msra.gmra.mxu1 %v14669_v45  ;;  %6680 = vmatpush.msra.mxu3 %v15387_v39  ;;  %v5271_v14 = vpop.f32.mrf.mxu2  ;;  %v15428_v45 = vsub.f32 %v12292_v18, %v15414_v5 }
 0x503   : > { %v5341_v23 = vadd.f32 %v5340_v20, %v5271_v14 }
 0x504   : > { %v5560_v21 = vpop.f32.mrf.mxu3  ;;  %6682 = vmatpush.msra.mxu3 %v15414_v5  ;;  %v18523_v20 = vand.u32 4294901760, %v15428_v45  ;;  %v19068_v37 = vand.u32 4294901760, %v15428_v45 }
 0x505   : > { %v5406_v61 = vadd.f32 %v5405_v22, %v5341_v23 }
 0x506   : > { %v15420_v42 = vpop.f32.mrf.mxu0 }
 0x507   : > { %v15422_v60 = vpop.f32.mrf.mxu1  ;;  %v15424_v28 = vadd.f32 %v5474_v15, %v5406_v61  ;;  %6053 = vmatmul.f32.vlgmr.msra.gmra.mxu2 %v19055_v13  ;;  %v6554_v13 = vsub.f32 %v15428_v45, %v18523_v20 }
 0x508   : > { %6616 = vmatpush.msra.mxu2 %v15392_v47 }
 0x509   : > { %6154 = vmatmul.f32.gmra.mxu3 %v14671_v24  ;;  %6208 = vmatmul.f32.vlgmr.msra.gmra.mxu0 %v14661_v46  ;;  %v6555_v46 = vand.u32 4294901760, %v6554_v13 }
 0x50a   : > { %6276 = vmatmul.f32.gmra.mxu1 %v14696_v36  ;;  %v5507_v22 = vpop.f32.mrf.mxu2  ;;  %6619 = vmatpush.msra.mxu2 %v15428_v45 }
 0x50b   : > { %v5508_v14 = vadd.f32 %v5507_v22, %v15345_v25  ;;  %6556 = vmatpush.msrb.mxu1 %v6555_v46  ;;  %v12291_v25 = vld [vmem:[%s18231_s3 + $0x1c8] sm:$0xff]  ;;  %v19057_v22 = vld [vmem:[#allocation46_spill] sm:$0xff] }
 0x50c   : > { %v5564_v15 = vpop.f32.mrf.mxu3 }
 0x50d   : > { %v5561_v18 = vadd.f32 %v5560_v21, %v5508_v14  ;;  %v15453_v21 = vand.u32 4294901760, %v12291_v25  ;;  %v19058_v14 = vld [vmem:[#allocation26_spill] sm:$0xff] }
 0x50e   : > { %v15440_v23 = vpop.f32.mrf.mxu0 }
 0x50f   : > { %v15442_v61 = vpop.f32.mrf.mxu1  ;;  %v15445_v36 = vadd.f32 %v5561_v18, %v15227_v3  ;;  %6061 = vmatmul.f32.gmra.mxu2 %v19056_v63  ;;  %6465 = vmatpush.msrb.mxu0 %v15453_v21 }
 0x510   : > { %6684 = vmatpush.msra.mxu3 %v15453_v21 }
 0x511   : > { %6158 = vmatmul.f32.gmra.mxu3 %v14698_v9  ;;  %6213 = vmatmul.f32.gmra.mxu0 %v19057_v22  ;;  %v19059_v22 = vld [vmem:[#allocation27_spill] sm:$0xff] }
 0x512   : > { %6282 = vmatmul.f32.gmra.mxu1 %v19058_v14  ;;  %v5511_v13 = vpop.f32.mrf.mxu2  ;;  %v6558_v14 = vsub.f32 %v12291_v25, %v15453_v21  ;;  %v15477_v25 = vld [vmem:[%s14334_s9 + $0x88] sm:$0x3] }
 0x513   : > { %v5512_v3 = vadd.f32 %v5511_v13, %v15351_v12 }
 0x514   : > { %v5568_v18 = vpop.f32.mrf.mxu3  ;;  %v6559_v12 = vand.u32 4294901760, %v6558_v14  ;;  %6622 = vmatpush.msra.mxu2 %v6558_v14 }
 0x515   : > { %v5565_v46 = vadd.f32 %v5564_v15, %v5512_v3 }
 0x516   : > { %v15459_v20 = vpop.f32.mrf.mxu0  ;;  %v6560_v49 = vsub.f32 %v6558_v14, %v6559_v12  ;;  %v19065_v14 = vld [vmem:[#allocation15_spill] sm:$0xff] }
 0x517   : > { %v15461_v63 = vpop.f32.mrf.mxu1  ;;  %v15464_v33 = vadd.f32 %v5565_v46, %v15236_v43  ;;  %6069 = vmatmul.f32.gmra.mxu2 %v19059_v22 }
 0x518   : > { %v6561_v27 = vand.u32 4294901760, %v6560_v49  ;;  %v6018_v49 = vrot.slane %v15248_v19, 1 }
 0x519   : > { %6162 = vmatmul.f32.gmra.mxu3 %v19060_v59  ;;  %6218 = vmatmul.f32.gmra.mxu0 %v19061_v10  ;;  %v19063_v10 = vld [vmem:[#allocation13_spill] sm:$0xff] }
 0x51a   : > { %6288 = vmatmul.f32.gmra.mxu1 %v19062_v26  ;;  %v5515_v15 = vpop.f32.mrf.mxu2  ;;  %v6019_v26 = vrot.slane %v15477_v25, 1 }
 0x51b   : > { %v5516_v13 = vadd.f32 %v5515_v15, %v15364_v17  ;;  %6562 = vmatpush.msrb.mxu1 %v6561_v27  ;;  %v12290_v17 = vld [vmem:[%s18231_s3 + $0x1c0] sm:$0xff]  ;;  %v19064_v15 = vld [vmem:[#allocation23_spill] sm:$0xff] }
 0x51c   : > { %v5572_v3 = vpop.f32.mrf.mxu3 }
 0x51d   : > { %v5569_v43 = vadd.f32 %v5568_v18, %v5516_v13  ;;  %v6466_v18 = vand.u32 4294901760, %v12290_v17  ;;  %v19066_v13 = vld [vmem:[#allocation16_spill] sm:$0xff] }
 0x51e   : > { %v15472_v46 = vpop.f32.mrf.mxu0 }
 0x51f   : > { %v15474_v22 = vpop.f32.mrf.mxu1  ;;  %v15480_v50 = vadd.f32 %v5569_v43, %v15245_v11  ;;  %6077 = vmatmul.f32.gmra.mxu2 %v19063_v10  ;;  %6467 = vmatpush.msrb.mxu0 %v6466_v18  ;;  %v19067_v10 = vand.u32 4294901760, %v15392_v47 }
 0x520   : > { %6686 = vmatpush.msra.mxu3 %v6466_v18 }
 0x521   : > { %6166 = vmatmul.f32.gmra.mxu3 %v19064_v15  ;;  %6223 = vmatmul.f32.gmra.mxu0 %v19065_v14  ;;  %v6020_v14 = vsel %vm381_vm0, %v6018_v49, %v6019_v26 }
 0x522   : > { %6294 = vmatmul.f32.gmra.mxu1 %v19066_v13  ;;  %v5519_v11 = vpop.f32.mrf.mxu2  ;;  %6751 = vmatpush.msra.mxu0 %v19067_v10  ;;  %v19071_v10 = vld [vmem:[#allocation6_spill] sm:$0xff]  ;;  %v6026_v47 = vsel %vm411_vm1, %v6020_v14, 0 }
 0x523   : > { %v5520_v27 = vadd.f32 %v5519_v11, %v15372_v48  ;;  %v6564_v48 = vsub.f32 %v12290_v17, %v6466_v18  ;;  %v19070_v11 = vld [vmem:[#allocation24_spill] sm:$0xff] }
 0x524   : > { %v5576_v43 = vpop.f32.mrf.mxu3  ;;  %6755 = vmatpush.msra.mxu0 %v19068_v37 }
 0x525   : > { %v5573_v32 = vadd.f32 %v5572_v3, %v5520_v27  ;;  %v19072_v3 = vld [vmem:[#allocation28_spill] sm:$0xff]  ;;  %v6565_v26 = vand.u32 4294901760, %v6564_v48  ;;  %6625 = vmatpush.msra.mxu2 %v6564_v48 }
 0x526   : > { %v15494_v53 = vpop.f32.mrf.mxu0  ;;  %6759 = vmatpush.msra.mxu0 %v6559_v12 }
 0x527   : > { %v15499_v13 = vpop.f32.mrf.mxu1  ;;  %v15502_v0 = vadd.f32 %v5573_v32, %v15259_v31  ;;  %6085 = vmatmul.f32.gmra.mxu2 %v19069_v16  ;;  %v15510_v32 = vand.u32 4294901760, %v6026_v47  ;;  %v6566_v31 = vsub.f32 %v6564_v48, %v6565_v26  ;;  %v19077_v48 = vld [vmem:[#allocation2_spill] sm:$0xff] }
 0x528   : > { %6763 = vmatpush.msra.mxu0 %v6565_v26 }
 0x529   : > { %6170 = vmatmul.f32.gmra.mxu3 %v19070_v11  ;;  %6228 = vmatmul.f32.gmra.mxu0 %v19071_v10  ;;  %v6567_v27 = vand.u32 4294901760, %v6566_v31  ;;  %v15521_v10 = vsub.f32 %v6026_v47, %v15510_v32 }
 0x52a   : > { %6300 = vmatmul.f32.gmra.mxu1 %v19072_v3  ;;  %v5523_v37 = vpop.f32.mrf.mxu2  ;;  %v19073_v3 = vld [vmem:[#allocation12_spill] sm:$0xff] }
 0x52b   : > { %v5524_v45 = vadd.f32 %v5523_v37, %v15379_v30  ;;  %19074 = vst [vmem:[#allocation20_spill] sm:$0xff] %v15521_v10  ;;  %6568 = vmatpush.msrb.mxu1 %v6567_v27  ;;  %v19075_v30 = vld [vmem:[#allocation5_spill] sm:$0xff]  ;;  %v19076_v37 = vld [vmem:[#allocation14_spill] sm:$0xff] }
 0x52c   : > { %v5580_v49 = vpop.f32.mrf.mxu3 }
 0x52d   : > { %v5577_v17 = vadd.f32 %v5576_v43, %v5524_v45  ;;  %6810 = vmatpush.msra.mxu1 %v15387_v39 }
 0x52e   : > { %v15512_v12 = vpop.f32.mrf.mxu0 }
 0x52f   : > { %v15514_v16 = vpop.f32.mrf.mxu1  ;;  %v15517_v14 = vadd.f32 %v5577_v17, %v15288_v58  ;;  %6093 = vmatmul.f32.gmra.mxu2 %v19073_v3  ;;  %v15529_v58 = vand.u32 4294901760, %v15521_v10  ;;  %6812 = vmatpush.msra.mxu1 %v15414_v5 }
 0x531   : > { %6174 = vmatmul.f32.gmra.mxu3 %v19075_v30  ;;  %6233 = vmatmul.f32.gmra.mxu0 %v19076_v37  ;;  %19078 = vst [vmem:[#allocation8_spill] sm:$0xff] %v15529_v58  ;;  %v6107_v39 = vsub.f32 %v15521_v10, %v15529_v58 }
 0x532   : > { %6306 = vmatmul.f32.gmra.mxu1 %v19077_v48  ;;  %v5527_v43 = vpop.f32.mrf.mxu2  ;;  %v19079_v48 = vld [vmem:[#allocation19_spill] sm:$0xff] }
 0x533   : > { %v5528_v26 = vadd.f32 %v5527_v43, %v15394_v1  ;;  %6814 = vmatpush.msra.mxu1 %v15453_v21  ;;  %v19080_v1 = vld [vmem:[#allocation22_spill] sm:$0xff]  ;;  %v15547_v43 = vand.u32 4294901760, %v6107_v39 }
 0x534   : > { %v5584_v45 = vpop.f32.mrf.mxu3 }
 0x535   : > { %v5581_v47 = vadd.f32 %v5580_v49, %v5528_v26  ;;  %6816 = vmatpush.msra.mxu1 %v6466_v18  ;;  %19081 = vst [vmem:[#allocation44_spill] sm:$0xff] %v15547_v43 }
 0x536   : > { %v15532_v31 = vpop.f32.mrf.mxu0 }
 0x537   : > { %v15534_v17 = vpop.f32.mrf.mxu1  ;;  %v15538_v27 = vadd.f32 %v5581_v47, %v15312_v35  ;;  %6101 = vmatmul.f32.gmra.mxu2 %v19079_v48 }
 0x539   : > { %6178 = vmatmul.f32.gmra.mxu3 %v15510_v32  ;;  %6238 = vmatmul.f32.gmra.mxu0 %v19080_v1 }
 0x53a   : > { %6312 = vmatmul.f32.gmra.mxu1 %v15529_v58  ;;  %v5531_v5 = vpop.f32.mrf.mxu2 }
 0x53b   : > { %v5532_v49 = vadd.f32 %v5531_v5, %v15406_v2 }
 0x53c   : > { %v5588_v21 = vpop.f32.mrf.mxu3 }
 0x53d   : > { %v5585_v35 = vadd.f32 %v5584_v45, %v5532_v49 }
 0x53e   : > { %v15549_v26 = vpop.f32.mrf.mxu0 }
 0x53f   : > { %v5978_v47 = vpop.f32.mrf.mxu1  ;;  %v15552_v37 = vadd.f32 %v5585_v35, %v15328_v29  ;;  %6109 = vmatmul.f32.gmra.mxu2 %v15547_v43  ;;  %v19082_v29 = vld [vmem:[#allocation18_spill] sm:$0xff]  ;;  %v5731_v35 = vadd.f32 %v15404_v54, %v15420_v42 }
 0x541   : > { %6243 = vmatmul.f32.gmra.mxu0 %v15521_v10  ;;  %6398 = vmatmul.f32.vlgmr.msrb.gmra.mxu3 %v14643_v6 }
 0x542   : > { %6570 = vmatmul.f32.vlgmr.msrb.gmra.mxu1 %v14966_v56  ;;  %v5535_v18 = vpop.f32.mrf.mxu2 }
 0x543   : > { %v5536_v2 = vadd.f32 %v5535_v18, %v15424_v28 }
 0x544   : > { %v5850_v39 = vpop.f32.mrf.mxu3 }
 0x545   : > { %v5589_v5 = vadd.f32 %v5588_v21, %v5536_v2 }
 0x546   : > { %v5925_v45 = vpop.f32.mrf.mxu0 }
 0x547   : > { %v5982_v49 = vpop.f32.mrf.mxu1  ;;  %v15560_v58 = vadd.f32 %v5589_v5, %v15343_v34  ;;  %6345 = vmatmul.f32.vlgmr.msrb.gmra.mxu2 %v14643_v6  ;;  %v19083_v6 = vld [vmem:[#allocation55_spill] sm:$0xff]  ;;  %v5735_v34 = vadd.f32 %v15422_v60, %v15440_v23  ;;  %v5739_v60 = vadd.f32 %v15442_v61, %v15459_v20  ;;  %v5743_v20 = vadd.f32 %v15461_v63, %v15472_v46 }
 0x549   : > { %6402 = vmatmul.f32.gmra.mxu3 %v14671_v24  ;;  %6473 = vmatmul.f32.vlgmr.msrb.gmra.mxu0 %v19082_v29 }
 0x54a   : > { %6574 = vmatmul.f32.gmra.mxu1 %v14992_v44  ;;  %v5788_v10 = vpop.f32.mrf.mxu2 }
 0x54b   : > { %v5789_v28 = vadd.f32 %v5788_v10, %v5731_v35 }
 0x54c   : > { %v5856_v18 = vpop.f32.mrf.mxu3 }
 0x54d   : > { %v5851_v21 = vadd.f32 %v5850_v39, %v5789_v28 }
 0x54e   : > { %v5929_v2 = vpop.f32.mrf.mxu0 }
 0x54f   : > { %v5986_v1 = vpop.f32.mrf.mxu1  ;;  %v5926_v43 = vadd.f32 %v5925_v45, %v5851_v21  ;;  %6349 = vmatmul.f32.gmra.mxu2 %v14671_v24  ;;  %v19084_v21 = vld [vmem:[#allocation61_spill] sm:$0xff] }
 0x551   : > { %6406 = vmatmul.f32.gmra.mxu3 %v14698_v9  ;;  %6481 = vmatmul.f32.gmra.mxu0 %v19083_v6  ;;  %v5979_v5 = vadd.f32 %v5978_v47, %v5926_v43 }
 0x552   : > { %6578 = vmatmul.f32.gmra.mxu1 %v15017_v40  ;;  %v5793_v54 = vpop.f32.mrf.mxu2 }
 0x553   : > { %v15575_v42 = vadd.f32 %v5979_v5, %v15445_v36  ;;  %v5794_v10 = vadd.f32 %v5793_v54, %v5735_v34 }
 0x554   : > { %v5862_v39 = vpop.f32.mrf.mxu3 }
 0x555   : > { %v5857_v29 = vadd.f32 %v5856_v18, %v5794_v10  ;;  %v6439_v10 = vrot.slane %v15477_v25, 2 }
 0x556   : > { %v5933_v45 = vpop.f32.mrf.mxu0 }
 0x557   : > { %v5990_v35 = vpop.f32.mrf.mxu1  ;;  %v5930_v28 = vadd.f32 %v5929_v2, %v5857_v29  ;;  %6353 = vmatmul.f32.gmra.mxu2 %v14698_v9 }
 0x559   : > { %6410 = vmatmul.f32.gmra.mxu3 %v19060_v59  ;;  %6489 = vmatmul.f32.gmra.mxu0 %v19084_v21  ;;  %v5983_v23 = vadd.f32 %v5982_v49, %v5930_v28 }
 0x55a   : > { %6582 = vmatmul.f32.gmra.mxu1 %v15062_v41  ;;  %v5798_v36 = vpop.f32.mrf.mxu2 }
 0x55b   : > { %v15584_v43 = vadd.f32 %v5983_v23, %v15464_v33  ;;  %v5799_v47 = vadd.f32 %v5798_v36, %v5739_v60  ;;  %v6438_v33 = vrot.slane %v15248_v19, 2  ;;  %v5747_v19 = vadd.f32 %v15474_v22, %v15494_v53 }
 0x55c   : > { %v5868_v18 = vpop.f32.mrf.mxu3 }
 0x55d   : > { %v5863_v34 = vadd.f32 %v5862_v39, %v5799_v47  ;;  %v6440_v36 = vsel %vm1248_vm2, %v6438_v33, %v6439_v10 }
 0x55e   : > { %v5937_v2 = vpop.f32.mrf.mxu0 }
 0x55f   : > { %v5994_v5 = vpop.f32.mrf.mxu1  ;;  %v5934_v54 = vadd.f32 %v5933_v45, %v5863_v34  ;;  %6357 = vmatmul.f32.gmra.mxu2 %v19060_v59  ;;  %v12297_v34 = vld [vmem:[%s18231_s3 + $0x1f8] sm:$0xff] }
 0x561   : > { %6414 = vmatmul.f32.gmra.mxu3 %v19064_v15  ;;  %6497 = vmatmul.f32.gmra.mxu0 %v15124_v38  ;;  %v5987_v61 = vadd.f32 %v5986_v1, %v5934_v54  ;;  %v15613_v54 = vand.u32 4294901760, %v12297_v34  ;;  %v19115_v38 = vld [vmem:[#allocation38_spill] sm:$0xff] }
 0x562   : > { %6586 = vmatmul.f32.gmra.mxu1 %v15085_v62  ;;  %v5803_v49 = vpop.f32.mrf.mxu2 }
 0x563   : > { %v15595_v39 = vadd.f32 %v5987_v61, %v15480_v50  ;;  %v5804_v29 = vadd.f32 %v5803_v49, %v5743_v20  ;;  %v6446_v50 = vsel %vm411_vm1, %v6440_v36, 0  ;;  %6879 = vmatpush.msrb.mxu2 %v15613_v54  ;;  %v15617_v20 = vsub.f32 %v12297_v34, %v15613_v54  ;;  %7098 = vmatpush.msrb.mxu1 %v15613_v54 }
 0x564   : > { %v5874_v45 = vpop.f32.mrf.mxu3  ;;  %v5751_v49 = vadd.f32 %v15499_v13, %v15512_v12 }
 0x565   : > { %v5869_v28 = vadd.f32 %v5868_v18, %v5804_v29  ;;  %v6965_v33 = vand.u32 4294901760, %v15617_v20  ;;  %7034 = vmatpush.msrb.mxu0 %v15617_v20 }
 0x566   : > { %v5941_v60 = vpop.f32.mrf.mxu0 }
 0x567   : > { %v5998_v23 = vpop.f32.mrf.mxu1  ;;  %v5938_v47 = vadd.f32 %v5937_v2, %v5869_v28  ;;  %6361 = vmatmul.f32.gmra.mxu2 %v19064_v15  ;;  %v15611_v2 = vand.u32 4294901760, %v6446_v50 }
 0x569   : > { %6418 = vmatmul.f32.gmra.mxu3 %v19070_v11  ;;  %6505 = vmatmul.f32.gmra.mxu0 %v15151_v4  ;;  %v5991_v63 = vadd.f32 %v5990_v35, %v5938_v47  ;;  %19085 = vst [vmem:[#allocation21_spill] sm:$0xff] %v15611_v2  ;;  %v15624_v61 = vsub.f32 %v6446_v50, %v15611_v2  ;;  %v12296_v50 = vld [vmem:[%s18231_s3 + $0x1f0] sm:$0xff]  ;;  %v19113_v4 = vld [vmem:[#allocation30_spill] sm:$0xff] }
 0x56a   : > { %6590 = vmatmul.f32.gmra.mxu1 %v15126_v55  ;;  %v5808_v46 = vpop.f32.mrf.mxu2 }
 0x56b   : > { %v15606_v25 = vadd.f32 %v5991_v63, %v15502_v0  ;;  %v5809_v1 = vadd.f32 %v5808_v46, %v5747_v19  ;;  %19086 = vst [vmem:[#allocation23_spill] sm:$0xff] %v15624_v61  ;;  %v15638_v47 = vand.u32 4294901760, %v15624_v61  ;;  %v15648_v46 = vand.u32 4294901760, %v12296_v50 }
 0x56c   : > { %v5880_v18 = vpop.f32.mrf.mxu3 }
 0x56d   : > { %v5875_v53 = vadd.f32 %v5874_v45, %v5809_v1  ;;  %v6966_v45 = vsub.f32 %v15617_v20, %v6965_v33  ;;  %19087 = vst [vmem:[#allocation24_spill] sm:$0xff] %v15638_v47  ;;  %v5755_v1 = vadd.f32 %v15514_v16, %v15532_v31  ;;  %6881 = vmatpush.msrb.mxu2 %v15648_v46 }
 0x56e   : > { %v5945_v22 = vpop.f32.mrf.mxu0  ;;  %7100 = vmatpush.msrb.mxu1 %v15648_v46 }
 0x56f   : > { %v6002_v35 = vpop.f32.mrf.mxu1  ;;  %v5942_v0 = vadd.f32 %v5941_v60, %v5875_v53  ;;  %6365 = vmatmul.f32.gmra.mxu2 %v19070_v11  ;;  %v6967_v19 = vand.u32 4294901760, %v6966_v45  ;;  %v15655_v53 = vsub.f32 %v12296_v50, %v15648_v46 }
 0x571   : > { %6422 = vmatmul.f32.gmra.mxu3 %v19075_v30  ;;  %6513 = vmatmul.f32.gmra.mxu0 %v15177_v57  ;;  %v5995_v10 = vadd.f32 %v5994_v5, %v5942_v0  ;;  %v6971_v16 = vand.u32 4294901760, %v15655_v53 }
 0x572   : > { %6594 = vmatmul.f32.gmra.mxu1 %v15157_v51  ;;  %v5813_v29 = vpop.f32.mrf.mxu2  ;;  %6968 = vmatpush.msrb.mxu3 %v6967_v19 }
 0x573   : > { %v15635_v28 = vadd.f32 %v5995_v10, %v15517_v14  ;;  %v5814_v60 = vadd.f32 %v5813_v29, %v5751_v49  ;;  %v6527_v14 = vsub.f32 %v15624_v61, %v15638_v47  ;;  %7037 = vmatpush.msrb.mxu0 %v15655_v53  ;;  %v6972_v45 = vsub.f32 %v15655_v53, %v6971_v16 }
 0x574   : > { %v5886_v36 = vpop.f32.mrf.mxu3 }
 0x575   : > { %v5881_v13 = vadd.f32 %v5880_v18, %v5814_v60  ;;  %v15661_v10 = vand.u32 4294901760, %v6527_v14  ;;  %v6973_v19 = vand.u32 4294901760, %v6972_v45 }
 0x576   : > { %v5949_v12 = vpop.f32.mrf.mxu0 }
 0x577   : > { %v6006_v5 = vpop.f32.mrf.mxu1  ;;  %v5946_v63 = vadd.f32 %v5945_v22, %v5881_v13  ;;  %6369 = vmatmul.f32.gmra.mxu2 %v19075_v30  ;;  %19088 = vst [vmem:[#allocation12_spill] sm:$0xff] %v15661_v10  ;;  %v5759_v13 = vadd.f32 %v15534_v17, %v15549_v26  ;;  %6974 = vmatpush.msrb.mxu3 %v6973_v19  ;;  %v12295_v17 = vld [vmem:[%s18231_s3 + $0x1e8] sm:$0xff]  ;;  %v19091_v26 = vld [vmem:[#allocation54_spill] sm:$0xff] }
 0x579   : > { %6426 = vmatmul.f32.gmra.mxu3 %v15510_v32  ;;  %6521 = vmatmul.f32.gmra.mxu0 %v15199_v8  ;;  %v5999_v18 = vadd.f32 %v5998_v23, %v5946_v63 }
 0x57a   : > { %6598 = vmatmul.f32.gmra.mxu1 %v15611_v2  ;;  %v5818_v34 = vpop.f32.mrf.mxu2 }
 0x57b   : > { %v15659_v22 = vadd.f32 %v5999_v18, %v15538_v27  ;;  %v5819_v0 = vadd.f32 %v5818_v34, %v5755_v1  ;;  %v19089_v27 = vld [vmem:[#allocation59_spill] sm:$0xff] }
 0x57c   : > { %v5892_v49 = vpop.f32.mrf.mxu3 }
 0x57d   : > { %v5887_v31 = vadd.f32 %v5886_v36, %v5819_v0 }
 0x57e   : > { %v5953_v23 = vpop.f32.mrf.mxu0 }
 0x57f   : > { %v6271_v29 = vpop.f32.mrf.mxu1  ;;  %v5950_v60 = vadd.f32 %v5949_v12, %v5887_v31  ;;  %6373 = vmatmul.f32.gmra.mxu2 %v15510_v32  ;;  %v19090_v31 = vld [vmem:[#allocation56_spill] sm:$0xff] }
 0x581   : > { %6529 = vmatmul.f32.gmra.mxu0 %v15661_v10  ;;  %6690 = vmatmul.f32.vlgmr.msra.gmra.mxu3 %v19089_v27  ;;  %v6003_v63 = vadd.f32 %v6002_v35, %v5950_v60  ;;  %v15683_v35 = vand.u32 4294901760, %v12295_v17 }
 0x582   : > { %6818 = vmatmul.f32.vlgmr.msra.gmra.mxu1 %v14966_v56  ;;  %v5823_v36 = vpop.f32.mrf.mxu2 }
 0x583   : > { %v15675_v50 = vadd.f32 %v6003_v63, %v15552_v37  ;;  %v5824_v14 = vadd.f32 %v5823_v36, %v5759_v13  ;;  %6883 = vmatpush.msrb.mxu2 %v15683_v35  ;;  %7102 = vmatpush.msrb.mxu1 %v15683_v35 }
 0x584   : > { %v6151_v12 = vpop.f32.mrf.mxu3 }
 0x585   : > { %v5893_v1 = vadd.f32 %v5892_v49, %v5824_v14  ;;  %v6976_v49 = vsub.f32 %v12295_v17, %v15683_v35  ;;  %v19092_v14 = vld [vmem:[#allocation71_spill] sm:$0xff] }
 0x586   : > { %v6209_v18 = vpop.f32.mrf.mxu0 }
 0x587   : > { %v6277_v34 = vpop.f32.mrf.mxu1  ;;  %v5954_v0 = vadd.f32 %v5953_v23, %v5893_v1  ;;  %6628 = vmatmul.f32.vlgmr.msra.gmra.mxu2 %v19090_v31  ;;  %v6977_v19 = vand.u32 4294901760, %v6976_v49  ;;  %7040 = vmatpush.msrb.mxu0 %v6976_v49  ;;  %v19093_v1 = vld [vmem:[#allocation57_spill] sm:$0xff] }
 0x589   : > { %6696 = vmatmul.f32.gmra.mxu3 %v19091_v26  ;;  %6765 = vmatmul.f32.vlgmr.msra.gmra.mxu0 %v14966_v56  ;;  %v6007_v37 = vadd.f32 %v6006_v5, %v5954_v0  ;;  %v6978_v5 = vsub.f32 %v6976_v49, %v6977_v19  ;;  %v12294_v49 = vld [vmem:[%s18231_s3 + $0x1e0] sm:$0xff] }
 0x58a   : > { %6822 = vmatmul.f32.gmra.mxu1 %v14992_v44  ;;  %v6054_v45 = vpop.f32.mrf.mxu2 }
 0x58b   : > { %v15690_v23 = vadd.f32 %v6007_v37, %v15560_v58  ;;  %v6152_v60 = vadd.f32 %v6151_v12, %v6054_v45  ;;  %v6979_v0 = vand.u32 4294901760, %v6978_v5 }
 0x58c   : > { %v6155_v27 = vpop.f32.mrf.mxu3 }
 0x58d   : > { %v6210_v56 = vadd.f32 %v6209_v18, %v6152_v60  ;;  %6980 = vmatpush.msrb.mxu3 %v6979_v0  ;;  %v19095_v60 = vld [vmem:[#allocation66_spill] sm:$0xff] }
 0x58e   : > { %v6214_v13 = vpop.f32.mrf.mxu0 }
 0x58f   : > { %v6283_v63 = vpop.f32.mrf.mxu1  ;;  %v15692_v36 = vadd.f32 %v6271_v29, %v6210_v56  ;;  %6633 = vmatmul.f32.gmra.mxu2 %v19092_v14  ;;  %v19094_v29 = vld [vmem:[#allocation52_spill] sm:$0xff]  ;;  %v6884_v56 = vand.u32 4294901760, %v12294_v49 }
 0x591   : > { %6702 = vmatmul.f32.gmra.mxu3 %v19093_v1  ;;  %6769 = vmatmul.f32.gmra.mxu0 %v14992_v44 }
 0x592   : > { %6826 = vmatmul.f32.gmra.mxu1 %v15017_v40  ;;  %v6062_v58 = vpop.f32.mrf.mxu2  ;;  %6885 = vmatpush.msrb.mxu2 %v6884_v56 }
 0x593   : > { %v6156_v12 = vadd.f32 %v6155_v27, %v6062_v58  ;;  %7104 = vmatpush.msrb.mxu1 %v6884_v56 }
 0x594   : > { %v6159_v31 = vpop.f32.mrf.mxu3  ;;  %7169 = vmatpush.msra.mxu2 %v6965_v33 }
 0x595   : > { %v6215_v17 = vadd.f32 %v6214_v13, %v6156_v12  ;;  %v6982_v13 = vsub.f32 %v12294_v49, %v6884_v56  ;;  %v19096_v49 = vld [vmem:[#allocation70_spill] sm:$0xff] }
 0x596   : > { %v6219_v18 = vpop.f32.mrf.mxu0  ;;  %7173 = vmatpush.msra.mxu2 %v6971_v16 }
 0x597   : > { %v6289_v37 = vpop.f32.mrf.mxu1  ;;  %v15698_v45 = vadd.f32 %v6277_v34, %v6215_v17  ;;  %6638 = vmatmul.f32.gmra.mxu2 %v19094_v29  ;;  %v6983_v0 = vand.u32 4294901760, %v6982_v13  ;;  %7043 = vmatpush.msrb.mxu0 %v6982_v13 }
 0x598   : > { %7177 = vmatpush.msra.mxu2 %v6977_v19 }
 0x599   : > { %6708 = vmatmul.f32.gmra.mxu3 %v19095_v60  ;;  %6773 = vmatmul.f32.gmra.mxu0 %v15017_v40  ;;  %v6984_v10 = vsub.f32 %v6982_v13, %v6983_v0 }
 0x59a   : > { %6830 = vmatmul.f32.gmra.mxu1 %v15062_v41  ;;  %v6070_v27 = vpop.f32.mrf.mxu2  ;;  %7181 = vmatpush.msra.mxu2 %v6983_v0 }
 0x59b   : > { %v6160_v5 = vadd.f32 %v6159_v31, %v6070_v27  ;;  %v6985_v31 = vand.u32 4294901760, %v6984_v10  ;;  %v19097_v10 = vld [vmem:[#allocation42_spill] sm:$0xff] }
 0x59c   : > { %v6163_v34 = vpop.f32.mrf.mxu3 }
 0x59d   : > { %v6220_v58 = vadd.f32 %v6219_v18, %v6160_v5  ;;  %6986 = vmatpush.msrb.mxu3 %v6985_v31 }
 0x59e   : > { %v6224_v12 = vpop.f32.mrf.mxu0 }
 0x59f   : > { %v6295_v17 = vpop.f32.mrf.mxu1  ;;  %v15711_v8 = vadd.f32 %v6283_v63, %v6220_v58  ;;  %6643 = vmatmul.f32.gmra.mxu2 %v15076_v7  ;;  %7228 = vmatpush.msra.mxu3 %v15613_v54  ;;  %v19099_v58 = vld [vmem:[#allocation76_spill] sm:$0xff] }
 0x5a1   : > { %6714 = vmatmul.f32.gmra.mxu3 %v19096_v49  ;;  %6777 = vmatmul.f32.gmra.mxu0 %v15062_v41  ;;  %v19114_v49 = vld [vmem:[#allocation45_spill] sm:$0xff] }
 0x5a2   : > { %6834 = vmatmul.f32.gmra.mxu1 %v15085_v62  ;;  %v6078_v20 = vpop.f32.mrf.mxu2  ;;  %7230 = vmatpush.msra.mxu3 %v15648_v46 }
 0x5a3   : > { %v6164_v33 = vadd.f32 %v6163_v34, %v6078_v20 }
 0x5a4   : > { %v6167_v18 = vpop.f32.mrf.mxu3  ;;  %7232 = vmatpush.msra.mxu3 %v15683_v35  ;;  %v12301_v35 = vld [vmem:[%s18231_s3 + $0x218] sm:$0xff] }
 0x5a5   : > { %v6225_v53 = vadd.f32 %v6224_v12, %v6164_v33  ;;  %v15734_v12 = vand.u32 4294901760, %v12301_v35 }
 0x5a6   : > { %v6229_v16 = vpop.f32.mrf.mxu0  ;;  %7234 = vmatpush.msra.mxu3 %v6884_v56 }
 0x5a7   : > { %v6301_v63 = vpop.f32.mrf.mxu1  ;;  %v15719_v27 = vadd.f32 %v6289_v37, %v6225_v53  ;;  %6648 = vmatmul.f32.gmra.mxu2 %v15099_v52  ;;  %v19098_v37 = vld [vmem:[#allocation4_spill] sm:$0xff]  ;;  %7300 = vmatpush.msra.mxu0 %v15734_v12  ;;  %v15739_v20 = vsub.f32 %v12301_v35, %v15734_v12 }
 0x5a9   : > { %6720 = vmatmul.f32.gmra.mxu3 %v19097_v10  ;;  %6781 = vmatmul.f32.gmra.mxu0 %v15085_v62  ;;  %v19109_v10 = vld [vmem:[#allocation62_spill] sm:$0xff] }
 0x5aa   : > { %6838 = vmatmul.f32.gmra.mxu1 %v15126_v55  ;;  %v6086_v54 = vpop.f32.mrf.mxu2 }
 0x5ab   : > { %v6168_v19 = vadd.f32 %v6167_v18, %v6086_v54  ;;  %v19100_v54 = vld [vmem:[#allocation48_spill] sm:$0xff] }
 0x5ac   : > { %v6171_v13 = vpop.f32.mrf.mxu3 }
 0x5ad   : > { %v6230_v5 = vadd.f32 %v6229_v16, %v6168_v19  ;;  %v18539_v19 = vand.u32 4294901760, %v15739_v20 }
 0x5ae   : > { %v6234_v34 = vpop.f32.mrf.mxu0 }
 0x5af   : > { %v6307_v46 = vpop.f32.mrf.mxu1  ;;  %v15726_v0 = vadd.f32 %v6295_v17, %v6230_v5  ;;  %6653 = vmatmul.f32.gmra.mxu2 %v19098_v37  ;;  %v19105_v37 = vld [vmem:[#allocation9_spill] sm:$0xff] }
 0x5b1   : > { %6726 = vmatmul.f32.gmra.mxu3 %v19099_v58  ;;  %6785 = vmatmul.f32.gmra.mxu0 %v15126_v55  ;;  %v19104_v58 = vld [vmem:[#allocation7_spill] sm:$0xff]  ;;  %v19112_v55 = vld [vmem:[#allocation34_spill] sm:$0xff] }
 0x5b2   : > { %6842 = vmatmul.f32.gmra.mxu1 %v15157_v51  ;;  %v6094_v56 = vpop.f32.mrf.mxu2 }
 0x5b3   : > { %v6172_v31 = vadd.f32 %v6171_v13, %v6094_v56  ;;  %v7387_v13 = vsub.f32 %v15739_v20, %v18539_v19  ;;  %v19101_v19 = vld [vmem:[#allocation3_spill] sm:$0xff] }
 0x5b4   : > { %v6175_v17 = vpop.f32.mrf.mxu3 }
 0x5b5   : > { %v6235_v33 = vadd.f32 %v6234_v34, %v6172_v31  ;;  %v7388_v56 = vand.u32 4294901760, %v7387_v13  ;;  %v19102_v13 = vld [vmem:[#allocation53_spill] sm:$0xff] }
 0x5b6   : > { %v6239_v18 = vpop.f32.mrf.mxu0 }
 0x5b7   : > { %v6313_v53 = vpop.f32.mrf.mxu1  ;;  %v15741_v16 = vadd.f32 %v6301_v63, %v6235_v33  ;;  %6658 = vmatmul.f32.gmra.mxu2 %v19100_v54  ;;  %7389 = vmatpush.msra.mxu1 %v7388_v56 }
 0x5b9   : > { %6732 = vmatmul.f32.gmra.mxu3 %v15638_v47  ;;  %6789 = vmatmul.f32.gmra.mxu0 %v15157_v51  ;;  %v12300_v47 = vld [vmem:[%s18231_s3 + $0x210] sm:$0xff] }
 0x5ba   : > { %6846 = vmatmul.f32.gmra.mxu1 %v15611_v2  ;;  %v6102_v5 = vpop.f32.mrf.mxu2 }
 0x5bb   : > { %v6176_v34 = vadd.f32 %v6175_v17, %v6102_v5  ;;  %v15761_v17 = vand.u32 4294901760, %v12300_v47 }
 0x5bc   : > { %v6179_v35 = vpop.f32.mrf.mxu3 }
 0x5bd   : > { %v6240_v63 = vadd.f32 %v6239_v18, %v6176_v34  ;;  %7302 = vmatpush.msra.mxu0 %v15761_v17 }
 0x5be   : > { %v6244_v31 = vpop.f32.mrf.mxu0 }
 0x5bf   : > { %v15751_v33 = vpop.f32.mrf.mxu1  ;;  %v15753_v54 = vadd.f32 %v6307_v46, %v6240_v63  ;;  %6663 = vmatmul.f32.gmra.mxu2 %v15624_v61 }
 0x5c1   : > { %6793 = vmatmul.f32.gmra.mxu0 %v15611_v2  ;;  %6988 = vmatmul.f32.vlgmr.msrb.gmra.mxu3 %v19101_v19  ;;  %v19103_v2 = vld [vmem:[#allocation69_spill] sm:$0xff] }
 0x5c2   : > { %7108 = vmatmul.f32.vlgmr.msrb.gmra.mxu1 %v19102_v13  ;;  %7519 = vmatpush.msrb.mxu3 %v15734_v12  ;;  %v6110_v18 = vpop.f32.mrf.mxu2  ;;  %v15775_v13 = vsub.f32 %v12300_v47, %v15761_v17 }
 0x5c3   : > { %v6180_v46 = vadd.f32 %v6179_v35, %v6110_v18  ;;  %v19106_v35 = vld [vmem:[#allocation65_spill] sm:$0xff] }
 0x5c4   : > { %v6399_v5 = vpop.f32.mrf.mxu3  ;;  %7521 = vmatpush.msrb.mxu3 %v15761_v17  ;;  %v7392_v18 = vand.u32 4294901760, %v15775_v13 }
 0x5c5   : > { %v6245_v34 = vadd.f32 %v6244_v31, %v6180_v46 }
 0x5c6   : > { %v15767_v56 = vpop.f32.mrf.mxu0 }
 0x5c7   : > { %v15769_v63 = vpop.f32.mrf.mxu1  ;;  %v15771_v61 = vadd.f32 %v6313_v53, %v6245_v34  ;;  %6891 = vmatmul.f32.vlgmr.msrb.gmra.mxu2 %v19103_v2  ;;  %v7393_v34 = vsub.f32 %v15775_v13, %v7392_v18 }
 0x5c8   : > { %7455 = vmatpush.msrb.mxu2 %v15739_v20 }
 0x5c9   : > { %6992 = vmatmul.f32.gmra.mxu3 %v19104_v58  ;;  %7046 = vmatmul.f32.vlgmr.msrb.gmra.mxu0 %v19105_v37  ;;  %v7394_v51 = vand.u32 4294901760, %v7393_v34 }
 0x5ca   : > { %7114 = vmatmul.f32.gmra.mxu1 %v19106_v35  ;;  %v6346_v31 = vpop.f32.mrf.mxu2  ;;  %7458 = vmatpush.msrb.mxu2 %v15775_v13  ;;  %v19107_v35 = vld [vmem:[#allocation39_spill] sm:$0xff]  ;;  %v19110_v13 = vld [vmem:[#allocation36_spill] sm:$0xff] }
 0x5cb   : > { %v6347_v46 = vadd.f32 %v6346_v31, %v15692_v36  ;;  %7395 = vmatpush.msra.mxu1 %v7394_v51  ;;  %v12299_v36 = vld [vmem:[%s18231_s3 + $0x208] sm:$0xff] }
 0x5cc   : > { %v6403_v53 = vpop.f32.mrf.mxu3  ;;  %v19108_v31 = vld [vmem:[#allocation67_spill] sm:$0xff] }
 0x5cd   : > { %v6400_v2 = vadd.f32 %v6399_v5, %v6347_v46  ;;  %v15798_v5 = vand.u32 4294901760, %v12299_v36 }
 0x5ce   : > { %v15785_v47 = vpop.f32.mrf.mxu0 }
 0x5cf   : > { %v15787_v57 = vpop.f32.mrf.mxu1  ;;  %v15790_v37 = vadd.f32 %v6400_v2, %v15575_v42  ;;  %6899 = vmatmul.f32.gmra.mxu2 %v19107_v35  ;;  %7304 = vmatpush.msra.mxu0 %v15798_v5 }
 0x5d0   : > { %7523 = vmatpush.msrb.mxu3 %v15798_v5 }
 0x5d1   : > { %6996 = vmatmul.f32.gmra.mxu3 %v19108_v31  ;;  %7051 = vmatmul.f32.gmra.mxu0 %v19109_v10  ;;  %v19111_v10 = vld [vmem:[#allocation49_spill] sm:$0xff] }
 0x5d2   : > { %7120 = vmatmul.f32.gmra.mxu1 %v19110_v13  ;;  %v6350_v46 = vpop.f32.mrf.mxu2  ;;  %v7397_v13 = vsub.f32 %v12299_v36, %v15798_v5 }
 0x5d3   : > { %v6351_v42 = vadd.f32 %v6350_v46, %v15698_v45 }
 0x5d4   : > { %v6407_v51 = vpop.f32.mrf.mxu3  ;;  %v7398_v45 = vand.u32 4294901760, %v7397_v13  ;;  %7461 = vmatpush.msrb.mxu2 %v7397_v13 }
 0x5d5   : > { %v6404_v34 = vadd.f32 %v6403_v53, %v6351_v42 }
 0x5d6   : > { %v15804_v2 = vpop.f32.mrf.mxu0  ;;  %v7399_v7 = vsub.f32 %v7397_v13, %v7398_v45  ;;  %v19118_v13 = vld [vmem:[#allocation74_spill] sm:$0xff] }
 0x5d7   : > { %v15806_v35 = vpop.f32.mrf.mxu1  ;;  %v15809_v52 = vadd.f32 %v6404_v34, %v15584_v43  ;;  %6907 = vmatmul.f32.gmra.mxu2 %v19111_v10 }
 0x5d8   : > { %v7400_v34 = vand.u32 4294901760, %v7399_v7 }
 0x5d9   : > { %7000 = vmatmul.f32.gmra.mxu3 %v19112_v55  ;;  %7056 = vmatmul.f32.gmra.mxu0 %v19113_v4  ;;  %v12298_v4 = vld [vmem:[%s18231_s3 + $0x200] sm:$0xff] }
 0x5da   : > { %7126 = vmatmul.f32.gmra.mxu1 %v19114_v49  ;;  %v6354_v53 = vpop.f32.mrf.mxu2  ;;  %v19117_v49 = vld [vmem:[#allocation43_spill] sm:$0xff] }
 0x5db   : > { %v6355_v46 = vadd.f32 %v6354_v53, %v15711_v8  ;;  %7401 = vmatpush.msra.mxu1 %v7400_v34  ;;  %v19116_v8 = vld [vmem:[#allocation47_spill] sm:$0xff]  ;;  %v15837_v34 = vld [vmem:[%s14334_s9 + $0x90] sm:$0xff] }
 0x5dc   : > { %v6411_v42 = vpop.f32.mrf.mxu3 }
 0x5dd   : > { %v6408_v62 = vadd.f32 %v6407_v51, %v6355_v46  ;;  %v7305_v51 = vand.u32 4294901760, %v12298_v4 }
 0x5de   : > { %v15817_v43 = vpop.f32.mrf.mxu0 }
 0x5df   : > { %v15819_v10 = vpop.f32.mrf.mxu1  ;;  %v15822_v36 = vadd.f32 %v6408_v62, %v15595_v39  ;;  %6915 = vmatmul.f32.gmra.mxu2 %v19115_v38  ;;  %7306 = vmatpush.msra.mxu0 %v7305_v51  ;;  %v19119_v38 = vand.u32 4294901760, %v15739_v20  ;;  %v7403_v29 = vsub.f32 %v12298_v4, %v7305_v51  ;;  %v6864_v20 = vsel %vm411_vm1, %v15837_v34, 0 }
 0x5e0   : > { %7525 = vmatpush.msrb.mxu3 %v7305_v51 }
 0x5e1   : > { %7004 = vmatmul.f32.gmra.mxu3 %v19116_v8  ;;  %7061 = vmatmul.f32.gmra.mxu0 %v19117_v49 }
 0x5e2   : > { %7132 = vmatmul.f32.gmra.mxu1 %v19118_v13  ;;  %v6358_v7 = vpop.f32.mrf.mxu2  ;;  %7590 = vmatpush.msrb.mxu0 %v19119_v38  ;;  %v19120_v13 = vld [vmem:[#allocation35_spill] sm:$0xff] }
 0x5e3   : > { %v6359_v62 = vadd.f32 %v6358_v7, %v15719_v27  ;;  %v19121_v27 = vld [vmem:[#allocation32_spill] sm:$0xff]  ;;  %v19122_v7 = vld [vmem:[#allocation51_spill] sm:$0xff]  ;;  %7464 = vmatpush.msrb.mxu2 %v7403_v29 }
 0x5e4   : > { %v6415_v39 = vpop.f32.mrf.mxu3  ;;  %7594 = vmatpush.msrb.mxu0 %v7392_v18 }
 0x5e5   : > { %v6412_v53 = vadd.f32 %v6411_v42, %v6359_v62  ;;  %v19123_v42 = vld [vmem:[#allocation33_spill] sm:$0xff]  ;;  %v7404_v62 = vand.u32 4294901760, %v7403_v29 }
 0x5e6   : > { %v15834_v46 = vpop.f32.mrf.mxu0  ;;  %7598 = vmatpush.msrb.mxu0 %v7398_v45 }
 0x5e7   : > { %v15839_v60 = vpop.f32.mrf.mxu1  ;;  %v15842_v49 = vadd.f32 %v6412_v53, %v15606_v25  ;;  %6923 = vmatmul.f32.gmra.mxu2 %v19120_v13  ;;  %v15851_v53 = vand.u32 4294901760, %v6864_v20  ;;  %v7405_v13 = vsub.f32 %v7403_v29, %v7404_v62  ;;  %v19127_v29 = vld [vmem:[#allocation78_spill] sm:$0xff] }
 0x5e8   : > { %7602 = vmatpush.msrb.mxu0 %v7404_v62 }
 0x5e9   : > { %7008 = vmatmul.f32.gmra.mxu3 %v19121_v27  ;;  %7066 = vmatmul.f32.gmra.mxu0 %v19122_v7  ;;  %v7406_v41 = vand.u32 4294901760, %v7405_v13  ;;  %v6943_v1 = vsub.f32 %v6864_v20, %v15851_v53 }
 0x5ea   : > { %7138 = vmatmul.f32.gmra.mxu1 %v19123_v42  ;;  %v6362_v18 = vpop.f32.mrf.mxu2  ;;  %v19124_v42 = vld [vmem:[#allocation37_spill] sm:$0xff] }
 0x5eb   : > { %v6363_v38 = vadd.f32 %v6362_v18, %v15726_v0  ;;  %7407 = vmatpush.msra.mxu1 %v7406_v41  ;;  %v19125_v0 = vld [vmem:[#allocation11_spill] sm:$0xff]  ;;  %v6944_v13 = vand.u32 4294901760, %v6943_v1 }
 0x5ec   : > { %v6419_v25 = vpop.f32.mrf.mxu3  ;;  %v19126_v18 = vld [vmem:[#allocation31_spill] sm:$0xff] }
 0x5ed   : > { %v6416_v45 = vadd.f32 %v6415_v39, %v6363_v38  ;;  %7649 = vmatpush.msrb.mxu1 %v15734_v12  ;;  %v19129_v12 = vld [vmem:[#allocation17_spill] sm:$0xff] }
 0x5ee   : > { %v15853_v4 = vpop.f32.mrf.mxu0 }
 0x5ef   : > { %v15855_v7 = vpop.f32.mrf.mxu1  ;;  %v15858_v21 = vadd.f32 %v6416_v45, %v15635_v28  ;;  %6931 = vmatmul.f32.gmra.mxu2 %v19124_v42  ;;  %7651 = vmatpush.msrb.mxu1 %v15761_v17  ;;  %v19128_v42 = vld [vmem:[#allocation79_spill] sm:$0xff] }
 0x5f1   : > { %7012 = vmatmul.f32.gmra.mxu3 %v19125_v0  ;;  %7071 = vmatmul.f32.gmra.mxu0 %v19126_v18  ;;  %v6945_v18 = vsub.f32 %v6943_v1, %v6944_v13 }
 0x5f2   : > { %7144 = vmatmul.f32.gmra.mxu1 %v19127_v29  ;;  %v6366_v39 = vpop.f32.mrf.mxu2 }
 0x5f3   : > { %v6367_v62 = vadd.f32 %v6366_v39, %v15741_v16  ;;  %7653 = vmatpush.msrb.mxu1 %v15798_v5 }
 0x5f4   : > { %v6423_v38 = vpop.f32.mrf.mxu3 }
 0x5f5   : > { %v6420_v28 = vadd.f32 %v6419_v25, %v6367_v62  ;;  %7655 = vmatpush.msrb.mxu1 %v7305_v51  ;;  %v6946_v25 = vand.u32 4294901760, %v6945_v18 }
 0x5f6   : > { %v15868_v45 = vpop.f32.mrf.mxu0 }
 0x5f7   : > { %v15870_v20 = vpop.f32.mrf.mxu1  ;;  %v15874_v41 = vadd.f32 %v6420_v28, %v15659_v22  ;;  %6939 = vmatmul.f32.gmra.mxu2 %v19128_v42 }
 0x5f9   : > { %7016 = vmatmul.f32.gmra.mxu3 %v15851_v53  ;;  %7076 = vmatmul.f32.gmra.mxu0 %v19129_v12 }
 0x5fa   : > { %7150 = vmatmul.f32.gmra.mxu1 %v6944_v13  ;;  %v6370_v16 = vpop.f32.mrf.mxu2 }
 0x5fb   : > { %v6371_v17 = vadd.f32 %v6370_v16, %v15753_v54 }
 0x5fc   : > { %v6427_v29 = vpop.f32.mrf.mxu3 }
 0x5fd   : > { %v6424_v39 = vadd.f32 %v6423_v38, %v6371_v17 }
 0x5fe   : > { %v15880_v62 = vpop.f32.mrf.mxu0 }
 0x5ff   : > { %v6819_v5 = vpop.f32.mrf.mxu1  ;;  %v15883_v22 = vadd.f32 %v6424_v39, %v15675_v50  ;;  %6947 = vmatmul.f32.gmra.mxu2 %v6946_v25  ;;  %v19130_v50 = vld [vmem:[#allocation72_spill] sm:$0xff] }
 0x601   : > { %7081 = vmatmul.f32.gmra.mxu0 %v6943_v1  ;;  %7236 = vmatmul.f32.vlgmr.msra.gmra.mxu3 %v19101_v19  ;;  %v6572_v1 = vadd.f32 %v15751_v33, %v15767_v56 }
 0x602   : > { %7409 = vmatmul.f32.vlgmr.msra.gmra.mxu1 %v14671_v24  ;;  %v6374_v13 = vpop.f32.mrf.mxu2 }
 0x603   : > { %v6375_v51 = vadd.f32 %v6374_v13, %v15771_v61 }
 0x604   : > { %v6691_v28 = vpop.f32.mrf.mxu3 }
 0x605   : > { %v6428_v54 = vadd.f32 %v6427_v29, %v6375_v51 }
 0x606   : > { %v6766_v42 = vpop.f32.mrf.mxu0 }
 0x607   : > { %v6823_v18 = vpop.f32.mrf.mxu1  ;;  %v15889_v38 = vadd.f32 %v6428_v54, %v15690_v23  ;;  %7183 = vmatmul.f32.vlgmr.msra.gmra.mxu2 %v19101_v19  ;;  %v19131_v23 = vld [vmem:[#allocation27_spill] sm:$0xff]  ;;  %v6576_v19 = vadd.f32 %v15769_v63, %v15785_v47  ;;  %v6580_v63 = vadd.f32 %v15787_v57, %v15804_v2  ;;  %v19133_v57 = vld [vmem:[#allocation25_spill] sm:$0xff]  ;;  %v6584_v2 = vadd.f32 %v15806_v35, %v15817_v43 }
 0x608   : > { %v6588_v35 = vadd.f32 %v15819_v10, %v15834_v46 }
 0x609   : > { %7240 = vmatmul.f32.gmra.mxu3 %v19104_v58  ;;  %7312 = vmatmul.f32.vlgmr.msra.gmra.mxu0 %v19130_v50 }
 0x60a   : > { %7413 = vmatmul.f32.gmra.mxu1 %v14698_v9  ;;  %v6629_v12 = vpop.f32.mrf.mxu2 }
 0x60b   : > { %v6630_v61 = vadd.f32 %v6629_v12, %v6572_v1  ;;  %v19132_v1 = vld [vmem:[#allocation13_spill] sm:$0xff] }
 0x60c   : > { %v6697_v16 = vpop.f32.mrf.mxu3 }
 0x60d   : > { %v6692_v17 = vadd.f32 %v6691_v28, %v6630_v61 }
 0x60e   : > { %v6770_v25 = vpop.f32.mrf.mxu0 }
 0x60f   : > { %v6827_v29 = vpop.f32.mrf.mxu1  ;;  %v6767_v39 = vadd.f32 %v6766_v42, %v6692_v17  ;;  %7187 = vmatmul.f32.gmra.mxu2 %v19104_v58 }
 0x611   : > { %7244 = vmatmul.f32.gmra.mxu3 %v19108_v31  ;;  %7320 = vmatmul.f32.gmra.mxu0 %v19131_v23  ;;  %v6820_v13 = vadd.f32 %v6819_v5, %v6767_v39  ;;  %v15917_v39 = vld [vmem:[%s14334_s9 + $0x98] sm:$0x3] }
 0x612   : > { %7417 = vmatmul.f32.gmra.mxu1 %v19060_v59  ;;  %v6634_v33 = vpop.f32.mrf.mxu2 }
 0x613   : > { %v15904_v56 = vadd.f32 %v6820_v13, %v15790_v37  ;;  %v6635_v51 = vadd.f32 %v6634_v33, %v6576_v19  ;;  %v7278_v19 = vrot.slane %v15917_v39, 1 }
 0x614   : > { %v6703_v28 = vpop.f32.mrf.mxu3 }
 0x615   : > { %v6698_v54 = vadd.f32 %v6697_v16, %v6635_v51 }
 0x616   : > { %v6774_v42 = vpop.f32.mrf.mxu0 }
 0x617   : > { %v6831_v50 = vpop.f32.mrf.mxu1  ;;  %v6771_v58 = vadd.f32 %v6770_v25, %v6698_v54  ;;  %7191 = vmatmul.f32.gmra.mxu2 %v19108_v31 }
 0x619   : > { %7248 = vmatmul.f32.gmra.mxu3 %v19112_v55  ;;  %7328 = vmatmul.f32.gmra.mxu0 %v19132_v1  ;;  %v6824_v47 = vadd.f32 %v6823_v18, %v6771_v58 }
 0x61a   : > { %7421 = vmatmul.f32.gmra.mxu1 %v19064_v15  ;;  %v6639_v37 = vpop.f32.mrf.mxu2 }
 0x61b   : > { %v15913_v5 = vadd.f32 %v6824_v47, %v15809_v52  ;;  %v6640_v12 = vadd.f32 %v6639_v37, %v6580_v63  ;;  %v7277_v52 = vrot.slane %v15837_v34, 1 }
 0x61c   : > { %v6709_v61 = vpop.f32.mrf.mxu3 }
 0x61d   : > { %v6704_v16 = vadd.f32 %v6703_v28, %v6640_v12 }
 0x61e   : > { %v6778_v17 = vpop.f32.mrf.mxu0 }
 0x61f   : > { %v6835_v25 = vpop.f32.mrf.mxu1  ;;  %v6775_v31 = vadd.f32 %v6774_v42, %v6704_v16  ;;  %7195 = vmatmul.f32.gmra.mxu2 %v19112_v55  ;;  %v7279_v42 = vsel %vm381_vm0, %v7277_v52, %v7278_v19 }
 0x621   : > { %7252 = vmatmul.f32.gmra.mxu3 %v19116_v8  ;;  %7336 = vmatmul.f32.gmra.mxu0 %v19133_v57  ;;  %v6828_v18 = vadd.f32 %v6827_v29, %v6775_v31 }
 0x622   : > { %7425 = vmatmul.f32.gmra.mxu1 %v19070_v11  ;;  %v6644_v23 = vpop.f32.mrf.mxu2 }
 0x623   : > { %v15927_v13 = vadd.f32 %v6828_v18, %v15822_v36  ;;  %v6645_v55 = vadd.f32 %v6644_v23, %v6584_v2  ;;  %v7285_v36 = vsel %vm411_vm1, %v7279_v42, 0 }
 0x624   : > { %v6715_v33 = vpop.f32.mrf.mxu3  ;;  %v15943_v37 = vand.u32 4294901760, %v7285_v36 }
 0x625   : > { %v6710_v51 = vadd.f32 %v6709_v61, %v6645_v55  ;;  %v12304_v55 = vld [vmem:[%s18231_s3 + $0x230] sm:$0xff] }
 0x626   : > { %v6782_v28 = vpop.f32.mrf.mxu0  ;;  %v15956_v61 = vsub.f32 %v7285_v36, %v15943_v37 }
 0x627   : > { %v6839_v54 = vpop.f32.mrf.mxu1  ;;  %v6779_v58 = vadd.f32 %v6778_v17, %v6710_v51  ;;  %7199 = vmatmul.f32.gmra.mxu2 %v19116_v8  ;;  %v12305_v8 = vld [vmem:[%s18231_s3 + $0x238] sm:$0xff]  ;;  %v6592_v17 = vadd.f32 %v15839_v60, %v15853_v4  ;;  %v15979_v51 = vand.u32 4294901760, %v12304_v55 }
 0x628   : > { %v7365_v52 = vand.u32 4294901760, %v15956_v61 }
 0x629   : > { %7256 = vmatmul.f32.gmra.mxu3 %v19121_v27  ;;  %7344 = vmatmul.f32.gmra.mxu0 %v19073_v3  ;;  %v6832_v43 = vadd.f32 %v6831_v50, %v6779_v58  ;;  %v15945_v3 = vand.u32 4294901760, %v12305_v8  ;;  %v15986_v58 = vsub.f32 %v12304_v55, %v15979_v51 }
 0x62a   : > { %7429 = vmatmul.f32.gmra.mxu1 %v19075_v30  ;;  %v6649_v29 = vpop.f32.mrf.mxu2 }
 0x62b   : > { %v15938_v1 = vadd.f32 %v6832_v43, %v15842_v49  ;;  %v6650_v63 = vadd.f32 %v6649_v29, %v6588_v35  ;;  %7720 = vmatpush.msra.mxu2 %v15945_v3  ;;  %v15949_v12 = vsub.f32 %v12305_v8, %v15945_v3  ;;  %7939 = vmatpush.msra.mxu1 %v15945_v3 }
 0x62c   : > { %v6721_v47 = vpop.f32.mrf.mxu3 }
 0x62d   : > { %v6716_v10 = vadd.f32 %v6715_v33, %v6650_v63  ;;  %v7806_v16 = vand.u32 4294901760, %v15949_v12  ;;  %7875 = vmatpush.msra.mxu0 %v15949_v12  ;;  %v7366_v33 = vsub.f32 %v15956_v61, %v7365_v52  ;;  %7722 = vmatpush.msra.mxu2 %v15979_v51  ;;  %v7812_v63 = vand.u32 4294901760, %v15986_v58 }
 0x62e   : > { %v6786_v46 = vpop.f32.mrf.mxu0  ;;  %7941 = vmatpush.msra.mxu1 %v15979_v51 }
 0x62f   : > { %v6843_v50 = vpop.f32.mrf.mxu1  ;;  %v6783_v49 = vadd.f32 %v6782_v28, %v6716_v10  ;;  %7203 = vmatmul.f32.gmra.mxu2 %v19121_v27  ;;  %v7807_v27 = vsub.f32 %v15949_v12, %v7806_v16  ;;  %v6596_v28 = vadd.f32 %v15855_v7, %v15868_v45  ;;  %v7367_v29 = vand.u32 4294901760, %v7366_v33  ;;  %7878 = vmatpush.msra.mxu0 %v15986_v58 }
 0x631   : > { %7260 = vmatmul.f32.gmra.mxu3 %v19125_v0  ;;  %7352 = vmatmul.f32.gmra.mxu0 %v19079_v48  ;;  %v6836_v31 = vadd.f32 %v6835_v25, %v6783_v49  ;;  %v7808_v23 = vand.u32 4294901760, %v7807_v27 }
 0x632   : > { %7433 = vmatmul.f32.gmra.mxu1 %v15510_v32  ;;  %v6654_v57 = vpop.f32.mrf.mxu2 }
 0x633   : > { %v15967_v48 = vadd.f32 %v6836_v31, %v15858_v21  ;;  %v6655_v2 = vadd.f32 %v6654_v57, %v6592_v17  ;;  %7809 = vmatpush.msra.mxu3 %v7808_v23  ;;  %v19134_v21 = vld [vmem:[#allocation44_spill] sm:$0xff] }
 0x634   : > { %v6727_v18 = vpop.f32.mrf.mxu3 }
 0x635   : > { %v6722_v19 = vadd.f32 %v6721_v47, %v6655_v2  ;;  %v7813_v47 = vsub.f32 %v15986_v58, %v7812_v63 }
 0x636   : > { %v6790_v60 = vpop.f32.mrf.mxu0 }
 0x637   : > { %v6847_v4 = vpop.f32.mrf.mxu1  ;;  %v6787_v25 = vadd.f32 %v6786_v46, %v6722_v19  ;;  %7207 = vmatmul.f32.gmra.mxu2 %v19125_v0  ;;  %v7814_v10 = vand.u32 4294901760, %v7813_v47  ;;  %v6600_v46 = vadd.f32 %v15870_v20, %v15880_v62  ;;  %v19136_v19 = vld [vmem:[#allocation46_spill] sm:$0xff]  ;;  %v12303_v20 = vld [vmem:[%s18231_s3 + $0x228] sm:$0xff] }
 0x638   : > { %v19137_v62 = vld [vmem:[#allocation26_spill] sm:$0xff] }
 0x639   : > { %7264 = vmatmul.f32.gmra.mxu3 %v15851_v53  ;;  %7360 = vmatmul.f32.gmra.mxu0 %v19134_v21  ;;  %v6840_v42 = vadd.f32 %v6839_v54, %v6787_v25 }
 0x63a   : > { %7437 = vmatmul.f32.gmra.mxu1 %v15943_v37  ;;  %v6659_v0 = vpop.f32.mrf.mxu2  ;;  %7815 = vmatpush.msra.mxu3 %v7814_v10 }
 0x63b   : > { %v15990_v35 = vadd.f32 %v6840_v42, %v15874_v41  ;;  %v6660_v43 = vadd.f32 %v6659_v0, %v6596_v28  ;;  %v19135_v41 = vld [vmem:[#allocation50_spill] sm:$0xff] }
 0x63c   : > { %v6733_v36 = vpop.f32.mrf.mxu3 }
 0x63d   : > { %v6728_v7 = vadd.f32 %v6727_v18, %v6660_v43 }
 0x63e   : > { %v6794_v45 = vpop.f32.mrf.mxu0 }
 0x63f   : > { %v7109_v54 = vpop.f32.mrf.mxu1  ;;  %v6791_v8 = vadd.f32 %v6790_v60, %v6728_v7  ;;  %7211 = vmatmul.f32.gmra.mxu2 %v15851_v53 }
 0x641   : > { %7368 = vmatmul.f32.gmra.mxu0 %v7367_v29  ;;  %7529 = vmatmul.f32.vlgmr.msrb.gmra.mxu3 %v19135_v41  ;;  %v6844_v49 = vadd.f32 %v6843_v50, %v6791_v8  ;;  %v16011_v50 = vand.u32 4294901760, %v12303_v20  ;;  %v19139_v29 = vld [vmem:[#allocation29_spill] sm:$0xff] }
 0x642   : > { %7657 = vmatmul.f32.vlgmr.msrb.gmra.mxu1 %v14671_v24  ;;  %v6664_v17 = vpop.f32.mrf.mxu2 }
 0x643   : > { %v16003_v31 = vadd.f32 %v6844_v49, %v15883_v22  ;;  %v6665_v57 = vadd.f32 %v6664_v17, %v6600_v46  ;;  %7724 = vmatpush.msra.mxu2 %v16011_v50  ;;  %v7817_v25 = vsub.f32 %v12303_v20, %v16011_v50  ;;  %7943 = vmatpush.msra.mxu1 %v16011_v50  ;;  %v12302_v49 = vld [vmem:[%s18231_s3 + $0x220] sm:$0xff]  ;;  %v19141_v17 = vld [vmem:[#allocation16_spill] sm:$0xff] }
 0x644   : > { %v6989_v27 = vpop.f32.mrf.mxu3 }
 0x645   : > { %v6734_v2 = vadd.f32 %v6733_v36, %v6665_v57  ;;  %v7818_v28 = vand.u32 4294901760, %v7817_v25  ;;  %7881 = vmatpush.msra.mxu0 %v7817_v25  ;;  %v19138_v36 = vld [vmem:[#allocation73_spill] sm:$0xff] }
 0x646   : > { %v7047_v18 = vpop.f32.mrf.mxu0 }
 0x647   : > { %v7115_v53 = vpop.f32.mrf.mxu1  ;;  %v6795_v23 = vadd.f32 %v6794_v45, %v6734_v2  ;;  %7467 = vmatmul.f32.vlgmr.msrb.gmra.mxu2 %v19136_v19 }
 0x649   : > { %7535 = vmatmul.f32.gmra.mxu3 %v19137_v62  ;;  %7604 = vmatmul.f32.vlgmr.msrb.gmra.mxu0 %v14671_v24  ;;  %v6848_v22 = vadd.f32 %v6847_v4, %v6795_v23  ;;  %v7819_v4 = vsub.f32 %v7817_v25, %v7818_v28 }
 0x64a   : > { %7661 = vmatmul.f32.gmra.mxu1 %v14698_v9  ;;  %v6892_v60 = vpop.f32.mrf.mxu2 }
 0x64b   : > { %v16018_v55 = vadd.f32 %v6848_v22, %v15889_v38  ;;  %v6990_v21 = vadd.f32 %v6989_v27, %v6892_v60  ;;  %v7820_v7 = vand.u32 4294901760, %v7819_v4  ;;  %v19142_v22 = vld [vmem:[#allocation6_spill] sm:$0xff]  ;;  %v19143_v60 = vld [vmem:[#allocation28_spill] sm:$0xff] }
 0x64c   : > { %v6993_v33 = vpop.f32.mrf.mxu3 }
 0x64d   : > { %v7048_v24 = vadd.f32 %v7047_v18, %v6990_v21  ;;  %7821 = vmatpush.msra.mxu3 %v7820_v7  ;;  %v19146_v7 = vld [vmem:[#allocation22_spill] sm:$0xff] }
 0x64e   : > { %v7052_v42 = vpop.f32.mrf.mxu0 }
 0x64f   : > { %v7121_v0 = vpop.f32.mrf.mxu1  ;;  %v16020_v43 = vadd.f32 %v7109_v54, %v7048_v24  ;;  %7472 = vmatmul.f32.gmra.mxu2 %v19138_v36  ;;  %v19140_v54 = vld [vmem:[#allocation15_spill] sm:$0xff] }
 0x651   : > { %7541 = vmatmul.f32.gmra.mxu3 %v19139_v29  ;;  %7608 = vmatmul.f32.gmra.mxu0 %v14698_v9  ;;  %v7725_v9 = vand.u32 4294901760, %v12302_v49 }
 0x652   : > { %7665 = vmatmul.f32.gmra.mxu1 %v19060_v59  ;;  %v6900_v38 = vpop.f32.mrf.mxu2 }
 0x653   : > { %v6994_v45 = vadd.f32 %v6993_v33, %v6900_v38  ;;  %7726 = vmatpush.msra.mxu2 %v7725_v9  ;;  %v7823_v27 = vsub.f32 %v12302_v49, %v7725_v9  ;;  %7945 = vmatpush.msra.mxu1 %v7725_v9  ;;  %v19147_v38 = vld [vmem:[#allocation8_spill] sm:$0xff] }
 0x654   : > { %v6997_v47 = vpop.f32.mrf.mxu3 }
 0x655   : > { %v7053_v8 = vadd.f32 %v7052_v42, %v6994_v45  ;;  %8010 = vmatpush.msrb.mxu2 %v7806_v16  ;;  %7884 = vmatpush.msra.mxu0 %v7823_v27  ;;  %v19144_v42 = vld [vmem:[#allocation14_spill] sm:$0xff] }
 0x656   : > { %v7057_v41 = vpop.f32.mrf.mxu0 }
 0x657   : > { %v7127_v10 = vpop.f32.mrf.mxu1  ;;  %v16026_v46 = vadd.f32 %v7115_v53, %v7053_v8  ;;  %7477 = vmatmul.f32.gmra.mxu2 %v19140_v54  ;;  %v7824_v53 = vand.u32 4294901760, %v7823_v27 }
 0x658   : > { %8014 = vmatpush.msrb.mxu2 %v7812_v63 }
 0x659   : > { %7547 = vmatmul.f32.gmra.mxu3 %v19141_v17  ;;  %7612 = vmatmul.f32.gmra.mxu0 %v19060_v59  ;;  %v7825_v20 = vsub.f32 %v7823_v27, %v7824_v53 }
 0x65a   : > { %7669 = vmatmul.f32.gmra.mxu1 %v19064_v15  ;;  %v6908_v57 = vpop.f32.mrf.mxu2  ;;  %8018 = vmatpush.msrb.mxu2 %v7818_v28 }
 0x65b   : > { %v6998_v2 = vadd.f32 %v6997_v47, %v6908_v57  ;;  %v7826_v25 = vand.u32 4294901760, %v7825_v20 }
 0x65c   : > { %v7001_v18 = vpop.f32.mrf.mxu3  ;;  %8022 = vmatpush.msrb.mxu2 %v7824_v53 }
 0x65d   : > { %v7058_v23 = vadd.f32 %v7057_v41, %v6998_v2  ;;  %7827 = vmatpush.msra.mxu3 %v7826_v25 }
 0x65e   : > { %v7062_v19 = vpop.f32.mrf.mxu0 }
 0x65f   : > { %v7133_v59 = vpop.f32.mrf.mxu1  ;;  %v16039_v62 = vadd.f32 %v7121_v0, %v7058_v23  ;;  %7482 = vmatmul.f32.gmra.mxu2 %v19142_v22  ;;  %8069 = vmatpush.msrb.mxu3 %v15945_v3 }
 0x661   : > { %7553 = vmatmul.f32.gmra.mxu3 %v19143_v60  ;;  %7616 = vmatmul.f32.gmra.mxu0 %v19064_v15  ;;  %v19145_v15 = vld [vmem:[#allocation2_spill] sm:$0xff] }
 0x662   : > { %7673 = vmatmul.f32.gmra.mxu1 %v19070_v11  ;;  %v6916_v12 = vpop.f32.mrf.mxu2  ;;  %8071 = vmatpush.msrb.mxu3 %v15979_v51 }
 0x663   : > { %v7002_v16 = vadd.f32 %v7001_v18, %v6916_v12 }
 0x664   : > { %v7005_v21 = vpop.f32.mrf.mxu3  ;;  %8073 = vmatpush.msrb.mxu3 %v16011_v50  ;;  %v12309_v50 = vld [vmem:[%s18231_s3 + $0x258] sm:$0xff] }
 0x665   : > { %v7063_v58 = vadd.f32 %v7062_v19, %v7002_v16 }
 0x666   : > { %v7067_v63 = vpop.f32.mrf.mxu0  ;;  %8075 = vmatpush.msrb.mxu3 %v7725_v9  ;;  %v19148_v9 = vld [vmem:[#allocation20_spill] sm:$0xff] }
 0x667   : > { %v7139_v33 = vpop.f32.mrf.mxu1  ;;  %v16047_v24 = vadd.f32 %v7127_v10, %v7063_v58  ;;  %7487 = vmatmul.f32.gmra.mxu2 %v19144_v42 }
 0x669   : > { %7559 = vmatmul.f32.gmra.mxu3 %v19145_v15  ;;  %7620 = vmatmul.f32.gmra.mxu0 %v19070_v11  ;;  %v16062_v11 = vand.u32 4294901760, %v12309_v50 }
 0x66a   : > { %7677 = vmatmul.f32.gmra.mxu1 %v19075_v30  ;;  %v6924_v3 = vpop.f32.mrf.mxu2 }
 0x66b   : > { %v7006_v28 = vadd.f32 %v7005_v21, %v6924_v3  ;;  %8179 = vmatpush.msrb.mxu0 %v16062_v11  ;;  %v16067_v41 = vsub.f32 %v12309_v50, %v16062_v11  ;;  %v19149_v21 = vld [vmem:[#allocation57_spill] sm:$0xff]  ;;  %v19153_v50 = vld [vmem:[#allocation66_spill] sm:$0xff] }
 0x66c   : > { %v7009_v0 = vpop.f32.mrf.mxu3 }
 0x66d   : > { %v7068_v4 = vadd.f32 %v7067_v63, %v7006_v28 }
 0x66e   : > { %v7072_v36 = vpop.f32.mrf.mxu0 }
 0x66f   : > { %v7145_v51 = vpop.f32.mrf.mxu1  ;;  %v16054_v29 = vadd.f32 %v7133_v59, %v7068_v4  ;;  %7492 = vmatmul.f32.gmra.mxu2 %v19146_v7  ;;  %v19150_v4 = vld [vmem:[#allocation61_spill] sm:$0xff] }
 0x671   : > { %7565 = vmatmul.f32.gmra.mxu3 %v19147_v38  ;;  %7624 = vmatmul.f32.gmra.mxu0 %v19075_v30  ;;  %v8265_v30 = vand.u32 4294901760, %v16067_v41 }
 0x672   : > { %7681 = vmatmul.f32.gmra.mxu1 %v15510_v32  ;;  %v6932_v45 = vpop.f32.mrf.mxu2 }
 0x673   : > { %v7010_v47 = vadd.f32 %v7009_v0, %v6932_v45  ;;  %v8266_v57 = vsub.f32 %v16067_v41, %v8265_v30 }
 0x674   : > { %v7013_v8 = vpop.f32.mrf.mxu3 }
 0x675   : > { %v7073_v10 = vadd.f32 %v7072_v36, %v7010_v47  ;;  %v8267_v53 = vand.u32 4294901760, %v8266_v57  ;;  %v19151_v36 = vld [vmem:[#allocation60_spill] sm:$0xff]  ;;  %v19155_v57 = vld [vmem:[#allocation63_spill] sm:$0xff] }
 0x676   : > { %v7077_v54 = vpop.f32.mrf.mxu0 }
 0x677   : > { %v7151_v49 = vpop.f32.mrf.mxu1  ;;  %v16069_v17 = vadd.f32 %v7139_v33, %v7073_v10  ;;  %7497 = vmatmul.f32.gmra.mxu2 %v19148_v9  ;;  %8268 = vmatpush.msrb.mxu1 %v8267_v53 }
 0x679   : > { %7571 = vmatmul.f32.gmra.mxu3 %v7365_v52  ;;  %7628 = vmatmul.f32.gmra.mxu0 %v15510_v32  ;;  %v12308_v32 = vld [vmem:[%s18231_s3 + $0x250] sm:$0xff] }
 0x67a   : > { %7685 = vmatmul.f32.gmra.mxu1 %v15943_v37  ;;  %v6940_v27 = vpop.f32.mrf.mxu2  ;;  %v16090_v52 = vand.u32 4294901760, %v12308_v32 }
 0x67b   : > { %v7014_v2 = vadd.f32 %v7013_v8, %v6940_v27  ;;  %v19156_v27 = vld [vmem:[#allocation58_spill] sm:$0xff] }
 0x67c   : > { %v7017_v18 = vpop.f32.mrf.mxu3  ;;  %8181 = vmatpush.msrb.mxu0 %v16090_v52 }
 0x67d   : > { %v7078_v23 = vadd.f32 %v7077_v54, %v7014_v2  ;;  %v19157_v2 = vld [vmem:[#allocation70_spill] sm:$0xff] }
 0x67e   : > { %v7082_v19 = vpop.f32.mrf.mxu0 }
 0x67f   : > { %v16080_v59 = vpop.f32.mrf.mxu1  ;;  %v16082_v20 = vadd.f32 %v7145_v51, %v7078_v23  ;;  %7502 = vmatmul.f32.gmra.mxu2 %v15956_v61  ;;  %v19152_v51 = vld [vmem:[#allocation52_spill] sm:$0xff] }
 0x681   : > { %7632 = vmatmul.f32.gmra.mxu0 %v15943_v37  ;;  %7829 = vmatmul.f32.vlgmr.msra.gmra.mxu3 %v14992_v44 }
 0x682   : > { %7949 = vmatmul.f32.vlgmr.msra.gmra.mxu1 %v19091_v26  ;;  %8398 = vmatpush.msra.mxu3 %v16062_v11  ;;  %v6948_v22 = vpop.f32.mrf.mxu2  ;;  %v16104_v26 = vsub.f32 %v12308_v32, %v16090_v52 }
 0x683   : > { %v7018_v60 = vadd.f32 %v7017_v18, %v6948_v22 }
 0x684   : > { %v7237_v25 = vpop.f32.mrf.mxu3  ;;  %8400 = vmatpush.msra.mxu3 %v16090_v52  ;;  %v8271_v58 = vand.u32 4294901760, %v16104_v26 }
 0x685   : > { %v7083_v61 = vadd.f32 %v7082_v19, %v7018_v60 }
 0x686   : > { %v16096_v12 = vpop.f32.mrf.mxu0 }
 0x687   : > { %v16098_v16 = vpop.f32.mrf.mxu1  ;;  %v16100_v37 = vadd.f32 %v7151_v49, %v7083_v61  ;;  %7732 = vmatmul.f32.vlgmr.msra.gmra.mxu2 %v19083_v6  ;;  %v8272_v6 = vsub.f32 %v16104_v26, %v8271_v58  ;;  %v19154_v49 = vld [vmem:[#allocation68_spill] sm:$0xff] }
 0x688   : > { %8334 = vmatpush.msra.mxu2 %v16067_v41  ;;  %v19158_v61 = vld [vmem:[#allocation40_spill] sm:$0xff]  ;;  %v19163_v41 = vld [vmem:[#allocation41_spill] sm:$0xff] }
 0x689   : > { %7833 = vmatmul.f32.gmra.mxu3 %v15017_v40  ;;  %7887 = vmatmul.f32.vlgmr.msra.gmra.mxu0 %v19092_v14  ;;  %v8273_v14 = vand.u32 4294901760, %v8272_v6  ;;  %v19161_v6 = vld [vmem:[#allocation42_spill] sm:$0xff] }
 0x68a   : > { %7955 = vmatmul.f32.gmra.mxu1 %v19149_v21  ;;  %v7184_v63 = vpop.f32.mrf.mxu2  ;;  %8337 = vmatpush.msra.mxu2 %v16104_v26  ;;  %v12306_v21 = vld [vmem:[%s18231_s3 + $0x240] sm:$0xff] }
 0x68b   : > { %v7185_v33 = vadd.f32 %v7184_v63, %v16020_v43  ;;  %8274 = vmatpush.msrb.mxu1 %v8273_v14  ;;  %v12307_v43 = vld [vmem:[%s18231_s3 + $0x248] sm:$0xff]  ;;  %v19160_v63 = vld [vmem:[#allocation64_spill] sm:$0xff] }
 0x68c   : > { %v7241_v42 = vpop.f32.mrf.mxu3  ;;  %v16129_v7 = vand.u32 4294901760, %v12307_v43 }
 0x68d   : > { %v7238_v15 = vadd.f32 %v7237_v25, %v7185_v33  ;;  %v16162_v33 = vand.u32 4294901760, %v12306_v21 }
 0x68e   : > { %v16116_v3 = vpop.f32.mrf.mxu0  ;;  %8183 = vmatpush.msrb.mxu0 %v16129_v7  ;;  %8402 = vmatpush.msra.mxu3 %v16129_v7  ;;  %v8276_v9 = vsub.f32 %v12307_v43, %v16129_v7 }
 0x68f   : > { %v16118_v28 = vpop.f32.mrf.mxu1  ;;  %v16121_v0 = vadd.f32 %v7238_v15, %v15904_v56  ;;  %7740 = vmatmul.f32.gmra.mxu2 %v19150_v4 }
 0x690   : > { %8340 = vmatpush.msra.mxu2 %v8276_v9  ;;  %8185 = vmatpush.msrb.mxu0 %v16162_v33 }
 0x691   : > { %7837 = vmatmul.f32.gmra.mxu3 %v19151_v36  ;;  %7892 = vmatmul.f32.gmra.mxu0 %v19152_v51 }
 0x692   : > { %7961 = vmatmul.f32.gmra.mxu1 %v19153_v50  ;;  %v7188_v38 = vpop.f32.mrf.mxu2  ;;  %8404 = vmatpush.msra.mxu3 %v16162_v33 }
 0x693   : > { %v7189_v56 = vadd.f32 %v7188_v38, %v16026_v46  ;;  %v8277_v46 = vand.u32 4294901760, %v8276_v9  ;;  %8469 = vmatpush.msra.mxu0 %v8265_v30  ;;  %v19162_v38 = vld [vmem:[#allocation75_spill] sm:$0xff]  ;;  %v19164_v30 = vld [vmem:[#allocation4_spill] sm:$0xff] }
 0x694   : > { %v7245_v45 = vpop.f32.mrf.mxu3 }
 0x695   : > { %v7242_v47 = vadd.f32 %v7241_v42, %v7189_v56  ;;  %v8278_v19 = vsub.f32 %v8276_v9, %v8277_v46  ;;  %v7697_v42 = vrot.slane %v15837_v34, 2  ;;  %8473 = vmatpush.msra.mxu0 %v8271_v58 }
 0x696   : > { %v16135_v8 = vpop.f32.mrf.mxu0 }
 0x697   : > { %v16137_v10 = vpop.f32.mrf.mxu1  ;;  %v16141_v54 = vadd.f32 %v7242_v47, %v15913_v5  ;;  %7748 = vmatmul.f32.gmra.mxu2 %v19154_v49  ;;  %v8279_v22 = vand.u32 4294901760, %v8278_v19  ;;  %8477 = vmatpush.msra.mxu0 %v8277_v46 }
 0x699   : > { %7841 = vmatmul.f32.gmra.mxu3 %v19155_v57  ;;  %7897 = vmatmul.f32.gmra.mxu0 %v19156_v27 }
 0x69a   : > { %7967 = vmatmul.f32.gmra.mxu1 %v19157_v2  ;;  %v7192_v18 = vpop.f32.mrf.mxu2 }
 0x69b   : > { %v7193_v53 = vadd.f32 %v7192_v18, %v16039_v62  ;;  %8280 = vmatpush.msrb.mxu1 %v8279_v22  ;;  %v19159_v62 = vld [vmem:[#allocation10_spill] sm:$0xff]  ;;  %v19168_v22 = vld [vmem:[#allocation48_spill] sm:$0xff] }
 0x69c   : > { %v7249_v23 = vpop.f32.mrf.mxu3 }
 0x69d   : > { %v7246_v5 = vadd.f32 %v7245_v45, %v7193_v53  ;;  %v19165_v45 = vld [vmem:[#allocation76_spill] sm:$0xff]  ;;  %v16202_v53 = vld [vmem:[%s16195_s11] sm:$0xff] }
 0x69e   : > { %v16149_v32 = vpop.f32.mrf.mxu0 }
 0x69f   : > { %v16151_v60 = vpop.f32.mrf.mxu1  ;;  %v16154_v25 = vadd.f32 %v7246_v5, %v15927_v13  ;;  %7756 = vmatmul.f32.gmra.mxu2 %v19158_v61  ;;  %v7698_v13 = vrot.slane %v15917_v39, 2  ;;  %v19167_v5 = vld [vmem:[#allocation21_spill] sm:$0xff]  ;;  %v19169_v61 = vld [vmem:[#allocation24_spill] sm:$0xff] }
 0x6a1   : > { %7845 = vmatmul.f32.gmra.mxu3 %v19159_v62  ;;  %7902 = vmatmul.f32.gmra.mxu0 %v19160_v63  ;;  %v7699_v34 = vsel %vm1248_vm2, %v7697_v42, %v7698_v13 }
 0x6a2   : > { %7973 = vmatmul.f32.gmra.mxu1 %v19161_v6  ;;  %v7196_v15 = vpop.f32.mrf.mxu2  ;;  %v7705_v56 = vsel %vm411_vm1, %v7699_v34, 0 }
 0x6a3   : > { %v7197_v14 = vadd.f32 %v7196_v15, %v16047_v24  ;;  %v8282_v24 = vsub.f32 %v12306_v21, %v16162_v33  ;;  %v16190_v49 = vand.u32 4294901760, %v7705_v56  ;;  %v8143_v21 = vsel %vm411_vm1, %v16202_v53, 0 }
 0x6a4   : > { %v7253_v4 = vpop.f32.mrf.mxu3  ;;  %v16216_v13 = vand.u32 4294901760, %v8143_v21 }
 0x6a5   : > { %v7250_v43 = vadd.f32 %v7249_v23, %v7197_v14  ;;  %v8283_v26 = vand.u32 4294901760, %v8282_v24  ;;  %8343 = vmatpush.msra.mxu2 %v8282_v24  ;;  %v19166_v23 = vld [vmem:[#allocation77_spill] sm:$0xff]  ;;  %v7784_v19 = vsub.f32 %v7705_v56, %v16190_v49 }
 0x6a6   : > { %v16172_v51 = vpop.f32.mrf.mxu0 }
 0x6a7   : > { %v16178_v39 = vpop.f32.mrf.mxu1  ;;  %v16181_v50 = vadd.f32 %v7250_v43, %v15938_v1  ;;  %7764 = vmatmul.f32.gmra.mxu2 %v19162_v38  ;;  %v8284_v9 = vsub.f32 %v8282_v24, %v8283_v26  ;;  %8481 = vmatpush.msra.mxu0 %v8283_v26  ;;  %v7785_v6 = vand.u32 4294901760, %v7784_v19  ;;  %v16224_v43 = vld [vmem:[%s16195_s11 + $0x10] sm:$0xff]  ;;  %v19171_v38 = vld [vmem:[#allocation23_spill] sm:$0xff] }
 0x6a8   : > { %v8146_v24 = vsel %vm411_vm1, %v16224_v43, 0 }
 0x6a9   : > { %7849 = vmatmul.f32.gmra.mxu3 %v19163_v41  ;;  %7907 = vmatmul.f32.gmra.mxu0 %v19164_v30  ;;  %v8285_v46 = vand.u32 4294901760, %v8284_v9  ;;  %v16241_v26 = vand.u32 4294901760, %v8146_v24  ;;  %v16246_v9 = vld [vmem:[%s16195_s11 + $0x20] sm:$0xff] }
 0x6aa   : > { %7979 = vmatmul.f32.gmra.mxu1 %v19165_v45  ;;  %v7200_v58 = vpop.f32.mrf.mxu2 }
 0x6ab   : > { %v7201_v1 = vadd.f32 %v7200_v58, %v16054_v29  ;;  %8286 = vmatpush.msrb.mxu1 %v8285_v46  ;;  %19172 = vst [vmem:[#allocation5_spill] sm:$0xff] %v16241_v26  ;;  %v8149_v46 = vsel %vm411_vm1, %v16246_v9, 0 }
 0x6ac   : > { %v7257_v47 = vpop.f32.mrf.mxu3 }
 0x6ad   : > { %v7254_v27 = vadd.f32 %v7253_v4, %v7201_v1  ;;  %8528 = vmatpush.msra.mxu1 %v16062_v11  ;;  %v19170_v11 = vld [vmem:[#allocation12_spill] sm:$0xff] }
 0x6ae   : > { %v16197_v2 = vpop.f32.mrf.mxu0 }
 0x6af   : > { %v16199_v18 = vpop.f32.mrf.mxu1  ;;  %v16205_v29 = vadd.f32 %v7254_v27, %v15967_v48  ;;  %7772 = vmatmul.f32.gmra.mxu2 %v19166_v23  ;;  %8530 = vmatpush.msra.mxu1 %v16090_v52  ;;  %v16234_v52 = vsub.f32 %v8143_v21, %v16216_v13  ;;  %v16265_v21 = vand.u32 4294901760, %v8149_v46 }
 0x6b1   : > { %7853 = vmatmul.f32.gmra.mxu3 %v19167_v5  ;;  %7912 = vmatmul.f32.gmra.mxu0 %v19168_v22  ;;  %v18556_v45 = vand.u32 4294901760, %v16234_v52  ;;  %19175 = vst [vmem:[#allocation55_spill] sm:$0xff] %v16265_v21 }
 0x6b2   : > { %7985 = vmatmul.f32.gmra.mxu1 %v19169_v61  ;;  %v7204_v63 = vpop.f32.mrf.mxu2 }
 0x6b3   : > { %v7205_v48 = vadd.f32 %v7204_v63, %v16069_v17  ;;  %8532 = vmatpush.msra.mxu1 %v16129_v7  ;;  %v7786_v17 = vsub.f32 %v7784_v19, %v7785_v6 }
 0x6b4   : > { %v7261_v42 = vpop.f32.mrf.mxu3 }
 0x6b5   : > { %v7258_v15 = vadd.f32 %v7257_v47, %v7205_v48  ;;  %8534 = vmatpush.msra.mxu1 %v16162_v33  ;;  %v7787_v7 = vand.u32 4294901760, %v7786_v17  ;;  %v16256_v33 = vsub.f32 %v8146_v24, %v16241_v26  ;;  %v7411_v17 = vadd.f32 %v16080_v59, %v16096_v12 }
 0x6b6   : > { %v16219_v14 = vpop.f32.mrf.mxu0 }
 0x6b7   : > { %v16221_v4 = vpop.f32.mrf.mxu1  ;;  %v16228_v34 = vadd.f32 %v7258_v15, %v15990_v35  ;;  %7780 = vmatmul.f32.gmra.mxu2 %v19170_v11  ;;  %19173 = vst [vmem:[#allocation19_spill] sm:$0xff] %v16256_v33  ;;  %v16278_v11 = vsub.f32 %v8149_v46, %v16265_v21  ;;  %v16293_v46 = vld [vmem:[%s16195_s11 + $0x40] sm:$0xff] }
 0x6b9   : > { %7857 = vmatmul.f32.gmra.mxu3 %v16190_v49  ;;  %7917 = vmatmul.f32.gmra.mxu0 %v19171_v38  ;;  %19176 = vst [vmem:[#allocation59_spill] sm:$0xff] %v16278_v11 }
 0x6ba   : > { %7991 = vmatmul.f32.gmra.mxu1 %v7785_v6  ;;  %v7208_v30 = vpop.f32.mrf.mxu2  ;;  %v16268_v6 = vld [vmem:[%s16195_s11 + $0x30] sm:$0xff] }
 0x6bb   : > { %v7209_v35 = vadd.f32 %v7208_v30, %v16082_v20  ;;  %v8189_v20 = vsub.f32 %v16234_v52, %v18556_v45 }
 0x6bc   : > { %v7265_v56 = vpop.f32.mrf.mxu3 }
 0x6bd   : > { %v7262_v58 = vadd.f32 %v7261_v42, %v7209_v35  ;;  %v8190_v61 = vand.u32 4294901760, %v8189_v20  ;;  %v16288_v35 = vand.u32 4294901760, %v16278_v11 }
 0x6be   : > { %v16243_v1 = vpop.f32.mrf.mxu0 }
 0x6bf   : > { %v7658_v47 = vpop.f32.mrf.mxu1  ;;  %v16249_v27 = vadd.f32 %v7262_v58, %v16003_v31  ;;  %7788 = vmatmul.f32.gmra.mxu2 %v7787_v7  ;;  %19178 = vst [vmem:[#allocation54_spill] sm:$0xff] %v16288_v35  ;;  %v8205_v12 = vsub.f32 %v16278_v11, %v16288_v35 }
 0x6c1   : > { %7922 = vmatmul.f32.gmra.mxu0 %v7784_v19  ;;  %8077 = vmatmul.f32.vlgmr.msrb.gmra.mxu3 %v14992_v44  ;;  %v16263_v19 = vand.u32 4294901760, %v16256_v33 }
 0x6c2   : > { %8288 = vmatmul.f32.vlgmr.msrb.gmra.mxu1 %v16216_v13  ;;  %v7212_v23 = vpop.f32.mrf.mxu2 }
 0x6c3   : > { %v7213_v31 = vadd.f32 %v7212_v23, %v16100_v37  ;;  %19174 = vst [vmem:[#allocation18_spill] sm:$0xff] %v16263_v19  ;;  %v8197_v37 = vsub.f32 %v16256_v33, %v16263_v19 }
 0x6c4   : > { %v7530_v22 = vpop.f32.mrf.mxu3 }
 0x6c5   : > { %v7266_v63 = vadd.f32 %v7265_v56, %v7213_v31  ;;  %v16285_v30 = vand.u32 4294901760, %v8197_v37  ;;  %v7415_v31 = vadd.f32 %v16098_v16, %v16116_v3 }
 0x6c6   : > { %v7605_v48 = vpop.f32.mrf.mxu0 }
 0x6c7   : > { %v7662_v42 = vpop.f32.mrf.mxu1  ;;  %v16271_v15 = vadd.f32 %v7266_v63, %v16018_v55  ;;  %8024 = vmatmul.f32.vlgmr.msrb.gmra.mxu2 %v14992_v44  ;;  %v8152_v55 = vsel %vm411_vm1, %v16268_v6, 0  ;;  %19177 = vst [vmem:[#allocation56_spill] sm:$0xff] %v16285_v30 }
 0x6c8   : > { %v16290_v7 = vand.u32 4294901760, %v8152_v55 }
 0x6c9   : > { %8081 = vmatmul.f32.gmra.mxu3 %v15017_v40  ;;  %8191 = vmatmul.f32.vlgmr.msrb.gmra.mxu0 %v8190_v61 }
 0x6ca   : > { %8292 = vmatmul.f32.gmra.mxu1 %v16241_v26  ;;  %v7468_v38 = vpop.f32.mrf.mxu2  ;;  %19179 = vst [vmem:[#allocation71_spill] sm:$0xff] %v16290_v7  ;;  %v16301_v23 = vsub.f32 %v8152_v55, %v16290_v7 }
 0x6cb   : > { %v7469_v44 = vadd.f32 %v7468_v38, %v7411_v17  ;;  %v16311_v17 = vand.u32 4294901760, %v8205_v12 }
 0x6cc   : > { %v7536_v24 = vpop.f32.mrf.mxu3  ;;  %19180 = vst [vmem:[#allocation3_spill] sm:$0xff] %v16301_v23  ;;  %v16314_v55 = vand.u32 4294901760, %v16301_v23 }
 0x6cd   : > { %v7531_v56 = vadd.f32 %v7530_v22, %v7469_v44  ;;  %19181 = vst [vmem:[#allocation53_spill] sm:$0xff] %v16311_v17  ;;  %v16319_v44 = vld [vmem:[%s16195_s11 + $0x50] sm:$0xff] }
 0x6ce   : > { %v7609_v58 = vpop.f32.mrf.mxu0  ;;  %19182 = vst [vmem:[#allocation69_spill] sm:$0xff] %v16314_v55 }
 0x6cf   : > { %v7666_v20 = vpop.f32.mrf.mxu1  ;;  %v7606_v59 = vadd.f32 %v7605_v48, %v7531_v56  ;;  %8028 = vmatmul.f32.gmra.mxu2 %v15017_v40  ;;  %v8155_v40 = vsel %vm411_vm1, %v16293_v46, 0 }
 0x6d0   : > { %v16316_v38 = vand.u32 4294901760, %v8155_v40 }
 0x6d1   : > { %8085 = vmatmul.f32.gmra.mxu3 %v19151_v36  ;;  %8199 = vmatmul.f32.gmra.mxu0 %v16285_v30  ;;  %v7659_v22 = vadd.f32 %v7658_v47, %v7606_v59 }
 0x6d2   : > { %8296 = vmatmul.f32.gmra.mxu1 %v16265_v21  ;;  %v7473_v61 = vpop.f32.mrf.mxu2  ;;  %19183 = vst [vmem:[#allocation7_spill] sm:$0xff] %v16316_v38  ;;  %v16327_v59 = vsub.f32 %v8155_v40, %v16316_v38 }
 0x6d3   : > { %v16309_v63 = vadd.f32 %v7659_v22, %v16121_v0  ;;  %v7474_v48 = vadd.f32 %v7473_v61, %v7415_v31  ;;  %v8213_v0 = vsub.f32 %v16301_v23, %v16314_v55 }
 0x6d4   : > { %v7542_v37 = vpop.f32.mrf.mxu3  ;;  %19184 = vst [vmem:[#allocation9_spill] sm:$0xff] %v16327_v59  ;;  %v16340_v40 = vand.u32 4294901760, %v16327_v59 }
 0x6d5   : > { %v7537_v16 = vadd.f32 %v7536_v24, %v7474_v48  ;;  %v7419_v24 = vadd.f32 %v16118_v28, %v16135_v8  ;;  %v16337_v48 = vand.u32 4294901760, %v8213_v0 }
 0x6d6   : > { %v7613_v3 = vpop.f32.mrf.mxu0  ;;  %19186 = vst [vmem:[#allocation39_spill] sm:$0xff] %v16340_v40 }
 0x6d7   : > { %v7670_v47 = vpop.f32.mrf.mxu1  ;;  %v7610_v56 = vadd.f32 %v7609_v58, %v7537_v16  ;;  %8032 = vmatmul.f32.gmra.mxu2 %v19151_v36  ;;  %v8158_v36 = vsel %vm411_vm1, %v16319_v44, 0  ;;  %19185 = vst [vmem:[#allocation65_spill] sm:$0xff] %v16337_v48 }
 0x6d8   : > { %v16342_v16 = vand.u32 4294901760, %v8158_v36 }
 0x6d9   : > { %8089 = vmatmul.f32.gmra.mxu3 %v19155_v57  ;;  %8207 = vmatmul.f32.gmra.mxu0 %v16311_v17  ;;  %v7663_v12 = vadd.f32 %v7662_v42, %v7610_v56  ;;  %v16345_v56 = vld [vmem:[%s16195_s11 + $0x60] sm:$0xff] }
 0x6da   : > { %8300 = vmatmul.f32.gmra.mxu1 %v16290_v7  ;;  %v7478_v58 = vpop.f32.mrf.mxu2  ;;  %19187 = vst [vmem:[#allocation67_spill] sm:$0xff] %v16342_v16  ;;  %v16353_v0 = vsub.f32 %v8158_v36, %v16342_v16 }
 0x6db   : > { %v16335_v31 = vadd.f32 %v7663_v12, %v16141_v54  ;;  %v7479_v22 = vadd.f32 %v7478_v58, %v7419_v24  ;;  %v8221_v54 = vsub.f32 %v16327_v59, %v16340_v40 }
 0x6dc   : > { %v7548_v61 = vpop.f32.mrf.mxu3  ;;  %19188 = vst [vmem:[#allocation62_spill] sm:$0xff] %v16353_v0  ;;  %v16366_v36 = vand.u32 4294901760, %v16353_v0 }
 0x6dd   : > { %v7543_v28 = vadd.f32 %v7542_v37, %v7479_v22  ;;  %v7423_v37 = vadd.f32 %v16137_v10, %v16149_v32 }
 0x6de   : > { %v7617_v8 = vpop.f32.mrf.mxu0  ;;  %19190 = vst [vmem:[#allocation49_spill] sm:$0xff] %v16366_v36 }
 0x6df   : > { %v7674_v42 = vpop.f32.mrf.mxu1  ;;  %v7614_v45 = vadd.f32 %v7613_v3, %v7543_v28  ;;  %8036 = vmatmul.f32.gmra.mxu2 %v19155_v57  ;;  %v8161_v57 = vsel %vm411_vm1, %v16345_v56, 0  ;;  %v16363_v28 = vand.u32 4294901760, %v8221_v54 }
 0x6e1   : > { %8093 = vmatmul.f32.gmra.mxu3 %v19159_v62  ;;  %8215 = vmatmul.f32.gmra.mxu0 %v16337_v48  ;;  %v7667_v24 = vadd.f32 %v7666_v20, %v7614_v45  ;;  %19189 = vst [vmem:[#allocation36_spill] sm:$0xff] %v16363_v28  ;;  %v16368_v48 = vand.u32 4294901760, %v8161_v57  ;;  %v16371_v20 = vld [vmem:[%s16195_s11 + $0x70] sm:$0xff] }
 0x6e2   : > { %8304 = vmatmul.f32.gmra.mxu1 %v16316_v38  ;;  %v7483_v3 = vpop.f32.mrf.mxu2  ;;  %19192 = vst [vmem:[#allocation30_spill] sm:$0xff] %v16371_v20 }
 0x6e3   : > { %v16361_v12 = vadd.f32 %v7667_v24, %v16154_v25  ;;  %v7484_v58 = vadd.f32 %v7483_v3, %v7423_v37  ;;  %19191 = vst [vmem:[#allocation34_spill] sm:$0xff] %v16368_v48  ;;  %v8229_v25 = vsub.f32 %v16353_v0, %v16366_v36  ;;  %v16379_v54 = vsub.f32 %v8161_v57, %v16368_v48  ;;  %v12313_v57 = vld [vmem:[%s18231_s3 + $0x278] sm:$0xff] }
 0x6e4   : > { %v7554_v22 = vpop.f32.mrf.mxu3 }
 0x6e5   : > { %v7549_v10 = vadd.f32 %v7548_v61, %v7484_v58  ;;  %19193 = vst [vmem:[#allocation45_spill] sm:$0xff] %v16379_v54  ;;  %v7427_v61 = vadd.f32 %v16151_v60, %v16172_v51  ;;  %v16395_v60 = vand.u32 4294901760, %v16379_v54 }
 0x6e6   : > { %v7621_v32 = vpop.f32.mrf.mxu0 }
 0x6e7   : > { %v7678_v45 = vpop.f32.mrf.mxu1  ;;  %v7618_v17 = vadd.f32 %v7617_v8, %v7549_v10  ;;  %8040 = vmatmul.f32.gmra.mxu2 %v19159_v62  ;;  %v8164_v8 = vsel %vm411_vm1, %v16371_v20, 0  ;;  %v16392_v10 = vand.u32 4294901760, %v8229_v25  ;;  %19196 = vst [vmem:[#allocation43_spill] sm:$0xff] %v16395_v60  ;;  %v8237_v25 = vsub.f32 %v16379_v54, %v16395_v60 }
 0x6e8   : > { %v16397_v51 = vand.u32 4294901760, %v8164_v8 }
 0x6e9   : > { %8097 = vmatmul.f32.gmra.mxu3 %v19163_v41  ;;  %8223 = vmatmul.f32.gmra.mxu0 %v16363_v28  ;;  %v7671_v37 = vadd.f32 %v7670_v47, %v7618_v17  ;;  %19195 = vst [vmem:[#allocation47_spill] sm:$0xff] %v16392_v10  ;;  %v16399_v17 = vand.u32 4294901760, %v12313_v57 }
 0x6ea   : > { %8308 = vmatmul.f32.gmra.mxu1 %v16342_v16  ;;  %v7488_v62 = vpop.f32.mrf.mxu2  ;;  %19197 = vst [vmem:[#allocation74_spill] sm:$0xff] %v16397_v51 }
 0x6eb   : > { %v16387_v24 = vadd.f32 %v7671_v37, %v16181_v50  ;;  %v7489_v3 = vadd.f32 %v7488_v62, %v7427_v61  ;;  %8642 = vmatpush.msrb.mxu2 %v16399_v17  ;;  %v16403_v50 = vsub.f32 %v12313_v57, %v16399_v17  ;;  %8861 = vmatpush.msrb.mxu1 %v16399_v17 }
 0x6ec   : > { %v7560_v58 = vpop.f32.mrf.mxu3  ;;  %v7431_v62 = vadd.f32 %v16178_v39, %v16197_v2 }
 0x6ed   : > { %19194 = vst [vmem:[#allocation38_spill] sm:$0xff] %v16387_v24  ;;  %v7555_v47 = vadd.f32 %v7554_v22, %v7489_v3  ;;  %v16412_v22 = vsub.f32 %v8164_v8, %v16397_v51  ;;  %v18568_v37 = vand.u32 4294901760, %v16403_v50  ;;  %8797 = vmatpush.msrb.mxu0 %v16403_v50 }
 0x6ee   : > { %v7625_v28 = vpop.f32.mrf.mxu0 }
 0x6ef   : > { %v7682_v30 = vpop.f32.mrf.mxu1  ;;  %v7622_v61 = vadd.f32 %v7621_v32, %v7555_v47  ;;  %8044 = vmatmul.f32.gmra.mxu2 %v19163_v41  ;;  %19198 = vst [vmem:[#allocation35_spill] sm:$0xff] %v16412_v22  ;;  %v8729_v32 = vsub.f32 %v16403_v50, %v18568_v37  ;;  %v16428_v24 = vand.u32 4294901760, %v16412_v22 }
 0x6f1   : > { %8101 = vmatmul.f32.gmra.mxu3 %v19167_v5  ;;  %8231 = vmatmul.f32.gmra.mxu0 %v16392_v10  ;;  %v7675_v3 = vadd.f32 %v7674_v42, %v7622_v61  ;;  %v16425_v10 = vand.u32 4294901760, %v8237_v25  ;;  %19200 = vst [vmem:[#allocation51_spill] sm:$0xff] %v16428_v24  ;;  %v8730_v39 = vand.u32 4294901760, %v8729_v32  ;;  %v8245_v25 = vsub.f32 %v16412_v22, %v16428_v24 }
 0x6f2   : > { %8312 = vmatmul.f32.gmra.mxu1 %v16368_v48  ;;  %v7493_v41 = vpop.f32.mrf.mxu2 }
 0x6f3   : > { %v16423_v57 = vadd.f32 %v7675_v3, %v16205_v29  ;;  %v7494_v8 = vadd.f32 %v7493_v41, %v7431_v62  ;;  %19199 = vst [vmem:[#allocation32_spill] sm:$0xff] %v16425_v10  ;;  %8731 = vmatpush.msrb.mxu3 %v8730_v39  ;;  %v12312_v29 = vld [vmem:[%s18231_s3 + $0x270] sm:$0xff]  ;;  %v16451_v39 = vand.u32 4294901760, %v8245_v25 }
 0x6f4   : > { %v7566_v47 = vpop.f32.mrf.mxu3  ;;  %v16438_v62 = vand.u32 4294901760, %v12312_v29 }
 0x6f5   : > { %v7561_v2 = vadd.f32 %v7560_v58, %v7494_v8  ;;  %v7435_v58 = vadd.f32 %v16199_v18, %v16219_v14  ;;  %19201 = vst [vmem:[#allocation33_spill] sm:$0xff] %v16451_v39 }
 0x6f6   : > { %v7629_v42 = vpop.f32.mrf.mxu0  ;;  %8644 = vmatpush.msrb.mxu2 %v16438_v62  ;;  %8863 = vmatpush.msrb.mxu1 %v16438_v62 }
 0x6f7   : > { %v7686_v61 = vpop.f32.mrf.mxu1  ;;  %v7626_v20 = vadd.f32 %v7625_v28, %v7561_v2  ;;  %8048 = vmatmul.f32.gmra.mxu2 %v19167_v5  ;;  %v16445_v28 = vsub.f32 %v12312_v29, %v16438_v62 }
 0x6f9   : > { %8105 = vmatmul.f32.gmra.mxu3 %v16190_v49  ;;  %8239 = vmatmul.f32.gmra.mxu0 %v16425_v10  ;;  %v7679_v3 = vadd.f32 %v7678_v45, %v7626_v20  ;;  %v18567_v18 = vand.u32 4294901760, %v16445_v28  ;;  %v16568_v10 = vld [vmem:[%s16195_s11 + $0x38] sm:$0x3] }
 0x6fa   : > { %8316 = vmatmul.f32.gmra.mxu1 %v16397_v51  ;;  %v7498_v5 = vpop.f32.mrf.mxu2  ;;  %8800 = vmatpush.msrb.mxu0 %v16445_v28 }
 0x6fb   : > { %v16449_v41 = vadd.f32 %v7679_v3, %v16228_v34  ;;  %v7499_v32 = vadd.f32 %v7498_v5, %v7435_v58  ;;  %v8735_v2 = vsub.f32 %v16445_v28, %v18567_v18  ;;  %v19202_v34 = vand.u32 4294901760, %v16234_v52 }
 0x6fc   : > { %v7572_v8 = vpop.f32.mrf.mxu3  ;;  %v7439_v58 = vadd.f32 %v16221_v4, %v16243_v1  ;;  %v12311_v4 = vld [vmem:[%s18231_s3 + $0x268] sm:$0xff] }
 0x6fd   : > { %v7567_v14 = vadd.f32 %v7566_v47, %v7499_v32  ;;  %v8736_v25 = vand.u32 4294901760, %v8735_v2  ;;  %v16474_v1 = vand.u32 4294901760, %v12311_v4 }
 0x6fe   : > { %v7633_v45 = vpop.f32.mrf.mxu0 }
 0x6ff   : > { %v7950_v20 = vpop.f32.mrf.mxu1  ;;  %v7630_v29 = vadd.f32 %v7629_v42, %v7567_v14  ;;  %8052 = vmatmul.f32.gmra.mxu2 %v16190_v49  ;;  %8737 = vmatpush.msrb.mxu3 %v8736_v25 }
 0x700   : > { %8646 = vmatpush.msrb.mxu2 %v16474_v1  ;;  %8865 = vmatpush.msrb.mxu1 %v16474_v1 }
 0x701   : > { %8247 = vmatmul.f32.gmra.mxu0 %v16451_v39  ;;  %8408 = vmatmul.f32.vlgmr.msra.gmra.mxu3 %v19202_v34  ;;  %v7683_v3 = vadd.f32 %v7682_v30, %v7630_v29 }
 0x702   : > { %8536 = vmatmul.f32.vlgmr.msra.gmra.mxu1 %v16216_v13  ;;  %v7503_v47 = vpop.f32.mrf.mxu2 }
 0x703   : > { %v16466_v5 = vadd.f32 %v7683_v3, %v16249_v27  ;;  %v7504_v42 = vadd.f32 %v7503_v47, %v7439_v58 }
 0x704   : > { %v7830_v32 = vpop.f32.mrf.mxu3 }
 0x705   : > { %v7573_v49 = vadd.f32 %v7572_v8, %v7504_v42  ;;  %v8739_v8 = vsub.f32 %v12311_v4, %v16474_v1 }
 0x706   : > { %v7888_v14 = vpop.f32.mrf.mxu0 }
 0x707   : > { %v7956_v18 = vpop.f32.mrf.mxu1  ;;  %v7634_v37 = vadd.f32 %v7633_v45, %v7573_v49  ;;  %8346 = vmatmul.f32.vlgmr.msra.gmra.mxu2 %v16234_v52  ;;  %v8740_v29 = vand.u32 4294901760, %v8739_v8  ;;  %8803 = vmatpush.msrb.mxu0 %v8739_v8 }
 0x709   : > { %8414 = vmatmul.f32.gmra.mxu3 %v16263_v19  ;;  %8483 = vmatmul.f32.vlgmr.msra.gmra.mxu0 %v16216_v13  ;;  %v7687_v27 = vadd.f32 %v7686_v61, %v7634_v37  ;;  %v8741_v37 = vsub.f32 %v8739_v8, %v8740_v29 }
 0x70a   : > { %8540 = vmatmul.f32.gmra.mxu1 %v16241_v26  ;;  %v7733_v30 = vpop.f32.mrf.mxu2 }
 0x70b   : > { %v16481_v52 = vadd.f32 %v7687_v27, %v16271_v15  ;;  %v7831_v45 = vadd.f32 %v7830_v32, %v7733_v30  ;;  %v8742_v58 = vand.u32 4294901760, %v8741_v37  ;;  %v19204_v37 = vand.u32 4294901760, %v16445_v28 }
 0x70c   : > { %v7834_v2 = vpop.f32.mrf.mxu3 }
 0x70d   : > { %v7889_v13 = vadd.f32 %v7888_v14, %v7831_v45  ;;  %8743 = vmatpush.msrb.mxu3 %v8742_v58  ;;  %v19203_v45 = vand.u32 4294901760, %v16403_v50 }
 0x70e   : > { %v7893_v34 = vpop.f32.mrf.mxu0 }
 0x70f   : > { %v7962_v25 = vpop.f32.mrf.mxu1  ;;  %v16483_v61 = vadd.f32 %v7950_v20, %v7889_v13  ;;  %8351 = vmatmul.f32.gmra.mxu2 %v16256_v33  ;;  %v12310_v20 = vld [vmem:[%s18231_s3 + $0x260] sm:$0xff] }
 0x710   : > { %v8647_v4 = vand.u32 4294901760, %v12310_v20 }
 0x711   : > { %8420 = vmatmul.f32.gmra.mxu3 %v16288_v35  ;;  %8487 = vmatmul.f32.gmra.mxu0 %v16241_v26 }
 0x712   : > { %8544 = vmatmul.f32.gmra.mxu1 %v16265_v21  ;;  %v7741_v15 = vpop.f32.mrf.mxu2  ;;  %8648 = vmatpush.msrb.mxu2 %v8647_v4  ;;  %v8745_v30 = vsub.f32 %v12310_v20, %v8647_v4 }
 0x713   : > { %v7835_v3 = vadd.f32 %v7834_v2, %v7741_v15  ;;  %8867 = vmatpush.msrb.mxu1 %v8647_v4 }
 0x714   : > { %v7838_v47 = vpop.f32.mrf.mxu3  ;;  %8932 = vmatpush.msra.mxu2 %v19203_v45  ;;  %v8746_v2 = vand.u32 4294901760, %v8745_v30  ;;  %8806 = vmatpush.msrb.mxu0 %v8745_v30 }
 0x715   : > { %v7894_v42 = vadd.f32 %v7893_v34, %v7835_v3 }
 0x716   : > { %v7898_v32 = vpop.f32.mrf.mxu0  ;;  %8936 = vmatpush.msra.mxu2 %v19204_v37  ;;  %v8747_v15 = vsub.f32 %v8745_v30, %v8746_v2  ;;  %v12317_v37 = vld [vmem:[%s18231_s3 + $0x298] sm:$0xff] }
 0x717   : > { %v7968_v49 = vpop.f32.mrf.mxu1  ;;  %v16489_v14 = vadd.f32 %v7956_v18, %v7894_v42  ;;  %8356 = vmatmul.f32.gmra.mxu2 %v16278_v11 }
 0x718   : > { %v8748_v50 = vand.u32 4294901760, %v8747_v15  ;;  %8940 = vmatpush.msra.mxu2 %v8740_v29 }
 0x719   : > { %8426 = vmatmul.f32.gmra.mxu3 %v16314_v55  ;;  %8491 = vmatmul.f32.gmra.mxu0 %v16265_v21  ;;  %v16679_v55 = vld [vmem:[%s16195_s11 + $0x68] sm:$0x3]  ;;  %v16712_v21 = vld [vmem:[%s16195_s11 + $0x78] sm:$0x3] }
 0x71a   : > { %8548 = vmatmul.f32.gmra.mxu1 %v16290_v7  ;;  %v7749_v27 = vpop.f32.mrf.mxu2  ;;  %8749 = vmatpush.msrb.mxu3 %v8748_v50 }
 0x71b   : > { %v7839_v8 = vadd.f32 %v7838_v47, %v7749_v27  ;;  %8944 = vmatpush.msra.mxu2 %v8746_v2  ;;  %v16511_v27 = vld [vmem:[%s16195_s11 + $0x8] sm:$0x3] }
 0x71c   : > { %v7842_v18 = vpop.f32.mrf.mxu3  ;;  %8991 = vmatpush.msra.mxu3 %v16399_v17  ;;  %v8584_v17 = vrot.slane %v16202_v53, 1 }
 0x71d   : > { %v7899_v13 = vadd.f32 %v7898_v32, %v7839_v8 }
 0x71e   : > { %v7903_v34 = vpop.f32.mrf.mxu0  ;;  %8993 = vmatpush.msra.mxu3 %v16438_v62  ;;  %v8585_v62 = vrot.slane %v16511_v27, 1 }
 0x71f   : > { %v7974_v58 = vpop.f32.mrf.mxu1  ;;  %v16502_v3 = vadd.f32 %v7962_v25, %v7899_v13  ;;  %8361 = vmatmul.f32.gmra.mxu2 %v16301_v23  ;;  %v16524_v13 = vld [vmem:[%s16195_s11 + $0x18] sm:$0x3] }
 0x720   : > { %8995 = vmatpush.msra.mxu3 %v16474_v1  ;;  %v8586_v2 = vsel %vm381_vm0, %v8584_v17, %v8585_v62  ;;  %v8588_v50 = vrot.slane %v16524_v13, 1 }
 0x721   : > { %8432 = vmatmul.f32.gmra.mxu3 %v16340_v40  ;;  %8495 = vmatmul.f32.gmra.mxu0 %v16290_v7  ;;  %v8613_v15 = vsel %vm411_vm1, %v8586_v2, 0  ;;  %v16637_v40 = vld [vmem:[%s16195_s11 + $0x58] sm:$0x3] }
 0x722   : > { %8552 = vmatmul.f32.gmra.mxu1 %v16316_v38  ;;  %v7757_v47 = vpop.f32.mrf.mxu2  ;;  %8997 = vmatpush.msra.mxu3 %v8647_v4  ;;  %v8587_v4 = vrot.slane %v16224_v43, 1 }
 0x723   : > { %v7843_v42 = vadd.f32 %v7842_v18, %v7757_v47  ;;  %v16537_v47 = vand.u32 4294901760, %v12317_v37 }
 0x724   : > { %v7846_v28 = vpop.f32.mrf.mxu3  ;;  %v8589_v17 = vsel %vm381_vm0, %v8587_v4, %v8588_v50 }
 0x725   : > { %v7904_v25 = vadd.f32 %v7903_v34, %v7843_v42  ;;  %9097 = vmatpush.msra.mxu0 %v16537_v47 }
 0x726   : > { %v7908_v32 = vpop.f32.mrf.mxu0 }
 0x727   : > { %v7980_v20 = vpop.f32.mrf.mxu1  ;;  %v16513_v30 = vadd.f32 %v7968_v49, %v7904_v25  ;;  %8366 = vmatmul.f32.gmra.mxu2 %v16327_v59  ;;  %v16541_v25 = vand.u32 4294901760, %v8613_v15 }
 0x729   : > { %8438 = vmatmul.f32.gmra.mxu3 %v16366_v36  ;;  %8499 = vmatmul.f32.gmra.mxu0 %v16316_v38  ;;  %v8650_v39 = vsub.f32 %v8613_v15, %v16541_v25  ;;  %v16604_v36 = vld [vmem:[%s16195_s11 + $0x48] sm:$0x3] }
 0x72a   : > { %8556 = vmatmul.f32.gmra.mxu1 %v16342_v16  ;;  %v7765_v29 = vpop.f32.mrf.mxu2 }
 0x72b   : > { %v7847_v8 = vadd.f32 %v7846_v28, %v7765_v29 }
 0x72c   : > { %v7850_v18 = vpop.f32.mrf.mxu3 }
 0x72d   : > { %v7909_v49 = vadd.f32 %v7908_v32, %v7847_v8  ;;  %v16544_v32 = vsub.f32 %v12317_v37, %v16537_v47 }
 0x72e   : > { %v7913_v45 = vpop.f32.mrf.mxu0 }
 0x72f   : > { %v7986_v1 = vpop.f32.mrf.mxu1  ;;  %v16526_v34 = vadd.f32 %v7974_v58, %v7909_v49  ;;  %8371 = vmatmul.f32.gmra.mxu2 %v16353_v0  ;;  %v16548_v49 = vld [vmem:[%s16195_s11 + $0x28] sm:$0x3] }
 0x730   : > { %v8591_v37 = vrot.slane %v16548_v49, 1 }
 0x731   : > { %8444 = vmatmul.f32.gmra.mxu3 %v16395_v60  ;;  %8503 = vmatmul.f32.gmra.mxu0 %v16342_v16 }
 0x732   : > { %8560 = vmatmul.f32.gmra.mxu1 %v16368_v48  ;;  %v7773_v58 = vpop.f32.mrf.mxu2 }
 0x733   : > { %v7851_v42 = vadd.f32 %v7850_v18, %v7773_v58  ;;  %v8615_v18 = vsel %vm411_vm1, %v8589_v17, 0  ;;  %v18579_v58 = vand.u32 4294901760, %v16544_v32  ;;  %v8651_v17 = vand.u32 4294901760, %v8650_v39 }
 0x734   : > { %v7854_v28 = vpop.f32.mrf.mxu3  ;;  %v16564_v15 = vand.u32 4294901760, %v8615_v18 }
 0x735   : > { %v7914_v62 = vadd.f32 %v7913_v45, %v7851_v42  ;;  %v8590_v45 = vrot.slane %v16246_v9, 1 }
 0x736   : > { %v7918_v29 = vpop.f32.mrf.mxu0 }
 0x737   : > { %v7992_v8 = vpop.f32.mrf.mxu1  ;;  %v16550_v2 = vadd.f32 %v7980_v20, %v7914_v62  ;;  %8376 = vmatmul.f32.gmra.mxu2 %v16379_v54  ;;  %v9184_v20 = vsub.f32 %v16544_v32, %v18579_v58  ;;  %v8592_v9 = vsel %vm381_vm0, %v8590_v45, %v8591_v37  ;;  %v16573_v58 = vsub.f32 %v8615_v18, %v16564_v15 }
 0x738   : > { %v8617_v45 = vsel %vm411_vm1, %v8592_v9, 0  ;;  %v8594_v18 = vrot.slane %v16568_v10, 1 }
 0x739   : > { %8450 = vmatmul.f32.gmra.mxu3 %v16428_v24  ;;  %8507 = vmatmul.f32.gmra.mxu0 %v16368_v48  ;;  %v9185_v62 = vand.u32 4294901760, %v9184_v20  ;;  %19205 = vst [vmem:[#allocation37_spill] sm:$0xff] %v16573_v58  ;;  %v8593_v20 = vrot.slane %v16268_v6, 1 }
 0x73a   : > { %8564 = vmatmul.f32.gmra.mxu1 %v16397_v51  ;;  %v7781_v4 = vpop.f32.mrf.mxu2 }
 0x73b   : > { %v7855_v50 = vadd.f32 %v7854_v28, %v7781_v4  ;;  %9186 = vmatpush.msra.mxu1 %v9185_v62  ;;  %v8652_v28 = vsub.f32 %v8650_v39, %v8651_v17  ;;  %v16593_v62 = vand.u32 4294901760, %v8617_v45  ;;  %v8595_v9 = vsel %vm381_vm0, %v8593_v20, %v8594_v18 }
 0x73c   : > { %v7858_v42 = vpop.f32.mrf.mxu3 }
 0x73d   : > { %v7919_v24 = vadd.f32 %v7918_v29, %v7855_v50  ;;  %v12316_v29 = vld [vmem:[%s18231_s3 + $0x290] sm:$0xff]  ;;  %v8653_v4 = vand.u32 4294901760, %v8652_v28  ;;  %v8619_v28 = vsel %vm411_vm1, %v8595_v9, 0 }
 0x73e   : > { %v7923_v54 = vpop.f32.mrf.mxu0  ;;  %v16586_v37 = vand.u32 4294901760, %v12316_v29  ;;  %v16621_v18 = vand.u32 4294901760, %v8619_v28 }
 0x73f   : > { %v16570_v60 = vpop.f32.mrf.mxu1  ;;  %v16575_v0 = vadd.f32 %v7986_v1, %v7919_v24  ;;  %8381 = vmatmul.f32.gmra.mxu2 %v16412_v22  ;;  %v16590_v1 = vand.u32 4294901760, %v16573_v58 }
 0x740   : > { %9099 = vmatpush.msra.mxu0 %v16586_v37  ;;  %v16613_v20 = vsub.f32 %v12316_v29, %v16586_v37 }
 0x741   : > { %8511 = vmatmul.f32.gmra.mxu0 %v16397_v51  ;;  %8751 = vmatmul.f32.vlgmr.msrb.gmra.mxu3 %v16541_v25  ;;  %19206 = vst [vmem:[#allocation11_spill] sm:$0xff] %v16590_v1 }
 0x742   : > { %8871 = vmatmul.f32.vlgmr.msrb.gmra.mxu1 %v8651_v17  ;;  %9316 = vmatpush.msrb.mxu3 %v16537_v47  ;;  %v7789_v24 = vpop.f32.mrf.mxu2  ;;  %v8660_v17 = vsub.f32 %v16573_v58, %v16590_v1  ;;  %v19223_v19 = vand.u32 4294901760, %v16613_v20 }
 0x743   : > { %v7859_v6 = vadd.f32 %v7858_v42, %v7789_v24  ;;  %v16609_v42 = vsub.f32 %v8617_v45, %v16593_v62 }
 0x744   : > { %v8078_v50 = vpop.f32.mrf.mxu3  ;;  %9318 = vmatpush.msrb.mxu3 %v16586_v37  ;;  %v16624_v24 = vand.u32 4294901760, %v8660_v17  ;;  %v16642_v17 = vsub.f32 %v8619_v28, %v16621_v18 }
 0x745   : > { %v7924_v22 = vadd.f32 %v7923_v54, %v7859_v6  ;;  %19207 = vst [vmem:[#allocation31_spill] sm:$0xff] %v16609_v42  ;;  %v8596_v54 = vrot.slane %v16293_v46, 1 }
 0x746   : > { %v16597_v51 = vpop.f32.mrf.mxu0  ;;  %19208 = vst [vmem:[#allocation78_spill] sm:$0xff] %v16624_v24 }
 0x747   : > { %v16601_v48 = vpop.f32.mrf.mxu1  ;;  %v16606_v59 = vadd.f32 %v7992_v8, %v7924_v22  ;;  %8654 = vmatmul.f32.vlgmr.msrb.gmra.mxu2 %v8653_v4  ;;  %v18597_v22 = vand.u32 4294901760, %v16613_v20  ;;  %v8597_v8 = vrot.slane %v16604_v36, 1  ;;  %19210 = vst [vmem:[#allocation17_spill] sm:$0xff] %v16642_v17 }
 0x748   : > { %9252 = vmatpush.msrb.mxu2 %v16544_v32 }
 0x749   : > { %8755 = vmatmul.f32.gmra.mxu3 %v16564_v15  ;;  %8809 = vmatmul.f32.vlgmr.msrb.gmra.mxu0 %v8650_v39  ;;  %v16627_v39 = vand.u32 4294901760, %v16609_v42  ;;  %v9190_v46 = vsub.f32 %v16613_v20, %v18597_v22  ;;  %v8598_v16 = vsel %vm381_vm0, %v8596_v54, %v8597_v8  ;;  %v12315_v54 = vld [vmem:[%s18231_s3 + $0x288] sm:$0xff]  ;;  %v8599_v8 = vrot.slane %v16319_v44, 1 }
 0x74a   : > { %8877 = vmatmul.f32.gmra.mxu1 %v16590_v1  ;;  %v8025_v45 = vpop.f32.mrf.mxu2  ;;  %9255 = vmatpush.msrb.mxu2 %v16613_v20  ;;  %v8621_v28 = vsel %vm411_vm1, %v8598_v16, 0 }
 0x74b   : > { %v8026_v29 = vadd.f32 %v8025_v45, %v16483_v61  ;;  %19209 = vst [vmem:[#allocation79_spill] sm:$0xff] %v16627_v39  ;;  %v9191_v1 = vand.u32 4294901760, %v9190_v46  ;;  %v16662_v46 = vand.u32 4294901760, %v16642_v17  ;;  %v16669_v22 = vand.u32 4294901760, %v8621_v28 }
 0x74c   : > { %v8082_v6 = vpop.f32.mrf.mxu3 }
 0x74d   : > { %v8079_v4 = vadd.f32 %v8078_v50, %v8026_v29  ;;  %v8668_v50 = vsub.f32 %v16609_v42, %v16627_v39  ;;  %9192 = vmatpush.msra.mxu1 %v9191_v1  ;;  %v16658_v29 = vand.u32 4294901760, %v12315_v54  ;;  %19211 = vst [vmem:[#allocation72_spill] sm:$0xff] %v16662_v46 }
 0x74e   : > { %v16633_v9 = vpop.f32.mrf.mxu0 }
 0x74f   : > { %v16639_v61 = vpop.f32.mrf.mxu1  ;;  %v16645_v45 = vadd.f32 %v8079_v4, %v16309_v63  ;;  %8662 = vmatmul.f32.gmra.mxu2 %v16624_v24  ;;  %v8600_v63 = vrot.slane %v16637_v40, 1  ;;  %9101 = vmatpush.msra.mxu0 %v16658_v29  ;;  %v16667_v4 = vand.u32 4294901760, %v8668_v50 }
 0x750   : > { %9320 = vmatpush.msrb.mxu3 %v16658_v29 }
 0x751   : > { %8759 = vmatmul.f32.gmra.mxu3 %v16593_v62  ;;  %8814 = vmatmul.f32.gmra.mxu0 %v16573_v58  ;;  %19212 = vst [vmem:[#allocation27_spill] sm:$0xff] %v16667_v4  ;;  %v8601_v58 = vsel %vm381_vm0, %v8599_v8, %v8600_v63  ;;  %v8602_v8 = vrot.slane %v16345_v56, 1 }
 0x752   : > { %8883 = vmatmul.f32.gmra.mxu1 %v16627_v39  ;;  %v8029_v1 = vpop.f32.mrf.mxu2  ;;  %v8676_v39 = vsub.f32 %v16642_v17, %v16662_v46  ;;  %v8623_v50 = vsel %vm411_vm1, %v8601_v58, 0 }
 0x753   : > { %v8030_v44 = vadd.f32 %v8029_v1, %v16489_v14  ;;  %v16686_v14 = vsub.f32 %v8621_v28, %v16669_v22  ;;  %v16695_v28 = vand.u32 4294901760, %v8623_v50 }
 0x754   : > { %v8086_v16 = vpop.f32.mrf.mxu3  ;;  %v16698_v1 = vand.u32 4294901760, %v8676_v39 }
 0x755   : > { %v8083_v24 = vadd.f32 %v8082_v6, %v8030_v44  ;;  %19213 = vst [vmem:[#allocation13_spill] sm:$0xff] %v16686_v14  ;;  %v9194_v6 = vsub.f32 %v12315_v54, %v16658_v29  ;;  %v16701_v44 = vand.u32 4294901760, %v16686_v14  ;;  %v16709_v33 = vsub.f32 %v8623_v50, %v16695_v28 }
 0x756   : > { %v16672_v23 = vpop.f32.mrf.mxu0  ;;  %19214 = vst [vmem:[#allocation25_spill] sm:$0xff] %v16695_v28 }
 0x757   : > { %v16676_v38 = vpop.f32.mrf.mxu1  ;;  %v16682_v11 = vadd.f32 %v8083_v24, %v16335_v31  ;;  %8670 = vmatmul.f32.gmra.mxu2 %v16667_v4  ;;  %v9195_v63 = vand.u32 4294901760, %v9194_v6  ;;  %v8603_v31 = vrot.slane %v16679_v55, 1  ;;  %19215 = vst [vmem:[#allocation44_spill] sm:$0xff] %v16698_v1  ;;  %v8684_v39 = vsub.f32 %v16686_v14, %v16701_v44 }
 0x758   : > { %9258 = vmatpush.msrb.mxu2 %v9194_v6  ;;  %19216 = vst [vmem:[#allocation50_spill] sm:$0xff] %v16701_v44 }
 0x759   : > { %8763 = vmatmul.f32.gmra.mxu3 %v16621_v18  ;;  %8819 = vmatmul.f32.gmra.mxu0 %v16609_v42  ;;  %v9196_v42 = vsub.f32 %v9194_v6, %v9195_v63  ;;  %v8604_v7 = vsel %vm381_vm0, %v8602_v8, %v8603_v31  ;;  %19217 = vst [vmem:[#allocation46_spill] sm:$0xff] %v16709_v33  ;;  %v8606_v8 = vrot.slane %v16712_v21, 1 }
 0x75a   : > { %8889 = vmatmul.f32.gmra.mxu1 %v16662_v46  ;;  %v8033_v24 = vpop.f32.mrf.mxu2 }
 0x75b   : > { %v8034_v58 = vadd.f32 %v8033_v24, %v16502_v3  ;;  %v9197_v46 = vand.u32 4294901760, %v9196_v42  ;;  %v12314_v42 = vld [vmem:[%s18231_s3 + $0x280] sm:$0xff] }
 0x75c   : > { %v8090_v54 = vpop.f32.mrf.mxu3  ;;  %v16726_v50 = vand.u32 4294901760, %v12314_v42 }
 0x75d   : > { %v8087_v56 = vadd.f32 %v8086_v16, %v8034_v58  ;;  %9198 = vmatpush.msra.mxu1 %v9197_v46  ;;  %v8625_v16 = vsel %vm411_vm1, %v8604_v7, 0  ;;  %v16732_v46 = vand.u32 4294901760, %v16709_v33  ;;  %v16737_v58 = vand.u32 4294901760, %v8684_v39  ;;  %v19224_v39 = vld [vmem:[#allocation38_spill] sm:$0xff] }
 0x75e   : > { %v16703_v4 = vpop.f32.mrf.mxu0  ;;  %9103 = vmatpush.msra.mxu0 %v16726_v50  ;;  %9322 = vmatpush.msrb.mxu3 %v16726_v50 }
 0x75f   : > { %v16706_v35 = vpop.f32.mrf.mxu1  ;;  %v16715_v3 = vadd.f32 %v8087_v56, %v16361_v12  ;;  %8678 = vmatmul.f32.gmra.mxu2 %v16698_v1  ;;  %v19218_v12 = vld [vmem:[#allocation30_spill] sm:$0xff]  ;;  %19219 = vst [vmem:[#allocation26_spill] sm:$0xff] %v16732_v46  ;;  %v16739_v56 = vand.u32 4294901760, %v8625_v16  ;;  %v8692_v26 = vsub.f32 %v16709_v33, %v16732_v46 }
 0x760   : > { %v8605_v6 = vrot.slane %v19218_v12, 1  ;;  %19220 = vst [vmem:[#allocation73_spill] sm:$0xff] %v16737_v58  ;;  %v19222_v12 = vand.u32 4294901760, %v16544_v32 }
 0x761   : > { %8767 = vmatmul.f32.gmra.mxu3 %v16669_v22  ;;  %8824 = vmatmul.f32.gmra.mxu0 %v16642_v17  ;;  %19221 = vst [vmem:[#allocation29_spill] sm:$0xff] %v16739_v56  ;;  %v16757_v32 = vsub.f32 %v8625_v16, %v16739_v56  ;;  %v9040_v16 = vrot.slane %v16511_v27, 2 }
 0x762   : > { %8895 = vmatmul.f32.gmra.mxu1 %v16701_v44  ;;  %v8037_v31 = vpop.f32.mrf.mxu2  ;;  %9387 = vmatpush.msrb.mxu0 %v19222_v12  ;;  %v8607_v1 = vsel %vm381_vm0, %v8605_v6, %v8606_v8  ;;  %v16765_v8 = vand.u32 4294901760, %v8692_v26 }
 0x763   : > { %v8038_v24 = vadd.f32 %v8037_v31, %v16513_v30  ;;  %19225 = vst [vmem:[#allocation15_spill] sm:$0xff] %v16757_v32 }
 0x764   : > { %v8094_v7 = vpop.f32.mrf.mxu3  ;;  %9391 = vmatpush.msrb.mxu0 %v19223_v19  ;;  %v8627_v19 = vsel %vm411_vm1, %v8607_v1, 0  ;;  %19226 = vst [vmem:[#allocation16_spill] sm:$0xff] %v16765_v8 }
 0x765   : > { %v8091_v44 = vadd.f32 %v8090_v54, %v8038_v24  ;;  %v9200_v54 = vsub.f32 %v12314_v42, %v16726_v50  ;;  %v16770_v24 = vand.u32 4294901760, %v16757_v32  ;;  %v16772_v12 = vand.u32 4294901760, %v8627_v19 }
 0x766   : > { %v16743_v17 = vpop.f32.mrf.mxu0  ;;  %9395 = vmatpush.msrb.mxu0 %v9195_v63 }
 0x767   : > { %v16750_v30 = vpop.f32.mrf.mxu1  ;;  %v16753_v31 = vadd.f32 %v8091_v44, %v19224_v39  ;;  %8686 = vmatmul.f32.gmra.mxu2 %v16737_v58  ;;  %v9201_v20 = vand.u32 4294901760, %v9200_v54  ;;  %v9039_v44 = vrot.slane %v16202_v53, 2  ;;  %19227 = vst [vmem:[#allocation6_spill] sm:$0xff] %v16770_v24 }
 0x768   : > { %9261 = vmatpush.msrb.mxu2 %v9200_v54  ;;  %19228 = vst [vmem:[#allocation28_spill] sm:$0xff] %v16772_v12 }
 0x769   : > { %8771 = vmatmul.f32.gmra.mxu3 %v16695_v28  ;;  %8829 = vmatmul.f32.gmra.mxu0 %v16686_v14  ;;  %v9202_v1 = vsub.f32 %v9200_v54, %v9201_v20  ;;  %v9041_v26 = vsel %vm1248_vm2, %v9039_v44, %v9040_v16 }
 0x76a   : > { %8901 = vmatmul.f32.gmra.mxu1 %v16732_v46  ;;  %v8041_v6 = vpop.f32.mrf.mxu2  ;;  %9399 = vmatpush.msrb.mxu0 %v9201_v20  ;;  %v9043_v20 = vrot.slane %v16524_v13, 2 }
 0x76b   : > { %v8042_v42 = vadd.f32 %v8041_v6, %v16526_v34  ;;  %v9203_v14 = vand.u32 4294901760, %v9202_v1  ;;  %v8700_v34 = vsub.f32 %v16757_v32, %v16770_v24  ;;  %v16786_v6 = vsub.f32 %v8627_v19, %v16772_v12 }
 0x76c   : > { %v8098_v63 = vpop.f32.mrf.mxu3 }
 0x76d   : > { %v8095_v39 = vadd.f32 %v8094_v7, %v8042_v42  ;;  %19229 = vst [vmem:[#allocation14_spill] sm:$0xff] %v16786_v6  ;;  %9204 = vmatpush.msra.mxu1 %v9203_v14  ;;  %v9068_v7 = vsel %vm411_vm1, %v9041_v26, 0  ;;  %v16796_v19 = vand.u32 4294901760, %v8700_v34  ;;  %v16799_v16 = vand.u32 4294901760, %v16786_v6 }
 0x76e   : > { %v16774_v46 = vpop.f32.mrf.mxu0  ;;  %v16801_v42 = vand.u32 4294901760, %v9068_v7  ;;  %v9046_v34 = vrot.slane %v16548_v49, 2 }
 0x76f   : > { %v16776_v53 = vpop.f32.mrf.mxu1  ;;  %v16780_v27 = vadd.f32 %v8095_v39, %v16423_v57  ;;  %8694 = vmatmul.f32.gmra.mxu2 %v16765_v8  ;;  %v9042_v57 = vrot.slane %v16224_v43, 2  ;;  %9446 = vmatpush.msrb.mxu1 %v16537_v47  ;;  %19230 = vst [vmem:[#allocation2_spill] sm:$0xff] %v16796_v19 }
 0x770   : > { %19231 = vst [vmem:[#allocation22_spill] sm:$0xff] %v16799_v16 }
 0x771   : > { %8775 = vmatmul.f32.gmra.mxu3 %v16739_v56  ;;  %8834 = vmatmul.f32.gmra.mxu0 %v16709_v33  ;;  %v9044_v13 = vsel %vm1248_vm2, %v9042_v57, %v9043_v20 }
 0x772   : > { %8907 = vmatmul.f32.gmra.mxu1 %v16770_v24  ;;  %v8045_v54 = vpop.f32.mrf.mxu2 }
 0x773   : > { %v8046_v44 = vadd.f32 %v8045_v54, %v16550_v2  ;;  %9448 = vmatpush.msrb.mxu1 %v16586_v37  ;;  %v8708_v2 = vsub.f32 %v16786_v6, %v16799_v16  ;;  %v16819_v37 = vsub.f32 %v9068_v7, %v16801_v42 }
 0x774   : > { %v8102_v14 = vpop.f32.mrf.mxu3 }
 0x775   : > { %v8099_v1 = vadd.f32 %v8098_v63, %v8046_v44  ;;  %9450 = vmatpush.msrb.mxu1 %v16658_v29  ;;  %v9070_v63 = vsel %vm411_vm1, %v9044_v13, 0  ;;  %v12404_v29 = vld [vmem:[%s16195_s11 + $0x20] sm:$0xff]  ;;  %v16827_v54 = vand.u32 4294901760, %v8708_v2  ;;  %v18640_v7 = vand.u32 4294901760, %v16819_v37  ;;  %v12405_v2 = vld [vmem:[%s16195_s11 + $0x30] sm:$0xff] }
 0x776   : > { %v16804_v43 = vpop.f32.mrf.mxu0  ;;  %v9045_v26 = vrot.slane %v12404_v29, 2  ;;  %v16830_v44 = vand.u32 4294901760, %v9070_v63 }
 0x777   : > { %v16806_v39 = vpop.f32.mrf.mxu1  ;;  %v16811_v47 = vadd.f32 %v8099_v1, %v16449_v41  ;;  %8702 = vmatmul.f32.gmra.mxu2 %v16796_v19  ;;  %9452 = vmatpush.msrb.mxu1 %v16726_v50  ;;  %19232 = vst [vmem:[#allocation8_spill] sm:$0xff] %v16827_v54 }
 0x778   : > { %v9047_v29 = vsel %vm1248_vm2, %v9045_v26, %v9046_v34  ;;  %v16845_v50 = vsub.f32 %v9070_v63, %v16830_v44 }
 0x779   : > { %8779 = vmatmul.f32.gmra.mxu3 %v16772_v12  ;;  %8839 = vmatmul.f32.gmra.mxu0 %v16757_v32 }
 0x77a   : > { %8913 = vmatmul.f32.gmra.mxu1 %v16799_v16  ;;  %v8049_v41 = vpop.f32.mrf.mxu2 }
 0x77b   : > { %v8050_v57 = vadd.f32 %v8049_v41, %v16575_v0  ;;  %v9107_v0 = vsub.f32 %v16819_v37, %v18640_v7  ;;  %v9049_v41 = vrot.slane %v16568_v10, 2 }
 0x77c   : > { %v8106_v20 = vpop.f32.mrf.mxu3 }
 0x77d   : > { %v8103_v1 = vadd.f32 %v8102_v14, %v8050_v57  ;;  %v9072_v14 = vsel %vm411_vm1, %v9047_v29, 0 }
 0x77e   : > { %v16832_v16 = vpop.f32.mrf.mxu0  ;;  %v16855_v7 = vand.u32 4294901760, %v9072_v14 }
 0x77f   : > { %v8537_v13 = vpop.f32.mrf.mxu1  ;;  %v16836_v49 = vadd.f32 %v8103_v1, %v16466_v5  ;;  %8710 = vmatmul.f32.gmra.mxu2 %v16827_v54  ;;  %v9048_v5 = vrot.slane %v12405_v2, 2  ;;  %v9108_v1 = vand.u32 4294901760, %v9107_v0 }
 0x780   : > { %v16866_v10 = vsub.f32 %v9072_v14, %v16855_v7 }
 0x781   : > { %8844 = vmatmul.f32.gmra.mxu0 %v16786_v6  ;;  %8999 = vmatmul.f32.vlgmr.msra.gmra.mxu3 %v16541_v25  ;;  %v16853_v6 = vand.u32 4294901760, %v16845_v50  ;;  %v9050_v29 = vsel %vm1248_vm2, %v9048_v5, %v9049_v41 }
 0x782   : > { %9206 = vmatmul.f32.vlgmr.msra.gmra.mxu1 %v16801_v42  ;;  %v8053_v26 = vpop.f32.mrf.mxu2  ;;  %19233 = vst [vmem:[#allocation20_spill] sm:$0xff] %v16866_v10  ;;  %v9074_v0 = vsel %vm411_vm1, %v9050_v29, 0 }
 0x783   : > { %v8054_v34 = vadd.f32 %v8053_v26, %v16606_v59  ;;  %v9115_v59 = vsub.f32 %v16845_v50, %v16853_v6  ;;  %v16879_v14 = vand.u32 4294901760, %v9074_v0 }
 0x784   : > { %v8409_v57 = vpop.f32.mrf.mxu3 }
 0x785   : > { %v8107_v63 = vadd.f32 %v8106_v20, %v8054_v34  ;;  %v8290_v20 = vadd.f32 %v16570_v60, %v16597_v51 }
 0x786   : > { %v8484_v32 = vpop.f32.mrf.mxu0 }
 0x787   : > { %v8541_v24 = vpop.f32.mrf.mxu1  ;;  %v16859_v2 = vadd.f32 %v8107_v63, %v16481_v52  ;;  %8946 = vmatmul.f32.vlgmr.msra.gmra.mxu2 %v16541_v25  ;;  %v12406_v52 = vld [vmem:[%s16195_s11 + $0x40] sm:$0xff]  ;;  %v9052_v25 = vrot.slane %v16604_v36, 2  ;;  %v16877_v63 = vand.u32 4294901760, %v16866_v10 }
 0x788   : > { %v9051_v5 = vrot.slane %v12406_v52, 2  ;;  %v12407_v52 = vld [vmem:[%s16195_s11 + $0x50] sm:$0xff] }
 0x789   : > { %9003 = vmatmul.f32.gmra.mxu3 %v16564_v15  ;;  %9109 = vmatmul.f32.vlgmr.msra.gmra.mxu0 %v9108_v1  ;;  %v16874_v1 = vand.u32 4294901760, %v9115_v59  ;;  %19235 = vst [vmem:[#allocation61_spill] sm:$0xff] %v16877_v63  ;;  %v9123_v36 = vsub.f32 %v16866_v10, %v16877_v63  ;;  %v16888_v59 = vsub.f32 %v9074_v0, %v16879_v14 }
 0x78a   : > { %9210 = vmatmul.f32.gmra.mxu1 %v16830_v44  ;;  %v8347_v26 = vpop.f32.mrf.mxu2  ;;  %v9053_v29 = vsel %vm1248_vm2, %v9051_v5, %v9052_v25  ;;  %v9054_v5 = vrot.slane %v12407_v52, 2  ;;  %v9055_v25 = vrot.slane %v16637_v40, 2 }
 0x78b   : > { %v8348_v41 = vadd.f32 %v8347_v26, %v8290_v20  ;;  %19234 = vst [vmem:[#allocation57_spill] sm:$0xff] %v16874_v1  ;;  %v16899_v0 = vand.u32 4294901760, %v9123_v36  ;;  %v16902_v19 = vand.u32 4294901760, %v16888_v59 }
 0x78c   : > { %v8415_v34 = vpop.f32.mrf.mxu3  ;;  %19236 = vst [vmem:[#allocation60_spill] sm:$0xff] %v16888_v59 }
 0x78d   : > { %v8410_v60 = vadd.f32 %v8409_v57, %v8348_v41  ;;  %v8294_v57 = vadd.f32 %v16601_v48, %v16633_v9  ;;  %19237 = vst [vmem:[#allocation52_spill] sm:$0xff] %v16899_v0  ;;  %v9131_v40 = vsub.f32 %v16888_v59, %v16902_v19 }
 0x78e   : > { %v8488_v51 = vpop.f32.mrf.mxu0  ;;  %19238 = vst [vmem:[#allocation66_spill] sm:$0xff] %v16902_v19 }
 0x78f   : > { %v8545_v33 = vpop.f32.mrf.mxu1  ;;  %v8485_v54 = vadd.f32 %v8484_v32, %v8410_v60  ;;  %8950 = vmatmul.f32.gmra.mxu2 %v16564_v15  ;;  %v9076_v32 = vsel %vm411_vm1, %v9053_v29, 0  ;;  %v9056_v29 = vsel %vm1248_vm2, %v9054_v5, %v9055_v25 }
 0x790   : > { %v16904_v48 = vand.u32 4294901760, %v9076_v32 }
 0x791   : > { %9007 = vmatmul.f32.gmra.mxu3 %v16593_v62  ;;  %9117 = vmatmul.f32.gmra.mxu0 %v16874_v1  ;;  %v8538_v20 = vadd.f32 %v8537_v13, %v8485_v54 }
 0x792   : > { %9214 = vmatmul.f32.gmra.mxu1 %v16855_v7  ;;  %v8352_v26 = vpop.f32.mrf.mxu2  ;;  %19239 = vst [vmem:[#allocation68_spill] sm:$0xff] %v16904_v48 }
 0x793   : > { %v16897_v41 = vadd.f32 %v8538_v20, %v16645_v45  ;;  %v8353_v60 = vadd.f32 %v8352_v26, %v8294_v57  ;;  %v16913_v45 = vsub.f32 %v9076_v32, %v16904_v48  ;;  %v12408_v57 = vld [vmem:[%s16195_s11 + $0x60] sm:$0xff]  ;;  %v9058_v26 = vrot.slane %v16679_v55, 2 }
 0x794   : > { %v8421_v1 = vpop.f32.mrf.mxu3  ;;  %v9057_v20 = vrot.slane %v12408_v57, 2  ;;  %v16924_v32 = vand.u32 4294901760, %v9131_v40 }
 0x795   : > { %v8416_v9 = vadd.f32 %v8415_v34, %v8353_v60  ;;  %19240 = vst [vmem:[#allocation63_spill] sm:$0xff] %v16913_v45  ;;  %v8298_v34 = vadd.f32 %v16639_v61, %v16672_v23 }
 0x796   : > { %v8492_v54 = vpop.f32.mrf.mxu0  ;;  %19241 = vst [vmem:[#allocation58_spill] sm:$0xff] %v16924_v32 }
 0x797   : > { %v8549_v13 = vpop.f32.mrf.mxu1  ;;  %v8489_v52 = vadd.f32 %v8488_v51, %v8416_v9  ;;  %8954 = vmatmul.f32.gmra.mxu2 %v16593_v62  ;;  %v9078_v51 = vsel %vm411_vm1, %v9056_v29, 0 }
 0x798   : > { %v16929_v23 = vand.u32 4294901760, %v9078_v51 }
 0x799   : > { %9011 = vmatmul.f32.gmra.mxu3 %v16621_v18  ;;  %9125 = vmatmul.f32.gmra.mxu0 %v16899_v0  ;;  %v8542_v36 = vadd.f32 %v8541_v24, %v8489_v52  ;;  %v16927_v0 = vand.u32 4294901760, %v16913_v45  ;;  %v9059_v52 = vsel %vm1248_vm2, %v9057_v20, %v9058_v26 }
 0x79a   : > { %9218 = vmatmul.f32.gmra.mxu1 %v16879_v14  ;;  %v8357_v5 = vpop.f32.mrf.mxu2  ;;  %19243 = vst [vmem:[#allocation40_spill] sm:$0xff] %v16929_v23  ;;  %v16938_v55 = vsub.f32 %v9078_v51, %v16929_v23 }
 0x79b   : > { %v16922_v25 = vadd.f32 %v8542_v36, %v16682_v11  ;;  %v8358_v60 = vadd.f32 %v8357_v5, %v8298_v34  ;;  %19242 = vst [vmem:[#allocation70_spill] sm:$0xff] %v16927_v0  ;;  %v9139_v11 = vsub.f32 %v16913_v45, %v16927_v0  ;;  %v12409_v34 = vld [vmem:[%s16195_s11 + $0x70] sm:$0xff]  ;;  %v9061_v5 = vrot.slane %v16712_v21, 2 }
 0x79c   : > { %v8427_v9 = vpop.f32.mrf.mxu3  ;;  %19244 = vst [vmem:[#allocation10_spill] sm:$0xff] %v16938_v55  ;;  %v9060_v36 = vrot.slane %v12409_v34, 2 }
 0x79d   : > { %v8422_v61 = vadd.f32 %v8421_v1, %v8358_v60  ;;  %v8302_v1 = vadd.f32 %v16676_v38, %v16703_v4  ;;  %v16949_v51 = vand.u32 4294901760, %v9139_v11 }
 0x79e   : > { %v8496_v24 = vpop.f32.mrf.mxu0 }
 0x79f   : > { %v8553_v29 = vpop.f32.mrf.mxu1  ;;  %v8493_v57 = vadd.f32 %v8492_v54, %v8422_v61  ;;  %8958 = vmatmul.f32.gmra.mxu2 %v16621_v18  ;;  %v9080_v54 = vsel %vm411_vm1, %v9059_v52, 0  ;;  %19245 = vst [vmem:[#allocation64_spill] sm:$0xff] %v16949_v51 }
 0x7a1   : > { %9015 = vmatmul.f32.gmra.mxu3 %v16669_v22  ;;  %9133 = vmatmul.f32.gmra.mxu0 %v16924_v32  ;;  %v8546_v40 = vadd.f32 %v8545_v33, %v8493_v57  ;;  %v16952_v32 = vand.u32 4294901760, %v16938_v55  ;;  %v16954_v33 = vand.u32 4294901760, %v9080_v54  ;;  %v9062_v57 = vsel %vm1248_vm2, %v9060_v36, %v9061_v5  ;;  %v12321_v5 = vld [vmem:[%s18231_s3 + $0x2b8] sm:$0xff] }
 0x7a2   : > { %9222 = vmatmul.f32.gmra.mxu1 %v16904_v48  ;;  %v8362_v20 = vpop.f32.mrf.mxu2 }
 0x7a3   : > { %v16947_v26 = vadd.f32 %v8546_v40, %v16715_v3  ;;  %v8363_v60 = vadd.f32 %v8362_v20, %v8302_v1  ;;  %19246 = vst [vmem:[#allocation42_spill] sm:$0xff] %v16952_v32  ;;  %v9147_v21 = vsub.f32 %v16938_v55, %v16952_v32  ;;  %v16963_v3 = vsub.f32 %v9080_v54, %v16954_v33 }
 0x7a4   : > { %v8433_v61 = vpop.f32.mrf.mxu3  ;;  %19247 = vst [vmem:[#allocation75_spill] sm:$0xff] %v16954_v33 }
 0x7a5   : > { %v8428_v38 = vadd.f32 %v8427_v9, %v8363_v60  ;;  %19248 = vst [vmem:[#allocation41_spill] sm:$0xff] %v16963_v3  ;;  %v8306_v9 = vadd.f32 %v16706_v35, %v16743_v17  ;;  %v16975_v54 = vand.u32 4294901760, %v9147_v21  ;;  %v16978_v60 = vand.u32 4294901760, %v16963_v3 }
 0x7a6   : > { %v8500_v4 = vpop.f32.mrf.mxu0  ;;  %v16982_v17 = vand.u32 4294901760, %v12321_v5 }
 0x7a7   : > { %v8557_v52 = vpop.f32.mrf.mxu1  ;;  %v8497_v34 = vadd.f32 %v8496_v24, %v8428_v38  ;;  %8962 = vmatmul.f32.gmra.mxu2 %v16669_v22  ;;  %v9082_v24 = vsel %vm411_vm1, %v9062_v57, 0  ;;  %19249 = vst [vmem:[#allocation4_spill] sm:$0xff] %v16975_v54  ;;  %v9155_v21 = vsub.f32 %v16963_v3, %v16978_v60 }
 0x7a8   : > { %19250 = vst [vmem:[#allocation76_spill] sm:$0xff] %v16978_v60  ;;  %v16980_v35 = vand.u32 4294901760, %v9082_v24  ;;  %9515 = vmatpush.msra.mxu2 %v16982_v17  ;;  %9734 = vmatpush.msra.mxu1 %v16982_v17 }
 0x7a9   : > { %9019 = vmatmul.f32.gmra.mxu3 %v16695_v28  ;;  %9141 = vmatmul.f32.gmra.mxu0 %v16949_v51  ;;  %v8550_v11 = vadd.f32 %v8549_v13, %v8497_v34 }
 0x7aa   : > { %9226 = vmatmul.f32.gmra.mxu1 %v16929_v23  ;;  %v8367_v1 = vpop.f32.mrf.mxu2  ;;  %19251 = vst [vmem:[#allocation77_spill] sm:$0xff] %v16980_v35 }
 0x7ab   : > { %v16970_v40 = vadd.f32 %v8550_v11, %v16753_v31  ;;  %v8368_v36 = vadd.f32 %v8367_v1, %v8306_v9  ;;  %v16986_v31 = vsub.f32 %v12321_v5, %v16982_v17  ;;  %v8310_v11 = vadd.f32 %v16750_v30, %v16774_v46 }
 0x7ac   : > { %v8439_v20 = vpop.f32.mrf.mxu3 }
 0x7ad   : > { %v8434_v13 = vadd.f32 %v8433_v61, %v8368_v36  ;;  %v16995_v61 = vsub.f32 %v9082_v24, %v16980_v35  ;;  %v18662_v9 = vand.u32 4294901760, %v16986_v31  ;;  %9670 = vmatpush.msra.mxu0 %v16986_v31 }
 0x7ae   : > { %v8504_v38 = vpop.f32.mrf.mxu0 }
 0x7af   : > { %v8561_v57 = vpop.f32.mrf.mxu1  ;;  %v8501_v34 = vadd.f32 %v8500_v4, %v8434_v13  ;;  %8966 = vmatmul.f32.gmra.mxu2 %v16695_v28  ;;  %19252 = vst [vmem:[#allocation21_spill] sm:$0xff] %v16995_v61  ;;  %v9602_v36 = vsub.f32 %v16986_v31, %v18662_v9  ;;  %v17011_v51 = vand.u32 4294901760, %v16995_v61 }
 0x7b1   : > { %9023 = vmatmul.f32.gmra.mxu3 %v16739_v56  ;;  %9149 = vmatmul.f32.gmra.mxu0 %v16975_v54  ;;  %v8554_v1 = vadd.f32 %v8553_v29, %v8501_v34  ;;  %v17008_v54 = vand.u32 4294901760, %v9155_v21  ;;  %19254 = vst [vmem:[#allocation24_spill] sm:$0xff] %v17011_v51  ;;  %v9603_v46 = vand.u32 4294901760, %v9602_v36  ;;  %v9163_v21 = vsub.f32 %v16995_v61, %v17011_v51 }
 0x7b2   : > { %9230 = vmatmul.f32.gmra.mxu1 %v16954_v33  ;;  %v8372_v4 = vpop.f32.mrf.mxu2 }
 0x7b3   : > { %v17006_v5 = vadd.f32 %v8554_v1, %v16780_v27  ;;  %v8373_v24 = vadd.f32 %v8372_v4, %v8310_v11  ;;  %19253 = vst [vmem:[#allocation48_spill] sm:$0xff] %v17008_v54  ;;  %9604 = vmatpush.msra.mxu3 %v9603_v46  ;;  %v12320_v27 = vld [vmem:[%s18231_s3 + $0x2b0] sm:$0xff] }
 0x7b4   : > { %v8445_v13 = vpop.f32.mrf.mxu3  ;;  %v17021_v11 = vand.u32 4294901760, %v12320_v27 }
 0x7b5   : > { %v8440_v30 = vadd.f32 %v8439_v20, %v8373_v24  ;;  %v8314_v20 = vadd.f32 %v16776_v53, %v16804_v43 }
 0x7b6   : > { %v8508_v29 = vpop.f32.mrf.mxu0  ;;  %9517 = vmatpush.msra.mxu2 %v17021_v11  ;;  %v17028_v4 = vsub.f32 %v12320_v27, %v17021_v11  ;;  %9736 = vmatpush.msra.mxu1 %v17021_v11 }
 0x7b7   : > { %v8565_v34 = vpop.f32.mrf.mxu1  ;;  %v8505_v8 = vadd.f32 %v8504_v38, %v8440_v30  ;;  %8970 = vmatmul.f32.gmra.mxu2 %v16739_v56  ;;  %v17034_v30 = vand.u32 4294901760, %v9163_v21 }
 0x7b8   : > { %v18663_v53 = vand.u32 4294901760, %v17028_v4  ;;  %9673 = vmatpush.msra.mxu0 %v17028_v4 }
 0x7b9   : > { %9027 = vmatmul.f32.gmra.mxu3 %v16772_v12  ;;  %9157 = vmatmul.f32.gmra.mxu0 %v17008_v54  ;;  %v8558_v1 = vadd.f32 %v8557_v52, %v8505_v8  ;;  %19255 = vst [vmem:[#allocation12_spill] sm:$0xff] %v17034_v30 }
 0x7ba   : > { %9234 = vmatmul.f32.gmra.mxu1 %v16980_v35  ;;  %v8377_v38 = vpop.f32.mrf.mxu2  ;;  %v9608_v27 = vsub.f32 %v17028_v4, %v18663_v53 }
 0x7bb   : > { %v17032_v36 = vadd.f32 %v8558_v1, %v16811_v47  ;;  %v8378_v24 = vadd.f32 %v8377_v38, %v8314_v20  ;;  %v19256_v47 = vand.u32 4294901760, %v16819_v37  ;;  %v8318_v20 = vadd.f32 %v16806_v39, %v16832_v16  ;;  %v12319_v16 = vld [vmem:[%s18231_s3 + $0x2a8] sm:$0xff] }
 0x7bc   : > { %v8451_v46 = vpop.f32.mrf.mxu3  ;;  %v9609_v21 = vand.u32 4294901760, %v9608_v27  ;;  %v17057_v39 = vand.u32 4294901760, %v12319_v16 }
 0x7bd   : > { %v8446_v8 = vadd.f32 %v8445_v13, %v8378_v24 }
 0x7be   : > { %v8512_v43 = vpop.f32.mrf.mxu0  ;;  %9610 = vmatpush.msra.mxu3 %v9609_v21  ;;  %9519 = vmatpush.msra.mxu2 %v17057_v39 }
 0x7bf   : > { %v8872_v52 = vpop.f32.mrf.mxu1  ;;  %v8509_v9 = vadd.f32 %v8508_v29, %v8446_v8  ;;  %8974 = vmatmul.f32.gmra.mxu2 %v16772_v12  ;;  %9738 = vmatpush.msra.mxu1 %v17057_v39 }
 0x7c1   : > { %9165 = vmatmul.f32.gmra.mxu0 %v17034_v30  ;;  %9326 = vmatmul.f32.vlgmr.msrb.gmra.mxu3 %v19256_v47  ;;  %v8562_v1 = vadd.f32 %v8561_v57, %v8509_v9  ;;  %v9612_v9 = vsub.f32 %v12319_v16, %v17057_v39 }
 0x7c2   : > { %9454 = vmatmul.f32.vlgmr.msrb.gmra.mxu1 %v16801_v42  ;;  %v8382_v13 = vpop.f32.mrf.mxu2 }
 0x7c3   : > { %v17049_v38 = vadd.f32 %v8562_v1, %v16836_v49  ;;  %v8383_v29 = vadd.f32 %v8382_v13, %v8318_v20  ;;  %v9613_v27 = vand.u32 4294901760, %v9612_v9  ;;  %9676 = vmatpush.msra.mxu0 %v9612_v9 }
 0x7c4   : > { %v8752_v24 = vpop.f32.mrf.mxu3 }
 0x7c5   : > { %v8452_v8 = vadd.f32 %v8451_v46, %v8383_v29 }
 0x7c6   : > { %v8810_v53 = vpop.f32.mrf.mxu0 }
 0x7c7   : > { %v8878_v30 = vpop.f32.mrf.mxu1  ;;  %v8513_v54 = vadd.f32 %v8512_v43, %v8452_v8  ;;  %9264 = vmatmul.f32.vlgmr.msrb.gmra.mxu2 %v16819_v37 }
 0x7c9   : > { %9332 = vmatmul.f32.gmra.mxu3 %v16853_v6  ;;  %9401 = vmatmul.f32.vlgmr.msrb.gmra.mxu0 %v16801_v42  ;;  %v8566_v49 = vadd.f32 %v8565_v34, %v8513_v54  ;;  %v9614_v54 = vsub.f32 %v9612_v9, %v9613_v27 }
 0x7ca   : > { %9458 = vmatmul.f32.gmra.mxu1 %v16830_v44  ;;  %v8655_v57 = vpop.f32.mrf.mxu2 }
 0x7cb   : > { %v17064_v37 = vadd.f32 %v8566_v49, %v16859_v2  ;;  %v8753_v46 = vadd.f32 %v8752_v24, %v8655_v57  ;;  %v9615_v20 = vand.u32 4294901760, %v9614_v54  ;;  %v19258_v54 = vand.u32 4294901760, %v17028_v4 }
 0x7cc   : > { %v8756_v43 = vpop.f32.mrf.mxu3 }
 0x7cd   : > { %v8811_v42 = vadd.f32 %v8810_v53, %v8753_v46  ;;  %9616 = vmatpush.msra.mxu3 %v9615_v20  ;;  %v19257_v46 = vand.u32 4294901760, %v16986_v31 }
 0x7ce   : > { %v8815_v47 = vpop.f32.mrf.mxu0 }
 0x7cf   : > { %v8884_v21 = vpop.f32.mrf.mxu1  ;;  %v17066_v34 = vadd.f32 %v8872_v52, %v8811_v42  ;;  %9269 = vmatmul.f32.gmra.mxu2 %v16845_v50  ;;  %v12318_v52 = vld [vmem:[%s18231_s3 + $0x2a0] sm:$0xff] }
 0x7d0   : > { %v9520_v16 = vand.u32 4294901760, %v12318_v52 }
 0x7d1   : > { %9338 = vmatmul.f32.gmra.mxu3 %v16877_v63  ;;  %9405 = vmatmul.f32.gmra.mxu0 %v16830_v44 }
 0x7d2   : > { %9462 = vmatmul.f32.gmra.mxu1 %v16855_v7  ;;  %v8663_v2 = vpop.f32.mrf.mxu2  ;;  %9521 = vmatpush.msra.mxu2 %v9520_v16  ;;  %v9618_v57 = vsub.f32 %v12318_v52, %v9520_v16 }
 0x7d3   : > { %v8757_v1 = vadd.f32 %v8756_v43, %v8663_v2  ;;  %9740 = vmatpush.msra.mxu1 %v9520_v16 }
 0x7d4   : > { %v8760_v13 = vpop.f32.mrf.mxu3  ;;  %9805 = vmatpush.msrb.mxu2 %v19257_v46  ;;  %v9619_v43 = vand.u32 4294901760, %v9618_v57  ;;  %9679 = vmatpush.msra.mxu0 %v9618_v57 }
 0x7d5   : > { %v8816_v29 = vadd.f32 %v8815_v47, %v8757_v1 }
 0x7d6   : > { %v8820_v53 = vpop.f32.mrf.mxu0  ;;  %9809 = vmatpush.msrb.mxu2 %v19258_v54  ;;  %v9620_v2 = vsub.f32 %v9618_v57, %v9619_v43 }
 0x7d7   : > { %v8890_v24 = vpop.f32.mrf.mxu1  ;;  %v17072_v8 = vadd.f32 %v8878_v30, %v8816_v29  ;;  %9274 = vmatmul.f32.gmra.mxu2 %v16866_v10 }
 0x7d8   : > { %9813 = vmatpush.msrb.mxu2 %v9613_v27 }
 0x7d9   : > { %9344 = vmatmul.f32.gmra.mxu3 %v16902_v19  ;;  %9409 = vmatmul.f32.gmra.mxu0 %v16855_v7 }
 0x7da   : > { %9466 = vmatmul.f32.gmra.mxu1 %v16879_v14  ;;  %v8671_v49 = vpop.f32.mrf.mxu2  ;;  %9817 = vmatpush.msrb.mxu2 %v9619_v43 }
 0x7db   : > { %v8761_v9 = vadd.f32 %v8760_v13, %v8671_v49  ;;  %v9621_v13 = vand.u32 4294901760, %v9620_v2 }
 0x7dc   : > { %v8764_v30 = vpop.f32.mrf.mxu3 }
 0x7dd   : > { %v8821_v42 = vadd.f32 %v8820_v53, %v8761_v9  ;;  %9622 = vmatpush.msra.mxu3 %v9621_v13 }
 0x7de   : > { %v8825_v47 = vpop.f32.mrf.mxu0 }
 0x7df   : > { %v8896_v20 = vpop.f32.mrf.mxu1  ;;  %v17085_v1 = vadd.f32 %v8884_v21, %v8821_v42  ;;  %9279 = vmatmul.f32.gmra.mxu2 %v16888_v59  ;;  %9864 = vmatpush.msrb.mxu3 %v16982_v17 }
 0x7e1   : > { %9350 = vmatmul.f32.gmra.mxu3 %v16927_v0  ;;  %9413 = vmatmul.f32.gmra.mxu0 %v16879_v14 }
 0x7e2   : > { %9470 = vmatmul.f32.gmra.mxu1 %v16904_v48  ;;  %v8679_v31 = vpop.f32.mrf.mxu2  ;;  %9866 = vmatpush.msrb.mxu3 %v17021_v11 }
 0x7e3   : > { %v8765_v29 = vadd.f32 %v8764_v30, %v8679_v31 }
 0x7e4   : > { %v8768_v53 = vpop.f32.mrf.mxu3  ;;  %9868 = vmatpush.msrb.mxu3 %v17057_v39  ;;  %v12325_v39 = vld [vmem:[%s18231_s3 + $0x2d8] sm:$0xff] }
 0x7e5   : > { %v8826_v4 = vadd.f32 %v8825_v47, %v8765_v29 }
 0x7e6   : > { %v8830_v21 = vpop.f32.mrf.mxu0  ;;  %9870 = vmatpush.msrb.mxu3 %v9520_v16 }
 0x7e7   : > { %v8902_v52 = vpop.f32.mrf.mxu1  ;;  %v17093_v49 = vadd.f32 %v8890_v24, %v8826_v4  ;;  %9284 = vmatmul.f32.gmra.mxu2 %v16913_v45  ;;  %v17108_v24 = vand.u32 4294901760, %v12325_v39 }
 0x7e9   : > { %9356 = vmatmul.f32.gmra.mxu3 %v16952_v32  ;;  %9417 = vmatmul.f32.gmra.mxu0 %v16904_v48  ;;  %v17113_v47 = vsub.f32 %v12325_v39, %v17108_v24  ;;  %v19259_v39 = vld [vmem:[#allocation5_spill] sm:$0xff] }
 0x7ea   : > { %9474 = vmatmul.f32.gmra.mxu1 %v16929_v23  ;;  %v8687_v17 = vpop.f32.mrf.mxu2  ;;  %9936 = vmatpush.msrb.mxu0 %v17108_v24 }
 0x7eb   : > { %v8769_v27 = vadd.f32 %v8768_v53, %v8687_v17  ;;  %v18668_v31 = vand.u32 4294901760, %v17113_v47 }
 0x7ec   : > { %v8772_v57 = vpop.f32.mrf.mxu3 }
 0x7ed   : > { %v8831_v9 = vadd.f32 %v8830_v21, %v8769_v27  ;;  %v10023_v29 = vsub.f32 %v17113_v47, %v18668_v31  ;;  %v19263_v31 = vld [vmem:[#allocation19_spill] sm:$0xff] }
 0x7ee   : > { %v8835_v30 = vpop.f32.mrf.mxu0 }
 0x7ef   : > { %v8908_v11 = vpop.f32.mrf.mxu1  ;;  %v17100_v46 = vadd.f32 %v8896_v20, %v8831_v9  ;;  %9289 = vmatmul.f32.gmra.mxu2 %v16938_v55  ;;  %v10024_v17 = vand.u32 4294901760, %v10023_v29  ;;  %v19271_v55 = vld [vmem:[#allocation3_spill] sm:$0xff] }
 0x7f1   : > { %9362 = vmatmul.f32.gmra.mxu3 %v16978_v60  ;;  %9421 = vmatmul.f32.gmra.mxu0 %v16929_v23  ;;  %v19270_v60 = vld [vmem:[#allocation7_spill] sm:$0xff]  ;;  %v19273_v23 = vld [vmem:[#allocation36_spill] sm:$0xff] }
 0x7f2   : > { %9478 = vmatmul.f32.gmra.mxu1 %v16954_v33  ;;  %v8695_v16 = vpop.f32.mrf.mxu2 }
 0x7f3   : > { %v8773_v43 = vadd.f32 %v8772_v57, %v8695_v16  ;;  %10025 = vmatpush.msrb.mxu1 %v10024_v17  ;;  %v19261_v17 = vld [vmem:[#allocation56_spill] sm:$0xff] }
 0x7f4   : > { %v8776_v42 = vpop.f32.mrf.mxu3 }
 0x7f5   : > { %v8836_v54 = vadd.f32 %v8835_v30, %v8773_v43  ;;  %v12324_v30 = vld [vmem:[%s18231_s3 + $0x2d0] sm:$0xff]  ;;  %v19260_v43 = vld [vmem:[#allocation18_spill] sm:$0xff] }
 0x7f6   : > { %v8840_v20 = vpop.f32.mrf.mxu0  ;;  %v17135_v16 = vand.u32 4294901760, %v12324_v30 }
 0x7f7   : > { %v8914_v2 = vpop.f32.mrf.mxu1  ;;  %v17115_v13 = vadd.f32 %v8902_v52, %v8836_v54  ;;  %9294 = vmatmul.f32.gmra.mxu2 %v16963_v3  ;;  %v19267_v3 = vld [vmem:[#allocation59_spill] sm:$0xff] }
 0x7f8   : > { %9938 = vmatpush.msrb.mxu0 %v17135_v16 }
 0x7f9   : > { %9368 = vmatmul.f32.gmra.mxu3 %v17011_v51  ;;  %9425 = vmatmul.f32.gmra.mxu0 %v16954_v33  ;;  %v19272_v33 = vld [vmem:[#allocation39_spill] sm:$0xff] }
 0x7fa   : > { %9482 = vmatmul.f32.gmra.mxu1 %v16980_v35  ;;  %v8703_v53 = vpop.f32.mrf.mxu2 }
 0x7fb   : > { %v8777_v4 = vadd.f32 %v8776_v42, %v8703_v53 }
 0x7fc   : > { %v8780_v21 = vpop.f32.mrf.mxu3 }
 0x7fd   : > { %v8841_v52 = vadd.f32 %v8840_v20, %v8777_v4 }
 0x7fe   : > { %v8845_v27 = vpop.f32.mrf.mxu0 }
 0x7ff   : > { %v17125_v57 = vpop.f32.mrf.mxu1  ;;  %v17127_v9 = vadd.f32 %v8908_v11, %v8841_v52  ;;  %9299 = vmatmul.f32.gmra.mxu2 %v16995_v61  ;;  %v17149_v52 = vsub.f32 %v12324_v30, %v17135_v16 }
 0x801   : > { %9429 = vmatmul.f32.gmra.mxu0 %v16980_v35  ;;  %9624 = vmatmul.f32.vlgmr.msra.gmra.mxu3 %v19259_v39 }
 0x802   : > { %9744 = vmatmul.f32.vlgmr.msra.gmra.mxu1 %v19260_v43  ;;  %10155 = vmatpush.msra.mxu3 %v17108_v24  ;;  %v8711_v42 = vpop.f32.mrf.mxu2  ;;  %v19262_v43 = vld [vmem:[#allocation55_spill] sm:$0xff] }
 0x803   : > { %v8781_v11 = vadd.f32 %v8780_v21, %v8711_v42  ;;  %v19264_v21 = vld [vmem:[#allocation54_spill] sm:$0xff]  ;;  %v10028_v42 = vand.u32 4294901760, %v17149_v52 }
 0x804   : > { %v9000_v54 = vpop.f32.mrf.mxu3  ;;  %10157 = vmatpush.msra.mxu3 %v17135_v16 }
 0x805   : > { %v8846_v20 = vadd.f32 %v8845_v27, %v8781_v11 }
 0x806   : > { %v17141_v29 = vpop.f32.mrf.mxu0 }
 0x807   : > { %v17143_v53 = vpop.f32.mrf.mxu1  ;;  %v17145_v4 = vadd.f32 %v8914_v2, %v8846_v20  ;;  %9527 = vmatmul.f32.vlgmr.msra.gmra.mxu2 %v19261_v17  ;;  %v10029_v20 = vsub.f32 %v17149_v52, %v10028_v42 }
 0x808   : > { %10091 = vmatpush.msra.mxu2 %v17113_v47 }
 0x809   : > { %9628 = vmatmul.f32.gmra.mxu3 %v19262_v43  ;;  %9682 = vmatmul.f32.vlgmr.msra.gmra.mxu0 %v19263_v31  ;;  %v10030_v61 = vand.u32 4294901760, %v10029_v20 }
 0x80a   : > { %9750 = vmatmul.f32.gmra.mxu1 %v19264_v21  ;;  %v8947_v27 = vpop.f32.mrf.mxu2  ;;  %10094 = vmatpush.msra.mxu2 %v17149_v52  ;;  %v19265_v21 = vld [vmem:[#allocation53_spill] sm:$0xff] }
 0x80b   : > { %v8948_v11 = vadd.f32 %v8947_v27, %v17066_v34  ;;  %10031 = vmatpush.msrb.mxu1 %v10030_v61  ;;  %v12323_v34 = vld [vmem:[%s18231_s3 + $0x2c8] sm:$0xff]  ;;  %v19268_v52 = vld [vmem:[#allocation69_spill] sm:$0xff] }
 0x80c   : > { %v9004_v2 = vpop.f32.mrf.mxu3  ;;  %v19266_v27 = vld [vmem:[#allocation71_spill] sm:$0xff] }
 0x80d   : > { %v9001_v30 = vadd.f32 %v9000_v54, %v8948_v11  ;;  %v17172_v54 = vand.u32 4294901760, %v12323_v34 }
 0x80e   : > { %v17159_v17 = vpop.f32.mrf.mxu0 }
 0x80f   : > { %v17161_v51 = vpop.f32.mrf.mxu1  ;;  %v17164_v31 = vadd.f32 %v9001_v30, %v16897_v41  ;;  %9535 = vmatmul.f32.gmra.mxu2 %v19265_v21  ;;  %9940 = vmatpush.msrb.mxu0 %v17172_v54 }
 0x810   : > { %10159 = vmatpush.msra.mxu3 %v17172_v54 }
 0x811   : > { %9632 = vmatmul.f32.gmra.mxu3 %v19266_v27  ;;  %9687 = vmatmul.f32.gmra.mxu0 %v19267_v3  ;;  %v19269_v3 = vld [vmem:[#allocation65_spill] sm:$0xff] }
 0x812   : > { %9756 = vmatmul.f32.gmra.mxu1 %v19268_v52  ;;  %v8951_v11 = vpop.f32.mrf.mxu2  ;;  %v10033_v52 = vsub.f32 %v12323_v34, %v17172_v54 }
 0x813   : > { %v8952_v41 = vadd.f32 %v8951_v11, %v17072_v8 }
 0x814   : > { %v9008_v61 = vpop.f32.mrf.mxu3  ;;  %v10034_v8 = vand.u32 4294901760, %v10033_v52  ;;  %10097 = vmatpush.msra.mxu2 %v10033_v52 }
 0x815   : > { %v9005_v20 = vadd.f32 %v9004_v2, %v8952_v41 }
 0x816   : > { %v17178_v30 = vpop.f32.mrf.mxu0  ;;  %v10035_v32 = vsub.f32 %v10033_v52, %v10034_v8  ;;  %v19275_v52 = vld [vmem:[#allocation9_spill] sm:$0xff] }
 0x817   : > { %v17180_v21 = vpop.f32.mrf.mxu1  ;;  %v17183_v35 = vadd.f32 %v9005_v20, %v16922_v25  ;;  %9543 = vmatmul.f32.gmra.mxu2 %v19269_v3 }
 0x818   : > { %v10036_v20 = vand.u32 4294901760, %v10035_v32 }
 0x819   : > { %9636 = vmatmul.f32.gmra.mxu3 %v19270_v60  ;;  %9692 = vmatmul.f32.gmra.mxu0 %v19271_v55 }
 0x81a   : > { %9762 = vmatmul.f32.gmra.mxu1 %v19272_v33  ;;  %v8955_v2 = vpop.f32.mrf.mxu2  ;;  %v12322_v33 = vld [vmem:[%s18231_s3 + $0x2c0] sm:$0xff] }
 0x81b   : > { %v8956_v11 = vadd.f32 %v8955_v2, %v17085_v1  ;;  %10037 = vmatpush.msrb.mxu1 %v10036_v20  ;;  %v19274_v1 = vld [vmem:[#allocation67_spill] sm:$0xff]  ;;  %v19276_v2 = vld [vmem:[#allocation49_spill] sm:$0xff] }
 0x81c   : > { %v9012_v41 = vpop.f32.mrf.mxu3 }
 0x81d   : > { %v9009_v45 = vadd.f32 %v9008_v61, %v8956_v11  ;;  %v9941_v61 = vand.u32 4294901760, %v12322_v33  ;;  %v19277_v11 = vand.u32 4294901760, %v17113_v47 }
 0x81e   : > { %v17191_v25 = vpop.f32.mrf.mxu0 }
 0x81f   : > { %v17193_v3 = vpop.f32.mrf.mxu1  ;;  %v17196_v34 = vadd.f32 %v9009_v45, %v16947_v26  ;;  %9551 = vmatmul.f32.gmra.mxu2 %v19273_v23  ;;  %9942 = vmatpush.msrb.mxu0 %v9941_v61  ;;  %v17211_v23 = vld [vmem:[%s16195_s11 + $0x80] sm:$0xff]  ;;  %v10039_v59 = vsub.f32 %v12322_v33, %v9941_v61 }
 0x820   : > { %10161 = vmatpush.msra.mxu3 %v9941_v61  ;;  %v9500_v47 = vsel %vm411_vm1, %v17211_v23, 0 }
 0x821   : > { %9640 = vmatmul.f32.gmra.mxu3 %v19274_v1  ;;  %9697 = vmatmul.f32.gmra.mxu0 %v19275_v52 }
 0x822   : > { %9768 = vmatmul.f32.gmra.mxu1 %v19276_v2  ;;  %v8959_v32 = vpop.f32.mrf.mxu2  ;;  %10226 = vmatpush.msra.mxu0 %v19277_v11  ;;  %v19278_v2 = vld [vmem:[#allocation47_spill] sm:$0xff] }
 0x823   : > { %v8960_v45 = vadd.f32 %v8959_v32, %v17093_v49  ;;  %v19279_v49 = vld [vmem:[#allocation34_spill] sm:$0xff]  ;;  %10100 = vmatpush.msra.mxu2 %v10039_v59 }
 0x824   : > { %v9016_v26 = vpop.f32.mrf.mxu3  ;;  %10230 = vmatpush.msra.mxu0 %v10028_v42  ;;  %v19280_v32 = vld [vmem:[#allocation62_spill] sm:$0xff] }
 0x825   : > { %v9013_v20 = vadd.f32 %v9012_v41, %v8960_v45  ;;  %v19281_v41 = vld [vmem:[#allocation43_spill] sm:$0xff]  ;;  %v10040_v45 = vand.u32 4294901760, %v10039_v59 }
 0x826   : > { %v17208_v55 = vpop.f32.mrf.mxu0  ;;  %10234 = vmatpush.msra.mxu0 %v10034_v8 }
 0x827   : > { %v17213_v0 = vpop.f32.mrf.mxu1  ;;  %v17216_v52 = vadd.f32 %v9013_v20, %v16970_v40  ;;  %9559 = vmatmul.f32.gmra.mxu2 %v19278_v2  ;;  %v17225_v20 = vand.u32 4294901760, %v9500_v47  ;;  %v10041_v2 = vsub.f32 %v10039_v59, %v10040_v45  ;;  %v19286_v59 = vld [vmem:[#allocation51_spill] sm:$0xff] }
 0x828   : > { %10238 = vmatpush.msra.mxu0 %v10040_v45 }
 0x829   : > { %9644 = vmatmul.f32.gmra.mxu3 %v19279_v49  ;;  %9702 = vmatmul.f32.gmra.mxu0 %v19280_v32  ;;  %v10042_v48 = vand.u32 4294901760, %v10041_v2  ;;  %v17236_v10 = vsub.f32 %v9500_v47, %v17225_v20 }
 0x82a   : > { %9774 = vmatmul.f32.gmra.mxu1 %v19281_v41  ;;  %v8963_v42 = vpop.f32.mrf.mxu2  ;;  %v19282_v41 = vld [vmem:[#allocation32_spill] sm:$0xff] }
 0x82b   : > { %v8964_v11 = vadd.f32 %v8963_v42, %v17100_v46  ;;  %19283 = vst [vmem:[#allocation23_spill] sm:$0xff] %v17236_v10  ;;  %10043 = vmatpush.msrb.mxu1 %v10042_v48  ;;  %v19284_v46 = vld [vmem:[#allocation74_spill] sm:$0xff]  ;;  %v19285_v42 = vld [vmem:[#allocation45_spill] sm:$0xff] }
 0x82c   : > { %v9020_v40 = vpop.f32.mrf.mxu3 }
 0x82d   : > { %v9017_v33 = vadd.f32 %v9016_v26, %v8964_v11  ;;  %10285 = vmatpush.msra.mxu1 %v17108_v24 }
 0x82e   : > { %v17227_v8 = vpop.f32.mrf.mxu0 }
 0x82f   : > { %v17229_v32 = vpop.f32.mrf.mxu1  ;;  %v17232_v19 = vadd.f32 %v9017_v33, %v17006_v5  ;;  %9567 = vmatmul.f32.gmra.mxu2 %v19282_v41  ;;  %v17244_v5 = vand.u32 4294901760, %v17236_v10  ;;  %10287 = vmatpush.msra.mxu1 %v17135_v16 }
 0x831   : > { %9648 = vmatmul.f32.gmra.mxu3 %v19284_v46  ;;  %9707 = vmatmul.f32.gmra.mxu0 %v19285_v42  ;;  %19287 = vst [vmem:[#allocation30_spill] sm:$0xff] %v17244_v5  ;;  %v9581_v24 = vsub.f32 %v17236_v10, %v17244_v5 }
 0x832   : > { %9780 = vmatmul.f32.gmra.mxu1 %v19286_v59  ;;  %v8967_v26 = vpop.f32.mrf.mxu2  ;;  %v19288_v59 = vld [vmem:[#allocation33_spill] sm:$0xff] }
 0x833   : > { %v8968_v2 = vadd.f32 %v8967_v26, %v17115_v13  ;;  %10289 = vmatpush.msra.mxu1 %v17172_v54  ;;  %v19289_v13 = vld [vmem:[#allocation35_spill] sm:$0xff]  ;;  %v17262_v26 = vand.u32 4294901760, %v9581_v24 }
 0x834   : > { %v9024_v45 = vpop.f32.mrf.mxu3 }
 0x835   : > { %v9021_v47 = vadd.f32 %v9020_v40, %v8968_v2  ;;  %10291 = vmatpush.msra.mxu1 %v9941_v61  ;;  %19290 = vst [vmem:[#allocation38_spill] sm:$0xff] %v17262_v26 }
 0x836   : > { %v17247_v11 = vpop.f32.mrf.mxu0 }
 0x837   : > { %v17249_v48 = vpop.f32.mrf.mxu1  ;;  %v17253_v33 = vadd.f32 %v9021_v47, %v17032_v36  ;;  %9575 = vmatmul.f32.gmra.mxu2 %v19288_v59 }
 0x839   : > { %9652 = vmatmul.f32.gmra.mxu3 %v17225_v20  ;;  %9712 = vmatmul.f32.gmra.mxu0 %v19289_v13 }
 0x83a   : > { %9786 = vmatmul.f32.gmra.mxu1 %v17244_v5  ;;  %v8971_v16 = vpop.f32.mrf.mxu2 }
 0x83b   : > { %v8972_v40 = vadd.f32 %v8971_v16, %v17127_v9 }
 0x83c   : > { %v9028_v54 = vpop.f32.mrf.mxu3 }
 0x83d   : > { %v9025_v36 = vadd.f32 %v9024_v45, %v8972_v40 }
 0x83e   : > { %v17264_v2 = vpop.f32.mrf.mxu0 }
 0x83f   : > { %v9455_v47 = vpop.f32.mrf.mxu1  ;;  %v17267_v42 = vadd.f32 %v9025_v36, %v17049_v38  ;;  %9583 = vmatmul.f32.gmra.mxu2 %v17262_v26  ;;  %v19291_v38 = vld [vmem:[#allocation78_spill] sm:$0xff]  ;;  %v9208_v36 = vadd.f32 %v17125_v57, %v17141_v29 }
 0x841   : > { %9717 = vmatmul.f32.gmra.mxu0 %v17236_v10  ;;  %9872 = vmatmul.f32.vlgmr.msrb.gmra.mxu3 %v19259_v39 }
 0x842   : > { %10045 = vmatmul.f32.vlgmr.msrb.gmra.mxu1 %v16564_v15  ;;  %v8975_v61 = vpop.f32.mrf.mxu2 }
 0x843   : > { %v8976_v9 = vadd.f32 %v8975_v61, %v17145_v4 }
 0x844   : > { %v9327_v24 = vpop.f32.mrf.mxu3 }
 0x845   : > { %v9029_v16 = vadd.f32 %v9028_v54, %v8976_v9 }
 0x846   : > { %v9402_v45 = vpop.f32.mrf.mxu0 }
 0x847   : > { %v9459_v40 = vpop.f32.mrf.mxu1  ;;  %v17275_v5 = vadd.f32 %v9029_v16, %v17064_v37  ;;  %9819 = vmatmul.f32.vlgmr.msrb.gmra.mxu2 %v19259_v39  ;;  %v19292_v37 = vld [vmem:[#allocation27_spill] sm:$0xff]  ;;  %v9212_v39 = vadd.f32 %v17143_v53, %v17159_v17  ;;  %v9216_v53 = vadd.f32 %v17161_v51, %v17178_v30  ;;  %v9220_v51 = vadd.f32 %v17180_v21, %v17191_v25  ;;  %v19294_v21 = vld [vmem:[#allocation16_spill] sm:$0xff] }
 0x848   : > { %v9224_v25 = vadd.f32 %v17193_v3, %v17208_v55 }
 0x849   : > { %9876 = vmatmul.f32.gmra.mxu3 %v19262_v43  ;;  %9948 = vmatmul.f32.vlgmr.msrb.gmra.mxu0 %v19291_v38 }
 0x84a   : > { %10049 = vmatmul.f32.gmra.mxu1 %v16593_v62  ;;  %v9265_v10 = vpop.f32.mrf.mxu2 }
 0x84b   : > { %v9266_v4 = vadd.f32 %v9265_v10, %v9208_v36 }
 0x84c   : > { %v9333_v61 = vpop.f32.mrf.mxu3 }
 0x84d   : > { %v9328_v54 = vadd.f32 %v9327_v24, %v9266_v4 }
 0x84e   : > { %v9406_v9 = vpop.f32.mrf.mxu0 }
 0x84f   : > { %v9463_v13 = vpop.f32.mrf.mxu1  ;;  %v9403_v26 = vadd.f32 %v9402_v45, %v9328_v54  ;;  %9823 = vmatmul.f32.gmra.mxu2 %v19262_v43  ;;  %v19293_v54 = vld [vmem:[#allocation44_spill] sm:$0xff] }
 0x851   : > { %9880 = vmatmul.f32.gmra.mxu3 %v19266_v27  ;;  %9956 = vmatmul.f32.gmra.mxu0 %v19292_v37  ;;  %v9456_v16 = vadd.f32 %v9455_v47, %v9403_v26 }
 0x852   : > { %10053 = vmatmul.f32.gmra.mxu1 %v16621_v18  ;;  %v9270_v57 = vpop.f32.mrf.mxu2 }
 0x853   : > { %v17290_v10 = vadd.f32 %v9456_v16, %v17164_v31  ;;  %v9271_v29 = vadd.f32 %v9270_v57, %v9212_v39 }
 0x854   : > { %v9339_v24 = vpop.f32.mrf.mxu3 }
 0x855   : > { %v9334_v38 = vadd.f32 %v9333_v61, %v9271_v29  ;;  %v17303_v29 = vld [vmem:[%s16195_s11 + $0x88] sm:$0x3] }
 0x856   : > { %v9410_v45 = vpop.f32.mrf.mxu0 }
 0x857   : > { %v9467_v36 = vpop.f32.mrf.mxu1  ;;  %v9407_v4 = vadd.f32 %v9406_v9, %v9334_v38  ;;  %9827 = vmatmul.f32.gmra.mxu2 %v19266_v27 }
 0x859   : > { %9884 = vmatmul.f32.gmra.mxu3 %v19270_v60  ;;  %9964 = vmatmul.f32.gmra.mxu0 %v19293_v54  ;;  %v9460_v17 = vadd.f32 %v9459_v40, %v9407_v4 }
 0x85a   : > { %10057 = vmatmul.f32.gmra.mxu1 %v16669_v22  ;;  %v9275_v31 = vpop.f32.mrf.mxu2 }
 0x85b   : > { %v17299_v26 = vadd.f32 %v9460_v17, %v17183_v35  ;;  %v9276_v47 = vadd.f32 %v9275_v31, %v9216_v53  ;;  %v9913_v35 = vrot.slane %v17211_v23, 1 }
 0x85c   : > { %v9345_v61 = vpop.f32.mrf.mxu3 }
 0x85d   : > { %v9340_v9 = vadd.f32 %v9339_v24, %v9276_v47  ;;  %v9914_v24 = vrot.slane %v17303_v29, 1 }
 0x85e   : > { %v9414_v39 = vpop.f32.mrf.mxu0 }
 0x85f   : > { %v9471_v16 = vpop.f32.mrf.mxu1  ;;  %v9411_v57 = vadd.f32 %v9410_v45, %v9340_v9  ;;  %9831 = vmatmul.f32.gmra.mxu2 %v19270_v60  ;;  %v9915_v47 = vsel %vm381_vm0, %v9913_v35, %v9914_v24 }
 0x861   : > { %9888 = vmatmul.f32.gmra.mxu3 %v19274_v1  ;;  %9972 = vmatmul.f32.gmra.mxu0 %v16737_v58  ;;  %v9464_v30 = vadd.f32 %v9463_v13, %v9411_v57 }
 0x862   : > { %10061 = vmatmul.f32.gmra.mxu1 %v16695_v28  ;;  %v9280_v40 = vpop.f32.mrf.mxu2 }
 0x863   : > { %v17313_v38 = vadd.f32 %v9464_v30, %v17196_v34  ;;  %v9281_v45 = vadd.f32 %v9280_v40, %v9220_v51  ;;  %v9921_v34 = vsel %vm411_vm1, %v9915_v47, 0  ;;  %v12329_v30 = vld [vmem:[%s18231_s3 + $0x2f8] sm:$0xff]  ;;  %v9228_v47 = vadd.f32 %v17213_v0, %v17227_v8 }
 0x864   : > { %v9351_v4 = vpop.f32.mrf.mxu3  ;;  %v17329_v35 = vand.u32 4294901760, %v9921_v34  ;;  %v17331_v40 = vand.u32 4294901760, %v12329_v30 }
 0x865   : > { %v9346_v53 = vadd.f32 %v9345_v61, %v9281_v45  ;;  %v19296_v45 = vld [vmem:[#allocation2_spill] sm:$0xff] }
 0x866   : > { %v9418_v17 = vpop.f32.mrf.mxu0  ;;  %19295 = vst [vmem:[#allocation5_spill] sm:$0xff] %v17329_v35  ;;  %10356 = vmatpush.msrb.mxu2 %v17331_v40  ;;  %v17335_v24 = vsub.f32 %v12329_v30, %v17331_v40  ;;  %10575 = vmatpush.msrb.mxu1 %v17331_v40 }
 0x867   : > { %v9475_v31 = vpop.f32.mrf.mxu1  ;;  %v9415_v9 = vadd.f32 %v9414_v39, %v9346_v53  ;;  %9835 = vmatmul.f32.gmra.mxu2 %v19274_v1  ;;  %v17342_v53 = vsub.f32 %v9921_v34, %v17329_v35 }
 0x868   : > { %10511 = vmatpush.msrb.mxu0 %v17335_v24 }
 0x869   : > { %9892 = vmatmul.f32.gmra.mxu3 %v19279_v49  ;;  %9980 = vmatmul.f32.gmra.mxu0 %v19294_v21  ;;  %v9468_v13 = vadd.f32 %v9467_v36, %v9415_v9  ;;  %19297 = vst [vmem:[#allocation18_spill] sm:$0xff] %v17342_v53  ;;  %v19302_v21 = vld [vmem:[#allocation37_spill] sm:$0xff] }
 0x86a   : > { %10065 = vmatmul.f32.gmra.mxu1 %v16739_v56  ;;  %v9285_v61 = vpop.f32.mrf.mxu2 }
 0x86b   : > { %v17324_v57 = vadd.f32 %v9468_v13, %v17216_v52  ;;  %v9286_v51 = vadd.f32 %v9285_v61, %v9224_v25 }
 0x86c   : > { %v9357_v39 = vpop.f32.mrf.mxu3 }
 0x86d   : > { %v9352_v55 = vadd.f32 %v9351_v4, %v9286_v51  ;;  %v18702_v4 = vand.u32 4294901760, %v17335_v24  ;;  %v17356_v51 = vand.u32 4294901760, %v17342_v53 }
 0x86e   : > { %v9422_v3 = vpop.f32.mrf.mxu0 }
 0x86f   : > { %v9479_v36 = vpop.f32.mrf.mxu1  ;;  %v9419_v52 = vadd.f32 %v9418_v17, %v9352_v55  ;;  %9839 = vmatmul.f32.gmra.mxu2 %v19279_v49  ;;  %v10443_v25 = vsub.f32 %v17335_v24, %v18702_v4  ;;  %19298 = vst [vmem:[#allocation56_spill] sm:$0xff] %v17356_v51 }
 0x871   : > { %9896 = vmatmul.f32.gmra.mxu3 %v19284_v46  ;;  %9988 = vmatmul.f32.gmra.mxu0 %v19296_v45  ;;  %v9472_v9 = vadd.f32 %v9471_v16, %v9419_v52  ;;  %v10444_v30 = vand.u32 4294901760, %v10443_v25  ;;  %v12328_v52 = vld [vmem:[%s18231_s3 + $0x2f0] sm:$0xff] }
 0x872   : > { %10069 = vmatmul.f32.gmra.mxu1 %v16772_v12  ;;  %v9290_v17 = vpop.f32.mrf.mxu2 }
 0x873   : > { %v17353_v13 = vadd.f32 %v9472_v9, %v17232_v19  ;;  %v9291_v34 = vadd.f32 %v9290_v17, %v9228_v47  ;;  %10445 = vmatpush.msrb.mxu3 %v10444_v30  ;;  %v19299_v19 = vld [vmem:[#allocation8_spill] sm:$0xff]  ;;  %v10002_v47 = vsub.f32 %v17342_v53, %v17356_v51  ;;  %v17366_v9 = vand.u32 4294901760, %v12328_v52 }
 0x874   : > { %v9363_v61 = vpop.f32.mrf.mxu3 }
 0x875   : > { %v9358_v0 = vadd.f32 %v9357_v39, %v9291_v34  ;;  %v9232_v39 = vadd.f32 %v17229_v32, %v17247_v11  ;;  %10358 = vmatpush.msrb.mxu2 %v17366_v9  ;;  %v17373_v25 = vsub.f32 %v12328_v52, %v17366_v9  ;;  %10577 = vmatpush.msrb.mxu1 %v17366_v9  ;;  %v17379_v4 = vand.u32 4294901760, %v10002_v47 }
 0x876   : > { %v9426_v8 = vpop.f32.mrf.mxu0 }
 0x877   : > { %v9483_v16 = vpop.f32.mrf.mxu1  ;;  %v9423_v55 = vadd.f32 %v9422_v3, %v9358_v0  ;;  %9843 = vmatmul.f32.gmra.mxu2 %v19284_v46  ;;  %19300 = vst [vmem:[#allocation55_spill] sm:$0xff] %v17379_v4  ;;  %v18703_v32 = vand.u32 4294901760, %v17373_v25  ;;  %10514 = vmatpush.msrb.mxu0 %v17373_v25  ;;  %v19309_v58 = vand.u32 4294901760, %v17373_v25 }
 0x879   : > { %9900 = vmatmul.f32.gmra.mxu3 %v17225_v20  ;;  %9996 = vmatmul.f32.gmra.mxu0 %v19299_v19  ;;  %v9476_v17 = vadd.f32 %v9475_v31, %v9423_v55  ;;  %v10449_v52 = vsub.f32 %v17373_v25, %v18703_v32 }
 0x87a   : > { %10073 = vmatmul.f32.gmra.mxu1 %v17329_v35  ;;  %v9295_v3 = vpop.f32.mrf.mxu2 }
 0x87b   : > { %v17377_v34 = vadd.f32 %v9476_v17, %v17253_v33  ;;  %v9296_v30 = vadd.f32 %v9295_v3, %v9232_v39  ;;  %v19301_v33 = vld [vmem:[#allocation11_spill] sm:$0xff]  ;;  %v10450_v47 = vand.u32 4294901760, %v10449_v52  ;;  %v9236_v39 = vadd.f32 %v17249_v48, %v17264_v2 }
 0x87c   : > { %v9369_v0 = vpop.f32.mrf.mxu3  ;;  %v12327_v48 = vld [vmem:[%s18231_s3 + $0x2e8] sm:$0xff] }
 0x87d   : > { %v9364_v11 = vadd.f32 %v9363_v61, %v9296_v30  ;;  %10451 = vmatpush.msrb.mxu3 %v10450_v47  ;;  %v19303_v2 = vld [vmem:[#allocation79_spill] sm:$0xff] }
 0x87e   : > { %v9430_v31 = vpop.f32.mrf.mxu0 }
 0x87f   : > { %v9745_v55 = vpop.f32.mrf.mxu1  ;;  %v9427_v19 = vadd.f32 %v9426_v8, %v9364_v11  ;;  %9847 = vmatmul.f32.gmra.mxu2 %v17225_v20 }
 0x881   : > { %10004 = vmatmul.f32.gmra.mxu0 %v17379_v4  ;;  %10165 = vmatmul.f32.vlgmr.msra.gmra.mxu3 %v19301_v33  ;;  %v9480_v17 = vadd.f32 %v9479_v36, %v9427_v19  ;;  %v17401_v36 = vand.u32 4294901760, %v12327_v48 }
 0x882   : > { %10293 = vmatmul.f32.vlgmr.msra.gmra.mxu1 %v16564_v15  ;;  %v9300_v61 = vpop.f32.mrf.mxu2 }
 0x883   : > { %v17393_v3 = vadd.f32 %v9480_v17, %v17267_v42  ;;  %v9301_v30 = vadd.f32 %v9300_v61, %v9236_v39  ;;  %10360 = vmatpush.msrb.mxu2 %v17401_v36  ;;  %10579 = vmatpush.msrb.mxu1 %v17401_v36  ;;  %v19304_v17 = vld [vmem:[#allocation31_spill] sm:$0xff]  ;;  %v19305_v61 = vld [vmem:[#allocation72_spill] sm:$0xff] }
 0x884   : > { %v9625_v8 = vpop.f32.mrf.mxu3 }
 0x885   : > { %v9370_v11 = vadd.f32 %v9369_v0, %v9301_v30  ;;  %v10453_v0 = vsub.f32 %v12327_v48, %v17401_v36 }
 0x886   : > { %v9683_v32 = vpop.f32.mrf.mxu0 }
 0x887   : > { %v9751_v45 = vpop.f32.mrf.mxu1  ;;  %v9431_v4 = vadd.f32 %v9430_v31, %v9370_v11  ;;  %10103 = vmatmul.f32.vlgmr.msra.gmra.mxu2 %v19302_v21  ;;  %v10454_v33 = vand.u32 4294901760, %v10453_v0  ;;  %10517 = vmatpush.msrb.mxu0 %v10453_v0 }
 0x889   : > { %10171 = vmatmul.f32.gmra.mxu3 %v19303_v2  ;;  %10240 = vmatmul.f32.vlgmr.msra.gmra.mxu0 %v16564_v15  ;;  %v9484_v42 = vadd.f32 %v9483_v16, %v9431_v4  ;;  %v10455_v4 = vsub.f32 %v10453_v0, %v10454_v33  ;;  %v12326_v0 = vld [vmem:[%s18231_s3 + $0x2e0] sm:$0xff] }
 0x88a   : > { %10297 = vmatmul.f32.gmra.mxu1 %v16593_v62  ;;  %v9528_v19 = vpop.f32.mrf.mxu2 }
 0x88b   : > { %v17408_v21 = vadd.f32 %v9484_v42, %v17275_v5  ;;  %v9626_v31 = vadd.f32 %v9625_v8, %v9528_v19  ;;  %v10456_v30 = vand.u32 4294901760, %v10455_v4 }
 0x88c   : > { %v9629_v52 = vpop.f32.mrf.mxu3 }
 0x88d   : > { %v9684_v15 = vadd.f32 %v9683_v32, %v9626_v31  ;;  %10457 = vmatpush.msrb.mxu3 %v10456_v30  ;;  %v19307_v31 = vld [vmem:[#allocation50_spill] sm:$0xff]  ;;  %v19308_v30 = vand.u32 4294901760, %v17335_v24 }
 0x88e   : > { %v9688_v47 = vpop.f32.mrf.mxu0 }
 0x88f   : > { %v9757_v39 = vpop.f32.mrf.mxu1  ;;  %v17410_v16 = vadd.f32 %v9745_v55, %v9684_v15  ;;  %10108 = vmatmul.f32.gmra.mxu2 %v19304_v17  ;;  %v19306_v55 = vld [vmem:[#allocation17_spill] sm:$0xff]  ;;  %v10361_v15 = vand.u32 4294901760, %v12326_v0 }
 0x891   : > { %10177 = vmatmul.f32.gmra.mxu3 %v19305_v61  ;;  %10244 = vmatmul.f32.gmra.mxu0 %v16593_v62  ;;  %v19310_v61 = vld [vmem:[#allocation13_spill] sm:$0xff] }
 0x892   : > { %10301 = vmatmul.f32.gmra.mxu1 %v16621_v18  ;;  %v9536_v5 = vpop.f32.mrf.mxu2  ;;  %10362 = vmatpush.msrb.mxu2 %v10361_v15 }
 0x893   : > { %v9630_v8 = vadd.f32 %v9629_v52, %v9536_v5  ;;  %10581 = vmatpush.msrb.mxu1 %v10361_v15 }
 0x894   : > { %v9633_v11 = vpop.f32.mrf.mxu3  ;;  %10646 = vmatpush.msra.mxu2 %v19308_v30 }
 0x895   : > { %v9689_v48 = vadd.f32 %v9688_v47, %v9630_v8  ;;  %v10459_v47 = vsub.f32 %v12326_v0, %v10361_v15  ;;  %v19311_v0 = vld [vmem:[#allocation26_spill] sm:$0xff] }
 0x896   : > { %v9693_v32 = vpop.f32.mrf.mxu0  ;;  %10650 = vmatpush.msra.mxu2 %v19309_v58 }
 0x897   : > { %v9763_v42 = vpop.f32.mrf.mxu1  ;;  %v17416_v19 = vadd.f32 %v9751_v45, %v9689_v48  ;;  %10113 = vmatmul.f32.gmra.mxu2 %v19306_v55  ;;  %v10460_v5 = vand.u32 4294901760, %v10459_v47  ;;  %10520 = vmatpush.msrb.mxu0 %v10459_v47 }
 0x898   : > { %10654 = vmatpush.msra.mxu2 %v10454_v33 }
 0x899   : > { %10183 = vmatmul.f32.gmra.mxu3 %v19307_v31  ;;  %10248 = vmatmul.f32.gmra.mxu0 %v16621_v18  ;;  %v10461_v55 = vsub.f32 %v10459_v47, %v10460_v5 }
 0x89a   : > { %10305 = vmatmul.f32.gmra.mxu1 %v16669_v22  ;;  %v9544_v52 = vpop.f32.mrf.mxu2  ;;  %10658 = vmatpush.msra.mxu2 %v10460_v5 }
 0x89b   : > { %v9634_v4 = vadd.f32 %v9633_v11, %v9544_v52  ;;  %v10462_v11 = vand.u32 4294901760, %v10461_v55  ;;  %v19313_v55 = vld [vmem:[#allocation6_spill] sm:$0xff] }
 0x89c   : > { %v9637_v45 = vpop.f32.mrf.mxu3 }
 0x89d   : > { %v9694_v8 = vadd.f32 %v9693_v32, %v9634_v4  ;;  %10463 = vmatpush.msrb.mxu3 %v10462_v11  ;;  %v19312_v4 = vld [vmem:[#allocation46_spill] sm:$0xff] }
 0x89e   : > { %v9698_v48 = vpop.f32.mrf.mxu0 }
 0x89f   : > { %v9769_v31 = vpop.f32.mrf.mxu1  ;;  %v17429_v54 = vadd.f32 %v9757_v39, %v9694_v8  ;;  %10118 = vmatmul.f32.gmra.mxu2 %v19310_v61  ;;  %10705 = vmatpush.msra.mxu3 %v17331_v40 }
 0x8a1   : > { %10189 = vmatmul.f32.gmra.mxu3 %v19311_v0  ;;  %10252 = vmatmul.f32.gmra.mxu0 %v16669_v22  ;;  %v19325_v0 = vld [vmem:[#allocation64_spill] sm:$0xff] }
 0x8a2   : > { %10309 = vmatmul.f32.gmra.mxu1 %v16695_v28  ;;  %v9552_v24 = vpop.f32.mrf.mxu2  ;;  %10707 = vmatpush.msra.mxu3 %v17366_v9 }
 0x8a3   : > { %v9638_v32 = vadd.f32 %v9637_v45, %v9552_v24 }
 0x8a4   : > { %v9641_v52 = vpop.f32.mrf.mxu3  ;;  %10709 = vmatpush.msra.mxu3 %v17401_v36  ;;  %v12333_v36 = vld [vmem:[%s18231_s3 + $0x318] sm:$0xff] }
 0x8a5   : > { %v9699_v58 = vadd.f32 %v9698_v48, %v9638_v32  ;;  %v19315_v48 = vld [vmem:[#allocation22_spill] sm:$0xff]  ;;  %v17452_v11 = vand.u32 4294901760, %v12333_v36 }
 0x8a6   : > { %v9703_v25 = vpop.f32.mrf.mxu0  ;;  %10711 = vmatpush.msra.mxu3 %v10361_v15 }
 0x8a7   : > { %v9775_v39 = vpop.f32.mrf.mxu1  ;;  %v17437_v47 = vadd.f32 %v9763_v42, %v9699_v58  ;;  %10123 = vmatmul.f32.gmra.mxu2 %v19312_v4  ;;  %v19314_v42 = vld [vmem:[#allocation15_spill] sm:$0xff]  ;;  %10774 = vmatpush.msra.mxu0 %v17452_v11  ;;  %v17457_v32 = vsub.f32 %v12333_v36, %v17452_v11 }
 0x8a9   : > { %10195 = vmatmul.f32.gmra.mxu3 %v19313_v55  ;;  %10256 = vmatmul.f32.gmra.mxu0 %v16695_v28  ;;  %v19324_v55 = vld [vmem:[#allocation70_spill] sm:$0xff]  ;;  %v19331_v28 = vld [vmem:[#allocation4_spill] sm:$0xff] }
 0x8aa   : > { %10313 = vmatmul.f32.gmra.mxu1 %v16739_v56  ;;  %v9560_v40 = vpop.f32.mrf.mxu2 }
 0x8ab   : > { %v9642_v33 = vadd.f32 %v9641_v52, %v9560_v40 }
 0x8ac   : > { %v9645_v45 = vpop.f32.mrf.mxu3 }
 0x8ad   : > { %v9704_v30 = vadd.f32 %v9703_v25, %v9642_v33  ;;  %v19316_v33 = vld [vmem:[#allocation14_spill] sm:$0xff] }
 0x8ae   : > { %v9708_v5 = vpop.f32.mrf.mxu0 }
 0x8af   : > { %v9781_v9 = vpop.f32.mrf.mxu1  ;;  %v17444_v8 = vadd.f32 %v9769_v31, %v9704_v30  ;;  %10128 = vmatmul.f32.gmra.mxu2 %v19314_v42  ;;  %v18707_v30 = vand.u32 4294901760, %v17457_v32  ;;  %v19322_v42 = vld [vmem:[#allocation68_spill] sm:$0xff] }
 0x8b1   : > { %10201 = vmatmul.f32.gmra.mxu3 %v19315_v48  ;;  %10260 = vmatmul.f32.gmra.mxu0 %v16739_v56 }
 0x8b2   : > { %10317 = vmatmul.f32.gmra.mxu1 %v16772_v12  ;;  %v9568_v15 = vpop.f32.mrf.mxu2 }
 0x8b3   : > { %v9646_v24 = vadd.f32 %v9645_v45, %v9568_v15  ;;  %v10861_v45 = vsub.f32 %v17457_v32, %v18707_v30  ;;  %v19317_v30 = vld [vmem:[#allocation57_spill] sm:$0xff] }
 0x8b4   : > { %v9649_v31 = vpop.f32.mrf.mxu3 }
 0x8b5   : > { %v9709_v52 = vadd.f32 %v9708_v5, %v9646_v24  ;;  %v10862_v24 = vand.u32 4294901760, %v10861_v45 }
 0x8b6   : > { %v9713_v58 = vpop.f32.mrf.mxu0 }
 0x8b7   : > { %v9787_v25 = vpop.f32.mrf.mxu1  ;;  %v17459_v40 = vadd.f32 %v9775_v39, %v9709_v52  ;;  %10133 = vmatmul.f32.gmra.mxu2 %v19316_v33  ;;  %10863 = vmatpush.msra.mxu1 %v10862_v24 }
 0x8b9   : > { %10207 = vmatmul.f32.gmra.mxu3 %v17356_v51  ;;  %10264 = vmatmul.f32.gmra.mxu0 %v16772_v12  ;;  %v12332_v51 = vld [vmem:[%s18231_s3 + $0x310] sm:$0xff] }
 0x8ba   : > { %10321 = vmatmul.f32.gmra.mxu1 %v17329_v35  ;;  %v9576_v36 = vpop.f32.mrf.mxu2  ;;  %v19323_v12 = vld [vmem:[#allocation60_spill] sm:$0xff] }
 0x8bb   : > { %v9650_v5 = vadd.f32 %v9649_v31, %v9576_v36  ;;  %v17479_v31 = vand.u32 4294901760, %v12332_v51 }
 0x8bc   : > { %v9653_v15 = vpop.f32.mrf.mxu3 }
 0x8bd   : > { %v9714_v39 = vadd.f32 %v9713_v58, %v9650_v5  ;;  %10776 = vmatpush.msra.mxu0 %v17479_v31 }
 0x8be   : > { %v9718_v52 = vpop.f32.mrf.mxu0 }
 0x8bf   : > { %v17469_v33 = vpop.f32.mrf.mxu1  ;;  %v17471_v48 = vadd.f32 %v9781_v9, %v9714_v39  ;;  %10138 = vmatmul.f32.gmra.mxu2 %v17342_v53  ;;  %v19318_v53 = vld [vmem:[#allocation52_spill] sm:$0xff] }
 0x8c1   : > { %10268 = vmatmul.f32.gmra.mxu0 %v17329_v35  ;;  %10465 = vmatmul.f32.vlgmr.msrb.gmra.mxu3 %v16830_v44 }
 0x8c2   : > { %10585 = vmatmul.f32.vlgmr.msrb.gmra.mxu1 %v16853_v6  ;;  %10993 = vmatpush.msrb.mxu3 %v17452_v11  ;;  %v9584_v58 = vpop.f32.mrf.mxu2  ;;  %v17493_v6 = vsub.f32 %v12332_v51, %v17479_v31 }
 0x8c3   : > { %v9654_v9 = vadd.f32 %v9653_v15, %v9584_v58 }
 0x8c4   : > { %v9873_v45 = vpop.f32.mrf.mxu3  ;;  %10995 = vmatpush.msrb.mxu3 %v17479_v31  ;;  %v18710_v15 = vand.u32 4294901760, %v17493_v6 }
 0x8c5   : > { %v9719_v36 = vadd.f32 %v9718_v52, %v9654_v9 }
 0x8c6   : > { %v17485_v5 = vpop.f32.mrf.mxu0 }
 0x8c7   : > { %v17487_v24 = vpop.f32.mrf.mxu1  ;;  %v17489_v39 = vadd.f32 %v9787_v25, %v9719_v36  ;;  %10368 = vmatmul.f32.vlgmr.msrb.gmra.mxu2 %v19317_v30  ;;  %v10867_v30 = vsub.f32 %v17493_v6, %v18710_v15 }
 0x8c8   : > { %10929 = vmatpush.msrb.mxu2 %v17457_v32 }
 0x8c9   : > { %10469 = vmatmul.f32.gmra.mxu3 %v16855_v7  ;;  %10523 = vmatmul.f32.vlgmr.msrb.gmra.mxu0 %v16845_v50  ;;  %v10868_v50 = vand.u32 4294901760, %v10867_v30 }
 0x8ca   : > { %10591 = vmatmul.f32.gmra.mxu1 %v16877_v63  ;;  %v9820_v52 = vpop.f32.mrf.mxu2  ;;  %10932 = vmatpush.msrb.mxu2 %v17493_v6 }
 0x8cb   : > { %v9821_v58 = vadd.f32 %v9820_v52, %v17410_v16  ;;  %10869 = vmatpush.msra.mxu1 %v10868_v50  ;;  %v12331_v16 = vld [vmem:[%s18231_s3 + $0x308] sm:$0xff]  ;;  %v19319_v52 = vld [vmem:[#allocation20_spill] sm:$0xff] }
 0x8cc   : > { %v9877_v25 = vpop.f32.mrf.mxu3 }
 0x8cd   : > { %v9874_v51 = vadd.f32 %v9873_v45, %v9821_v58  ;;  %v17518_v45 = vand.u32 4294901760, %v12331_v16  ;;  %v19320_v58 = vld [vmem:[#allocation66_spill] sm:$0xff] }
 0x8ce   : > { %v17505_v9 = vpop.f32.mrf.mxu0 }
 0x8cf   : > { %v17507_v36 = vpop.f32.mrf.mxu1  ;;  %v17510_v63 = vadd.f32 %v9874_v51, %v17290_v10  ;;  %10376 = vmatmul.f32.gmra.mxu2 %v19318_v53  ;;  %10778 = vmatpush.msra.mxu0 %v17518_v45 }
 0x8d0   : > { %10997 = vmatpush.msrb.mxu3 %v17518_v45 }
 0x8d1   : > { %10473 = vmatmul.f32.gmra.mxu3 %v16879_v14  ;;  %10528 = vmatmul.f32.gmra.mxu0 %v19319_v52  ;;  %v19321_v52 = vld [vmem:[#allocation58_spill] sm:$0xff] }
 0x8d2   : > { %10597 = vmatmul.f32.gmra.mxu1 %v19320_v58  ;;  %v9824_v30 = vpop.f32.mrf.mxu2  ;;  %v10871_v58 = vsub.f32 %v12331_v16, %v17518_v45 }
 0x8d3   : > { %v9825_v10 = vadd.f32 %v9824_v30, %v17416_v19 }
 0x8d4   : > { %v9881_v51 = vpop.f32.mrf.mxu3  ;;  %v10872_v19 = vand.u32 4294901760, %v10871_v58  ;;  %10935 = vmatpush.msrb.mxu2 %v10871_v58 }
 0x8d5   : > { %v9878_v50 = vadd.f32 %v9877_v25, %v9825_v10 }
 0x8d6   : > { %v17524_v15 = vpop.f32.mrf.mxu0  ;;  %v10873_v4 = vsub.f32 %v10871_v58, %v10872_v19 }
 0x8d7   : > { %v17526_v53 = vpop.f32.mrf.mxu1  ;;  %v17529_v35 = vadd.f32 %v9878_v50, %v17299_v26  ;;  %10384 = vmatmul.f32.gmra.mxu2 %v19321_v52 }
 0x8d8   : > { %v10874_v50 = vand.u32 4294901760, %v10873_v4  ;;  %v19328_v4 = vld [vmem:[#allocation42_spill] sm:$0xff] }
 0x8d9   : > { %10477 = vmatmul.f32.gmra.mxu3 %v19322_v42  ;;  %10533 = vmatmul.f32.gmra.mxu0 %v19323_v12  ;;  %v19326_v12 = vld [vmem:[#allocation40_spill] sm:$0xff] }
 0x8da   : > { %10603 = vmatmul.f32.gmra.mxu1 %v19324_v55  ;;  %v9828_v25 = vpop.f32.mrf.mxu2  ;;  %v12330_v55 = vld [vmem:[%s18231_s3 + $0x300] sm:$0xff] }
 0x8db   : > { %v9829_v30 = vadd.f32 %v9828_v25, %v17429_v54  ;;  %10875 = vmatpush.msra.mxu1 %v10874_v50  ;;  %v19327_v54 = vld [vmem:[#allocation63_spill] sm:$0xff]  ;;  %v10779_v58 = vand.u32 4294901760, %v12330_v55  ;;  %v10334_v25 = vrot.slane %v17303_v29, 2  ;;  %v19329_v50 = vand.u32 4294901760, %v17457_v32  ;;  %v19333_v32 = vld [vmem:[#allocation10_spill] sm:$0xff] }
 0x8dc   : > { %v9885_v10 = vpop.f32.mrf.mxu3 }
 0x8dd   : > { %v9882_v56 = vadd.f32 %v9881_v51, %v9829_v30  ;;  %v10333_v51 = vrot.slane %v17211_v23, 2  ;;  %10780 = vmatpush.msra.mxu0 %v10779_v58  ;;  %10999 = vmatpush.msrb.mxu3 %v10779_v58  ;;  %v19330_v23 = vand.u32 4294901760, %v17493_v6 }
 0x8de   : > { %v17537_v26 = vpop.f32.mrf.mxu0 }
 0x8df   : > { %v17539_v52 = vpop.f32.mrf.mxu1  ;;  %v17542_v16 = vadd.f32 %v9882_v56, %v17313_v38  ;;  %10392 = vmatmul.f32.gmra.mxu2 %v19325_v0  ;;  %11064 = vmatpush.msrb.mxu0 %v19329_v50 }
 0x8e1   : > { %10481 = vmatmul.f32.gmra.mxu3 %v19326_v12  ;;  %10538 = vmatmul.f32.gmra.mxu0 %v19327_v54  ;;  %v10335_v54 = vsel %vm1248_vm2, %v10333_v51, %v10334_v25 }
 0x8e2   : > { %10609 = vmatmul.f32.gmra.mxu1 %v19328_v4  ;;  %v9832_v56 = vpop.f32.mrf.mxu2  ;;  %11068 = vmatpush.msrb.mxu0 %v19330_v23 }
 0x8e3   : > { %v9833_v38 = vadd.f32 %v9832_v56, %v17437_v47  ;;  %v10877_v47 = vsub.f32 %v12330_v55, %v10779_v58  ;;  %v19332_v56 = vld [vmem:[#allocation75_spill] sm:$0xff] }
 0x8e4   : > { %v9889_v30 = vpop.f32.mrf.mxu3  ;;  %11072 = vmatpush.msrb.mxu0 %v10872_v19 }
 0x8e5   : > { %v9886_v0 = vadd.f32 %v9885_v10, %v9833_v38  ;;  %v10341_v10 = vsel %vm411_vm1, %v10335_v54, 0  ;;  %v19334_v38 = vld [vmem:[#allocation76_spill] sm:$0xff]  ;;  %v10878_v51 = vand.u32 4294901760, %v10877_v47  ;;  %10938 = vmatpush.msrb.mxu2 %v10877_v47 }
 0x8e6   : > { %v17556_v61 = vpop.f32.mrf.mxu0 }
 0x8e7   : > { %v17561_v4 = vpop.f32.mrf.mxu1  ;;  %v17564_v29 = vadd.f32 %v9886_v0, %v17324_v57  ;;  %10400 = vmatmul.f32.gmra.mxu2 %v19331_v28  ;;  %v17572_v57 = vand.u32 4294901760, %v10341_v10  ;;  %v10879_v0 = vsub.f32 %v10877_v47, %v10878_v51  ;;  %11076 = vmatpush.msrb.mxu0 %v10878_v51  ;;  %v19339_v47 = vld [vmem:[#allocation24_spill] sm:$0xff] }
 0x8e9   : > { %10485 = vmatmul.f32.gmra.mxu3 %v19332_v56  ;;  %10543 = vmatmul.f32.gmra.mxu0 %v19333_v32  ;;  %v10880_v23 = vand.u32 4294901760, %v10879_v0  ;;  %v17583_v32 = vsub.f32 %v10341_v10, %v17572_v57 }
 0x8ea   : > { %10615 = vmatmul.f32.gmra.mxu1 %v19334_v38  ;;  %v9836_v6 = vpop.f32.mrf.mxu2  ;;  %v19335_v38 = vld [vmem:[#allocation48_spill] sm:$0xff] }
 0x8eb   : > { %v9837_v25 = vadd.f32 %v9836_v6, %v17444_v8  ;;  %19336 = vst [vmem:[#allocation19_spill] sm:$0xff] %v17583_v32  ;;  %10881 = vmatpush.msra.mxu1 %v10880_v23  ;;  %v19337_v8 = vld [vmem:[#allocation77_spill] sm:$0xff] }
 0x8ec   : > { %v9893_v50 = vpop.f32.mrf.mxu3  ;;  %v19338_v6 = vld [vmem:[#allocation41_spill] sm:$0xff] }
 0x8ed   : > { %v9890_v55 = vadd.f32 %v9889_v30, %v9837_v25  ;;  %11123 = vmatpush.msrb.mxu1 %v17452_v11 }
 0x8ee   : > { %v17574_v19 = vpop.f32.mrf.mxu0 }
 0x8ef   : > { %v17576_v28 = vpop.f32.mrf.mxu1  ;;  %v17579_v54 = vadd.f32 %v9890_v55, %v17353_v13  ;;  %10408 = vmatmul.f32.gmra.mxu2 %v19335_v38  ;;  %v17591_v13 = vand.u32 4294901760, %v17583_v32  ;;  %11125 = vmatpush.msrb.mxu1 %v17479_v31 }
 0x8f1   : > { %10489 = vmatmul.f32.gmra.mxu3 %v19337_v8  ;;  %10548 = vmatmul.f32.gmra.mxu0 %v19338_v6  ;;  %19340 = vst [vmem:[#allocation71_spill] sm:$0xff] %v17591_v13  ;;  %v10422_v11 = vsub.f32 %v17583_v32, %v17591_v13 }
 0x8f2   : > { %10621 = vmatmul.f32.gmra.mxu1 %v19339_v47  ;;  %v9840_v30 = vpop.f32.mrf.mxu2  ;;  %v19341_v47 = vld [vmem:[#allocation12_spill] sm:$0xff] }
 0x8f3   : > { %v9841_v51 = vadd.f32 %v9840_v30, %v17459_v40  ;;  %11127 = vmatpush.msrb.mxu1 %v17518_v45  ;;  %v19342_v40 = vld [vmem:[#allocation21_spill] sm:$0xff]  ;;  %v17609_v30 = vand.u32 4294901760, %v10422_v11 }
 0x8f4   : > { %v9897_v25 = vpop.f32.mrf.mxu3 }
 0x8f5   : > { %v9894_v10 = vadd.f32 %v9893_v50, %v9841_v51  ;;  %11129 = vmatpush.msrb.mxu1 %v10779_v58  ;;  %19343 = vst [vmem:[#allocation7_spill] sm:$0xff] %v17609_v30 }
 0x8f6   : > { %v17594_v0 = vpop.f32.mrf.mxu0 }
 0x8f7   : > { %v17596_v55 = vpop.f32.mrf.mxu1  ;;  %v17600_v23 = vadd.f32 %v9894_v10, %v17377_v34  ;;  %10416 = vmatmul.f32.gmra.mxu2 %v19341_v47 }
 0x8f9   : > { %10493 = vmatmul.f32.gmra.mxu3 %v17572_v57  ;;  %10553 = vmatmul.f32.gmra.mxu0 %v19342_v40 }
 0x8fa   : > { %10627 = vmatmul.f32.gmra.mxu1 %v17591_v13  ;;  %v9844_v31 = vpop.f32.mrf.mxu2 }
 0x8fb   : > { %v9845_v50 = vadd.f32 %v9844_v31, %v17471_v48 }
 0x8fc   : > { %v9901_v45 = vpop.f32.mrf.mxu3 }
 0x8fd   : > { %v9898_v34 = vadd.f32 %v9897_v25, %v9845_v50 }
 0x8fe   : > { %v17611_v51 = vpop.f32.mrf.mxu0 }
 0x8ff   : > { %v10294_v10 = vpop.f32.mrf.mxu1  ;;  %v17614_v6 = vadd.f32 %v9898_v34, %v17393_v3  ;;  %10424 = vmatmul.f32.gmra.mxu2 %v17609_v30  ;;  %v19344_v3 = vld [vmem:[#allocation53_spill] sm:$0xff]  ;;  %v10047_v34 = vadd.f32 %v17469_v33, %v17485_v5 }
 0x901   : > { %10558 = vmatmul.f32.gmra.mxu0 %v17583_v32  ;;  %10713 = vmatmul.f32.vlgmr.msra.gmra.mxu3 %v16830_v44 }
 0x902   : > { %10883 = vmatmul.f32.vlgmr.msra.gmra.mxu1 %v19262_v43  ;;  %v9848_v58 = vpop.f32.mrf.mxu2 }
 0x903   : > { %v9849_v48 = vadd.f32 %v9848_v58, %v17489_v39 }
 0x904   : > { %v10166_v11 = vpop.f32.mrf.mxu3 }
 0x905   : > { %v9902_v31 = vadd.f32 %v9901_v45, %v9849_v48 }
 0x906   : > { %v10241_v25 = vpop.f32.mrf.mxu0 }
 0x907   : > { %v10298_v50 = vpop.f32.mrf.mxu1  ;;  %v17622_v13 = vadd.f32 %v9902_v31, %v17408_v21  ;;  %10660 = vmatmul.f32.vlgmr.msra.gmra.mxu2 %v16830_v44  ;;  %v19345_v44 = vld [vmem:[#allocation65_spill] sm:$0xff]  ;;  %v10051_v21 = vadd.f32 %v17487_v24, %v17505_v9  ;;  %v10055_v24 = vadd.f32 %v17507_v36, %v17524_v15  ;;  %v10059_v15 = vadd.f32 %v17526_v53, %v17537_v26 }
 0x908   : > { %v10063_v53 = vadd.f32 %v17539_v52, %v17556_v61 }
 0x909   : > { %10717 = vmatmul.f32.gmra.mxu3 %v16855_v7  ;;  %10786 = vmatmul.f32.vlgmr.msra.gmra.mxu0 %v19344_v3 }
 0x90a   : > { %10887 = vmatmul.f32.gmra.mxu1 %v19266_v27  ;;  %v10104_v32 = vpop.f32.mrf.mxu2 }
 0x90b   : > { %v10105_v39 = vadd.f32 %v10104_v32, %v10047_v34 }
 0x90c   : > { %v10172_v58 = vpop.f32.mrf.mxu3 }
 0x90d   : > { %v10167_v45 = vadd.f32 %v10166_v11, %v10105_v39 }
 0x90e   : > { %v10245_v48 = vpop.f32.mrf.mxu0 }
 0x90f   : > { %v10302_v40 = vpop.f32.mrf.mxu1  ;;  %v10242_v30 = vadd.f32 %v10241_v25, %v10167_v45  ;;  %10664 = vmatmul.f32.gmra.mxu2 %v16855_v7  ;;  %v19346_v45 = vld [vmem:[#allocation36_spill] sm:$0xff] }
 0x911   : > { %10721 = vmatmul.f32.gmra.mxu3 %v16879_v14  ;;  %10794 = vmatmul.f32.gmra.mxu0 %v19345_v44  ;;  %v10295_v31 = vadd.f32 %v10294_v10, %v10242_v30 }
 0x912   : > { %10891 = vmatmul.f32.gmra.mxu1 %v19270_v60  ;;  %v10109_v33 = vpop.f32.mrf.mxu2 }
 0x913   : > { %v17637_v5 = vadd.f32 %v10295_v31, %v17510_v63  ;;  %v10110_v32 = vadd.f32 %v10109_v33, %v10051_v21  ;;  %v19347_v33 = vld [vmem:[#allocation47_spill] sm:$0xff] }
 0x914   : > { %v10178_v11 = vpop.f32.mrf.mxu3 }
 0x915   : > { %v10173_v3 = vadd.f32 %v10172_v58, %v10110_v32 }
 0x916   : > { %v10249_v25 = vpop.f32.mrf.mxu0 }
 0x917   : > { %v10306_v34 = vpop.f32.mrf.mxu1  ;;  %v10246_v39 = vadd.f32 %v10245_v48, %v10173_v3  ;;  %10668 = vmatmul.f32.gmra.mxu2 %v16879_v14 }
 0x919   : > { %10725 = vmatmul.f32.gmra.mxu3 %v19322_v42  ;;  %10802 = vmatmul.f32.gmra.mxu0 %v19346_v45  ;;  %v10299_v9 = vadd.f32 %v10298_v50, %v10246_v39  ;;  %v17658_v45 = vld [vmem:[%s16195_s11 + $0x90] sm:$0xff] }
 0x91a   : > { %10895 = vmatmul.f32.gmra.mxu1 %v19274_v1  ;;  %v10114_v63 = vpop.f32.mrf.mxu2 }
 0x91b   : > { %v17646_v30 = vadd.f32 %v10299_v9, %v17529_v35  ;;  %v10115_v10 = vadd.f32 %v10114_v63, %v10055_v24 }
 0x91c   : > { %v10184_v58 = vpop.f32.mrf.mxu3 }
 0x91d   : > { %v10179_v44 = vadd.f32 %v10178_v11, %v10115_v10 }
 0x91e   : > { %v10253_v48 = vpop.f32.mrf.mxu0 }
 0x91f   : > { %v10310_v21 = vpop.f32.mrf.mxu1  ;;  %v10250_v31 = vadd.f32 %v10249_v25, %v10179_v44  ;;  %10672 = vmatmul.f32.gmra.mxu2 %v19322_v42 }
 0x921   : > { %10729 = vmatmul.f32.gmra.mxu3 %v19326_v12  ;;  %10810 = vmatmul.f32.gmra.mxu0 %v19347_v33  ;;  %v10303_v36 = vadd.f32 %v10302_v40, %v10250_v31 }
 0x922   : > { %10899 = vmatmul.f32.gmra.mxu1 %v19279_v49  ;;  %v10119_v35 = vpop.f32.mrf.mxu2 }
 0x923   : > { %v17655_v50 = vadd.f32 %v10303_v36, %v17542_v16  ;;  %v10120_v32 = vadd.f32 %v10119_v35, %v10059_v15  ;;  %v10759_v16 = vsel %vm411_vm1, %v17658_v45, 0  ;;  %v10067_v15 = vadd.f32 %v17561_v4, %v17574_v19 }
 0x924   : > { %v10190_v11 = vpop.f32.mrf.mxu3 }
 0x925   : > { %v10185_v3 = vadd.f32 %v10184_v58, %v10120_v32  ;;  %v12337_v58 = vld [vmem:[%s18231_s3 + $0x338] sm:$0xff] }
 0x926   : > { %v10257_v25 = vpop.f32.mrf.mxu0  ;;  %v17676_v44 = vand.u32 4294901760, %v12337_v58 }
 0x927   : > { %v10314_v39 = vpop.f32.mrf.mxu1  ;;  %v10254_v24 = vadd.f32 %v10253_v48, %v10185_v3  ;;  %10676 = vmatmul.f32.gmra.mxu2 %v19326_v12 }
 0x928   : > { %11195 = vmatpush.msra.mxu2 %v17676_v44  ;;  %v17680_v48 = vsub.f32 %v12337_v58, %v17676_v44  ;;  %11414 = vmatpush.msra.mxu1 %v17676_v44 }
 0x929   : > { %10733 = vmatmul.f32.gmra.mxu3 %v19332_v56  ;;  %10818 = vmatmul.f32.gmra.mxu0 %v19282_v41  ;;  %v10307_v26 = vadd.f32 %v10306_v34, %v10254_v24  ;;  %v17674_v41 = vand.u32 4294901760, %v10759_v16 }
 0x92a   : > { %10903 = vmatmul.f32.gmra.mxu1 %v19284_v46  ;;  %v10124_v40 = vpop.f32.mrf.mxu2  ;;  %v11281_v33 = vand.u32 4294901760, %v17680_v48  ;;  %11350 = vmatpush.msra.mxu0 %v17680_v48 }
 0x92b   : > { %v17669_v9 = vadd.f32 %v10307_v26, %v17564_v29  ;;  %v10125_v63 = vadd.f32 %v10124_v40, %v10063_v53  ;;  %v17687_v31 = vsub.f32 %v10759_v16, %v17674_v41  ;;  %v12336_v26 = vld [vmem:[%s18231_s3 + $0x330] sm:$0xff] }
 0x92c   : > { %v10196_v10 = vpop.f32.mrf.mxu3  ;;  %v11282_v32 = vsub.f32 %v17680_v48, %v11281_v33  ;;  %v17710_v40 = vand.u32 4294901760, %v12336_v26 }
 0x92d   : > { %v10191_v61 = vadd.f32 %v10190_v11, %v10125_v63  ;;  %v10071_v63 = vadd.f32 %v17576_v28, %v17594_v0 }
 0x92e   : > { %v10261_v52 = vpop.f32.mrf.mxu0  ;;  %v11283_v24 = vand.u32 4294901760, %v11282_v32  ;;  %11197 = vmatpush.msra.mxu2 %v17710_v40  ;;  %11416 = vmatpush.msra.mxu1 %v17710_v40 }
 0x92f   : > { %v10318_v34 = vpop.f32.mrf.mxu1  ;;  %v10258_v29 = vadd.f32 %v10257_v25, %v10191_v61  ;;  %10680 = vmatmul.f32.gmra.mxu2 %v19332_v56  ;;  %v10839_v25 = vand.u32 4294901760, %v17687_v31  ;;  %v17717_v61 = vsub.f32 %v12336_v26, %v17710_v40 }
 0x930   : > { %11284 = vmatpush.msra.mxu3 %v11283_v24 }
 0x931   : > { %10737 = vmatmul.f32.gmra.mxu3 %v19337_v8  ;;  %10826 = vmatmul.f32.gmra.mxu0 %v19288_v59  ;;  %v10311_v36 = vadd.f32 %v10310_v21, %v10258_v29  ;;  %v10840_v16 = vsub.f32 %v17687_v31, %v10839_v25 }
 0x932   : > { %10907 = vmatmul.f32.gmra.mxu1 %v17225_v20  ;;  %v10129_v35 = vpop.f32.mrf.mxu2  ;;  %11353 = vmatpush.msra.mxu0 %v17717_v61 }
 0x933   : > { %v17698_v59 = vadd.f32 %v10311_v36, %v17579_v54  ;;  %v10130_v11 = vadd.f32 %v10129_v35, %v10067_v15  ;;  %v19348_v54 = vld [vmem:[#allocation38_spill] sm:$0xff]  ;;  %v10841_v36 = vand.u32 4294901760, %v10840_v16  ;;  %v11287_v35 = vand.u32 4294901760, %v17717_v61 }
 0x934   : > { %v10202_v3 = vpop.f32.mrf.mxu3 }
 0x935   : > { %v10197_v53 = vadd.f32 %v10196_v10, %v10130_v11  ;;  %v11288_v32 = vsub.f32 %v17717_v61, %v11287_v35 }
 0x936   : > { %v10265_v4 = vpop.f32.mrf.mxu0 }
 0x937   : > { %v10322_v19 = vpop.f32.mrf.mxu1  ;;  %v10262_v21 = vadd.f32 %v10261_v52, %v10197_v53  ;;  %10684 = vmatmul.f32.gmra.mxu2 %v19337_v8  ;;  %v11289_v24 = vand.u32 4294901760, %v11288_v32  ;;  %v10075_v53 = vadd.f32 %v17596_v55, %v17611_v51  ;;  %v12335_v55 = vld [vmem:[%s18231_s3 + $0x328] sm:$0xff]  ;;  %v19351_v51 = vld [vmem:[#allocation69_spill] sm:$0xff] }
 0x939   : > { %10741 = vmatmul.f32.gmra.mxu3 %v17572_v57  ;;  %10834 = vmatmul.f32.gmra.mxu0 %v19348_v54  ;;  %v10315_v10 = vadd.f32 %v10314_v39, %v10262_v21 }
 0x93a   : > { %10911 = vmatmul.f32.gmra.mxu1 %v17674_v41  ;;  %v10134_v58 = vpop.f32.mrf.mxu2  ;;  %11290 = vmatpush.msra.mxu3 %v11289_v24 }
 0x93b   : > { %v17721_v52 = vadd.f32 %v10315_v10, %v17600_v23  ;;  %v10135_v29 = vadd.f32 %v10134_v58, %v10071_v63  ;;  %v19349_v23 = vld [vmem:[#allocation54_spill] sm:$0xff] }
 0x93c   : > { %v10208_v15 = vpop.f32.mrf.mxu3 }
 0x93d   : > { %v10203_v28 = vadd.f32 %v10202_v3, %v10135_v29  ;;  %v19350_v29 = vld [vmem:[#allocation59_spill] sm:$0xff] }
 0x93e   : > { %v10269_v0 = vpop.f32.mrf.mxu0 }
 0x93f   : > { %v10586_v39 = vpop.f32.mrf.mxu1  ;;  %v10266_v11 = vadd.f32 %v10265_v4, %v10203_v28  ;;  %10688 = vmatmul.f32.gmra.mxu2 %v17572_v57 }
 0x941   : > { %10842 = vmatmul.f32.gmra.mxu0 %v10841_v36  ;;  %11003 = vmatmul.f32.vlgmr.msrb.gmra.mxu3 %v19349_v23  ;;  %v10319_v21 = vadd.f32 %v10318_v34, %v10266_v11  ;;  %v17742_v34 = vand.u32 4294901760, %v12335_v55 }
 0x942   : > { %11131 = vmatmul.f32.vlgmr.msrb.gmra.mxu1 %v19262_v43  ;;  %v10139_v3 = vpop.f32.mrf.mxu2 }
 0x943   : > { %v17734_v26 = vadd.f32 %v10319_v21, %v17614_v6  ;;  %v10140_v54 = vadd.f32 %v10139_v3, %v10075_v53  ;;  %11199 = vmatpush.msra.mxu2 %v17742_v34  ;;  %11418 = vmatpush.msra.mxu1 %v17742_v34  ;;  %v19352_v21 = vld [vmem:[#allocation3_spill] sm:$0xff] }
 0x944   : > { %v10466_v16 = vpop.f32.mrf.mxu3  ;;  %v19353_v3 = vld [vmem:[#allocation39_spill] sm:$0xff] }
 0x945   : > { %v10209_v4 = vadd.f32 %v10208_v15, %v10140_v54  ;;  %v11292_v15 = vsub.f32 %v12335_v55, %v17742_v34 }
 0x946   : > { %v10524_v63 = vpop.f32.mrf.mxu0 }
 0x947   : > { %v10592_v10 = vpop.f32.mrf.mxu1  ;;  %v10270_v58 = vadd.f32 %v10269_v0, %v10209_v4  ;;  %10941 = vmatmul.f32.vlgmr.msrb.gmra.mxu2 %v19350_v29  ;;  %v11293_v11 = vand.u32 4294901760, %v11292_v15  ;;  %11356 = vmatpush.msra.mxu0 %v11292_v15 }
 0x949   : > { %11009 = vmatmul.f32.gmra.mxu3 %v19351_v51  ;;  %11078 = vmatmul.f32.vlgmr.msrb.gmra.mxu0 %v19262_v43  ;;  %v10323_v6 = vadd.f32 %v10322_v19, %v10270_v58  ;;  %v11294_v19 = vsub.f32 %v11292_v15, %v11293_v11  ;;  %v12334_v51 = vld [vmem:[%s18231_s3 + $0x320] sm:$0xff] }
 0x94a   : > { %11135 = vmatmul.f32.gmra.mxu1 %v19266_v27  ;;  %v10369_v36 = vpop.f32.mrf.mxu2 }
 0x94b   : > { %v17749_v28 = vadd.f32 %v10323_v6, %v17622_v13  ;;  %v10467_v0 = vadd.f32 %v10466_v16, %v10369_v36  ;;  %v11295_v54 = vand.u32 4294901760, %v11294_v19  ;;  %v19355_v6 = vld [vmem:[#allocation49_spill] sm:$0xff] }
 0x94c   : > { %v10470_v32 = vpop.f32.mrf.mxu3 }
 0x94d   : > { %v10525_v43 = vadd.f32 %v10524_v63, %v10467_v0  ;;  %11296 = vmatpush.msra.mxu3 %v11295_v54  ;;  %v19357_v54 = vld [vmem:[#allocation43_spill] sm:$0xff] }
 0x94e   : > { %v10529_v23 = vpop.f32.mrf.mxu0 }
 0x94f   : > { %v10598_v24 = vpop.f32.mrf.mxu1  ;;  %v17751_v53 = vadd.f32 %v10586_v39, %v10525_v43  ;;  %10946 = vmatmul.f32.gmra.mxu2 %v19352_v21  ;;  %v19354_v39 = vld [vmem:[#allocation9_spill] sm:$0xff] }
 0x951   : > { %11015 = vmatmul.f32.gmra.mxu3 %v19353_v3  ;;  %11082 = vmatmul.f32.gmra.mxu0 %v19266_v27  ;;  %v11200_v27 = vand.u32 4294901760, %v12334_v51  ;;  %v19356_v3 = vld [vmem:[#allocation62_spill] sm:$0xff] }
 0x952   : > { %11139 = vmatmul.f32.gmra.mxu1 %v19270_v60  ;;  %v10377_v13 = vpop.f32.mrf.mxu2 }
 0x953   : > { %v10471_v16 = vadd.f32 %v10470_v32, %v10377_v13  ;;  %11201 = vmatpush.msra.mxu2 %v11200_v27  ;;  %v11298_v15 = vsub.f32 %v12334_v51, %v11200_v27  ;;  %11420 = vmatpush.msra.mxu1 %v11200_v27 }
 0x954   : > { %v10474_v4 = vpop.f32.mrf.mxu3 }
 0x955   : > { %v10530_v58 = vadd.f32 %v10529_v23, %v10471_v16  ;;  %11485 = vmatpush.msrb.mxu2 %v11281_v33  ;;  %v11299_v32 = vand.u32 4294901760, %v11298_v15  ;;  %11359 = vmatpush.msra.mxu0 %v11298_v15 }
 0x956   : > { %v10534_v63 = vpop.f32.mrf.mxu0 }
 0x957   : > { %v10604_v29 = vpop.f32.mrf.mxu1  ;;  %v17757_v55 = vadd.f32 %v10592_v10, %v10530_v58  ;;  %10951 = vmatmul.f32.gmra.mxu2 %v19354_v39  ;;  %v11300_v19 = vsub.f32 %v11298_v15, %v11299_v32  ;;  %v19358_v58 = vld [vmem:[#allocation45_spill] sm:$0xff] }
 0x958   : > { %11489 = vmatpush.msrb.mxu2 %v11287_v35 }
 0x959   : > { %11021 = vmatmul.f32.gmra.mxu3 %v19355_v6  ;;  %11086 = vmatmul.f32.gmra.mxu0 %v19270_v60  ;;  %v11301_v13 = vand.u32 4294901760, %v11300_v19  ;;  %v19362_v19 = vld [vmem:[#allocation23_spill] sm:$0xff] }
 0x95a   : > { %11143 = vmatmul.f32.gmra.mxu1 %v19274_v1  ;;  %v10385_v36 = vpop.f32.mrf.mxu2  ;;  %11493 = vmatpush.msrb.mxu2 %v11293_v11 }
 0x95b   : > { %v10475_v0 = vadd.f32 %v10474_v4, %v10385_v36  ;;  %11302 = vmatpush.msra.mxu3 %v11301_v13  ;;  %v19361_v36 = vld [vmem:[#allocation30_spill] sm:$0xff] }
 0x95c   : > { %v10478_v10 = vpop.f32.mrf.mxu3  ;;  %11497 = vmatpush.msrb.mxu2 %v11299_v32 }
 0x95d   : > { %v10535_v43 = vadd.f32 %v10534_v63, %v10475_v0  ;;  %11544 = vmatpush.msrb.mxu3 %v17676_v44 }
 0x95e   : > { %v10539_v23 = vpop.f32.mrf.mxu0 }
 0x95f   : > { %v10610_v60 = vpop.f32.mrf.mxu1  ;;  %v17770_v21 = vadd.f32 %v10598_v24, %v10535_v43  ;;  %10956 = vmatmul.f32.gmra.mxu2 %v19356_v3  ;;  %11546 = vmatpush.msrb.mxu3 %v17710_v40 }
 0x961   : > { %11027 = vmatmul.f32.gmra.mxu3 %v19357_v54  ;;  %11090 = vmatmul.f32.gmra.mxu0 %v19274_v1  ;;  %v19359_v1 = vld [vmem:[#allocation51_spill] sm:$0xff] }
 0x962   : > { %11147 = vmatmul.f32.gmra.mxu1 %v19279_v49  ;;  %v10393_v48 = vpop.f32.mrf.mxu2  ;;  %11548 = vmatpush.msrb.mxu3 %v17742_v34  ;;  %v12341_v34 = vld [vmem:[%s18231_s3 + $0x358] sm:$0xff] }
 0x963   : > { %v10479_v33 = vadd.f32 %v10478_v10, %v10393_v48 }
 0x964   : > { %v10482_v16 = vpop.f32.mrf.mxu3  ;;  %11550 = vmatpush.msrb.mxu3 %v11200_v27 }
 0x965   : > { %v10540_v61 = vadd.f32 %v10539_v23, %v10479_v33 }
 0x966   : > { %v10544_v35 = vpop.f32.mrf.mxu0 }
 0x967   : > { %v10616_v24 = vpop.f32.mrf.mxu1  ;;  %v17778_v4 = vadd.f32 %v10604_v29, %v10540_v61  ;;  %10961 = vmatmul.f32.gmra.mxu2 %v19358_v58  ;;  %v19360_v29 = vld [vmem:[#allocation35_spill] sm:$0xff] }
 0x969   : > { %11033 = vmatmul.f32.gmra.mxu3 %v19359_v1  ;;  %11094 = vmatmul.f32.gmra.mxu0 %v19279_v49  ;;  %v17793_v49 = vand.u32 4294901760, %v12341_v34 }
 0x96a   : > { %11151 = vmatmul.f32.gmra.mxu1 %v19284_v46  ;;  %v10401_v44 = vpop.f32.mrf.mxu2 }
 0x96b   : > { %v10483_v11 = vadd.f32 %v10482_v16, %v10401_v44  ;;  %11615 = vmatpush.msrb.mxu0 %v17793_v49  ;;  %v17798_v10 = vsub.f32 %v12341_v34, %v17793_v49 }
 0x96c   : > { %v10486_v63 = vpop.f32.mrf.mxu3 }
 0x96d   : > { %v10545_v39 = vadd.f32 %v10544_v35, %v10483_v11 }
 0x96e   : > { %v10549_v51 = vpop.f32.mrf.mxu0 }
 0x96f   : > { %v10622_v40 = vpop.f32.mrf.mxu1  ;;  %v17785_v6 = vadd.f32 %v10610_v60, %v10545_v39  ;;  %10966 = vmatmul.f32.gmra.mxu2 %v19360_v29  ;;  %v19363_v39 = vld [vmem:[#allocation72_spill] sm:$0xff] }
 0x971   : > { %11039 = vmatmul.f32.gmra.mxu3 %v19361_v36  ;;  %11098 = vmatmul.f32.gmra.mxu0 %v19284_v46  ;;  %v11701_v46 = vand.u32 4294901760, %v17798_v10 }
 0x972   : > { %11155 = vmatmul.f32.gmra.mxu1 %v17225_v20  ;;  %v10409_v27 = vpop.f32.mrf.mxu2 }
 0x973   : > { %v10487_v15 = vadd.f32 %v10486_v63, %v10409_v27  ;;  %v11702_v3 = vsub.f32 %v17798_v10, %v11701_v46 }
 0x974   : > { %v10490_v0 = vpop.f32.mrf.mxu3 }
 0x975   : > { %v10550_v32 = vadd.f32 %v10549_v51, %v10487_v15  ;;  %v11703_v33 = vand.u32 4294901760, %v11702_v3 }
 0x976   : > { %v10554_v43 = vpop.f32.mrf.mxu0 }
 0x977   : > { %v10628_v23 = vpop.f32.mrf.mxu1  ;;  %v17800_v60 = vadd.f32 %v10616_v24, %v10550_v32  ;;  %10971 = vmatmul.f32.gmra.mxu2 %v19362_v19  ;;  %11704 = vmatpush.msrb.mxu1 %v11703_v33  ;;  %v19364_v32 = vld [vmem:[#allocation44_spill] sm:$0xff]  ;;  %v19366_v19 = vld [vmem:[#allocation50_spill] sm:$0xff] }
 0x979   : > { %11045 = vmatmul.f32.gmra.mxu3 %v10839_v25  ;;  %11102 = vmatmul.f32.gmra.mxu0 %v17225_v20  ;;  %v12340_v20 = vld [vmem:[%s18231_s3 + $0x350] sm:$0xff] }
 0x97a   : > { %11159 = vmatmul.f32.gmra.mxu1 %v17674_v41  ;;  %v10417_v54 = vpop.f32.mrf.mxu2  ;;  %v17821_v25 = vand.u32 4294901760, %v12340_v20 }
 0x97b   : > { %v10491_v13 = vadd.f32 %v10490_v0, %v10417_v54 }
 0x97c   : > { %v10494_v48 = vpop.f32.mrf.mxu3  ;;  %11617 = vmatpush.msrb.mxu0 %v17821_v25 }
 0x97d   : > { %v10555_v16 = vadd.f32 %v10554_v43, %v10491_v13  ;;  %v19365_v43 = vld [vmem:[#allocation17_spill] sm:$0xff] }
 0x97e   : > { %v10559_v61 = vpop.f32.mrf.mxu0 }
 0x97f   : > { %v17811_v35 = vpop.f32.mrf.mxu1  ;;  %v17813_v24 = vadd.f32 %v10622_v40, %v10555_v16  ;;  %10976 = vmatmul.f32.gmra.mxu2 %v17687_v31 }
 0x981   : > { %11106 = vmatmul.f32.gmra.mxu0 %v17674_v41  ;;  %11304 = vmatmul.f32.vlgmr.msra.gmra.mxu3 %v16593_v62 }
 0x982   : > { %11424 = vmatmul.f32.vlgmr.msra.gmra.mxu1 %v19303_v2  ;;  %11834 = vmatpush.msra.mxu3 %v17793_v49  ;;  %v10425_v58 = vpop.f32.mrf.mxu2  ;;  %v17835_v2 = vsub.f32 %v12340_v20, %v17821_v25 }
 0x983   : > { %v10495_v1 = vadd.f32 %v10494_v48, %v10425_v58  ;;  %v19368_v58 = vld [vmem:[#allocation25_spill] sm:$0xff] }
 0x984   : > { %v10714_v44 = vpop.f32.mrf.mxu3  ;;  %11836 = vmatpush.msra.mxu3 %v17821_v25  ;;  %v11707_v51 = vand.u32 4294901760, %v17835_v2 }
 0x985   : > { %v10560_v31 = vadd.f32 %v10559_v61, %v10495_v1  ;;  %v19367_v61 = vld [vmem:[#allocation73_spill] sm:$0xff] }
 0x986   : > { %v17827_v11 = vpop.f32.mrf.mxu0  ;;  %v19369_v1 = vld [vmem:[#allocation13_spill] sm:$0xff] }
 0x987   : > { %v17829_v63 = vpop.f32.mrf.mxu1  ;;  %v17831_v41 = vadd.f32 %v10628_v23, %v10560_v31  ;;  %11207 = vmatmul.f32.vlgmr.msra.gmra.mxu2 %v19292_v37  ;;  %v11708_v37 = vsub.f32 %v17835_v2, %v11707_v51 }
 0x988   : > { %11770 = vmatpush.msra.mxu2 %v17798_v10  ;;  %v19377_v10 = vld [vmem:[#allocation15_spill] sm:$0xff] }
 0x989   : > { %11308 = vmatmul.f32.gmra.mxu3 %v16621_v18  ;;  %11362 = vmatmul.f32.vlgmr.msra.gmra.mxu0 %v19304_v17  ;;  %v11709_v17 = vand.u32 4294901760, %v11708_v37 }
 0x98a   : > { %11430 = vmatmul.f32.gmra.mxu1 %v19363_v39  ;;  %v10661_v40 = vpop.f32.mrf.mxu2  ;;  %11773 = vmatpush.msra.mxu2 %v17835_v2 }
 0x98b   : > { %v10662_v29 = vadd.f32 %v10661_v40, %v17751_v53  ;;  %11710 = vmatpush.msrb.mxu1 %v11709_v17  ;;  %v12339_v53 = vld [vmem:[%s18231_s3 + $0x348] sm:$0xff]  ;;  %v17884_v17 = vld [vmem:[%s16195_s11 + $0x98] sm:$0x3] }
 0x98c   : > { %v10718_v34 = vpop.f32.mrf.mxu3  ;;  %v17860_v23 = vand.u32 4294901760, %v12339_v53 }
 0x98d   : > { %v10715_v36 = vadd.f32 %v10714_v44, %v10662_v29  ;;  %v19370_v44 = vld [vmem:[#allocation26_spill] sm:$0xff] }
 0x98e   : > { %v17847_v27 = vpop.f32.mrf.mxu0  ;;  %11619 = vmatpush.msrb.mxu0 %v17860_v23  ;;  %11838 = vmatpush.msra.mxu3 %v17860_v23  ;;  %v11712_v20 = vsub.f32 %v12339_v53, %v17860_v23  ;;  %v19371_v53 = vld [vmem:[#allocation16_spill] sm:$0xff] }
 0x98f   : > { %v17849_v15 = vpop.f32.mrf.mxu1  ;;  %v17852_v0 = vadd.f32 %v10715_v36, %v17637_v5  ;;  %11215 = vmatmul.f32.gmra.mxu2 %v19364_v32 }
 0x990   : > { %11776 = vmatpush.msra.mxu2 %v11712_v20 }
 0x991   : > { %11312 = vmatmul.f32.gmra.mxu3 %v16669_v22  ;;  %11367 = vmatmul.f32.gmra.mxu0 %v19365_v43  ;;  %v19372_v43 = vld [vmem:[#allocation29_spill] sm:$0xff] }
 0x992   : > { %11436 = vmatmul.f32.gmra.mxu1 %v19366_v19  ;;  %v10665_v3 = vpop.f32.mrf.mxu2  ;;  %v19373_v19 = vld [vmem:[#allocation46_spill] sm:$0xff] }
 0x993   : > { %v10666_v5 = vadd.f32 %v10665_v3, %v17757_v55  ;;  %v11713_v55 = vand.u32 4294901760, %v11712_v20 }
 0x994   : > { %v10722_v54 = vpop.f32.mrf.mxu3 }
 0x995   : > { %v10719_v13 = vadd.f32 %v10718_v34, %v10666_v5  ;;  %v11714_v29 = vsub.f32 %v11712_v20, %v11713_v55  ;;  %v11172_v5 = vrot.slane %v17658_v45, 1 }
 0x996   : > { %v17866_v48 = vpop.f32.mrf.mxu0 }
 0x997   : > { %v17868_v33 = vpop.f32.mrf.mxu1  ;;  %v17871_v16 = vadd.f32 %v10719_v13, %v17646_v30  ;;  %11223 = vmatmul.f32.gmra.mxu2 %v19367_v61  ;;  %v11715_v37 = vand.u32 4294901760, %v11714_v29  ;;  %v11173_v13 = vrot.slane %v17884_v17, 1 }
 0x999   : > { %11316 = vmatmul.f32.gmra.mxu3 %v19368_v58  ;;  %11372 = vmatmul.f32.gmra.mxu0 %v19369_v1 }
 0x99a   : > { %11442 = vmatmul.f32.gmra.mxu1 %v19370_v44  ;;  %v10669_v31 = vpop.f32.mrf.mxu2 }
 0x99b   : > { %v10670_v39 = vadd.f32 %v10669_v31, %v17770_v21  ;;  %11716 = vmatpush.msrb.mxu1 %v11715_v37  ;;  %v12338_v21 = vld [vmem:[%s18231_s3 + $0x340] sm:$0xff]  ;;  %v11174_v31 = vsel %vm381_vm0, %v11172_v5, %v11173_v13  ;;  %v19376_v37 = vld [vmem:[#allocation28_spill] sm:$0xff] }
 0x99c   : > { %v10726_v40 = vpop.f32.mrf.mxu3  ;;  %v11620_v3 = vand.u32 4294901760, %v12338_v21 }
 0x99d   : > { %v10723_v30 = vadd.f32 %v10722_v54, %v10670_v39  ;;  %v19374_v54 = vld [vmem:[#allocation6_spill] sm:$0xff] }
 0x99e   : > { %v17879_v34 = vpop.f32.mrf.mxu0  ;;  %11621 = vmatpush.msrb.mxu0 %v11620_v3  ;;  %11840 = vmatpush.msra.mxu3 %v11620_v3 }
 0x99f   : > { %v17881_v36 = vpop.f32.mrf.mxu1  ;;  %v17887_v32 = vadd.f32 %v10723_v30, %v17655_v50  ;;  %11231 = vmatmul.f32.gmra.mxu2 %v19371_v53  ;;  %v19375_v30 = vld [vmem:[#allocation2_spill] sm:$0xff] }
 0x9a0   : > { %11905 = vmatpush.msra.mxu0 %v11701_v46  ;;  %v11180_v46 = vsel %vm411_vm1, %v11174_v31, 0  ;;  %v19381_v31 = vld [vmem:[#allocation14_spill] sm:$0xff] }
 0x9a1   : > { %11320 = vmatmul.f32.gmra.mxu3 %v19372_v43  ;;  %11377 = vmatmul.f32.gmra.mxu0 %v19373_v19 }
 0x9a2   : > { %11448 = vmatmul.f32.gmra.mxu1 %v19374_v54  ;;  %v10673_v50 = vpop.f32.mrf.mxu2  ;;  %11909 = vmatpush.msra.mxu0 %v11707_v51 }
 0x9a3   : > { %v10674_v61 = vadd.f32 %v10673_v50, %v17778_v4  ;;  %v11718_v4 = vsub.f32 %v12338_v21, %v11620_v3 }
 0x9a4   : > { %v10730_v20 = vpop.f32.mrf.mxu3  ;;  %11913 = vmatpush.msra.mxu0 %v11713_v55 }
 0x9a5   : > { %v10727_v1 = vadd.f32 %v10726_v40, %v10674_v61  ;;  %v19378_v40 = vld [vmem:[#allocation22_spill] sm:$0xff]  ;;  %v11719_v53 = vand.u32 4294901760, %v11718_v4  ;;  %11779 = vmatpush.msra.mxu2 %v11718_v4  ;;  %v19379_v61 = vld [vmem:[#allocation8_spill] sm:$0xff] }
 0x9a6   : > { %v17901_v44 = vpop.f32.mrf.mxu0 }
 0x9a7   : > { %v17906_v39 = vpop.f32.mrf.mxu1  ;;  %v17909_v29 = vadd.f32 %v10727_v1, %v17669_v9  ;;  %11239 = vmatmul.f32.gmra.mxu2 %v19375_v30  ;;  %v17917_v9 = vand.u32 4294901760, %v11180_v46  ;;  %v11720_v5 = vsub.f32 %v11718_v4, %v11719_v53  ;;  %11917 = vmatpush.msra.mxu0 %v11719_v53  ;;  %v19382_v30 = vld [vmem:[#allocation56_spill] sm:$0xff] }
 0x9a9   : > { %11324 = vmatmul.f32.gmra.mxu3 %v19376_v37  ;;  %11382 = vmatmul.f32.gmra.mxu0 %v19377_v10  ;;  %v11721_v54 = vand.u32 4294901760, %v11720_v5  ;;  %v11259_v1 = vsub.f32 %v11180_v46, %v17917_v9 }
 0x9aa   : > { %11454 = vmatmul.f32.gmra.mxu1 %v19378_v40  ;;  %v10677_v2 = vpop.f32.mrf.mxu2 }
 0x9ab   : > { %v10678_v51 = vadd.f32 %v10677_v2, %v17785_v6  ;;  %11722 = vmatpush.msrb.mxu1 %v11721_v54  ;;  %v19380_v6 = vld [vmem:[#allocation5_spill] sm:$0xff]  ;;  %v11260_v40 = vand.u32 4294901760, %v11259_v1 }
 0x9ac   : > { %v10734_v19 = vpop.f32.mrf.mxu3 }
 0x9ad   : > { %v10731_v21 = vadd.f32 %v10730_v20, %v10678_v51  ;;  %11964 = vmatpush.msra.mxu1 %v17793_v49  ;;  %v19383_v51 = vld [vmem:[#allocation55_spill] sm:$0xff]  ;;  %v11261_v5 = vsub.f32 %v11259_v1, %v11260_v40  ;;  %v19384_v49 = vld [vmem:[#allocation18_spill] sm:$0xff] }
 0x9ae   : > { %v17919_v55 = vpop.f32.mrf.mxu0 }
 0x9af   : > { %v17921_v13 = vpop.f32.mrf.mxu1  ;;  %v17924_v50 = vadd.f32 %v10731_v21, %v17698_v59  ;;  %11247 = vmatmul.f32.gmra.mxu2 %v19379_v61  ;;  %11966 = vmatpush.msra.mxu1 %v17821_v25 }
 0x9b1   : > { %11328 = vmatmul.f32.gmra.mxu3 %v19380_v6  ;;  %11387 = vmatmul.f32.gmra.mxu0 %v19381_v31 }
 0x9b2   : > { %11460 = vmatmul.f32.gmra.mxu1 %v19382_v30  ;;  %v10681_v20 = vpop.f32.mrf.mxu2 }
 0x9b3   : > { %v10682_v4 = vadd.f32 %v10681_v20, %v17800_v60  ;;  %11968 = vmatpush.msra.mxu1 %v17860_v23 }
 0x9b4   : > { %v10738_v10 = vpop.f32.mrf.mxu3 }
 0x9b5   : > { %v10735_v59 = vadd.f32 %v10734_v19, %v10682_v4  ;;  %11970 = vmatpush.msra.mxu1 %v11620_v3  ;;  %v11262_v19 = vand.u32 4294901760, %v11261_v5 }
 0x9b6   : > { %v17934_v53 = vpop.f32.mrf.mxu0 }
 0x9b7   : > { %v17936_v46 = vpop.f32.mrf.mxu1  ;;  %v17940_v2 = vadd.f32 %v10735_v59, %v17721_v52  ;;  %11255 = vmatmul.f32.gmra.mxu2 %v19383_v51 }
 0x9b9   : > { %11332 = vmatmul.f32.gmra.mxu3 %v17917_v9  ;;  %11392 = vmatmul.f32.gmra.mxu0 %v19384_v49 }
 0x9ba   : > { %11466 = vmatmul.f32.gmra.mxu1 %v11260_v40  ;;  %v10685_v60 = vpop.f32.mrf.mxu2 }
 0x9bb   : > { %v10686_v25 = vadd.f32 %v10685_v60, %v17813_v24 }
 0x9bc   : > { %v10742_v21 = vpop.f32.mrf.mxu3 }
 0x9bd   : > { %v10739_v54 = vadd.f32 %v10738_v10, %v10686_v25 }
 0x9be   : > { %v17946_v61 = vpop.f32.mrf.mxu0 }
 0x9bf   : > { %v11132_v23 = vpop.f32.mrf.mxu1  ;;  %v17949_v52 = vadd.f32 %v10739_v54, %v17734_v26  ;;  %11263 = vmatmul.f32.gmra.mxu2 %v11262_v19  ;;  %v19385_v26 = vld [vmem:[#allocation52_spill] sm:$0xff] }
 0x9c1   : > { %11397 = vmatmul.f32.gmra.mxu0 %v11259_v1  ;;  %11552 = vmatmul.f32.vlgmr.msrb.gmra.mxu3 %v16593_v62  ;;  %v10885_v1 = vadd.f32 %v17811_v35, %v17827_v11 }
 0x9c2   : > { %11724 = vmatmul.f32.vlgmr.msrb.gmra.mxu1 %v16855_v7  ;;  %v10689_v31 = vpop.f32.mrf.mxu2 }
 0x9c3   : > { %v10690_v3 = vadd.f32 %v10689_v31, %v17831_v41 }
 0x9c4   : > { %v11004_v30 = vpop.f32.mrf.mxu3 }
 0x9c5   : > { %v10743_v24 = vadd.f32 %v10742_v21, %v10690_v3 }
 0x9c6   : > { %v11079_v20 = vpop.f32.mrf.mxu0 }
 0x9c7   : > { %v11136_v4 = vpop.f32.mrf.mxu1  ;;  %v17955_v10 = vadd.f32 %v10743_v24, %v17749_v28  ;;  %11499 = vmatmul.f32.vlgmr.msrb.gmra.mxu2 %v16593_v62  ;;  %v19386_v62 = vld [vmem:[#allocation58_spill] sm:$0xff]  ;;  %v10889_v28 = vadd.f32 %v17829_v63, %v17847_v27  ;;  %v10893_v63 = vadd.f32 %v17849_v15, %v17866_v48  ;;  %v10897_v15 = vadd.f32 %v17868_v33, %v17879_v34 }
 0x9c9   : > { %11556 = vmatmul.f32.gmra.mxu3 %v16621_v18  ;;  %11627 = vmatmul.f32.vlgmr.msrb.gmra.mxu0 %v19385_v26 }
 0x9ca   : > { %11728 = vmatmul.f32.gmra.mxu1 %v16879_v14  ;;  %v10942_v40 = vpop.f32.mrf.mxu2 }
 0x9cb   : > { %v10943_v41 = vadd.f32 %v10942_v40, %v10885_v1 }
 0x9cc   : > { %v11010_v59 = vpop.f32.mrf.mxu3 }
 0x9cd   : > { %v11005_v51 = vadd.f32 %v11004_v30, %v10943_v41  ;;  %v19387_v30 = vld [vmem:[#allocation64_spill] sm:$0xff] }
 0x9ce   : > { %v11083_v5 = vpop.f32.mrf.mxu0  ;;  %v19388_v41 = vld [vmem:[#allocation4_spill] sm:$0xff] }
 0x9cf   : > { %v11140_v49 = vpop.f32.mrf.mxu1  ;;  %v11080_v60 = vadd.f32 %v11079_v20, %v11005_v51  ;;  %11503 = vmatmul.f32.gmra.mxu2 %v16621_v18 }
 0x9d1   : > { %11560 = vmatmul.f32.gmra.mxu3 %v16669_v22  ;;  %11635 = vmatmul.f32.gmra.mxu0 %v19386_v62  ;;  %v11133_v25 = vadd.f32 %v11132_v23, %v11080_v60 }
 0x9d2   : > { %11732 = vmatmul.f32.gmra.mxu1 %v19322_v42  ;;  %v10947_v35 = vpop.f32.mrf.mxu2 }
 0x9d3   : > { %v17970_v11 = vadd.f32 %v11133_v25, %v17852_v0  ;;  %v10948_v19 = vadd.f32 %v10947_v35, %v10889_v28 }
 0x9d4   : > { %v11016_v21 = vpop.f32.mrf.mxu3 }
 0x9d5   : > { %v11011_v54 = vadd.f32 %v11010_v59, %v10948_v19  ;;  %v11593_v59 = vrot.slane %v17884_v17, 2 }
 0x9d6   : > { %v11087_v31 = vpop.f32.mrf.mxu0 }
 0x9d7   : > { %v11144_v3 = vpop.f32.mrf.mxu1  ;;  %v11084_v18 = vadd.f32 %v11083_v5, %v11011_v54  ;;  %11507 = vmatmul.f32.gmra.mxu2 %v16669_v22 }
 0x9d9   : > { %11564 = vmatmul.f32.gmra.mxu3 %v19368_v58  ;;  %11643 = vmatmul.f32.gmra.mxu0 %v19387_v30  ;;  %v11137_v27 = vadd.f32 %v11136_v4, %v11084_v18 }
 0x9da   : > { %11736 = vmatmul.f32.gmra.mxu1 %v19326_v12  ;;  %v10952_v0 = vpop.f32.mrf.mxu2 }
 0x9db   : > { %v17979_v23 = vadd.f32 %v11137_v27, %v17871_v16  ;;  %v10953_v24 = vadd.f32 %v10952_v0, %v10893_v63  ;;  %v11592_v16 = vrot.slane %v17658_v45, 2  ;;  %v10901_v45 = vadd.f32 %v17881_v36, %v17901_v44 }
 0x9dc   : > { %v11022_v20 = vpop.f32.mrf.mxu3  ;;  %v10905_v44 = vadd.f32 %v17906_v39, %v17919_v55  ;;  %v19389_v39 = vld [vmem:[#allocation7_spill] sm:$0xff] }
 0x9dd   : > { %v11017_v26 = vadd.f32 %v11016_v21, %v10953_v24  ;;  %v11594_v25 = vsel %vm1248_vm2, %v11592_v16, %v11593_v59 }
 0x9de   : > { %v11091_v1 = vpop.f32.mrf.mxu0  ;;  %v11600_v34 = vsel %vm411_vm1, %v11594_v25, 0 }
 0x9df   : > { %v11148_v40 = vpop.f32.mrf.mxu1  ;;  %v11088_v22 = vadd.f32 %v11087_v31, %v11017_v26  ;;  %11511 = vmatmul.f32.gmra.mxu2 %v19368_v58  ;;  %v18003_v21 = vand.u32 4294901760, %v11600_v34 }
 0x9e1   : > { %11568 = vmatmul.f32.gmra.mxu3 %v19372_v43  ;;  %11651 = vmatmul.f32.gmra.mxu0 %v19388_v41  ;;  %v11141_v48 = vadd.f32 %v11140_v49, %v11088_v22  ;;  %v18009_v36 = vsub.f32 %v11600_v34, %v18003_v21 }
 0x9e2   : > { %11740 = vmatmul.f32.gmra.mxu1 %v19332_v56  ;;  %v10957_v4 = vpop.f32.mrf.mxu2 }
 0x9e3   : > { %v17990_v51 = vadd.f32 %v11141_v48, %v17887_v32  ;;  %v10958_v5 = vadd.f32 %v10957_v4, %v10897_v15  ;;  %v19390_v4 = vld [vmem:[#allocation61_spill] sm:$0xff] }
 0x9e4   : > { %v11028_v58 = vpop.f32.mrf.mxu3 }
 0x9e5   : > { %v11023_v60 = vadd.f32 %v11022_v20, %v10958_v5 }
 0x9e6   : > { %v11095_v62 = vpop.f32.mrf.mxu0 }
 0x9e7   : > { %v11152_v28 = vpop.f32.mrf.mxu1  ;;  %v11092_v35 = vadd.f32 %v11091_v1, %v11023_v60  ;;  %11515 = vmatmul.f32.gmra.mxu2 %v19372_v43 }
 0x9e9   : > { %11572 = vmatmul.f32.gmra.mxu3 %v19376_v37  ;;  %11659 = vmatmul.f32.gmra.mxu0 %v19335_v38  ;;  %v11145_v33 = vadd.f32 %v11144_v3, %v11092_v35  ;;  %v19392_v35 = vld [vmem:[#allocation66_spill] sm:$0xff] }
 0x9ea   : > { %11744 = vmatmul.f32.gmra.mxu1 %v19337_v8  ;;  %v10962_v17 = vpop.f32.mrf.mxu2 }
 0x9eb   : > { %v18001_v32 = vadd.f32 %v11145_v33, %v17909_v29  ;;  %v10963_v49 = vadd.f32 %v10962_v17, %v10901_v45 }
 0x9ec   : > { %v11034_v19 = vpop.f32.mrf.mxu3 }
 0x9ed   : > { %v11029_v43 = vadd.f32 %v11028_v58, %v10963_v49 }
 0x9ee   : > { %v11099_v54 = vpop.f32.mrf.mxu0 }
 0x9ef   : > { %v11156_v31 = vpop.f32.mrf.mxu1  ;;  %v11096_v38 = vadd.f32 %v11095_v62, %v11029_v43  ;;  %11519 = vmatmul.f32.gmra.mxu2 %v19376_v37  ;;  %v11680_v37 = vand.u32 4294901760, %v18009_v36  ;;  %v19393_v43 = vld [vmem:[#allocation60_spill] sm:$0xff] }
 0x9f1   : > { %11576 = vmatmul.f32.gmra.mxu3 %v19380_v6  ;;  %11667 = vmatmul.f32.gmra.mxu0 %v19341_v47  ;;  %v11149_v29 = vadd.f32 %v11148_v40, %v11096_v38  ;;  %v11681_v55 = vsub.f32 %v18009_v36, %v11680_v37 }
 0x9f2   : > { %11748 = vmatmul.f32.gmra.mxu1 %v17572_v57  ;;  %v10967_v3 = vpop.f32.mrf.mxu2 }
 0x9f3   : > { %v18015_v18 = vadd.f32 %v11149_v29, %v17924_v50  ;;  %v10968_v30 = vadd.f32 %v10967_v3, %v10905_v44  ;;  %v10909_v50 = vadd.f32 %v17921_v13, %v17934_v53  ;;  %v11682_v22 = vand.u32 4294901760, %v11681_v55 }
 0x9f4   : > { %v11040_v63 = vpop.f32.mrf.mxu3  ;;  %v10913_v13 = vadd.f32 %v17936_v46, %v17946_v61 }
 0x9f5   : > { %v11035_v27 = vadd.f32 %v11034_v19, %v10968_v30  ;;  %v19395_v30 = vld [vmem:[#allocation63_spill] sm:$0xff] }
 0x9f6   : > { %v11103_v0 = vpop.f32.mrf.mxu0 }
 0x9f7   : > { %v11160_v47 = vpop.f32.mrf.mxu1  ;;  %v11100_v24 = vadd.f32 %v11099_v54, %v11035_v27  ;;  %11523 = vmatmul.f32.gmra.mxu2 %v19380_v6  ;;  %v19394_v54 = vld [vmem:[#allocation70_spill] sm:$0xff] }
 0x9f9   : > { %11580 = vmatmul.f32.gmra.mxu3 %v17917_v9  ;;  %11675 = vmatmul.f32.gmra.mxu0 %v19389_v39  ;;  %v11153_v20 = vadd.f32 %v11152_v28, %v11100_v24 }
 0x9fa   : > { %11752 = vmatmul.f32.gmra.mxu1 %v18003_v21  ;;  %v10972_v26 = vpop.f32.mrf.mxu2 }
 0x9fb   : > { %v18028_v1 = vadd.f32 %v11153_v20, %v17940_v2  ;;  %v10973_v40 = vadd.f32 %v10972_v26, %v10909_v50  ;;  %v19397_v50 = vld [vmem:[#allocation10_spill] sm:$0xff]  ;;  %v19398_v20 = vld [vmem:[#allocation76_spill] sm:$0xff] }
 0x9fc   : > { %v11046_v6 = vpop.f32.mrf.mxu3 }
 0x9fd   : > { %v11041_v41 = vadd.f32 %v11040_v63, %v10973_v40  ;;  %v19396_v63 = vld [vmem:[#allocation42_spill] sm:$0xff] }
 0x9fe   : > { %v11107_v15 = vpop.f32.mrf.mxu0 }
 0x9ff   : > { %v11425_v48 = vpop.f32.mrf.mxu1  ;;  %v11104_v16 = vadd.f32 %v11103_v0, %v11041_v41  ;;  %11527 = vmatmul.f32.gmra.mxu2 %v17917_v9  ;;  %v19391_v9 = vld [vmem:[#allocation20_spill] sm:$0xff] }
 0xa01   : > { %11683 = vmatmul.f32.gmra.mxu0 %v11682_v22  ;;  %11844 = vmatmul.f32.vlgmr.msra.gmra.mxu3 %v19390_v4  ;;  %v11157_v53 = vadd.f32 %v11156_v31, %v11104_v16  ;;  %v19400_v16 = vld [vmem:[#allocation24_spill] sm:$0xff] }
 0xa02   : > { %11972 = vmatmul.f32.vlgmr.msra.gmra.mxu1 %v16855_v7  ;;  %v10977_v2 = vpop.f32.mrf.mxu2 }
 0xa03   : > { %v18036_v59 = vadd.f32 %v11157_v53, %v17949_v52  ;;  %v10978_v5 = vadd.f32 %v10977_v2, %v10913_v13 }
 0xa04   : > { %v11305_v58 = vpop.f32.mrf.mxu3 }
 0xa05   : > { %v11047_v60 = vadd.f32 %v11046_v6, %v10978_v5 }
 0xa06   : > { %v11363_v62 = vpop.f32.mrf.mxu0 }
 0xa07   : > { %v11431_v28 = vpop.f32.mrf.mxu1  ;;  %v11108_v25 = vadd.f32 %v11107_v15, %v11047_v60  ;;  %11782 = vmatmul.f32.vlgmr.msra.gmra.mxu2 %v19391_v9  ;;  %v19401_v60 = vld [vmem:[#allocation21_spill] sm:$0xff] }
 0xa09   : > { %11850 = vmatmul.f32.gmra.mxu3 %v19392_v35  ;;  %11919 = vmatmul.f32.vlgmr.msra.gmra.mxu0 %v16855_v7  ;;  %v11161_v46 = vadd.f32 %v11160_v47, %v11108_v25 }
 0xa0a   : > { %11976 = vmatmul.f32.gmra.mxu1 %v16879_v14  ;;  %v11208_v61 = vpop.f32.mrf.mxu2 }
 0xa0b   : > { %v18043_v45 = vadd.f32 %v11161_v46, %v17955_v10  ;;  %v11306_v52 = vadd.f32 %v11305_v58, %v11208_v61 }
 0xa0c   : > { %v11309_v33 = vpop.f32.mrf.mxu3 }
 0xa0d   : > { %v11364_v34 = vadd.f32 %v11363_v62, %v11306_v52  ;;  %v19402_v62 = vld [vmem:[#allocation71_spill] sm:$0xff] }
 0xa0e   : > { %v11368_v17 = vpop.f32.mrf.mxu0  ;;  %v19403_v52 = vld [vmem:[#allocation19_spill] sm:$0xff] }
 0xa0f   : > { %v11437_v49 = vpop.f32.mrf.mxu1  ;;  %v18045_v19 = vadd.f32 %v11425_v48, %v11364_v34  ;;  %11787 = vmatmul.f32.gmra.mxu2 %v19393_v43  ;;  %v19399_v48 = vld [vmem:[#allocation41_spill] sm:$0xff] }
 0xa11   : > { %11856 = vmatmul.f32.gmra.mxu3 %v19394_v54  ;;  %11923 = vmatmul.f32.gmra.mxu0 %v16879_v14 }
 0xa12   : > { %11980 = vmatmul.f32.gmra.mxu1 %v19322_v42  ;;  %v11216_v7 = vpop.f32.mrf.mxu2 }
 0xa13   : > { %v11310_v31 = vadd.f32 %v11309_v33, %v11216_v7 }
 0xa14   : > { %v11313_v38 = vpop.f32.mrf.mxu3 }
 0xa15   : > { %v11369_v10 = vadd.f32 %v11368_v17, %v11310_v31 }
 0xa16   : > { %v11373_v44 = vpop.f32.mrf.mxu0 }
 0xa17   : > { %v11443_v29 = vpop.f32.mrf.mxu1  ;;  %v18051_v3 = vadd.f32 %v11431_v28, %v11369_v10  ;;  %11792 = vmatmul.f32.gmra.mxu2 %v19395_v30 }
 0xa19   : > { %11862 = vmatmul.f32.gmra.mxu3 %v19396_v63  ;;  %11927 = vmatmul.f32.gmra.mxu0 %v19322_v42 }
 0xa1a   : > { %11984 = vmatmul.f32.gmra.mxu1 %v19326_v12  ;;  %v11224_v27 = vpop.f32.mrf.mxu2 }
 0xa1b   : > { %v11314_v14 = vadd.f32 %v11313_v38, %v11224_v27 }
 0xa1c   : > { %v11317_v0 = vpop.f32.mrf.mxu3 }
 0xa1d   : > { %v11374_v47 = vadd.f32 %v11373_v44, %v11314_v14 }
 0xa1e   : > { %v11378_v24 = vpop.f32.mrf.mxu0 }
 0xa1f   : > { %v11449_v39 = vpop.f32.mrf.mxu1  ;;  %v18057_v55 = vadd.f32 %v11437_v49, %v11374_v47  ;;  %11797 = vmatmul.f32.gmra.mxu2 %v19397_v50 }
 0xa21   : > { %11868 = vmatmul.f32.gmra.mxu3 %v19398_v20  ;;  %11931 = vmatmul.f32.gmra.mxu0 %v19326_v12 }
 0xa22   : > { %11988 = vmatmul.f32.gmra.mxu1 %v19332_v56  ;;  %v11232_v26 = vpop.f32.mrf.mxu2 }
 0xa23   : > { %v11318_v42 = vadd.f32 %v11317_v0, %v11232_v26 }
 0xa24   : > { %v11321_v40 = vpop.f32.mrf.mxu3 }
 0xa25   : > { %v11379_v6 = vadd.f32 %v11378_v24, %v11318_v42 }
 0xa26   : > { %v11383_v22 = vpop.f32.mrf.mxu0 }
 0xa27   : > { %v11455_v41 = vpop.f32.mrf.mxu1  ;;  %v18063_v15 = vadd.f32 %v11443_v29, %v11379_v6  ;;  %11802 = vmatmul.f32.gmra.mxu2 %v19399_v48 }
 0xa29   : > { %11874 = vmatmul.f32.gmra.mxu3 %v19400_v16  ;;  %11935 = vmatmul.f32.gmra.mxu0 %v19332_v56 }
 0xa2a   : > { %11992 = vmatmul.f32.gmra.mxu1 %v19337_v8  ;;  %v11240_v4 = vpop.f32.mrf.mxu2 }
 0xa2b   : > { %v11322_v12 = vadd.f32 %v11321_v40, %v11240_v4 }
 0xa2c   : > { %v11325_v13 = vpop.f32.mrf.mxu3 }
 0xa2d   : > { %v11384_v53 = vadd.f32 %v11383_v22, %v11322_v12 }
 0xa2e   : > { %v11388_v2 = vpop.f32.mrf.mxu0 }
 0xa2f   : > { %v11461_v5 = vpop.f32.mrf.mxu1  ;;  %v18069_v58 = vadd.f32 %v11449_v39, %v11384_v53  ;;  %11807 = vmatmul.f32.gmra.mxu2 %v19401_v60 }
 0xa31   : > { %11880 = vmatmul.f32.gmra.mxu3 %v19402_v62  ;;  %11939 = vmatmul.f32.gmra.mxu0 %v19337_v8 }
 0xa32   : > { %11996 = vmatmul.f32.gmra.mxu1 %v17572_v57  ;;  %v11248_v28 = vpop.f32.mrf.mxu2 }
 0xa33   : > { %v11326_v56 = vadd.f32 %v11325_v13, %v11248_v28 }
 0xa34   : > { %v11329_v25 = vpop.f32.mrf.mxu3 }
 0xa35   : > { %v11389_v9 = vadd.f32 %v11388_v2, %v11326_v56 }
 0xa36   : > { %v11393_v35 = vpop.f32.mrf.mxu0 }
 0xa37   : > { %v11467_v46 = vpop.f32.mrf.mxu1  ;;  %v18075_v61 = vadd.f32 %v11455_v41, %v11389_v9  ;;  %11812 = vmatmul.f32.gmra.mxu2 %v19403_v52 }
 0xa39   : > { %11886 = vmatmul.f32.gmra.mxu3 %v11680_v37  ;;  %11943 = vmatmul.f32.gmra.mxu0 %v17572_v57 }
 0xa3a   : > { %12000 = vmatmul.f32.gmra.mxu1 %v18003_v21  ;;  %v11256_v8 = vpop.f32.mrf.mxu2 }
 0xa3b   : > { %v11330_v33 = vadd.f32 %v11329_v25, %v11256_v8 }
 0xa3c   : > { %v11333_v34 = vpop.f32.mrf.mxu3 }
 0xa3d   : > { %v11394_v17 = vadd.f32 %v11393_v35, %v11330_v33 }
 0xa3e   : > { %v11398_v49 = vpop.f32.mrf.mxu0 }
 0xa3f   : > { %v11725_v43 = vpop.f32.mrf.mxu1  ;;  %v18082_v54 = vadd.f32 %v11461_v5, %v11394_v17  ;;  %11817 = vmatmul.f32.gmra.mxu2 %v18009_v36 }
 0xa41   : > { %11947 = vmatmul.f32.gmra.mxu0 %v18003_v21 }
 0xa42   : > { %v11264_v7 = vpop.f32.mrf.mxu2 }
 0xa43   : > { %v11334_v37 = vadd.f32 %v11333_v34, %v11264_v7 }
 0xa44   : > { %v11553_v31 = vpop.f32.mrf.mxu3 }
 0xa45   : > { %v11399_v57 = vadd.f32 %v11398_v49, %v11334_v37 }
 0xa46   : > { %v11628_v38 = vpop.f32.mrf.mxu0 }
 0xa47   : > { %v18086_v10 = vadd.f32 %v11725_v43, %v11628_v38  ;;  %v11729_v44 = vpop.f32.mrf.mxu1  ;;  %v11468_v29 = vadd.f32 %v11467_v46, %v11399_v57 }
 0xa4a   : > { %v11500_v30 = vpop.f32.mrf.mxu2 }
 0xa4b   : > { %v11501_v63 = vadd.f32 %v11500_v30, %v18045_v19 }
 0xa4c   : > { %v11557_v27 = vpop.f32.mrf.mxu3 }
 0xa4d   : > { %v11554_v21 = vadd.f32 %v11553_v31, %v11501_v63 }
 0xa4e   : > { %v11636_v36 = vpop.f32.mrf.mxu0 }
 0xa4f   : > { %v18095_v14 = vadd.f32 %v11729_v44, %v11636_v36  ;;  %v11733_v0 = vpop.f32.mrf.mxu1  ;;  %v18098_v47 = vadd.f32 %v11554_v21, %v17970_v11 }
 0xa52   : > { %v11504_v24 = vpop.f32.mrf.mxu2 }
 0xa53   : > { %v11505_v39 = vadd.f32 %v11504_v24, %v18051_v3 }
 0xa54   : > { %v11561_v50 = vpop.f32.mrf.mxu3 }
 0xa55   : > { %v11558_v20 = vadd.f32 %v11557_v27, %v11505_v39 }
 0xa56   : > { %v11644_v26 = vpop.f32.mrf.mxu0 }
 0xa57   : > { %v18101_v19 = vadd.f32 %v11733_v0, %v11644_v26  ;;  %v11737_v42 = vpop.f32.mrf.mxu1  ;;  %v18104_v40 = vadd.f32 %v11558_v20, %v17979_v23 }
 0xa5a   : > { %v11508_v6 = vpop.f32.mrf.mxu2 }
 0xa5b   : > { %v11509_v22 = vadd.f32 %v11508_v6, %v18057_v55 }
 0xa5c   : > { %v11565_v41 = vpop.f32.mrf.mxu3 }
 0xa5d   : > { %v11562_v48 = vadd.f32 %v11561_v50, %v11509_v22 }
 0xa5e   : > { %v11652_v16 = vpop.f32.mrf.mxu0 }
 0xa5f   : > { %v18107_v11 = vadd.f32 %v11737_v42, %v11652_v16  ;;  %v11741_v4 = vpop.f32.mrf.mxu1  ;;  %v18110_v3 = vadd.f32 %v11562_v48, %v17990_v51 }
 0xa62   : > { %v11512_v12 = vpop.f32.mrf.mxu2 }
 0xa63   : > { %v11513_v13 = vadd.f32 %v11512_v12, %v18063_v15 }
 0xa64   : > { %v11569_v53 = vpop.f32.mrf.mxu3 }
 0xa65   : > { %v11566_v2 = vadd.f32 %v11565_v41, %v11513_v13 }
 0xa66   : > { %v11660_v5 = vpop.f32.mrf.mxu0 }
 0xa67   : > { %v18113_v23 = vadd.f32 %v11741_v4, %v11660_v5  ;;  %v11745_v60 = vpop.f32.mrf.mxu1  ;;  %v18116_v55 = vadd.f32 %v11566_v2, %v18001_v32 }
 0xa6a   : > { %v11516_v62 = vpop.f32.mrf.mxu2 }
 0xa6b   : > { %v11517_v28 = vadd.f32 %v11516_v62, %v18069_v58 }
 0xa6c   : > { %v11573_v56 = vpop.f32.mrf.mxu3 }
 0xa6d   : > { %v11570_v25 = vadd.f32 %v11569_v53, %v11517_v28 }
 0xa6e   : > { %v11668_v9 = vpop.f32.mrf.mxu0 }
 0xa6f   : > { %v18119_v51 = vadd.f32 %v11745_v60, %v11668_v9  ;;  %v11749_v35 = vpop.f32.mrf.mxu1  ;;  %v18122_v15 = vadd.f32 %v11570_v25, %v18015_v18 }
 0xa72   : > { %v11520_v46 = vpop.f32.mrf.mxu2 }
 0xa73   : > { %v11521_v52 = vadd.f32 %v11520_v46, %v18075_v61 }
 0xa74   : > { %v11577_v8 = vpop.f32.mrf.mxu3 }
 0xa75   : > { %v11574_v33 = vadd.f32 %v11573_v56, %v11521_v52 }
 0xa76   : > { %v11676_v34 = vpop.f32.mrf.mxu0 }
 0xa77   : > { %v18125_v32 = vadd.f32 %v11749_v35, %v11676_v34  ;;  %v18128_v17 = vadd.f32 %v11574_v33, %v18028_v1  ;;  %v18130_v58 = vpop.f32.mrf.mxu1 }
 0xa7a   : > { %v11524_v49 = vpop.f32.mrf.mxu2 }
 0xa7b   : > { %v11525_v43 = vadd.f32 %v11524_v49, %v18082_v54 }
 0xa7c   : > { %v11581_v7 = vpop.f32.mrf.mxu3 }
 0xa7d   : > { %v11578_v37 = vadd.f32 %v11577_v8, %v11525_v43 }
 0xa7e   : > { %v18133_v18 = vpop.f32.mrf.mxu0 }
 0xa7f   : > { %v18136_v31 = vadd.f32 %v11578_v37, %v18036_v59  ;;  %v11973_v61 = vpop.f32.mrf.mxu1 }
 0xa82   : > { %v11528_v57 = vpop.f32.mrf.mxu2 }
 0xa83   : > { %v11529_v38 = vadd.f32 %v11528_v57, %v11468_v29 }
 0xa84   : > { %v11845_v44 = vpop.f32.mrf.mxu3 }
 0xa85   : > { %v11582_v30 = vadd.f32 %v11581_v7, %v11529_v38 }
 0xa86   : > { %v11920_v63 = vpop.f32.mrf.mxu0 }
 0xa87   : > { %v18139_v1 = vadd.f32 %v11582_v30, %v18043_v45  ;;  %v11977_v21 = vpop.f32.mrf.mxu1 }
 0xa8a   : > { %v11783_v27 = vpop.f32.mrf.mxu2 }
 0xa8b   : > { %v11784_v54 = vadd.f32 %v11783_v27, %v18086_v10 }
 0xa8c   : > { %v11851_v36 = vpop.f32.mrf.mxu3 }
 0xa8d   : > { %v11846_v0 = vadd.f32 %v11845_v44, %v11784_v54  ;;  %v11754_v54 = vadd.f32 %v18130_v58, %v18133_v18 }
 0xa8e   : > { %v11924_v24 = vpop.f32.mrf.mxu0 }
 0xa8f   : > { %v11921_v39 = vadd.f32 %v11920_v63, %v11846_v0  ;;  %v11981_v42 = vpop.f32.mrf.mxu1 }
 0xa91   : > { %v11974_v50 = vadd.f32 %v11973_v61, %v11921_v39 }
 0xa92   : > { %v11788_v59 = vpop.f32.mrf.mxu2 }
 0xa93   : > { %v18143_v20 = vadd.f32 %v11974_v50, %v18098_v47  ;;  %v11789_v29 = vadd.f32 %v11788_v59, %v18095_v14 }
 0xa94   : > { %v11857_v26 = vpop.f32.mrf.mxu3 }
 0xa95   : > { %v11852_v6 = vadd.f32 %v11851_v36, %v11789_v29 }
 0xa96   : > { %v11928_v45 = vpop.f32.mrf.mxu0 }
 0xa97   : > { %v11925_v22 = vadd.f32 %v11924_v24, %v11852_v6  ;;  %v11985_v53 = vpop.f32.mrf.mxu1 }
 0xa99   : > { %v11978_v41 = vadd.f32 %v11977_v21, %v11925_v22 }
 0xa9a   : > { %v11793_v48 = vpop.f32.mrf.mxu2 }
 0xa9b   : > { %v18147_v10 = vadd.f32 %v11978_v41, %v18104_v40  ;;  %v11794_v16 = vadd.f32 %v11793_v48, %v18101_v19 }
 0xa9c   : > { %v11863_v4 = vpop.f32.mrf.mxu3 }
 0xa9d   : > { %v11858_v12 = vadd.f32 %v11857_v26, %v11794_v16 }
 0xa9e   : > { %v11932_v13 = vpop.f32.mrf.mxu0 }
 0xa9f   : > { %v11929_v47 = vadd.f32 %v11928_v45, %v11858_v12  ;;  %v11989_v9 = vpop.f32.mrf.mxu1 }
 0xaa1   : > { %v11982_v2 = vadd.f32 %v11981_v42, %v11929_v47 }
 0xaa2   : > { %v11798_v5 = vpop.f32.mrf.mxu2 }
 0xaa3   : > { %v12006_v14 = vadd.f32 %v11982_v2, %v18110_v3  ;;  %v11799_v60 = vadd.f32 %v11798_v5, %v18107_v11 }
 0xaa4   : > { %v11869_v62 = vpop.f32.mrf.mxu3 }
 0xaa5   : > { %v11864_v28 = vadd.f32 %v11863_v4, %v11799_v60 }
 0xaa6   : > { %v11936_v56 = vpop.f32.mrf.mxu0 }
 0xaa7   : > { %v11933_v25 = vadd.f32 %v11932_v13, %v11864_v28  ;;  %v11993_v3 = vpop.f32.mrf.mxu1 }
 0xaa9   : > { %v11986_v40 = vadd.f32 %v11985_v53, %v11933_v25 }
 0xaaa   : > { %v11803_v35 = vpop.f32.mrf.mxu2 }
 0xaab   : > { %v12007_v19 = vadd.f32 %v11986_v40, %v18116_v55  ;;  %v11804_v46 = vadd.f32 %v11803_v35, %v18113_v23 }
 0xaac   : > { %v11875_v8 = vpop.f32.mrf.mxu3 }
 0xaad   : > { %v11870_v52 = vadd.f32 %v11869_v62, %v11804_v46 }
 0xaae   : > { %v11940_v34 = vpop.f32.mrf.mxu0 }
 0xaaf   : > { %v11937_v33 = vadd.f32 %v11936_v56, %v11870_v52  ;;  %v11997_v63 = vpop.f32.mrf.mxu1 }
 0xab1   : > { %v11990_v49 = vadd.f32 %v11989_v9, %v11937_v33 }
 0xab2   : > { %v11808_v43 = vpop.f32.mrf.mxu2 }
 0xab3   : > { %v12008_v11 = vadd.f32 %v11990_v49, %v18122_v15  ;;  %v11809_v7 = vadd.f32 %v11808_v43, %v18119_v51 }
 0xab4   : > { %v11881_v57 = vpop.f32.mrf.mxu3 }
 0xab5   : > { %v11876_v37 = vadd.f32 %v11875_v8, %v11809_v7 }
 0xab6   : > { %v11944_v30 = vpop.f32.mrf.mxu0 }
 0xab7   : > { %v11941_v61 = vadd.f32 %v11940_v34, %v11876_v37  ;;  %v12001_v59 = vpop.f32.mrf.mxu1 }
 0xab9   : > { %v11994_v38 = vadd.f32 %v11993_v3, %v11941_v61 }
 0xaba   : > { %v11813_v44 = vpop.f32.mrf.mxu2 }
 0xabb   : > { %v12009_v55 = vadd.f32 %v11994_v38, %v18128_v17  ;;  %v11814_v23 = vadd.f32 %v11813_v44, %v18125_v32 }
 0xabc   : > { %v11887_v0 = vpop.f32.mrf.mxu3 }
 0xabd   : > { %v11882_v27 = vadd.f32 %v11881_v57, %v11814_v23 }
 0xabe   : > { %v11948_v39 = vpop.f32.mrf.mxu0 }
 0xabf   : > { %v11945_v21 = vadd.f32 %v11944_v30, %v11882_v27 }
 0xac1   : > { %v11998_v36 = vadd.f32 %v11997_v63, %v11945_v21 }
 0xac2   : > { %v11818_v15 = vpop.f32.mrf.mxu2 }
 0xac3   : > { %v12010_v51 = vadd.f32 %v11998_v36, %v18136_v31  ;;  %v11819_v24 = vadd.f32 %v11818_v15, %v11754_v54 }
 0xac5   : > { %v11888_v50 = vadd.f32 %v11887_v0, %v11819_v24 }
 0xac7   : > { %v11949_v29 = vadd.f32 %v11948_v39, %v11888_v50  ;;  %12017 = sbr.rel (%p18091_p12) target bundleno = 2766 (0xace), region = 40 }
 0xac9   : > { %v12002_v26 = vadd.f32 %v12001_v59, %v11949_v29 }
 0xacb   : > { %v12011_v17 = vadd.f32 %v12002_v26, %v18139_v1 }
 0xacc   : > { %vm12018_vm3 = vcmask 254976   ;;  %v12450_v32 = vmov 0.0  }
 0xacd   : > { %12019 = vst.msk [vmem:[%s18233_s5] sm:$0x3] %vm12018_vm3, %v12450_v32 }
 0xace PF: > { %v12021_v58 = vsel %vm411_vm1, %v18143_v20, 0.0  ;;  %v12022_v18 = vsel %vm411_vm1, %v18147_v10, 0.0  ;;  %v12024_v31 = vsel %vm411_vm1, %v12006_v14, 0.0  ;;  %12076 = vst.msk [vmem:[%s12591_s6] sm:$0xff] %vm411_vm1, %v18143_v20  ;;  %v12026_v42 = vsel %vm411_vm1, %v12007_v19, 0.0 }
 0xacf   : > { %v12023_v1 = vadd.f32 %v12022_v18, %v12021_v58  ;;  %v12042_v6 = vmul.f32 %v18143_v20, %v18143_v20  ;;  %v12043_v45 = vmul.f32 %v18147_v10, %v18147_v10  ;;  %v12044_v22 = vmul.f32 %v12006_v14, %v12006_v14  ;;  %12077 = vst.msk [vmem:[%s12591_s6 + $0x8] sm:$0xff] %vm411_vm1, %v18147_v10 }
 0xad0   : > { %v12045_v48 = vmul.f32 %v12007_v19, %v12007_v19  ;;  %12078 = vst.msk [vmem:[%s12591_s6 + $0x10] sm:$0xff] %vm411_vm1, %v12006_v14  ;;  %v12028_v16 = vsel %vm411_vm1, %v12008_v11, 0.0  ;;  %v12046_v4 = vmul.f32 %v12008_v11, %v12008_v11  ;;  %v12030_v47 = vsel %vm411_vm1, %v12009_v55, 0.0 }
 0xad1   : > { %v12025_v41 = vadd.f32 %v12024_v31, %v12023_v1  ;;  %v12050_v12 = vsel %vm411_vm1, %v12042_v6, 0.0  ;;  %v12051_v20 = vsel %vm411_vm1, %v12043_v45, 0.0  ;;  %12079 = vst.msk [vmem:[%s12591_s6 + $0x18] sm:$0xff] %vm411_vm1, %v12007_v19  ;;  %v12053_v10 = vsel %vm411_vm1, %v12044_v22, 0.0 }
 0xad2   : > { %v12052_v53 = vadd.f32 %v12051_v20, %v12050_v12  ;;  %12080 = vst.msk [vmem:[%s12591_s6 + $0x20] sm:$0xff] %vm411_vm1, %v12008_v11  ;;  %v12047_v2 = vmul.f32 %v12009_v55, %v12009_v55  ;;  %v12055_v5 = vsel %vm411_vm1, %v12045_v48, 0.0  ;;  %v12032_v62 = vsel %vm411_vm1, %v12010_v51, 0.0 }
 0xad3   : > { %v12027_v13 = vadd.f32 %v12026_v42, %v12025_v41  ;;  %12081 = vst.msk [vmem:[%s12591_s6 + $0x28] sm:$0xff] %vm411_vm1, %v12009_v55  ;;  %v12048_v28 = vmul.f32 %v12010_v51, %v12010_v51  ;;  %v12057_v56 = vsel %vm411_vm1, %v12046_v4, 0.0  ;;  %v12034_v40 = vsel %vm411_vm1, %v12011_v17, 0.0 }
 0xad4   : > { %v12054_v60 = vadd.f32 %v12053_v10, %v12052_v53  ;;  %12082 = vst.msk [vmem:[%s12591_s6 + $0x30] sm:$0xff] %vm411_vm1, %v12010_v51  ;;  %v12049_v35 = vmul.f32 %v12011_v17, %v12011_v17  ;;  %v12059_v19 = vsel %vm411_vm1, %v12047_v2, 0.0  ;;  %vm12071_vm4 = vcmask 1040384   ;;  %v12020_v27 = vld [vmem:[%s18233_s5] sm:$0x3] }
 0xad5   : > { %v12029_v14 = vadd.f32 %v12028_v16, %v12027_v13  ;;  %12083 = vst.msk [vmem:[%s12591_s6 + $0x38] sm:$0xff] %vm411_vm1, %v12011_v17  ;;  %v12061_v8 = vsel %vm411_vm1, %v12048_v28, 0.0  ;;  %vm12074_vm5 = vcmask 254976  }
 0xad6   : > { %v12056_v9 = vadd.f32 %v12055_v5, %v12054_v60  ;;  %v12063_v49 = vsel %vm411_vm1, %v12049_v35, 0.0 }
 0xad7   : > { %v12031_v25 = vadd.f32 %v12030_v47, %v12029_v14 }
 0xad8   : > { %v12058_v52 = vadd.f32 %v12057_v56, %v12056_v9 }
 0xad9   : > { %v12033_v46 = vadd.f32 %v12032_v62, %v12031_v25 }
 0xada   : > { %v12060_v34 = vadd.f32 %v12059_v19, %v12058_v52 }
 0xadb   : > { %v12035_v33 = vadd.f32 %v12034_v40, %v12033_v46 }
 0xadc   : > { %v12062_v3 = vadd.f32 %v12061_v8, %v12060_v34 }
 0xadd   : > { %v12036_v43 = vrot.slane %v12035_v33, 4 }
 0xade   : > { %v12064_v7 = vadd.f32 %v12063_v49, %v12062_v3 }
 0xadf   : > { %v12037_v11 = vadd.f32 %v12036_v43, %v12035_v33 }
 0xae0   : > { %v12065_v61 = vrot.slane %v12064_v7, 4 }
 0xae1   : > { %v12038_v37 = vrot.slane %v12037_v11, 2 }
 0xae2   : > { %v12066_v38 = vadd.f32 %v12065_v61, %v12064_v7 }
 0xae3   : > { %v12039_v57 = vadd.f32 %v12038_v37, %v12037_v11 }
 0xae4   : > { %v12067_v30 = vrot.slane %v12066_v38, 2 }
 0xae5   : > { %v12040_v44 = vrot.slane %v12039_v57, 1 }
 0xae6   : > { %v12068_v55 = vadd.f32 %v12067_v30, %v12066_v38 }
 0xae7   : > { %v12041_v23 = vadd.f32 %v12040_v44, %v12039_v57 }
 0xae8   : > { %v12069_v63 = vrot.slane %v12068_v55, 1 }
 0xaea   : > { %v12070_v21 = vadd.f32 %v12069_v63, %v12068_v55 }
 0xaec   : > { %v12072_v54 = vsel %vm12071_vm4, %v12041_v23, %v12070_v21 }
 0xaed   : > { %v12073_v36 = vadd.f32 %v12072_v54, %v12020_v27 }
 0xaef   : > { %12075 = vst.msk [vmem:[%s18233_s5] sm:$0x3] %vm12074_vm5, %v12073_v36 }
 0xaf0 PF: > { %s16_s22 = sadd.s32 1, %s12448_s22   ;;  %s19405_s18 = smov %s12440_s20 }
 0xaf1   : > { %p13_p13 = scmp.ge.s32.totalorder %s16_s22, 18   ;;  %s19406_s19 = smov %s12444_s21 }
 0xaf2   : > { %s19407_s20 = smov %s19410_s23  ;;  %s19408_s21 = smov %s19414_s24 }
 0xaf3   :  { %15 = sbr.rel (!%p13_p13) target bundleno = 3 (0x3), region = 110 }

</bundles_post_ra>
